<compile_context>
chip_gen: v5e
topology: v5e:2x2
jax: 0.10.0
libtpu: 0.0.40
codegen_flags: <defaults>
</compile_context>

<pallas_src>
import jax
import jax.numpy as jnp
from jax.experimental import pallas as pl
from jax.experimental.pallas import tpu as pltpu

N = 64          # total nodes
B = 2           # graphs in the batch (N // B nodes each)
C = 4           # input feature dim
K = 9           # kNN neighbours
BIG = 1e30
BN_SCALE = float(1.0 / (1.0 + 1e-5) ** 0.5)   # eval BatchNorm, default stats


# --------------------------- parameter slab layout ---------------------------
_PIECES = [  # (name, rows, cols)  -- cols <= 128, rows padded to multiple of 8
    ("bid_row", 1, N),
    ("c1w1a", C, 128), ("c1w1b", C, 128), ("c1b1", 1, 128),
    ("c1w2", 128, 128), ("c1b2", 1, 128),
    ("c1w3", 128, 128), ("c1b3", 1, 128),
    ("mw1", 128, 64), ("mb1", 1, 64),
    ("mw2", 64, 32), ("mb2", 1, 32),
    ("mw3t", 1, 32), ("mb3", 1, 1),
    ("c3w1a", C, 64), ("c3w1b", C, 64), ("c3b1", 1, 64),
    ("c3w2bd", 128, 128), ("c3b2p", 1, 128),
    ("c3w3bd", 128, 32), ("c3b3p", 1, 32),
    ("lwt", 1, 32), ("lb", 1, 1),
]


def _layout(pieces):
    offs, r = {}, 0
    for name, rows, cols in pieces:
        offs[name] = (r, rows, cols)
        r += ((rows + 7) // 8) * 8            # keep every piece 8-row aligned
    return offs, r


_OFFS, _SLAB_ROWS = _layout(_PIECES)


def _p(slab_ref, name):
    """Static-offset slice of a parameter piece out of the packed slab."""
    r0, rows, cols = _OFFS[name]
    return slab_ref[r0:r0 + rows, 0:cols]


# --------------------------- in-kernel helpers -------------------------------
def _pairwise_sq(xf):
    """Surrogate distance d[i,j] = ||x_j||^2 - 2<x_i,x_j> (per-row argmin only)."""
    m, c = xf.shape
    g = jax.lax.dot_general(xf, xf, (((1,), (1,)), ((), ())),
                            preferred_element_type=jnp.float32)          # [M,M]
    ones = jnp.ones((m, c), jnp.float32)
    sqj = jax.lax.dot_general(ones, xf * xf, (((1,), (1,)), ((), ())),
                              preferred_element_type=jnp.float32)        # [M,M]
    return sqj - 2.0 * g


def _knn_argmins(d, mask, k):
    """Self-inclusive kNN arg-mins, one XLU lane-reduction per iteration.

    The column index (< 128, 7 bits) is packed into the low mantissa bits of
    the f32 distance, so value-min and index-min collapse into a single
    jnp.min; tie-break / 7-bit truncation only reorders near-equal distances.
    Returns a list of k [M,1] int32 neighbour-column indices.
    """
    col = jax.lax.broadcasted_iota(jnp.int32, d.shape, 1)
    bits = pltpu.bitcast(d, jnp.int32)
    packed = jnp.bitwise_or(jnp.bitwise_and(bits, jnp.int32(-128)), col)
    key = jnp.where(mask, pltpu.bitcast(packed, jnp.float32), BIG)
    ams = []
    for _ in range(k):
        kmin = jnp.min(key, axis=1, keepdims=True)                        # [M,1]
        am = jnp.bitwise_and(pltpu.bitcast(kmin, jnp.int32), jnp.int32(127))
        ams.append(am)
        key = jnp.where(col == am, BIG, key)                              # remove
    return ams


def _edge_mlp_tail(h, w2, b2, w3, b3):
    """BN+ReLU -> Lin -> BN+ReLU -> Lin on layer-1 pre-activations (bf16 MXU)."""
    h = jnp.maximum(h * BN_SCALE, 0.0)
    h = jnp.dot(h.astype(jnp.bfloat16), w2.astype(jnp.bfloat16),
                preferred_element_type=jnp.float32) + b2
    h = jnp.maximum(h * BN_SCALE, 0.0)
    return jnp.dot(h.astype(jnp.bfloat16), w3.astype(jnp.bfloat16),
                   preferred_element_type=jnp.float32) + b3


def _slot_mean(h, k, m):
    """Mean over k slot-major row blocks of h ([k*m, F] -> [m, F]), tree-added."""
    blocks = [h[t * m:(t + 1) * m, :] for t in range(k)]
    while len(blocks) > 1:
        nxt = [blocks[i] + blocks[i + 1] for i in range(0, len(blocks) - 1, 2)]
        if len(blocks) % 2:
            nxt.append(blocks[-1])
        blocks = nxt
    return blocks[0] * (1.0 / k)


# ------------------------------ fused kernel ---------------------------------
def dgcnn_kernel(xin_ref, slab_ref, mass_ref):
    x = xin_ref[:, 0:C]                                   # [N, C]
    bidc = xin_ref[:, C:C + 1]                            # [N, 1] graph id (f32)
    bid_row = _p(slab_ref, "bid_row")                     # [1, N]

    # ---- conv1: per-graph kNN, one-hot gather fused into edge-MLP layer 1 --
    w1a = _p(slab_ref, "c1w1a")
    w1b = _p(slab_ref, "c1w1b")
    base1 = (jnp.dot(x, w1a - w1b, preferred_element_type=jnp.float32)
             + _p(slab_ref, "c1b1"))                      # [N,128]
    pb1 = jnp.dot(x, w1b, preferred_element_type=jnp.float32)            # [N,128]

    ams1 = _knn_argmins(_pairwise_sq(x), bidc == bid_row, K)
    col1 = jax.lax.broadcasted_iota(jnp.int32, (N, N), 1)
    blocks = []
    for am in ams1:
        onehot = jnp.where(col1 == am, 1.0, 0.0)                         # [N,N]
        blocks.append(base1 + jnp.dot(onehot, pb1,
                                      preferred_element_type=jnp.float32))
    h1 = jnp.concatenate(blocks, axis=0)                                 # [K*N,128]
    h1 = _edge_mlp_tail(h1, _p(slab_ref, "c1w2"), _p(slab_ref, "c1b2"),
                        _p(slab_ref, "c1w3"), _p(slab_ref, "c1b3"))      # [K*N,128]
    x1 = _slot_mean(h1, K, N)                                            # [N,128]

    # ---- node MLP ([128,64,32,1]) + standardize + sigmoid ------------------
    # TODO(synk): dropout(p=0.5) is eval-mode identity; the host-side
    # print('Division:', out) has no Pallas equivalent.
    h = jnp.maximum(
        jnp.dot(x1.astype(jnp.bfloat16), _p(slab_ref, "mw1").astype(jnp.bfloat16),
                preferred_element_type=jnp.float32) + _p(slab_ref, "mb1"), 0.0)
    h = jnp.maximum(
        jnp.dot(h.astype(jnp.bfloat16), _p(slab_ref, "mw2").astype(jnp.bfloat16),
                preferred_element_type=jnp.float32) + _p(slab_ref, "mb2"), 0.0)
    o = (jnp.sum(h * _p(slab_ref, "mw3t"), axis=1, keepdims=True)
         + _p(slab_ref, "mb3"))                                          # [N,1]
    mu = jnp.sum(o, keepdims=True) * (1.0 / N)                           # [1,1]
    var = jnp.sum((o - mu) ** 2, keepdims=True) * (1.0 / (N - 1))        # unbiased
    out = jax.nn.sigmoid((o - mu) / (jnp.sqrt(var) + 1e-5))              # [N,1]

    xl = out * x
    xs = (1.0 - out) * x

    # ---- conv3: one kNN over [xl; xs] (block-diag mask), lane-packed MLP ---
    xc = jnp.concatenate([xl, xs], axis=0)                               # [2N,C]
    w1a3 = _p(slab_ref, "c3w1a")
    w1b3 = _p(slab_ref, "c3w1b")
    base3 = (jnp.dot(xc, w1a3 - w1b3, preferred_element_type=jnp.float32)
             + _p(slab_ref, "c3b1"))                                     # [2N,64]
    pb3 = jnp.dot(xc, w1b3, preferred_element_type=jnp.float32)          # [2N,64]
    base3p = jnp.concatenate([base3[0:N, :], base3[N:2 * N, :]], axis=1) # [N,128]
    pb3l = pb3[0:N, :]
    pb3s = pb3[N:2 * N, :]

    ri = jax.lax.broadcasted_iota(jnp.int32, (2 * N, 2 * N), 0)
    ci = jax.lax.broadcasted_iota(jnp.int32, (2 * N, 2 * N), 1)
    same3 = ((ri < N) & (ci < N)) | ((ri >= N) & (ci >= N))              # block diag
    ams3 = _knn_argmins(_pairwise_sq(xc), same3, K)                      # k x [2N,1]

    blocks3 = []
    for am in ams3:
        am_l = am[0:N]
        am_s = am[N:2 * N] - N
        oh_l = jnp.where(col1 == am_l, 1.0, 0.0)                         # [N,N]
        oh_s = jnp.where(col1 == am_s, 1.0, 0.0)                         # [N,N]
        neigh = jnp.concatenate(
            [jnp.dot(oh_l, pb3l, preferred_element_type=jnp.float32),
             jnp.dot(oh_s, pb3s, preferred_element_type=jnp.float32)], axis=1)
        blocks3.append(base3p + neigh)                                   # [N,128]
    h3 = jnp.concatenate(blocks3, axis=0)                                # [K*N,128]
    h3 = _edge_mlp_tail(h3, _p(slab_ref, "c3w2bd"), _p(slab_ref, "c3b2p"),
                        _p(slab_ref, "c3w3bd"), _p(slab_ref, "c3b3p"))   # [K*N,32]
    hc = _slot_mean(h3, K, N)                       # [N,32]: lanes 0-15 xl, 16-31 xs

    # ---- global_max_pool per graph + Linear(32,1) (VPU lane-reduce) --------
    rows = []
    for g in range(B):
        mg = bidc == float(g)                                            # [N,1]
        rows.append(jnp.max(jnp.where(mg, hc, -BIG), axis=0, keepdims=True))
    pooled = jnp.concatenate(rows, axis=0)                               # [B,32]
    mass_ref[...] = (jnp.sum(pooled * _p(slab_ref, "lwt"), axis=1, keepdims=True)
                     + _p(slab_ref, "lb"))                               # [B,1]


# ------------------------------ wrapper ---------------------------------------
def _block_diag(a, b):
    ra, ca = a.shape
    rb, cb = b.shape
    top = jnp.concatenate([a, jnp.zeros((ra, cb), a.dtype)], axis=1)
    bot = jnp.concatenate([jnp.zeros((rb, ca), b.dtype), b], axis=1)
    return jnp.concatenate([top, bot], axis=0)


def prepare_inputs(x, batch_ids, params):
    """Pack node features (+ batch id lane) and all parameters into two slabs."""
    c1w1, c1b1, c1w2, c1b2, c1w3, c1b3 = params["conv1"]
    c3w1, c3b1, c3w2, c3b2, c3w3, c3b3 = params["conv3"]
    mw1, mb1, mw2, mb2, mw3, mb3 = params["mlp"]
    lw, lb = params["lin2"]

    vals = {
        "bid_row": batch_ids.astype(jnp.float32).reshape(1, N),
        "c1w1a": c1w1[:C], "c1w1b": c1w1[C:], "c1b1": c1b1,
        "c1w2": c1w2, "c1b2": c1b2, "c1w3": c1w3, "c1b3": c1b3,
        "mw1": mw1, "mb1": mb1, "mw2": mw2, "mb2": mb2,
        "mw3t": mw3.T, "mb3": mb3,
        "c3w1a": c3w1[:C], "c3w1b": c3w1[C:], "c3b1": c3b1,
        "c3w2bd": _block_diag(c3w2, c3w2),
        "c3b2p": jnp.concatenate([c3b2, c3b2], axis=1),
        "c3w3bd": _block_diag(c3w3, c3w3),
        "c3b3p": jnp.concatenate([c3b3, c3b3], axis=1),
        "lwt": lw.T, "lb": lb,
    }
    slab = jnp.zeros((_SLAB_ROWS, 128), jnp.float32)
    for name, rows, cols in _PIECES:
        r0, _, _ = _OFFS[name]
        slab = slab.at[r0:r0 + rows, 0:cols].set(
            vals[name].reshape(rows, cols).astype(jnp.float32))
    xin = jnp.concatenate(
        [x.astype(jnp.float32), batch_ids.astype(jnp.float32)[:, None]], axis=1)
    return xin, slab                                   # [N, C+1], [R, 128]


@jax.jit
def dgcnn_forward(xin, slab):
    mass = pl.pallas_call(
        dgcnn_kernel,
        out_shape=jax.ShapeDtypeStruct((B, 1), jnp.float32),
        grid=(1,),
        in_specs=[pl.BlockSpec(xin.shape, lambda i: (0, 0)),
                  pl.BlockSpec(slab.shape, lambda i: (0, 0))],
        out_specs=pl.BlockSpec((B, 1), lambda i: (0, 0)),
        compiler_params=pltpu.CompilerParams(
            dimension_semantics=("arbitrary",)),
    )(xin, slab)
    return mass.reshape(-1)                            # .flatten()


# ------------------------------ parameters ------------------------------------
def init_linear(key, fin, fout):
    kw, kb = jax.random.split(key)
    w = jax.random.normal(kw, (fin, fout), jnp.float32) * 0.1
    b = jax.random.normal(kb, (1, fout), jnp.float32) * 0.1
    return w, b


def init_params(key):
    keys = jax.random.split(key, 10)
    conv1 = sum((init_linear(keys[0], 8, 128),
                 init_linear(keys[1], 128, 128),
                 init_linear(keys[2], 128, 128)), ())
    conv3 = sum((init_linear(keys[3], 8, 64),
                 init_linear(keys[4], 64, 64),
                 init_linear(keys[5], 64, 16)), ())
    mlp = sum((init_linear(keys[6], 128, 64),
               init_linear(keys[7], 64, 32),
               init_linear(keys[8], 32, 1)), ())
    lin2 = init_linear(keys[9], 32, 1)
    return dict(conv1=conv1, conv3=conv3, mlp=mlp, lin2=lin2)


if __name__ == "__main__":
    key = jax.random.PRNGKey(0)
    k_x, k_p = jax.random.split(key)
    x = jax.random.normal(k_x, (N, C), jnp.float32)                     # data.x
    batch_ids = jnp.repeat(jnp.arange(B, dtype=jnp.int32), N // B)      # data.batch
    params = init_params(k_p)

    xin, slab = prepare_inputs(x, batch_ids, params)
    mass = dgcnn_forward(xin, slab)
    jax.block_until_ready(mass)
    assert mass.shape == (B,)
    print("KERNEL_OK")
</pallas_src>

<mosaic_0001>
module attributes {stable_mosaic.version = 11 : i64} {
  func.func @dgcnn_kernel(%arg0: i32, %arg1: memref<64x5xf32, #tpu.memory_space<vmem>>, %arg2: memref<840x128xf32, #tpu.memory_space<vmem>>, %arg3: memref<2x1xf32, #tpu.memory_space<vmem>>) attributes {dimension_semantics = [#tpu.dimension_semantics<arbitrary>], iteration_bounds = array<i64: 1>, scalar_prefetch = 0 : i64, scratch_operands = 0 : i64, tpu.core_type = #tpu.core_type<tc>, window_params = [{pipeline_mode = #tpu.pipeline_mode<synchronous>, transform_indices = @transform_0, window_bounds = array<i64: 64, 5>}, {pipeline_mode = #tpu.pipeline_mode<synchronous>, transform_indices = @transform_1, window_bounds = array<i64: 840, 128>}, {pipeline_mode = #tpu.pipeline_mode<synchronous>, transform_indices = @transform_2, window_bounds = array<i64: 2, 1>}]} {
    %c0 = arith.constant 0 : index
    %c0_0 = arith.constant 0 : index
    %0 = vector.load %arg1[%c0, %c0_0] : memref<64x5xf32, #tpu.memory_space<vmem>>, vector<64x4xf32>
    %c0_1 = arith.constant 0 : index
    %c4 = arith.constant 4 : index
    %1 = vector.load %arg1[%c0_1, %c4] : memref<64x5xf32, #tpu.memory_space<vmem>>, vector<64x1xf32>
    %c0_2 = arith.constant 0 : index
    %c0_3 = arith.constant 0 : index
    %2 = vector.load %arg2[%c0_2, %c0_3] : memref<840x128xf32, #tpu.memory_space<vmem>>, vector<1x64xf32>
    %c8 = arith.constant 8 : index
    %c0_4 = arith.constant 0 : index
    %3 = vector.load %arg2[%c8, %c0_4] : memref<840x128xf32, #tpu.memory_space<vmem>>, vector<4x128xf32>
    %c16 = arith.constant 16 : index
    %c0_5 = arith.constant 0 : index
    %4 = vector.load %arg2[%c16, %c0_5] : memref<840x128xf32, #tpu.memory_space<vmem>>, vector<4x128xf32>
    %5 = arith.subf %3, %4 : vector<4x128xf32>
    %cst = arith.constant dense<0.000000e+00> : vector<64x128xf32>
    %6 = tpu.matmul %0, %5, %cst {dimension_numbers = #tpu.dot_dimension_numbers<[1], [0], [0], [1], [0, 0, 1, 1], [], []>} : vector<64x4xf32>, vector<4x128xf32>, vector<64x128xf32> -> vector<64x128xf32>
    %c24 = arith.constant 24 : index
    %c0_6 = arith.constant 0 : index
    %7 = vector.load %arg2[%c24, %c0_6] : memref<840x128xf32, #tpu.memory_space<vmem>>, vector<1x128xf32>
    %8 = vector.broadcast %7 : vector<1x128xf32> to vector<64x128xf32>
    %9 = arith.addf %6, %8 : vector<64x128xf32>
    %cst_7 = arith.constant dense<0.000000e+00> : vector<64x128xf32>
    %10 = tpu.matmul %0, %4, %cst_7 {dimension_numbers = #tpu.dot_dimension_numbers<[1], [0], [0], [1], [0, 0, 1, 1], [], []>} : vector<64x4xf32>, vector<4x128xf32>, vector<64x128xf32> -> vector<64x128xf32>
    %cst_8 = arith.constant dense<0.000000e+00> : vector<64x64xf32>
    %11 = tpu.matmul %0, %0, %cst_8 {dimension_numbers = #tpu.dot_dimension_numbers<[1], [1], [0], [0], [0, 0, 1, 0], [], []>} : vector<64x4xf32>, vector<64x4xf32>, vector<64x64xf32> -> vector<64x64xf32>
    %cst_9 = arith.constant 1.000000e+00 : f32
    %12 = vector.broadcast %cst_9 : f32 to vector<64x4xf32>
    %13 = arith.mulf %0, %0 : vector<64x4xf32>
    %cst_10 = arith.constant dense<0.000000e+00> : vector<64x64xf32>
    %14 = tpu.matmul %12, %13, %cst_10 {dimension_numbers = #tpu.dot_dimension_numbers<[1], [1], [0], [0], [0, 0, 1, 0], [], []>} : vector<64x4xf32>, vector<64x4xf32>, vector<64x64xf32> -> vector<64x64xf32>
    %cst_11 = arith.constant 2.000000e+00 : f32
    %15 = vector.broadcast %cst_11 : f32 to vector<64x64xf32>
    %16 = arith.mulf %15, %11 : vector<64x64xf32>
    %17 = arith.subf %14, %16 : vector<64x64xf32>
    %18 = vector.broadcast %1 : vector<64x1xf32> to vector<64x64xf32>
    %19 = vector.broadcast %2 : vector<1x64xf32> to vector<64x64xf32>
    %20 = arith.cmpf oeq, %18, %19 : vector<64x64xf32>
    %21 = tpu.iota {dimensions = array<i32: 1>} : vector<64x64xi32>
    %22 = tpu.bitcast %17 : vector<64x64xf32> -> vector<64x64xi32>
    %c-128_i32 = arith.constant -128 : i32
    %23 = vector.broadcast %c-128_i32 : i32 to vector<64x64xi32>
    %24 = arith.andi %22, %23 : vector<64x64xi32>
    %25 = arith.ori %24, %21 : vector<64x64xi32>
    %26 = tpu.bitcast %25 : vector<64x64xi32> -> vector<64x64xf32>
    %cst_12 = arith.constant 1.000000e+30 : f32
    %27 = vector.broadcast %cst_12 : f32 to vector<64x64xf32>
    %28 = arith.select %20, %26, %27 : vector<64x64xi1>, vector<64x64xf32>
    %cst_13 = arith.constant dense<0x7F800000> : vector<64xf32>
    %29 = vector.multi_reduction <minimumf>, %28, %cst_13 [1] : vector<64x64xf32> to vector<64xf32>
    %30 = vector.shape_cast %29 : vector<64xf32> to vector<64x1xf32>
    %31 = tpu.bitcast %30 : vector<64x1xf32> -> vector<64x1xi32>
    %c127_i32 = arith.constant 127 : i32
    %32 = vector.broadcast %c127_i32 : i32 to vector<64x1xi32>
    %33 = arith.andi %31, %32 : vector<64x1xi32>
    %34 = vector.broadcast %33 : vector<64x1xi32> to vector<64x64xi32>
    %35 = arith.cmpi eq, %21, %34 : vector<64x64xi32>
    %cst_14 = arith.constant 1.000000e+30 : f32
    %36 = vector.broadcast %cst_14 : f32 to vector<64x64xf32>
    %37 = arith.select %35, %36, %28 : vector<64x64xi1>, vector<64x64xf32>
    %cst_15 = arith.constant dense<0x7F800000> : vector<64xf32>
    %38 = vector.multi_reduction <minimumf>, %37, %cst_15 [1] : vector<64x64xf32> to vector<64xf32>
    %39 = vector.shape_cast %38 : vector<64xf32> to vector<64x1xf32>
    %40 = tpu.bitcast %39 : vector<64x1xf32> -> vector<64x1xi32>
    %c127_i32_16 = arith.constant 127 : i32
    %41 = vector.broadcast %c127_i32_16 : i32 to vector<64x1xi32>
    %42 = arith.andi %40, %41 : vector<64x1xi32>
    %43 = vector.broadcast %42 : vector<64x1xi32> to vector<64x64xi32>
    %44 = arith.cmpi eq, %21, %43 : vector<64x64xi32>
    %cst_17 = arith.constant 1.000000e+30 : f32
    %45 = vector.broadcast %cst_17 : f32 to vector<64x64xf32>
    %46 = arith.select %44, %45, %37 : vector<64x64xi1>, vector<64x64xf32>
    %cst_18 = arith.constant dense<0x7F800000> : vector<64xf32>
    %47 = vector.multi_reduction <minimumf>, %46, %cst_18 [1] : vector<64x64xf32> to vector<64xf32>
    %48 = vector.shape_cast %47 : vector<64xf32> to vector<64x1xf32>
    %49 = tpu.bitcast %48 : vector<64x1xf32> -> vector<64x1xi32>
    %c127_i32_19 = arith.constant 127 : i32
    %50 = vector.broadcast %c127_i32_19 : i32 to vector<64x1xi32>
    %51 = arith.andi %49, %50 : vector<64x1xi32>
    %52 = vector.broadcast %51 : vector<64x1xi32> to vector<64x64xi32>
    %53 = arith.cmpi eq, %21, %52 : vector<64x64xi32>
    %cst_20 = arith.constant 1.000000e+30 : f32
    %54 = vector.broadcast %cst_20 : f32 to vector<64x64xf32>
    %55 = arith.select %53, %54, %46 : vector<64x64xi1>, vector<64x64xf32>
    %cst_21 = arith.constant dense<0x7F800000> : vector<64xf32>
    %56 = vector.multi_reduction <minimumf>, %55, %cst_21 [1] : vector<64x64xf32> to vector<64xf32>
    %57 = vector.shape_cast %56 : vector<64xf32> to vector<64x1xf32>
    %58 = tpu.bitcast %57 : vector<64x1xf32> -> vector<64x1xi32>
    %c127_i32_22 = arith.constant 127 : i32
    %59 = vector.broadcast %c127_i32_22 : i32 to vector<64x1xi32>
    %60 = arith.andi %58, %59 : vector<64x1xi32>
    %61 = vector.broadcast %60 : vector<64x1xi32> to vector<64x64xi32>
    %62 = arith.cmpi eq, %21, %61 : vector<64x64xi32>
    %cst_23 = arith.constant 1.000000e+30 : f32
    %63 = vector.broadcast %cst_23 : f32 to vector<64x64xf32>
    %64 = arith.select %62, %63, %55 : vector<64x64xi1>, vector<64x64xf32>
    %cst_24 = arith.constant dense<0x7F800000> : vector<64xf32>
    %65 = vector.multi_reduction <minimumf>, %64, %cst_24 [1] : vector<64x64xf32> to vector<64xf32>
    %66 = vector.shape_cast %65 : vector<64xf32> to vector<64x1xf32>
    %67 = tpu.bitcast %66 : vector<64x1xf32> -> vector<64x1xi32>
    %c127_i32_25 = arith.constant 127 : i32
    %68 = vector.broadcast %c127_i32_25 : i32 to vector<64x1xi32>
    %69 = arith.andi %67, %68 : vector<64x1xi32>
    %70 = vector.broadcast %69 : vector<64x1xi32> to vector<64x64xi32>
    %71 = arith.cmpi eq, %21, %70 : vector<64x64xi32>
    %cst_26 = arith.constant 1.000000e+30 : f32
    %72 = vector.broadcast %cst_26 : f32 to vector<64x64xf32>
    %73 = arith.select %71, %72, %64 : vector<64x64xi1>, vector<64x64xf32>
    %cst_27 = arith.constant dense<0x7F800000> : vector<64xf32>
    %74 = vector.multi_reduction <minimumf>, %73, %cst_27 [1] : vector<64x64xf32> to vector<64xf32>
    %75 = vector.shape_cast %74 : vector<64xf32> to vector<64x1xf32>
    %76 = tpu.bitcast %75 : vector<64x1xf32> -> vector<64x1xi32>
    %c127_i32_28 = arith.constant 127 : i32
    %77 = vector.broadcast %c127_i32_28 : i32 to vector<64x1xi32>
    %78 = arith.andi %76, %77 : vector<64x1xi32>
    %79 = vector.broadcast %78 : vector<64x1xi32> to vector<64x64xi32>
    %80 = arith.cmpi eq, %21, %79 : vector<64x64xi32>
    %cst_29 = arith.constant 1.000000e+30 : f32
    %81 = vector.broadcast %cst_29 : f32 to vector<64x64xf32>
    %82 = arith.select %80, %81, %73 : vector<64x64xi1>, vector<64x64xf32>
    %cst_30 = arith.constant dense<0x7F800000> : vector<64xf32>
    %83 = vector.multi_reduction <minimumf>, %82, %cst_30 [1] : vector<64x64xf32> to vector<64xf32>
    %84 = vector.shape_cast %83 : vector<64xf32> to vector<64x1xf32>
    %85 = tpu.bitcast %84 : vector<64x1xf32> -> vector<64x1xi32>
    %c127_i32_31 = arith.constant 127 : i32
    %86 = vector.broadcast %c127_i32_31 : i32 to vector<64x1xi32>
    %87 = arith.andi %85, %86 : vector<64x1xi32>
    %88 = vector.broadcast %87 : vector<64x1xi32> to vector<64x64xi32>
    %89 = arith.cmpi eq, %21, %88 : vector<64x64xi32>
    %cst_32 = arith.constant 1.000000e+30 : f32
    %90 = vector.broadcast %cst_32 : f32 to vector<64x64xf32>
    %91 = arith.select %89, %90, %82 : vector<64x64xi1>, vector<64x64xf32>
    %cst_33 = arith.constant dense<0x7F800000> : vector<64xf32>
    %92 = vector.multi_reduction <minimumf>, %91, %cst_33 [1] : vector<64x64xf32> to vector<64xf32>
    %93 = vector.shape_cast %92 : vector<64xf32> to vector<64x1xf32>
    %94 = tpu.bitcast %93 : vector<64x1xf32> -> vector<64x1xi32>
    %c127_i32_34 = arith.constant 127 : i32
    %95 = vector.broadcast %c127_i32_34 : i32 to vector<64x1xi32>
    %96 = arith.andi %94, %95 : vector<64x1xi32>
    %97 = vector.broadcast %96 : vector<64x1xi32> to vector<64x64xi32>
    %98 = arith.cmpi eq, %21, %97 : vector<64x64xi32>
    %cst_35 = arith.constant 1.000000e+30 : f32
    %99 = vector.broadcast %cst_35 : f32 to vector<64x64xf32>
    %100 = arith.select %98, %99, %91 : vector<64x64xi1>, vector<64x64xf32>
    %cst_36 = arith.constant dense<0x7F800000> : vector<64xf32>
    %101 = vector.multi_reduction <minimumf>, %100, %cst_36 [1] : vector<64x64xf32> to vector<64xf32>
    %102 = vector.shape_cast %101 : vector<64xf32> to vector<64x1xf32>
    %103 = tpu.bitcast %102 : vector<64x1xf32> -> vector<64x1xi32>
    %c127_i32_37 = arith.constant 127 : i32
    %104 = vector.broadcast %c127_i32_37 : i32 to vector<64x1xi32>
    %105 = arith.andi %103, %104 : vector<64x1xi32>
    %106 = tpu.iota {dimensions = array<i32: 1>} : vector<64x64xi32>
    %107 = vector.broadcast %33 : vector<64x1xi32> to vector<64x64xi32>
    %108 = arith.cmpi eq, %106, %107 : vector<64x64xi32>
    %cst_38 = arith.constant 1.000000e+00 : f32
    %cst_39 = arith.constant 0.000000e+00 : f32
    %109 = vector.broadcast %cst_38 : f32 to vector<64x64xf32>
    %110 = vector.broadcast %cst_39 : f32 to vector<64x64xf32>
    %111 = arith.select %108, %109, %110 : vector<64x64xi1>, vector<64x64xf32>
    %cst_40 = arith.constant dense<0.000000e+00> : vector<64x128xf32>
    %112 = tpu.matmul %111, %10, %cst_40 {dimension_numbers = #tpu.dot_dimension_numbers<[1], [0], [0], [1], [0, 0, 1, 1], [], []>} : vector<64x64xf32>, vector<64x128xf32>, vector<64x128xf32> -> vector<64x128xf32>
    %113 = arith.addf %9, %112 : vector<64x128xf32>
    %114 = vector.broadcast %42 : vector<64x1xi32> to vector<64x64xi32>
    %115 = arith.cmpi eq, %106, %114 : vector<64x64xi32>
    %cst_41 = arith.constant 1.000000e+00 : f32
    %cst_42 = arith.constant 0.000000e+00 : f32
    %116 = vector.broadcast %cst_41 : f32 to vector<64x64xf32>
    %117 = vector.broadcast %cst_42 : f32 to vector<64x64xf32>
    %118 = arith.select %115, %116, %117 : vector<64x64xi1>, vector<64x64xf32>
    %cst_43 = arith.constant dense<0.000000e+00> : vector<64x128xf32>
    %119 = tpu.matmul %118, %10, %cst_43 {dimension_numbers = #tpu.dot_dimension_numbers<[1], [0], [0], [1], [0, 0, 1, 1], [], []>} : vector<64x64xf32>, vector<64x128xf32>, vector<64x128xf32> -> vector<64x128xf32>
    %120 = arith.addf %9, %119 : vector<64x128xf32>
    %121 = vector.broadcast %51 : vector<64x1xi32> to vector<64x64xi32>
    %122 = arith.cmpi eq, %106, %121 : vector<64x64xi32>
    %cst_44 = arith.constant 1.000000e+00 : f32
    %cst_45 = arith.constant 0.000000e+00 : f32
    %123 = vector.broadcast %cst_44 : f32 to vector<64x64xf32>
    %124 = vector.broadcast %cst_45 : f32 to vector<64x64xf32>
    %125 = arith.select %122, %123, %124 : vector<64x64xi1>, vector<64x64xf32>
    %cst_46 = arith.constant dense<0.000000e+00> : vector<64x128xf32>
    %126 = tpu.matmul %125, %10, %cst_46 {dimension_numbers = #tpu.dot_dimension_numbers<[1], [0], [0], [1], [0, 0, 1, 1], [], []>} : vector<64x64xf32>, vector<64x128xf32>, vector<64x128xf32> -> vector<64x128xf32>
    %127 = arith.addf %9, %126 : vector<64x128xf32>
    %128 = vector.broadcast %60 : vector<64x1xi32> to vector<64x64xi32>
    %129 = arith.cmpi eq, %106, %128 : vector<64x64xi32>
    %cst_47 = arith.constant 1.000000e+00 : f32
    %cst_48 = arith.constant 0.000000e+00 : f32
    %130 = vector.broadcast %cst_47 : f32 to vector<64x64xf32>
    %131 = vector.broadcast %cst_48 : f32 to vector<64x64xf32>
    %132 = arith.select %129, %130, %131 : vector<64x64xi1>, vector<64x64xf32>
    %cst_49 = arith.constant dense<0.000000e+00> : vector<64x128xf32>
    %133 = tpu.matmul %132, %10, %cst_49 {dimension_numbers = #tpu.dot_dimension_numbers<[1], [0], [0], [1], [0, 0, 1, 1], [], []>} : vector<64x64xf32>, vector<64x128xf32>, vector<64x128xf32> -> vector<64x128xf32>
    %134 = arith.addf %9, %133 : vector<64x128xf32>
    %135 = vector.broadcast %69 : vector<64x1xi32> to vector<64x64xi32>
    %136 = arith.cmpi eq, %106, %135 : vector<64x64xi32>
    %cst_50 = arith.constant 1.000000e+00 : f32
    %cst_51 = arith.constant 0.000000e+00 : f32
    %137 = vector.broadcast %cst_50 : f32 to vector<64x64xf32>
    %138 = vector.broadcast %cst_51 : f32 to vector<64x64xf32>
    %139 = arith.select %136, %137, %138 : vector<64x64xi1>, vector<64x64xf32>
    %cst_52 = arith.constant dense<0.000000e+00> : vector<64x128xf32>
    %140 = tpu.matmul %139, %10, %cst_52 {dimension_numbers = #tpu.dot_dimension_numbers<[1], [0], [0], [1], [0, 0, 1, 1], [], []>} : vector<64x64xf32>, vector<64x128xf32>, vector<64x128xf32> -> vector<64x128xf32>
    %141 = arith.addf %9, %140 : vector<64x128xf32>
    %142 = vector.broadcast %78 : vector<64x1xi32> to vector<64x64xi32>
    %143 = arith.cmpi eq, %106, %142 : vector<64x64xi32>
    %cst_53 = arith.constant 1.000000e+00 : f32
    %cst_54 = arith.constant 0.000000e+00 : f32
    %144 = vector.broadcast %cst_53 : f32 to vector<64x64xf32>
    %145 = vector.broadcast %cst_54 : f32 to vector<64x64xf32>
    %146 = arith.select %143, %144, %145 : vector<64x64xi1>, vector<64x64xf32>
    %cst_55 = arith.constant dense<0.000000e+00> : vector<64x128xf32>
    %147 = tpu.matmul %146, %10, %cst_55 {dimension_numbers = #tpu.dot_dimension_numbers<[1], [0], [0], [1], [0, 0, 1, 1], [], []>} : vector<64x64xf32>, vector<64x128xf32>, vector<64x128xf32> -> vector<64x128xf32>
    %148 = arith.addf %9, %147 : vector<64x128xf32>
    %149 = vector.broadcast %87 : vector<64x1xi32> to vector<64x64xi32>
    %150 = arith.cmpi eq, %106, %149 : vector<64x64xi32>
    %cst_56 = arith.constant 1.000000e+00 : f32
    %cst_57 = arith.constant 0.000000e+00 : f32
    %151 = vector.broadcast %cst_56 : f32 to vector<64x64xf32>
    %152 = vector.broadcast %cst_57 : f32 to vector<64x64xf32>
    %153 = arith.select %150, %151, %152 : vector<64x64xi1>, vector<64x64xf32>
    %cst_58 = arith.constant dense<0.000000e+00> : vector<64x128xf32>
    %154 = tpu.matmul %153, %10, %cst_58 {dimension_numbers = #tpu.dot_dimension_numbers<[1], [0], [0], [1], [0, 0, 1, 1], [], []>} : vector<64x64xf32>, vector<64x128xf32>, vector<64x128xf32> -> vector<64x128xf32>
    %155 = arith.addf %9, %154 : vector<64x128xf32>
    %156 = vector.broadcast %96 : vector<64x1xi32> to vector<64x64xi32>
    %157 = arith.cmpi eq, %106, %156 : vector<64x64xi32>
    %cst_59 = arith.constant 1.000000e+00 : f32
    %cst_60 = arith.constant 0.000000e+00 : f32
    %158 = vector.broadcast %cst_59 : f32 to vector<64x64xf32>
    %159 = vector.broadcast %cst_60 : f32 to vector<64x64xf32>
    %160 = arith.select %157, %158, %159 : vector<64x64xi1>, vector<64x64xf32>
    %cst_61 = arith.constant dense<0.000000e+00> : vector<64x128xf32>
    %161 = tpu.matmul %160, %10, %cst_61 {dimension_numbers = #tpu.dot_dimension_numbers<[1], [0], [0], [1], [0, 0, 1, 1], [], []>} : vector<64x64xf32>, vector<64x128xf32>, vector<64x128xf32> -> vector<64x128xf32>
    %162 = arith.addf %9, %161 : vector<64x128xf32>
    %163 = vector.broadcast %105 : vector<64x1xi32> to vector<64x64xi32>
    %164 = arith.cmpi eq, %106, %163 : vector<64x64xi32>
    %cst_62 = arith.constant 1.000000e+00 : f32
    %cst_63 = arith.constant 0.000000e+00 : f32
    %165 = vector.broadcast %cst_62 : f32 to vector<64x64xf32>
    %166 = vector.broadcast %cst_63 : f32 to vector<64x64xf32>
    %167 = arith.select %164, %165, %166 : vector<64x64xi1>, vector<64x64xf32>
    %cst_64 = arith.constant dense<0.000000e+00> : vector<64x128xf32>
    %168 = tpu.matmul %167, %10, %cst_64 {dimension_numbers = #tpu.dot_dimension_numbers<[1], [0], [0], [1], [0, 0, 1, 1], [], []>} : vector<64x64xf32>, vector<64x128xf32>, vector<64x128xf32> -> vector<64x128xf32>
    %169 = arith.addf %9, %168 : vector<64x128xf32>
    %170 = tpu.concatenate %113, %120, %127, %134, %141, %148, %155, %162, %169 in 0 : vector<64x128xf32>, vector<64x128xf32>, vector<64x128xf32>, vector<64x128xf32>, vector<64x128xf32>, vector<64x128xf32>, vector<64x128xf32>, vector<64x128xf32>, vector<64x128xf32> -> vector<576x128xf32>
    %c32 = arith.constant 32 : index
    %c0_65 = arith.constant 0 : index
    %171 = vector.load %arg2[%c32, %c0_65] : memref<840x128xf32, #tpu.memory_space<vmem>>, vector<128x128xf32>
    %c160 = arith.constant 160 : index
    %c0_66 = arith.constant 0 : index
    %172 = vector.load %arg2[%c160, %c0_66] : memref<840x128xf32, #tpu.memory_space<vmem>>, vector<1x128xf32>
    %c168 = arith.constant 168 : index
    %c0_67 = arith.constant 0 : index
    %173 = vector.load %arg2[%c168, %c0_67] : memref<840x128xf32, #tpu.memory_space<vmem>>, vector<128x128xf32>
    %c296 = arith.constant 296 : index
    %c0_68 = arith.constant 0 : index
    %174 = vector.load %arg2[%c296, %c0_68] : memref<840x128xf32, #tpu.memory_space<vmem>>, vector<1x128xf32>
    %cst_69 = arith.constant 0.999994993 : f32
    %175 = vector.broadcast %cst_69 : f32 to vector<576x128xf32>
    %176 = arith.mulf %170, %175 : vector<576x128xf32>
    %cst_70 = arith.constant 0.000000e+00 : f32
    %177 = vector.broadcast %cst_70 : f32 to vector<576x128xf32>
    %178 = arith.maximumf %176, %177 : vector<576x128xf32>
    %179 = arith.truncf %178 : vector<576x128xf32> to vector<576x128xbf16>
    %180 = arith.truncf %171 : vector<128x128xf32> to vector<128x128xbf16>
    %cst_71 = arith.constant dense<0.000000e+00> : vector<576x128xf32>
    %181 = tpu.matmul %179, %180, %cst_71 {dimension_numbers = #tpu.dot_dimension_numbers<[1], [0], [0], [1], [0, 0, 1, 1], [], []>} : vector<576x128xbf16>, vector<128x128xbf16>, vector<576x128xf32> -> vector<576x128xf32>
    %182 = vector.broadcast %172 : vector<1x128xf32> to vector<576x128xf32>
    %183 = arith.addf %181, %182 : vector<576x128xf32>
    %cst_72 = arith.constant 0.999994993 : f32
    %184 = vector.broadcast %cst_72 : f32 to vector<576x128xf32>
    %185 = arith.mulf %183, %184 : vector<576x128xf32>
    %cst_73 = arith.constant 0.000000e+00 : f32
    %186 = vector.broadcast %cst_73 : f32 to vector<576x128xf32>
    %187 = arith.maximumf %185, %186 : vector<576x128xf32>
    %188 = arith.truncf %187 : vector<576x128xf32> to vector<576x128xbf16>
    %189 = arith.truncf %173 : vector<128x128xf32> to vector<128x128xbf16>
    %cst_74 = arith.constant dense<0.000000e+00> : vector<576x128xf32>
    %190 = tpu.matmul %188, %189, %cst_74 {dimension_numbers = #tpu.dot_dimension_numbers<[1], [0], [0], [1], [0, 0, 1, 1], [], []>} : vector<576x128xbf16>, vector<128x128xbf16>, vector<576x128xf32> -> vector<576x128xf32>
    %191 = vector.broadcast %174 : vector<1x128xf32> to vector<576x128xf32>
    %192 = arith.addf %190, %191 : vector<576x128xf32>
    %193 = vector.extract_strided_slice %192 {offsets = [0, 0], sizes = [64, 128], strides = [1, 1]} : vector<576x128xf32> to vector<64x128xf32>
    %194 = vector.extract_strided_slice %192 {offsets = [64, 0], sizes = [64, 128], strides = [1, 1]} : vector<576x128xf32> to vector<64x128xf32>
    %195 = vector.extract_strided_slice %192 {offsets = [128, 0], sizes = [64, 128], strides = [1, 1]} : vector<576x128xf32> to vector<64x128xf32>
    %196 = vector.extract_strided_slice %192 {offsets = [192, 0], sizes = [64, 128], strides = [1, 1]} : vector<576x128xf32> to vector<64x128xf32>
    %197 = vector.extract_strided_slice %192 {offsets = [256, 0], sizes = [64, 128], strides = [1, 1]} : vector<576x128xf32> to vector<64x128xf32>
    %198 = vector.extract_strided_slice %192 {offsets = [320, 0], sizes = [64, 128], strides = [1, 1]} : vector<576x128xf32> to vector<64x128xf32>
    %199 = vector.extract_strided_slice %192 {offsets = [384, 0], sizes = [64, 128], strides = [1, 1]} : vector<576x128xf32> to vector<64x128xf32>
    %200 = vector.extract_strided_slice %192 {offsets = [448, 0], sizes = [64, 128], strides = [1, 1]} : vector<576x128xf32> to vector<64x128xf32>
    %201 = vector.extract_strided_slice %192 {offsets = [512, 0], sizes = [64, 128], strides = [1, 1]} : vector<576x128xf32> to vector<64x128xf32>
    %202 = arith.addf %193, %194 : vector<64x128xf32>
    %203 = arith.addf %195, %196 : vector<64x128xf32>
    %204 = arith.addf %197, %198 : vector<64x128xf32>
    %205 = arith.addf %199, %200 : vector<64x128xf32>
    %206 = arith.addf %202, %203 : vector<64x128xf32>
    %207 = arith.addf %204, %205 : vector<64x128xf32>
    %208 = arith.addf %206, %207 : vector<64x128xf32>
    %209 = arith.addf %208, %201 : vector<64x128xf32>
    %cst_75 = arith.constant 0.111111112 : f32
    %210 = vector.broadcast %cst_75 : f32 to vector<64x128xf32>
    %211 = arith.mulf %209, %210 : vector<64x128xf32>
    %212 = arith.truncf %211 : vector<64x128xf32> to vector<64x128xbf16>
    %c304 = arith.constant 304 : index
    %c0_76 = arith.constant 0 : index
    %213 = vector.load %arg2[%c304, %c0_76] : memref<840x128xf32, #tpu.memory_space<vmem>>, vector<128x64xf32>
    %214 = arith.truncf %213 : vector<128x64xf32> to vector<128x64xbf16>
    %cst_77 = arith.constant dense<0.000000e+00> : vector<64x64xf32>
    %215 = tpu.matmul %212, %214, %cst_77 {dimension_numbers = #tpu.dot_dimension_numbers<[1], [0], [0], [1], [0, 0, 1, 1], [], []>} : vector<64x128xbf16>, vector<128x64xbf16>, vector<64x64xf32> -> vector<64x64xf32>
    %c432 = arith.constant 432 : index
    %c0_78 = arith.constant 0 : index
    %216 = vector.load %arg2[%c432, %c0_78] : memref<840x128xf32, #tpu.memory_space<vmem>>, vector<1x64xf32>
    %217 = vector.broadcast %216 : vector<1x64xf32> to vector<64x64xf32>
    %218 = arith.addf %215, %217 : vector<64x64xf32>
    %cst_79 = arith.constant 0.000000e+00 : f32
    %219 = vector.broadcast %cst_79 : f32 to vector<64x64xf32>
    %220 = arith.maximumf %218, %219 : vector<64x64xf32>
    %221 = arith.truncf %220 : vector<64x64xf32> to vector<64x64xbf16>
    %c440 = arith.constant 440 : index
    %c0_80 = arith.constant 0 : index
    %222 = vector.load %arg2[%c440, %c0_80] : memref<840x128xf32, #tpu.memory_space<vmem>>, vector<64x32xf32>
    %223 = arith.truncf %222 : vector<64x32xf32> to vector<64x32xbf16>
    %cst_81 = arith.constant dense<0.000000e+00> : vector<64x32xf32>
    %224 = tpu.matmul %221, %223, %cst_81 {dimension_numbers = #tpu.dot_dimension_numbers<[1], [0], [0], [1], [0, 0, 1, 1], [], []>} : vector<64x64xbf16>, vector<64x32xbf16>, vector<64x32xf32> -> vector<64x32xf32>
    %c504 = arith.constant 504 : index
    %c0_82 = arith.constant 0 : index
    %225 = vector.load %arg2[%c504, %c0_82] : memref<840x128xf32, #tpu.memory_space<vmem>>, vector<1x32xf32>
    %226 = vector.broadcast %225 : vector<1x32xf32> to vector<64x32xf32>
    %227 = arith.addf %224, %226 : vector<64x32xf32>
    %cst_83 = arith.constant 0.000000e+00 : f32
    %228 = vector.broadcast %cst_83 : f32 to vector<64x32xf32>
    %229 = arith.maximumf %227, %228 : vector<64x32xf32>
    %c512 = arith.constant 512 : index
    %c0_84 = arith.constant 0 : index
    %230 = vector.load %arg2[%c512, %c0_84] : memref<840x128xf32, #tpu.memory_space<vmem>>, vector<1x32xf32>
    %231 = vector.broadcast %230 : vector<1x32xf32> to vector<64x32xf32>
    %232 = arith.mulf %229, %231 : vector<64x32xf32>
    %cst_85 = arith.constant dense<0.000000e+00> : vector<64xf32>
    %233 = vector.multi_reduction <add>, %232, %cst_85 [1] : vector<64x32xf32> to vector<64xf32>
    %234 = vector.shape_cast %233 : vector<64xf32> to vector<64x1xf32>
    %c520 = arith.constant 520 : index
    %c0_86 = arith.constant 0 : index
    %235 = vector.load %arg2[%c520, %c0_86] : memref<840x128xf32, #tpu.memory_space<vmem>>, vector<1x1xf32>
    %236 = vector.broadcast %235 : vector<1x1xf32> to vector<64x1xf32>
    %237 = arith.addf %234, %236 : vector<64x1xf32>
    %238 = vector.shape_cast %237 : vector<64x1xf32> to vector<1x64x1xf32>
    %cst_87 = arith.constant dense<0.000000e+00> : vector<1xf32>
    %239 = vector.multi_reduction <add>, %238, %cst_87 [1, 2] : vector<1x64x1xf32> to vector<1xf32>
    %240 = vector.shape_cast %239 : vector<1xf32> to vector<1x1x1xf32>
    %241 = vector.extract %240[0, 0, 0] : f32 from vector<1x1x1xf32>
    %242 = vector.broadcast %241 : f32 to vector<1x1xf32>
    %cst_88 = arith.constant 1.562500e-02 : f32
    %243 = vector.broadcast %cst_88 : f32 to vector<1x1xf32>
    %244 = arith.mulf %242, %243 : vector<1x1xf32>
    %245 = vector.broadcast %244 : vector<1x1xf32> to vector<64x1xf32>
    %246 = arith.subf %237, %245 : vector<64x1xf32>
    %247 = arith.mulf %246, %246 : vector<64x1xf32>
    %248 = vector.shape_cast %247 : vector<64x1xf32> to vector<1x64x1xf32>
    %cst_89 = arith.constant dense<0.000000e+00> : vector<1xf32>
    %249 = vector.multi_reduction <add>, %248, %cst_89 [1, 2] : vector<1x64x1xf32> to vector<1xf32>
    %250 = vector.shape_cast %249 : vector<1xf32> to vector<1x1x1xf32>
    %251 = vector.extract %250[0, 0, 0] : f32 from vector<1x1x1xf32>
    %252 = vector.broadcast %251 : f32 to vector<1x1xf32>
    %cst_90 = arith.constant 0.0158730168 : f32
    %253 = vector.broadcast %cst_90 : f32 to vector<1x1xf32>
    %254 = arith.mulf %252, %253 : vector<1x1xf32>
    %255 = vector.broadcast %244 : vector<1x1xf32> to vector<64x1xf32>
    %256 = arith.subf %237, %255 : vector<64x1xf32>
    %257 = math.sqrt %254 : vector<1x1xf32>
    %cst_91 = arith.constant 9.99999974E-6 : f32
    %258 = vector.broadcast %cst_91 : f32 to vector<1x1xf32>
    %259 = arith.addf %257, %258 : vector<1x1xf32>
    %260 = vector.broadcast %259 : vector<1x1xf32> to vector<64x1xf32>
    %261 = arith.divf %256, %260 : vector<64x1xf32>
    %262 = arith.negf %261 : vector<64x1xf32>
    %263 = math.exp %262 : vector<64x1xf32>
    %cst_92 = arith.constant 1.000000e+00 : f32
    %264 = vector.broadcast %cst_92 : f32 to vector<64x1xf32>
    %265 = arith.addf %264, %263 : vector<64x1xf32>
    %266 = arith.divf %264, %265 : vector<64x1xf32>
    %267 = vector.broadcast %266 : vector<64x1xf32> to vector<64x4xf32>
    %268 = arith.mulf %267, %0 : vector<64x4xf32>
    %cst_93 = arith.constant 1.000000e+00 : f32
    %269 = vector.broadcast %cst_93 : f32 to vector<64x1xf32>
    %270 = arith.subf %269, %266 : vector<64x1xf32>
    %271 = vector.broadcast %270 : vector<64x1xf32> to vector<64x4xf32>
    %272 = arith.mulf %271, %0 : vector<64x4xf32>
    %273 = tpu.concatenate %268, %272 in 0 : vector<64x4xf32>, vector<64x4xf32> -> vector<128x4xf32>
    %c528 = arith.constant 528 : index
    %c0_94 = arith.constant 0 : index
    %274 = vector.load %arg2[%c528, %c0_94] : memref<840x128xf32, #tpu.memory_space<vmem>>, vector<4x64xf32>
    %c536 = arith.constant 536 : index
    %c0_95 = arith.constant 0 : index
    %275 = vector.load %arg2[%c536, %c0_95] : memref<840x128xf32, #tpu.memory_space<vmem>>, vector<4x64xf32>
    %276 = arith.subf %274, %275 : vector<4x64xf32>
    %cst_96 = arith.constant dense<0.000000e+00> : vector<128x64xf32>
    %277 = tpu.matmul %273, %276, %cst_96 {dimension_numbers = #tpu.dot_dimension_numbers<[1], [0], [0], [1], [0, 0, 1, 1], [], []>} : vector<128x4xf32>, vector<4x64xf32>, vector<128x64xf32> -> vector<128x64xf32>
    %c544 = arith.constant 544 : index
    %c0_97 = arith.constant 0 : index
    %278 = vector.load %arg2[%c544, %c0_97] : memref<840x128xf32, #tpu.memory_space<vmem>>, vector<1x64xf32>
    %279 = vector.broadcast %278 : vector<1x64xf32> to vector<128x64xf32>
    %280 = arith.addf %277, %279 : vector<128x64xf32>
    %cst_98 = arith.constant dense<0.000000e+00> : vector<128x64xf32>
    %281 = tpu.matmul %273, %275, %cst_98 {dimension_numbers = #tpu.dot_dimension_numbers<[1], [0], [0], [1], [0, 0, 1, 1], [], []>} : vector<128x4xf32>, vector<4x64xf32>, vector<128x64xf32> -> vector<128x64xf32>
    %282 = vector.extract_strided_slice %280 {offsets = [0, 0], sizes = [64, 64], strides = [1, 1]} : vector<128x64xf32> to vector<64x64xf32>
    %283 = vector.extract_strided_slice %280 {offsets = [64, 0], sizes = [64, 64], strides = [1, 1]} : vector<128x64xf32> to vector<64x64xf32>
    %284 = tpu.concatenate %282, %283 in 1 : vector<64x64xf32>, vector<64x64xf32> -> vector<64x128xf32>
    %285 = vector.extract_strided_slice %281 {offsets = [0, 0], sizes = [64, 64], strides = [1, 1]} : vector<128x64xf32> to vector<64x64xf32>
    %286 = vector.extract_strided_slice %281 {offsets = [64, 0], sizes = [64, 64], strides = [1, 1]} : vector<128x64xf32> to vector<64x64xf32>
    %287 = tpu.iota {dimensions = array<i32: 0>} : vector<128x128xi32>
    %288 = tpu.iota {dimensions = array<i32: 1>} : vector<128x128xi32>
    %c64_i32 = arith.constant 64 : i32
    %289 = vector.broadcast %c64_i32 : i32 to vector<128x128xi32>
    %290 = arith.cmpi slt, %287, %289 : vector<128x128xi32>
    %c64_i32_99 = arith.constant 64 : i32
    %291 = vector.broadcast %c64_i32_99 : i32 to vector<128x128xi32>
    %292 = arith.cmpi slt, %288, %291 : vector<128x128xi32>
    %293 = arith.andi %290, %292 : vector<128x128xi1>
    %c64_i32_100 = arith.constant 64 : i32
    %294 = vector.broadcast %c64_i32_100 : i32 to vector<128x128xi32>
    %295 = arith.cmpi sge, %287, %294 : vector<128x128xi32>
    %c64_i32_101 = arith.constant 64 : i32
    %296 = vector.broadcast %c64_i32_101 : i32 to vector<128x128xi32>
    %297 = arith.cmpi sge, %288, %296 : vector<128x128xi32>
    %298 = arith.andi %295, %297 : vector<128x128xi1>
    %299 = arith.ori %293, %298 : vector<128x128xi1>
    %cst_102 = arith.constant dense<0.000000e+00> : vector<128x128xf32>
    %300 = tpu.matmul %273, %273, %cst_102 {dimension_numbers = #tpu.dot_dimension_numbers<[1], [1], [0], [0], [0, 0, 1, 0], [], []>} : vector<128x4xf32>, vector<128x4xf32>, vector<128x128xf32> -> vector<128x128xf32>
    %cst_103 = arith.constant 1.000000e+00 : f32
    %301 = vector.broadcast %cst_103 : f32 to vector<128x4xf32>
    %302 = arith.mulf %273, %273 : vector<128x4xf32>
    %cst_104 = arith.constant dense<0.000000e+00> : vector<128x128xf32>
    %303 = tpu.matmul %301, %302, %cst_104 {dimension_numbers = #tpu.dot_dimension_numbers<[1], [1], [0], [0], [0, 0, 1, 0], [], []>} : vector<128x4xf32>, vector<128x4xf32>, vector<128x128xf32> -> vector<128x128xf32>
    %cst_105 = arith.constant 2.000000e+00 : f32
    %304 = vector.broadcast %cst_105 : f32 to vector<128x128xf32>
    %305 = arith.mulf %304, %300 : vector<128x128xf32>
    %306 = arith.subf %303, %305 : vector<128x128xf32>
    %307 = tpu.iota {dimensions = array<i32: 1>} : vector<128x128xi32>
    %308 = tpu.bitcast %306 : vector<128x128xf32> -> vector<128x128xi32>
    %c-128_i32_106 = arith.constant -128 : i32
    %309 = vector.broadcast %c-128_i32_106 : i32 to vector<128x128xi32>
    %310 = arith.andi %308, %309 : vector<128x128xi32>
    %311 = arith.ori %310, %307 : vector<128x128xi32>
    %312 = tpu.bitcast %311 : vector<128x128xi32> -> vector<128x128xf32>
    %cst_107 = arith.constant 1.000000e+30 : f32
    %313 = vector.broadcast %cst_107 : f32 to vector<128x128xf32>
    %314 = arith.select %299, %312, %313 : vector<128x128xi1>, vector<128x128xf32>
    %cst_108 = arith.constant dense<0x7F800000> : vector<128xf32>
    %315 = vector.multi_reduction <minimumf>, %314, %cst_108 [1] : vector<128x128xf32> to vector<128xf32>
    %316 = vector.shape_cast %315 : vector<128xf32> to vector<128x1xf32>
    %317 = tpu.bitcast %316 : vector<128x1xf32> -> vector<128x1xi32>
    %c127_i32_109 = arith.constant 127 : i32
    %318 = vector.broadcast %c127_i32_109 : i32 to vector<128x1xi32>
    %319 = arith.andi %317, %318 : vector<128x1xi32>
    %320 = vector.broadcast %319 : vector<128x1xi32> to vector<128x128xi32>
    %321 = arith.cmpi eq, %307, %320 : vector<128x128xi32>
    %cst_110 = arith.constant 1.000000e+30 : f32
    %322 = vector.broadcast %cst_110 : f32 to vector<128x128xf32>
    %323 = arith.select %321, %322, %314 : vector<128x128xi1>, vector<128x128xf32>
    %cst_111 = arith.constant dense<0x7F800000> : vector<128xf32>
    %324 = vector.multi_reduction <minimumf>, %323, %cst_111 [1] : vector<128x128xf32> to vector<128xf32>
    %325 = vector.shape_cast %324 : vector<128xf32> to vector<128x1xf32>
    %326 = tpu.bitcast %325 : vector<128x1xf32> -> vector<128x1xi32>
    %c127_i32_112 = arith.constant 127 : i32
    %327 = vector.broadcast %c127_i32_112 : i32 to vector<128x1xi32>
    %328 = arith.andi %326, %327 : vector<128x1xi32>
    %329 = vector.broadcast %328 : vector<128x1xi32> to vector<128x128xi32>
    %330 = arith.cmpi eq, %307, %329 : vector<128x128xi32>
    %cst_113 = arith.constant 1.000000e+30 : f32
    %331 = vector.broadcast %cst_113 : f32 to vector<128x128xf32>
    %332 = arith.select %330, %331, %323 : vector<128x128xi1>, vector<128x128xf32>
    %cst_114 = arith.constant dense<0x7F800000> : vector<128xf32>
    %333 = vector.multi_reduction <minimumf>, %332, %cst_114 [1] : vector<128x128xf32> to vector<128xf32>
    %334 = vector.shape_cast %333 : vector<128xf32> to vector<128x1xf32>
    %335 = tpu.bitcast %334 : vector<128x1xf32> -> vector<128x1xi32>
    %c127_i32_115 = arith.constant 127 : i32
    %336 = vector.broadcast %c127_i32_115 : i32 to vector<128x1xi32>
    %337 = arith.andi %335, %336 : vector<128x1xi32>
    %338 = vector.broadcast %337 : vector<128x1xi32> to vector<128x128xi32>
    %339 = arith.cmpi eq, %307, %338 : vector<128x128xi32>
    %cst_116 = arith.constant 1.000000e+30 : f32
    %340 = vector.broadcast %cst_116 : f32 to vector<128x128xf32>
    %341 = arith.select %339, %340, %332 : vector<128x128xi1>, vector<128x128xf32>
    %cst_117 = arith.constant dense<0x7F800000> : vector<128xf32>
    %342 = vector.multi_reduction <minimumf>, %341, %cst_117 [1] : vector<128x128xf32> to vector<128xf32>
    %343 = vector.shape_cast %342 : vector<128xf32> to vector<128x1xf32>
    %344 = tpu.bitcast %343 : vector<128x1xf32> -> vector<128x1xi32>
    %c127_i32_118 = arith.constant 127 : i32
    %345 = vector.broadcast %c127_i32_118 : i32 to vector<128x1xi32>
    %346 = arith.andi %344, %345 : vector<128x1xi32>
    %347 = vector.broadcast %346 : vector<128x1xi32> to vector<128x128xi32>
    %348 = arith.cmpi eq, %307, %347 : vector<128x128xi32>
    %cst_119 = arith.constant 1.000000e+30 : f32
    %349 = vector.broadcast %cst_119 : f32 to vector<128x128xf32>
    %350 = arith.select %348, %349, %341 : vector<128x128xi1>, vector<128x128xf32>
    %cst_120 = arith.constant dense<0x7F800000> : vector<128xf32>
    %351 = vector.multi_reduction <minimumf>, %350, %cst_120 [1] : vector<128x128xf32> to vector<128xf32>
    %352 = vector.shape_cast %351 : vector<128xf32> to vector<128x1xf32>
    %353 = tpu.bitcast %352 : vector<128x1xf32> -> vector<128x1xi32>
    %c127_i32_121 = arith.constant 127 : i32
    %354 = vector.broadcast %c127_i32_121 : i32 to vector<128x1xi32>
    %355 = arith.andi %353, %354 : vector<128x1xi32>
    %356 = vector.broadcast %355 : vector<128x1xi32> to vector<128x128xi32>
    %357 = arith.cmpi eq, %307, %356 : vector<128x128xi32>
    %cst_122 = arith.constant 1.000000e+30 : f32
    %358 = vector.broadcast %cst_122 : f32 to vector<128x128xf32>
    %359 = arith.select %357, %358, %350 : vector<128x128xi1>, vector<128x128xf32>
    %cst_123 = arith.constant dense<0x7F800000> : vector<128xf32>
    %360 = vector.multi_reduction <minimumf>, %359, %cst_123 [1] : vector<128x128xf32> to vector<128xf32>
    %361 = vector.shape_cast %360 : vector<128xf32> to vector<128x1xf32>
    %362 = tpu.bitcast %361 : vector<128x1xf32> -> vector<128x1xi32>
    %c127_i32_124 = arith.constant 127 : i32
    %363 = vector.broadcast %c127_i32_124 : i32 to vector<128x1xi32>
    %364 = arith.andi %362, %363 : vector<128x1xi32>
    %365 = vector.broadcast %364 : vector<128x1xi32> to vector<128x128xi32>
    %366 = arith.cmpi eq, %307, %365 : vector<128x128xi32>
    %cst_125 = arith.constant 1.000000e+30 : f32
    %367 = vector.broadcast %cst_125 : f32 to vector<128x128xf32>
    %368 = arith.select %366, %367, %359 : vector<128x128xi1>, vector<128x128xf32>
    %cst_126 = arith.constant dense<0x7F800000> : vector<128xf32>
    %369 = vector.multi_reduction <minimumf>, %368, %cst_126 [1] : vector<128x128xf32> to vector<128xf32>
    %370 = vector.shape_cast %369 : vector<128xf32> to vector<128x1xf32>
    %371 = tpu.bitcast %370 : vector<128x1xf32> -> vector<128x1xi32>
    %c127_i32_127 = arith.constant 127 : i32
    %372 = vector.broadcast %c127_i32_127 : i32 to vector<128x1xi32>
    %373 = arith.andi %371, %372 : vector<128x1xi32>
    %374 = vector.broadcast %373 : vector<128x1xi32> to vector<128x128xi32>
    %375 = arith.cmpi eq, %307, %374 : vector<128x128xi32>
    %cst_128 = arith.constant 1.000000e+30 : f32
    %376 = vector.broadcast %cst_128 : f32 to vector<128x128xf32>
    %377 = arith.select %375, %376, %368 : vector<128x128xi1>, vector<128x128xf32>
    %cst_129 = arith.constant dense<0x7F800000> : vector<128xf32>
    %378 = vector.multi_reduction <minimumf>, %377, %cst_129 [1] : vector<128x128xf32> to vector<128xf32>
    %379 = vector.shape_cast %378 : vector<128xf32> to vector<128x1xf32>
    %380 = tpu.bitcast %379 : vector<128x1xf32> -> vector<128x1xi32>
    %c127_i32_130 = arith.constant 127 : i32
    %381 = vector.broadcast %c127_i32_130 : i32 to vector<128x1xi32>
    %382 = arith.andi %380, %381 : vector<128x1xi32>
    %383 = vector.broadcast %382 : vector<128x1xi32> to vector<128x128xi32>
    %384 = arith.cmpi eq, %307, %383 : vector<128x128xi32>
    %cst_131 = arith.constant 1.000000e+30 : f32
    %385 = vector.broadcast %cst_131 : f32 to vector<128x128xf32>
    %386 = arith.select %384, %385, %377 : vector<128x128xi1>, vector<128x128xf32>
    %cst_132 = arith.constant dense<0x7F800000> : vector<128xf32>
    %387 = vector.multi_reduction <minimumf>, %386, %cst_132 [1] : vector<128x128xf32> to vector<128xf32>
    %388 = vector.shape_cast %387 : vector<128xf32> to vector<128x1xf32>
    %389 = tpu.bitcast %388 : vector<128x1xf32> -> vector<128x1xi32>
    %c127_i32_133 = arith.constant 127 : i32
    %390 = vector.broadcast %c127_i32_133 : i32 to vector<128x1xi32>
    %391 = arith.andi %389, %390 : vector<128x1xi32>
    %392 = vector.extract_strided_slice %319 {offsets = [0, 0], sizes = [64, 1], strides = [1, 1]} : vector<128x1xi32> to vector<64x1xi32>
    %393 = vector.extract_strided_slice %319 {offsets = [64, 0], sizes = [64, 1], strides = [1, 1]} : vector<128x1xi32> to vector<64x1xi32>
    %c64_i32_134 = arith.constant 64 : i32
    %394 = vector.broadcast %c64_i32_134 : i32 to vector<64x1xi32>
    %395 = arith.subi %393, %394 : vector<64x1xi32>
    %396 = vector.broadcast %392 : vector<64x1xi32> to vector<64x64xi32>
    %397 = arith.cmpi eq, %106, %396 : vector<64x64xi32>
    %cst_135 = arith.constant 1.000000e+00 : f32
    %cst_136 = arith.constant 0.000000e+00 : f32
    %398 = vector.broadcast %cst_135 : f32 to vector<64x64xf32>
    %399 = vector.broadcast %cst_136 : f32 to vector<64x64xf32>
    %400 = arith.select %397, %398, %399 : vector<64x64xi1>, vector<64x64xf32>
    %401 = vector.broadcast %395 : vector<64x1xi32> to vector<64x64xi32>
    %402 = arith.cmpi eq, %106, %401 : vector<64x64xi32>
    %cst_137 = arith.constant 1.000000e+00 : f32
    %cst_138 = arith.constant 0.000000e+00 : f32
    %403 = vector.broadcast %cst_137 : f32 to vector<64x64xf32>
    %404 = vector.broadcast %cst_138 : f32 to vector<64x64xf32>
    %405 = arith.select %402, %403, %404 : vector<64x64xi1>, vector<64x64xf32>
    %cst_139 = arith.constant dense<0.000000e+00> : vector<64x64xf32>
    %406 = tpu.matmul %400, %285, %cst_139 {dimension_numbers = #tpu.dot_dimension_numbers<[1], [0], [0], [1], [0, 0, 1, 1], [], []>} : vector<64x64xf32>, vector<64x64xf32>, vector<64x64xf32> -> vector<64x64xf32>
    %cst_140 = arith.constant dense<0.000000e+00> : vector<64x64xf32>
    %407 = tpu.matmul %405, %286, %cst_140 {dimension_numbers = #tpu.dot_dimension_numbers<[1], [0], [0], [1], [0, 0, 1, 1], [], []>} : vector<64x64xf32>, vector<64x64xf32>, vector<64x64xf32> -> vector<64x64xf32>
    %408 = tpu.concatenate %406, %407 in 1 : vector<64x64xf32>, vector<64x64xf32> -> vector<64x128xf32>
    %409 = arith.addf %284, %408 : vector<64x128xf32>
    %410 = vector.extract_strided_slice %328 {offsets = [0, 0], sizes = [64, 1], strides = [1, 1]} : vector<128x1xi32> to vector<64x1xi32>
    %411 = vector.extract_strided_slice %328 {offsets = [64, 0], sizes = [64, 1], strides = [1, 1]} : vector<128x1xi32> to vector<64x1xi32>
    %c64_i32_141 = arith.constant 64 : i32
    %412 = vector.broadcast %c64_i32_141 : i32 to vector<64x1xi32>
    %413 = arith.subi %411, %412 : vector<64x1xi32>
    %414 = vector.broadcast %410 : vector<64x1xi32> to vector<64x64xi32>
    %415 = arith.cmpi eq, %106, %414 : vector<64x64xi32>
    %cst_142 = arith.constant 1.000000e+00 : f32
    %cst_143 = arith.constant 0.000000e+00 : f32
    %416 = vector.broadcast %cst_142 : f32 to vector<64x64xf32>
    %417 = vector.broadcast %cst_143 : f32 to vector<64x64xf32>
    %418 = arith.select %415, %416, %417 : vector<64x64xi1>, vector<64x64xf32>
    %419 = vector.broadcast %413 : vector<64x1xi32> to vector<64x64xi32>
    %420 = arith.cmpi eq, %106, %419 : vector<64x64xi32>
    %cst_144 = arith.constant 1.000000e+00 : f32
    %cst_145 = arith.constant 0.000000e+00 : f32
    %421 = vector.broadcast %cst_144 : f32 to vector<64x64xf32>
    %422 = vector.broadcast %cst_145 : f32 to vector<64x64xf32>
    %423 = arith.select %420, %421, %422 : vector<64x64xi1>, vector<64x64xf32>
    %cst_146 = arith.constant dense<0.000000e+00> : vector<64x64xf32>
    %424 = tpu.matmul %418, %285, %cst_146 {dimension_numbers = #tpu.dot_dimension_numbers<[1], [0], [0], [1], [0, 0, 1, 1], [], []>} : vector<64x64xf32>, vector<64x64xf32>, vector<64x64xf32> -> vector<64x64xf32>
    %cst_147 = arith.constant dense<0.000000e+00> : vector<64x64xf32>
    %425 = tpu.matmul %423, %286, %cst_147 {dimension_numbers = #tpu.dot_dimension_numbers<[1], [0], [0], [1], [0, 0, 1, 1], [], []>} : vector<64x64xf32>, vector<64x64xf32>, vector<64x64xf32> -> vector<64x64xf32>
    %426 = tpu.concatenate %424, %425 in 1 : vector<64x64xf32>, vector<64x64xf32> -> vector<64x128xf32>
    %427 = arith.addf %284, %426 : vector<64x128xf32>
    %428 = vector.extract_strided_slice %337 {offsets = [0, 0], sizes = [64, 1], strides = [1, 1]} : vector<128x1xi32> to vector<64x1xi32>
    %429 = vector.extract_strided_slice %337 {offsets = [64, 0], sizes = [64, 1], strides = [1, 1]} : vector<128x1xi32> to vector<64x1xi32>
    %c64_i32_148 = arith.constant 64 : i32
    %430 = vector.broadcast %c64_i32_148 : i32 to vector<64x1xi32>
    %431 = arith.subi %429, %430 : vector<64x1xi32>
    %432 = vector.broadcast %428 : vector<64x1xi32> to vector<64x64xi32>
    %433 = arith.cmpi eq, %106, %432 : vector<64x64xi32>
    %cst_149 = arith.constant 1.000000e+00 : f32
    %cst_150 = arith.constant 0.000000e+00 : f32
    %434 = vector.broadcast %cst_149 : f32 to vector<64x64xf32>
    %435 = vector.broadcast %cst_150 : f32 to vector<64x64xf32>
    %436 = arith.select %433, %434, %435 : vector<64x64xi1>, vector<64x64xf32>
    %437 = vector.broadcast %431 : vector<64x1xi32> to vector<64x64xi32>
    %438 = arith.cmpi eq, %106, %437 : vector<64x64xi32>
    %cst_151 = arith.constant 1.000000e+00 : f32
    %cst_152 = arith.constant 0.000000e+00 : f32
    %439 = vector.broadcast %cst_151 : f32 to vector<64x64xf32>
    %440 = vector.broadcast %cst_152 : f32 to vector<64x64xf32>
    %441 = arith.select %438, %439, %440 : vector<64x64xi1>, vector<64x64xf32>
    %cst_153 = arith.constant dense<0.000000e+00> : vector<64x64xf32>
    %442 = tpu.matmul %436, %285, %cst_153 {dimension_numbers = #tpu.dot_dimension_numbers<[1], [0], [0], [1], [0, 0, 1, 1], [], []>} : vector<64x64xf32>, vector<64x64xf32>, vector<64x64xf32> -> vector<64x64xf32>
    %cst_154 = arith.constant dense<0.000000e+00> : vector<64x64xf32>
    %443 = tpu.matmul %441, %286, %cst_154 {dimension_numbers = #tpu.dot_dimension_numbers<[1], [0], [0], [1], [0, 0, 1, 1], [], []>} : vector<64x64xf32>, vector<64x64xf32>, vector<64x64xf32> -> vector<64x64xf32>
    %444 = tpu.concatenate %442, %443 in 1 : vector<64x64xf32>, vector<64x64xf32> -> vector<64x128xf32>
    %445 = arith.addf %284, %444 : vector<64x128xf32>
    %446 = vector.extract_strided_slice %346 {offsets = [0, 0], sizes = [64, 1], strides = [1, 1]} : vector<128x1xi32> to vector<64x1xi32>
    %447 = vector.extract_strided_slice %346 {offsets = [64, 0], sizes = [64, 1], strides = [1, 1]} : vector<128x1xi32> to vector<64x1xi32>
    %c64_i32_155 = arith.constant 64 : i32
    %448 = vector.broadcast %c64_i32_155 : i32 to vector<64x1xi32>
    %449 = arith.subi %447, %448 : vector<64x1xi32>
    %450 = vector.broadcast %446 : vector<64x1xi32> to vector<64x64xi32>
    %451 = arith.cmpi eq, %106, %450 : vector<64x64xi32>
    %cst_156 = arith.constant 1.000000e+00 : f32
    %cst_157 = arith.constant 0.000000e+00 : f32
    %452 = vector.broadcast %cst_156 : f32 to vector<64x64xf32>
    %453 = vector.broadcast %cst_157 : f32 to vector<64x64xf32>
    %454 = arith.select %451, %452, %453 : vector<64x64xi1>, vector<64x64xf32>
    %455 = vector.broadcast %449 : vector<64x1xi32> to vector<64x64xi32>
    %456 = arith.cmpi eq, %106, %455 : vector<64x64xi32>
    %cst_158 = arith.constant 1.000000e+00 : f32
    %cst_159 = arith.constant 0.000000e+00 : f32
    %457 = vector.broadcast %cst_158 : f32 to vector<64x64xf32>
    %458 = vector.broadcast %cst_159 : f32 to vector<64x64xf32>
    %459 = arith.select %456, %457, %458 : vector<64x64xi1>, vector<64x64xf32>
    %cst_160 = arith.constant dense<0.000000e+00> : vector<64x64xf32>
    %460 = tpu.matmul %454, %285, %cst_160 {dimension_numbers = #tpu.dot_dimension_numbers<[1], [0], [0], [1], [0, 0, 1, 1], [], []>} : vector<64x64xf32>, vector<64x64xf32>, vector<64x64xf32> -> vector<64x64xf32>
    %cst_161 = arith.constant dense<0.000000e+00> : vector<64x64xf32>
    %461 = tpu.matmul %459, %286, %cst_161 {dimension_numbers = #tpu.dot_dimension_numbers<[1], [0], [0], [1], [0, 0, 1, 1], [], []>} : vector<64x64xf32>, vector<64x64xf32>, vector<64x64xf32> -> vector<64x64xf32>
    %462 = tpu.concatenate %460, %461 in 1 : vector<64x64xf32>, vector<64x64xf32> -> vector<64x128xf32>
    %463 = arith.addf %284, %462 : vector<64x128xf32>
    %464 = vector.extract_strided_slice %355 {offsets = [0, 0], sizes = [64, 1], strides = [1, 1]} : vector<128x1xi32> to vector<64x1xi32>
    %465 = vector.extract_strided_slice %355 {offsets = [64, 0], sizes = [64, 1], strides = [1, 1]} : vector<128x1xi32> to vector<64x1xi32>
    %c64_i32_162 = arith.constant 64 : i32
    %466 = vector.broadcast %c64_i32_162 : i32 to vector<64x1xi32>
    %467 = arith.subi %465, %466 : vector<64x1xi32>
    %468 = vector.broadcast %464 : vector<64x1xi32> to vector<64x64xi32>
    %469 = arith.cmpi eq, %106, %468 : vector<64x64xi32>
    %cst_163 = arith.constant 1.000000e+00 : f32
    %cst_164 = arith.constant 0.000000e+00 : f32
    %470 = vector.broadcast %cst_163 : f32 to vector<64x64xf32>
    %471 = vector.broadcast %cst_164 : f32 to vector<64x64xf32>
    %472 = arith.select %469, %470, %471 : vector<64x64xi1>, vector<64x64xf32>
    %473 = vector.broadcast %467 : vector<64x1xi32> to vector<64x64xi32>
    %474 = arith.cmpi eq, %106, %473 : vector<64x64xi32>
    %cst_165 = arith.constant 1.000000e+00 : f32
    %cst_166 = arith.constant 0.000000e+00 : f32
    %475 = vector.broadcast %cst_165 : f32 to vector<64x64xf32>
    %476 = vector.broadcast %cst_166 : f32 to vector<64x64xf32>
    %477 = arith.select %474, %475, %476 : vector<64x64xi1>, vector<64x64xf32>
    %cst_167 = arith.constant dense<0.000000e+00> : vector<64x64xf32>
    %478 = tpu.matmul %472, %285, %cst_167 {dimension_numbers = #tpu.dot_dimension_numbers<[1], [0], [0], [1], [0, 0, 1, 1], [], []>} : vector<64x64xf32>, vector<64x64xf32>, vector<64x64xf32> -> vector<64x64xf32>
    %cst_168 = arith.constant dense<0.000000e+00> : vector<64x64xf32>
    %479 = tpu.matmul %477, %286, %cst_168 {dimension_numbers = #tpu.dot_dimension_numbers<[1], [0], [0], [1], [0, 0, 1, 1], [], []>} : vector<64x64xf32>, vector<64x64xf32>, vector<64x64xf32> -> vector<64x64xf32>
    %480 = tpu.concatenate %478, %479 in 1 : vector<64x64xf32>, vector<64x64xf32> -> vector<64x128xf32>
    %481 = arith.addf %284, %480 : vector<64x128xf32>
    %482 = vector.extract_strided_slice %364 {offsets = [0, 0], sizes = [64, 1], strides = [1, 1]} : vector<128x1xi32> to vector<64x1xi32>
    %483 = vector.extract_strided_slice %364 {offsets = [64, 0], sizes = [64, 1], strides = [1, 1]} : vector<128x1xi32> to vector<64x1xi32>
    %c64_i32_169 = arith.constant 64 : i32
    %484 = vector.broadcast %c64_i32_169 : i32 to vector<64x1xi32>
    %485 = arith.subi %483, %484 : vector<64x1xi32>
    %486 = vector.broadcast %482 : vector<64x1xi32> to vector<64x64xi32>
    %487 = arith.cmpi eq, %106, %486 : vector<64x64xi32>
    %cst_170 = arith.constant 1.000000e+00 : f32
    %cst_171 = arith.constant 0.000000e+00 : f32
    %488 = vector.broadcast %cst_170 : f32 to vector<64x64xf32>
    %489 = vector.broadcast %cst_171 : f32 to vector<64x64xf32>
    %490 = arith.select %487, %488, %489 : vector<64x64xi1>, vector<64x64xf32>
    %491 = vector.broadcast %485 : vector<64x1xi32> to vector<64x64xi32>
    %492 = arith.cmpi eq, %106, %491 : vector<64x64xi32>
    %cst_172 = arith.constant 1.000000e+00 : f32
    %cst_173 = arith.constant 0.000000e+00 : f32
    %493 = vector.broadcast %cst_172 : f32 to vector<64x64xf32>
    %494 = vector.broadcast %cst_173 : f32 to vector<64x64xf32>
    %495 = arith.select %492, %493, %494 : vector<64x64xi1>, vector<64x64xf32>
    %cst_174 = arith.constant dense<0.000000e+00> : vector<64x64xf32>
    %496 = tpu.matmul %490, %285, %cst_174 {dimension_numbers = #tpu.dot_dimension_numbers<[1], [0], [0], [1], [0, 0, 1, 1], [], []>} : vector<64x64xf32>, vector<64x64xf32>, vector<64x64xf32> -> vector<64x64xf32>
    %cst_175 = arith.constant dense<0.000000e+00> : vector<64x64xf32>
    %497 = tpu.matmul %495, %286, %cst_175 {dimension_numbers = #tpu.dot_dimension_numbers<[1], [0], [0], [1], [0, 0, 1, 1], [], []>} : vector<64x64xf32>, vector<64x64xf32>, vector<64x64xf32> -> vector<64x64xf32>
    %498 = tpu.concatenate %496, %497 in 1 : vector<64x64xf32>, vector<64x64xf32> -> vector<64x128xf32>
    %499 = arith.addf %284, %498 : vector<64x128xf32>
    %500 = vector.extract_strided_slice %373 {offsets = [0, 0], sizes = [64, 1], strides = [1, 1]} : vector<128x1xi32> to vector<64x1xi32>
    %501 = vector.extract_strided_slice %373 {offsets = [64, 0], sizes = [64, 1], strides = [1, 1]} : vector<128x1xi32> to vector<64x1xi32>
    %c64_i32_176 = arith.constant 64 : i32
    %502 = vector.broadcast %c64_i32_176 : i32 to vector<64x1xi32>
    %503 = arith.subi %501, %502 : vector<64x1xi32>
    %504 = vector.broadcast %500 : vector<64x1xi32> to vector<64x64xi32>
    %505 = arith.cmpi eq, %106, %504 : vector<64x64xi32>
    %cst_177 = arith.constant 1.000000e+00 : f32
    %cst_178 = arith.constant 0.000000e+00 : f32
    %506 = vector.broadcast %cst_177 : f32 to vector<64x64xf32>
    %507 = vector.broadcast %cst_178 : f32 to vector<64x64xf32>
    %508 = arith.select %505, %506, %507 : vector<64x64xi1>, vector<64x64xf32>
    %509 = vector.broadcast %503 : vector<64x1xi32> to vector<64x64xi32>
    %510 = arith.cmpi eq, %106, %509 : vector<64x64xi32>
    %cst_179 = arith.constant 1.000000e+00 : f32
    %cst_180 = arith.constant 0.000000e+00 : f32
    %511 = vector.broadcast %cst_179 : f32 to vector<64x64xf32>
    %512 = vector.broadcast %cst_180 : f32 to vector<64x64xf32>
    %513 = arith.select %510, %511, %512 : vector<64x64xi1>, vector<64x64xf32>
    %cst_181 = arith.constant dense<0.000000e+00> : vector<64x64xf32>
    %514 = tpu.matmul %508, %285, %cst_181 {dimension_numbers = #tpu.dot_dimension_numbers<[1], [0], [0], [1], [0, 0, 1, 1], [], []>} : vector<64x64xf32>, vector<64x64xf32>, vector<64x64xf32> -> vector<64x64xf32>
    %cst_182 = arith.constant dense<0.000000e+00> : vector<64x64xf32>
    %515 = tpu.matmul %513, %286, %cst_182 {dimension_numbers = #tpu.dot_dimension_numbers<[1], [0], [0], [1], [0, 0, 1, 1], [], []>} : vector<64x64xf32>, vector<64x64xf32>, vector<64x64xf32> -> vector<64x64xf32>
    %516 = tpu.concatenate %514, %515 in 1 : vector<64x64xf32>, vector<64x64xf32> -> vector<64x128xf32>
    %517 = arith.addf %284, %516 : vector<64x128xf32>
    %518 = vector.extract_strided_slice %382 {offsets = [0, 0], sizes = [64, 1], strides = [1, 1]} : vector<128x1xi32> to vector<64x1xi32>
    %519 = vector.extract_strided_slice %382 {offsets = [64, 0], sizes = [64, 1], strides = [1, 1]} : vector<128x1xi32> to vector<64x1xi32>
    %c64_i32_183 = arith.constant 64 : i32
    %520 = vector.broadcast %c64_i32_183 : i32 to vector<64x1xi32>
    %521 = arith.subi %519, %520 : vector<64x1xi32>
    %522 = vector.broadcast %518 : vector<64x1xi32> to vector<64x64xi32>
    %523 = arith.cmpi eq, %106, %522 : vector<64x64xi32>
    %cst_184 = arith.constant 1.000000e+00 : f32
    %cst_185 = arith.constant 0.000000e+00 : f32
    %524 = vector.broadcast %cst_184 : f32 to vector<64x64xf32>
    %525 = vector.broadcast %cst_185 : f32 to vector<64x64xf32>
    %526 = arith.select %523, %524, %525 : vector<64x64xi1>, vector<64x64xf32>
    %527 = vector.broadcast %521 : vector<64x1xi32> to vector<64x64xi32>
    %528 = arith.cmpi eq, %106, %527 : vector<64x64xi32>
    %cst_186 = arith.constant 1.000000e+00 : f32
    %cst_187 = arith.constant 0.000000e+00 : f32
    %529 = vector.broadcast %cst_186 : f32 to vector<64x64xf32>
    %530 = vector.broadcast %cst_187 : f32 to vector<64x64xf32>
    %531 = arith.select %528, %529, %530 : vector<64x64xi1>, vector<64x64xf32>
    %cst_188 = arith.constant dense<0.000000e+00> : vector<64x64xf32>
    %532 = tpu.matmul %526, %285, %cst_188 {dimension_numbers = #tpu.dot_dimension_numbers<[1], [0], [0], [1], [0, 0, 1, 1], [], []>} : vector<64x64xf32>, vector<64x64xf32>, vector<64x64xf32> -> vector<64x64xf32>
    %cst_189 = arith.constant dense<0.000000e+00> : vector<64x64xf32>
    %533 = tpu.matmul %531, %286, %cst_189 {dimension_numbers = #tpu.dot_dimension_numbers<[1], [0], [0], [1], [0, 0, 1, 1], [], []>} : vector<64x64xf32>, vector<64x64xf32>, vector<64x64xf32> -> vector<64x64xf32>
    %534 = tpu.concatenate %532, %533 in 1 : vector<64x64xf32>, vector<64x64xf32> -> vector<64x128xf32>
    %535 = arith.addf %284, %534 : vector<64x128xf32>
    %536 = vector.extract_strided_slice %391 {offsets = [0, 0], sizes = [64, 1], strides = [1, 1]} : vector<128x1xi32> to vector<64x1xi32>
    %537 = vector.extract_strided_slice %391 {offsets = [64, 0], sizes = [64, 1], strides = [1, 1]} : vector<128x1xi32> to vector<64x1xi32>
    %c64_i32_190 = arith.constant 64 : i32
    %538 = vector.broadcast %c64_i32_190 : i32 to vector<64x1xi32>
    %539 = arith.subi %537, %538 : vector<64x1xi32>
    %540 = vector.broadcast %536 : vector<64x1xi32> to vector<64x64xi32>
    %541 = arith.cmpi eq, %106, %540 : vector<64x64xi32>
    %cst_191 = arith.constant 1.000000e+00 : f32
    %cst_192 = arith.constant 0.000000e+00 : f32
    %542 = vector.broadcast %cst_191 : f32 to vector<64x64xf32>
    %543 = vector.broadcast %cst_192 : f32 to vector<64x64xf32>
    %544 = arith.select %541, %542, %543 : vector<64x64xi1>, vector<64x64xf32>
    %545 = vector.broadcast %539 : vector<64x1xi32> to vector<64x64xi32>
    %546 = arith.cmpi eq, %106, %545 : vector<64x64xi32>
    %cst_193 = arith.constant 1.000000e+00 : f32
    %cst_194 = arith.constant 0.000000e+00 : f32
    %547 = vector.broadcast %cst_193 : f32 to vector<64x64xf32>
    %548 = vector.broadcast %cst_194 : f32 to vector<64x64xf32>
    %549 = arith.select %546, %547, %548 : vector<64x64xi1>, vector<64x64xf32>
    %cst_195 = arith.constant dense<0.000000e+00> : vector<64x64xf32>
    %550 = tpu.matmul %544, %285, %cst_195 {dimension_numbers = #tpu.dot_dimension_numbers<[1], [0], [0], [1], [0, 0, 1, 1], [], []>} : vector<64x64xf32>, vector<64x64xf32>, vector<64x64xf32> -> vector<64x64xf32>
    %cst_196 = arith.constant dense<0.000000e+00> : vector<64x64xf32>
    %551 = tpu.matmul %549, %286, %cst_196 {dimension_numbers = #tpu.dot_dimension_numbers<[1], [0], [0], [1], [0, 0, 1, 1], [], []>} : vector<64x64xf32>, vector<64x64xf32>, vector<64x64xf32> -> vector<64x64xf32>
    %552 = tpu.concatenate %550, %551 in 1 : vector<64x64xf32>, vector<64x64xf32> -> vector<64x128xf32>
    %553 = arith.addf %284, %552 : vector<64x128xf32>
    %554 = tpu.concatenate %409, %427, %445, %463, %481, %499, %517, %535, %553 in 0 : vector<64x128xf32>, vector<64x128xf32>, vector<64x128xf32>, vector<64x128xf32>, vector<64x128xf32>, vector<64x128xf32>, vector<64x128xf32>, vector<64x128xf32>, vector<64x128xf32> -> vector<576x128xf32>
    %c552 = arith.constant 552 : index
    %c0_197 = arith.constant 0 : index
    %555 = vector.load %arg2[%c552, %c0_197] : memref<840x128xf32, #tpu.memory_space<vmem>>, vector<128x128xf32>
    %c680 = arith.constant 680 : index
    %c0_198 = arith.constant 0 : index
    %556 = vector.load %arg2[%c680, %c0_198] : memref<840x128xf32, #tpu.memory_space<vmem>>, vector<1x128xf32>
    %c688 = arith.constant 688 : index
    %c0_199 = arith.constant 0 : index
    %557 = vector.load %arg2[%c688, %c0_199] : memref<840x128xf32, #tpu.memory_space<vmem>>, vector<128x32xf32>
    %c816 = arith.constant 816 : index
    %c0_200 = arith.constant 0 : index
    %558 = vector.load %arg2[%c816, %c0_200] : memref<840x128xf32, #tpu.memory_space<vmem>>, vector<1x32xf32>
    %cst_201 = arith.constant 0.999994993 : f32
    %559 = vector.broadcast %cst_201 : f32 to vector<576x128xf32>
    %560 = arith.mulf %554, %559 : vector<576x128xf32>
    %cst_202 = arith.constant 0.000000e+00 : f32
    %561 = vector.broadcast %cst_202 : f32 to vector<576x128xf32>
    %562 = arith.maximumf %560, %561 : vector<576x128xf32>
    %563 = arith.truncf %562 : vector<576x128xf32> to vector<576x128xbf16>
    %564 = arith.truncf %555 : vector<128x128xf32> to vector<128x128xbf16>
    %cst_203 = arith.constant dense<0.000000e+00> : vector<576x128xf32>
    %565 = tpu.matmul %563, %564, %cst_203 {dimension_numbers = #tpu.dot_dimension_numbers<[1], [0], [0], [1], [0, 0, 1, 1], [], []>} : vector<576x128xbf16>, vector<128x128xbf16>, vector<576x128xf32> -> vector<576x128xf32>
    %566 = vector.broadcast %556 : vector<1x128xf32> to vector<576x128xf32>
    %567 = arith.addf %565, %566 : vector<576x128xf32>
    %cst_204 = arith.constant 0.999994993 : f32
    %568 = vector.broadcast %cst_204 : f32 to vector<576x128xf32>
    %569 = arith.mulf %567, %568 : vector<576x128xf32>
    %cst_205 = arith.constant 0.000000e+00 : f32
    %570 = vector.broadcast %cst_205 : f32 to vector<576x128xf32>
    %571 = arith.maximumf %569, %570 : vector<576x128xf32>
    %572 = arith.truncf %571 : vector<576x128xf32> to vector<576x128xbf16>
    %573 = arith.truncf %557 : vector<128x32xf32> to vector<128x32xbf16>
    %cst_206 = arith.constant dense<0.000000e+00> : vector<576x32xf32>
    %574 = tpu.matmul %572, %573, %cst_206 {dimension_numbers = #tpu.dot_dimension_numbers<[1], [0], [0], [1], [0, 0, 1, 1], [], []>} : vector<576x128xbf16>, vector<128x32xbf16>, vector<576x32xf32> -> vector<576x32xf32>
    %575 = vector.broadcast %558 : vector<1x32xf32> to vector<576x32xf32>
    %576 = arith.addf %574, %575 : vector<576x32xf32>
    %577 = vector.extract_strided_slice %576 {offsets = [0, 0], sizes = [64, 32], strides = [1, 1]} : vector<576x32xf32> to vector<64x32xf32>
    %578 = vector.extract_strided_slice %576 {offsets = [64, 0], sizes = [64, 32], strides = [1, 1]} : vector<576x32xf32> to vector<64x32xf32>
    %579 = vector.extract_strided_slice %576 {offsets = [128, 0], sizes = [64, 32], strides = [1, 1]} : vector<576x32xf32> to vector<64x32xf32>
    %580 = vector.extract_strided_slice %576 {offsets = [192, 0], sizes = [64, 32], strides = [1, 1]} : vector<576x32xf32> to vector<64x32xf32>
    %581 = vector.extract_strided_slice %576 {offsets = [256, 0], sizes = [64, 32], strides = [1, 1]} : vector<576x32xf32> to vector<64x32xf32>
    %582 = vector.extract_strided_slice %576 {offsets = [320, 0], sizes = [64, 32], strides = [1, 1]} : vector<576x32xf32> to vector<64x32xf32>
    %583 = vector.extract_strided_slice %576 {offsets = [384, 0], sizes = [64, 32], strides = [1, 1]} : vector<576x32xf32> to vector<64x32xf32>
    %584 = vector.extract_strided_slice %576 {offsets = [448, 0], sizes = [64, 32], strides = [1, 1]} : vector<576x32xf32> to vector<64x32xf32>
    %585 = vector.extract_strided_slice %576 {offsets = [512, 0], sizes = [64, 32], strides = [1, 1]} : vector<576x32xf32> to vector<64x32xf32>
    %586 = arith.addf %577, %578 : vector<64x32xf32>
    %587 = arith.addf %579, %580 : vector<64x32xf32>
    %588 = arith.addf %581, %582 : vector<64x32xf32>
    %589 = arith.addf %583, %584 : vector<64x32xf32>
    %590 = arith.addf %586, %587 : vector<64x32xf32>
    %591 = arith.addf %588, %589 : vector<64x32xf32>
    %592 = arith.addf %590, %591 : vector<64x32xf32>
    %593 = arith.addf %592, %585 : vector<64x32xf32>
    %cst_207 = arith.constant 0.111111112 : f32
    %594 = vector.broadcast %cst_207 : f32 to vector<64x32xf32>
    %595 = arith.mulf %593, %594 : vector<64x32xf32>
    %cst_208 = arith.constant 0.000000e+00 : f32
    %596 = vector.broadcast %cst_208 : f32 to vector<64x1xf32>
    %597 = arith.cmpf oeq, %1, %596 : vector<64x1xf32>
    %cst_209 = arith.constant -1.000000e+30 : f32
    %598 = vector.shape_cast %597 : vector<64x1xi1> to vector<64x1xi1>
    %599 = vector.broadcast %598 : vector<64x1xi1> to vector<64x32xi1>
    %600 = vector.broadcast %cst_209 : f32 to vector<64x32xf32>
    %601 = arith.select %599, %595, %600 : vector<64x32xi1>, vector<64x32xf32>
    %cst_210 = arith.constant dense<0xFF800000> : vector<32xf32>
    %602 = vector.multi_reduction <maximumf>, %601, %cst_210 [0] : vector<64x32xf32> to vector<32xf32>
    %603 = vector.shape_cast %602 : vector<32xf32> to vector<1x32xf32>
    %cst_211 = arith.constant 1.000000e+00 : f32
    %604 = vector.broadcast %cst_211 : f32 to vector<64x1xf32>
    %605 = arith.cmpf oeq, %1, %604 : vector<64x1xf32>
    %cst_212 = arith.constant -1.000000e+30 : f32
    %606 = vector.shape_cast %605 : vector<64x1xi1> to vector<64x1xi1>
    %607 = vector.broadcast %606 : vector<64x1xi1> to vector<64x32xi1>
    %608 = vector.broadcast %cst_212 : f32 to vector<64x32xf32>
    %609 = arith.select %607, %595, %608 : vector<64x32xi1>, vector<64x32xf32>
    %cst_213 = arith.constant dense<0xFF800000> : vector<32xf32>
    %610 = vector.multi_reduction <maximumf>, %609, %cst_213 [0] : vector<64x32xf32> to vector<32xf32>
    %611 = vector.shape_cast %610 : vector<32xf32> to vector<1x32xf32>
    %612 = tpu.concatenate %603, %611 in 0 : vector<1x32xf32>, vector<1x32xf32> -> vector<2x32xf32>
    %c824 = arith.constant 824 : index
    %c0_214 = arith.constant 0 : index
    %613 = vector.load %arg2[%c824, %c0_214] : memref<840x128xf32, #tpu.memory_space<vmem>>, vector<1x32xf32>
    %614 = vector.broadcast %613 : vector<1x32xf32> to vector<2x32xf32>
    %615 = arith.mulf %612, %614 : vector<2x32xf32>
    %cst_215 = arith.constant dense<0.000000e+00> : vector<2xf32>
    %616 = vector.multi_reduction <add>, %615, %cst_215 [1] : vector<2x32xf32> to vector<2xf32>
    %617 = vector.shape_cast %616 : vector<2xf32> to vector<2x1xf32>
    %c832 = arith.constant 832 : index
    %c0_216 = arith.constant 0 : index
    %618 = vector.load %arg2[%c832, %c0_216] : memref<840x128xf32, #tpu.memory_space<vmem>>, vector<1x1xf32>
    %619 = vector.broadcast %618 : vector<1x1xf32> to vector<2x1xf32>
    %620 = arith.addf %617, %619 : vector<2x1xf32>
    %c0_217 = arith.constant 0 : index
    %c0_218 = arith.constant 0 : index
    %621 = vector.load %arg3[%c0_217, %c0_218] : memref<2x1xf32, #tpu.memory_space<vmem>>, vector<2x1xf32>
    tpu.vector_store %arg3[%c0_217, %c0_218], %620 {strides = array<i32>} : memref<2x1xf32, #tpu.memory_space<vmem>>, vector<2x1xf32>,
    return
  }
  func.func @transform_0(%arg0: i32) -> (i32, i32) {
    %c0_i32 = arith.constant 0 : i32
    %c0_i32_0 = arith.constant 0 : i32
    %c0_i32_1 = arith.constant 0 : i32
    return %c0_i32, %c0_i32_0 : i32, i32
  }
  func.func @transform_1(%arg0: i32) -> (i32, i32) {
    %c0_i32 = arith.constant 0 : i32
    %c0_i32_0 = arith.constant 0 : i32
    %c0_i32_1 = arith.constant 0 : i32
    return %c0_i32, %c0_i32_0 : i32, i32
  }
  func.func @transform_2(%arg0: i32) -> (i32, i32) {
    %c0_i32 = arith.constant 0 : i32
    %c0_i32_0 = arith.constant 0 : i32
    %c0_i32_1 = arith.constant 0 : i32
    return %c0_i32, %c0_i32_0 : i32, i32
  }
}

</mosaic_0001>

<bundles_post_ra>
// kernel: dgcnn_forward.1
= control target key start
LH: loop header
LB: loop body
LE: loop exit
PB: predicated region body
PF: predicated region fallthrough
CT: control target
= control target key end

     0   :  { %7 = vsyncpa [#allocation3], 0  ;;  %s7978_s12 = smov [#allocation2]   ;;  %s7979_s14 = smov 128   ;;  %s12540_s0 = inlined_call_operand.vmem [shape: f32[64,5], index: 0, kind: input, shape index: {}]   ;;  %s12541_s1 = inlined_call_operand.hbm [shape: f32[840,128], index: 1, kind: input, shape index: {}]   ;;  %s12542_s2 = inlined_call_operand.vmem [shape: f32[2,1], index: 2, kind: output, shape index: {}]  }
   0x1   :  { %s14_s11 = sshll.u32 %s12541_s1, 4  ;;  %s16_s13 = sshll.u32 %s7978_s12, 4  ;;  %s15_s11 = int_to_ptr.hbm [resolvable:$true] %s14_s11  ;;  %s17_s13 = int_to_ptr.vmem [resolvable:$true] %s16_s13 }
   0x2   :  { %s7980_s15 = smov 8  }
   0x3   :  { %22 = dma.hbm_to_vmem [thread:$0]  %s15_s11, 13440, %s17_s13, [#allocation3], %s7979_s14, %s7979_s14, %s7980_s15  }
   0x4   :  { %7976 = dma.done.wait [#allocation3], 13440  }
   0x5   :  { %7977 = vsyncadd [#allocation3], 4294953856  ;;  %vm42_vm0 = vcmask 31744   ;;  %v8007_v0 = vld [vmem:[%s12540_s0 + $0x38] sm:$0xff]  ;;  %v8012_v1 = vld [vmem:[%s12540_s0 + $0x30] sm:$0xff]  ;;  %v7981_v9 = vmov 4   ;;  %v330_v19 = vlaneseq }
   0x6   :  { %7416 = vmatpush.xpose.msk.msra.mxu2 %vm42_vm0, %v8007_v0  ;;  %v204_v2 = vmul.f32 %v8007_v0, %v8007_v0  ;;  %v8021_v3 = vld [vmem:[%s12540_s0 + $0x28] sm:$0xff]  ;;  %v203_v4 = vmul.f32 %v8012_v1, %v8012_v1  ;;  %v8034_v6 = vld [vmem:[%s12540_s0 + $0x20] sm:$0xff]  ;;  %7874 = vset.pattern.permute.xlu0 %v7981_v9  ;;  %v8050_v10 = vld [vmem:[%s12540_s0 + $0x18] sm:$0xff]  ;;  %v7982_v17 = vmov 1.0   ;;  %vm67_vm1 = vcmask 1043456   ;;  %s7985_s20 = smov 64  }
   0x7   :  { %v202_v5 = vmul.f32 %v8021_v3, %v8021_v3  ;;  %v201_v7 = vmul.f32 %v8034_v6, %v8034_v6  ;;  %v8044_v8 = vld [vmem:[%s12540_s0] sm:$0xff]  ;;  %v8055_v11 = vld [vmem:[%s12540_s0 + $0x10] sm:$0xff]  ;;  %7875 = vset.pattern.permute.xlu1 %v7981_v9  ;;  %7876 = vset.pattern.permute.xlu2 %v7981_v9  ;;  %v200_v12 = vmul.f32 %v8050_v10, %v8050_v10  ;;  %v8075_v14 = vld [vmem:[%s12540_s0 + $0x8] sm:$0xff]  ;;  %v8149_v26 = vand.u32 127, %v330_v19 }
   0x8   :  { %7432 = vmatpush.xpose.msk.msra.mxu3 %vm42_vm0, %v204_v2  ;;  %290 = vperm.xlu0 %7874, %v8044_v8   ;;  %v199_v13 = vmul.f32 %v8055_v11, %v8055_v11  ;;  %v198_v15 = vmul.f32 %v8075_v14, %v8075_v14  ;;  %v197_v16 = vmul.f32 %v8044_v8, %v8044_v8  ;;  %v8111_v18 = vld [vmem:[#allocation2 + $0x10] sm:$0xf]  ;;  %v8147_v22 = vld [vmem:[#allocation2] ss:$0 sm:$0xff]  ;;  %vm372_vm3 = vcmask 523264  }
   0x9   :  { %298 = vperm.xlu1 %7875, %v8055_v11   ;;  %306 = vperm.xlu2 %7876, %v8034_v6   ;;  %v37_v56 = vld [vmem:[#allocation2 + $0x8] sm:$0xf] }
   0xa   :  { %7417 = vmatpush.xpose.msk.msra.mxu2 %vm42_vm0, %v8012_v1  ;;  %7407 = vmatpush.msk.msra.mxu1 %vm67_vm1, %v8111_v18  ;;  %v39_v57 = vsub.f32 %v37_v56, %v8111_v18 }
   0xb   :  { %7408 = vmatmul.msk.f32.vlgmr.msra.gmra.mxu1 %vm42_vm0, %v8044_v8 }
   0xc   :  { %7433 = vmatpush.xpose.msk.msra.mxu3 %vm42_vm0, %v203_v4  ;;  %7398 = vmatpush.msk.msra.mxu0 %vm67_vm1, %v39_v57 }
   0xd   :  { %7399 = vmatmul.msk.f32.vlgmr.msra.gmra.mxu0 %vm42_vm0, %v8044_v8 }
   0xe   :  { %7418 = vmatpush.xpose.msk.msra.mxu2 %vm42_vm0, %v8021_v3 }
  0x10   :  { %7434 = vmatpush.xpose.msk.msra.mxu3 %vm42_vm0, %v202_v5  ;;  %294 = vperm.xlu0 %7874, %v8075_v14  }
  0x11   :  { %302 = vperm.xlu1 %7875, %v8050_v10   ;;  %310 = vperm.xlu2 %7876, %v8021_v3  }
  0x12   :  { %7419 = vmatpush.xpose.msk.msra.mxu2 %vm42_vm0, %v8034_v6 }
  0x13   :  { %7409 = vmatmul.msk.f32.gmra.mxu1 %vm42_vm0, %v8075_v14 }
  0x14   :  { %7435 = vmatpush.xpose.msk.msra.mxu3 %vm42_vm0, %v201_v7 }
  0x15   :  { %7400 = vmatmul.msk.f32.gmra.mxu0 %vm42_vm0, %v8075_v14 }
  0x16   :  { %7420 = vmatpush.xpose.msk.msra.mxu2 %vm42_vm0, %v8050_v10 }
  0x18   :  { %7436 = vmatpush.xpose.msk.msra.mxu3 %vm42_vm0, %v200_v12 }
  0x19   :  { %314 = vperm.xlu1 %7875, %v8012_v1  }
  0x1a   :  { %7421 = vmatpush.xpose.msk.msra.mxu2 %vm42_vm0, %v8055_v11 }
  0x1b   :  { %7410 = vmatmul.msk.f32.gmra.mxu1 %vm42_vm0, %v8055_v11 }
  0x1c   :  { %7437 = vmatpush.xpose.msk.msra.mxu3 %vm42_vm0, %v199_v13 }
  0x1d   :  { %7401 = vmatmul.msk.f32.gmra.mxu0 %vm42_vm0, %v8055_v11 }
  0x1e   :  { %7422 = vmatpush.xpose.msk.msra.mxu2 %vm42_vm0, %v8075_v14 }
  0x20   :  { %7438 = vmatpush.xpose.msk.msra.mxu3 %vm42_vm0, %v198_v15 }
  0x21   :  { %318 = vperm.xlu1 %7875, %v8007_v0  }
  0x22   :  { %7423 = vmatpush.xpose.msk.msra.mxu2 %vm42_vm0, %v8044_v8 }
  0x23   :  { %7411 = vmatmul.msk.f32.gmra.mxu1 %vm42_vm0, %v8050_v10 }
  0x24   :  { %7439 = vmatpush.xpose.msk.msra.mxu3 %vm42_vm0, %v197_v16 }
  0x25   :  { %7424 = vmatmul.msk.f32.vlgmr.msra.gmra.mxu2 %vm42_vm0, %v8044_v8  ;;  %7402 = vmatmul.msk.f32.gmra.mxu0 %vm42_vm0, %v8050_v10 }
  0x27   :  { %7440 = vmatmul.msk.f32.vlgmr.msra.gmra.mxu3 %vm42_vm0, %v7982_v17 }
  0x2b   :  { %7412 = vmatmul.msk.f32.gmra.mxu1 %vm42_vm0, %v8034_v6 }
  0x2d   :  { %7425 = vmatmul.msk.f32.gmra.mxu2 %vm42_vm0, %v8075_v14  ;;  %7403 = vmatmul.msk.f32.gmra.mxu0 %vm42_vm0, %v8034_v6 }
  0x2f   :  { %7441 = vmatmul.msk.f32.gmra.mxu3 %vm42_vm0, %v7982_v17 }
  0x33   :  { %7413 = vmatmul.msk.f32.gmra.mxu1 %vm42_vm0, %v8021_v3 }
  0x35   :  { %7426 = vmatmul.msk.f32.gmra.mxu2 %vm42_vm0, %v8055_v11  ;;  %7404 = vmatmul.msk.f32.gmra.mxu0 %vm42_vm0, %v8021_v3 }
  0x37   :  { %7442 = vmatmul.msk.f32.gmra.mxu3 %vm42_vm0, %v7982_v17 }
  0x3b   :  { %7414 = vmatmul.msk.f32.gmra.mxu1 %vm42_vm0, %v8012_v1 }
  0x3d   :  { %7427 = vmatmul.msk.f32.gmra.mxu2 %vm42_vm0, %v8050_v10  ;;  %7405 = vmatmul.msk.f32.gmra.mxu0 %vm42_vm0, %v8012_v1 }
  0x3f   :  { %7443 = vmatmul.msk.f32.gmra.mxu3 %vm42_vm0, %v7982_v17 }
  0x43   :  { %7415 = vmatmul.msk.f32.gmra.mxu1 %vm42_vm0, %v8007_v0 }
  0x45   :  { %7428 = vmatmul.msk.f32.gmra.mxu2 %vm42_vm0, %v8034_v6  ;;  %7406 = vmatmul.msk.f32.gmra.mxu0 %vm42_vm0, %v8007_v0 }
  0x47   :  { %7444 = vmatmul.msk.f32.gmra.mxu3 %vm42_vm0, %v7982_v17 }
  0x4d   :  { %7429 = vmatmul.msk.f32.gmra.mxu2 %vm42_vm0, %v8021_v3  ;;  %v12549_v3 = vmov 0.0  }
  0x4f   :  { %7445 = vmatmul.msk.f32.gmra.mxu3 %vm42_vm0, %v7982_v17 }
  0x55   :  { %7430 = vmatmul.msk.f32.gmra.mxu2 %vm42_vm0, %v8012_v1 }
  0x57   :  { %7446 = vmatmul.msk.f32.gmra.mxu3 %vm42_vm0, %v7982_v17 }
  0x5d   :  { %7431 = vmatmul.msk.f32.gmra.mxu2 %vm42_vm0, %v8007_v0 }
  0x5f   :  { %7447 = vmatmul.msk.f32.gmra.mxu3 %vm42_vm0, %v7982_v17 }
  0x63   :  { %v307_v62 = vpop.permute.xlu2 %306 }
  0x64   :  { %vm326_vm7 = vcmp.eq.f32.partialorder %v307_v62, %v8147_v22 }
  0x7a   :  { %v291_v24 = vpop.permute.xlu0 %290 }
  0x7b   :  { %vm322_vm2 = vcmp.eq.f32.partialorder %v291_v24, %v8147_v22  ;;  %v299_v41 = vpop.permute.xlu1 %298 }
  0x7c   :  { %vm324_vm5 = vcmp.eq.f32.partialorder %v299_v41, %v8147_v22 }
  0x82   :  { %v295_v35 = vpop.permute.xlu0 %294 }
  0x83   :  { %vm323_vm4 = vcmp.eq.f32.partialorder %v295_v35, %v8147_v22  ;;  %v303_v53 = vpop.permute.xlu1 %302 }
  0x84   :  { %vm325_vm6 = vcmp.eq.f32.partialorder %v303_v53, %v8147_v22 }
  0x88   :  { %v8169_v54 = vpop.f32.mrf.mxu1 }
  0x90   :  { %v8181_v5 = vpop.f32.mrf.mxu1 }
  0xa8   :  { %v173_v20 = vpop.f32.mrf.mxu2 }
  0xa9   :  { %v273_v21 = vmul.f32 2.0, %v173_v20  ;;  %v311_v20 = vpop.permute.xlu2 %310 }
  0xaa   :  { %v249_v23 = vpop.f32.mrf.mxu3  ;;  %vm327_vm8 = vcmp.eq.f32.partialorder %v311_v20, %v8147_v22 }
  0xab   :  { %v281_v25 = vsub.f32 %v249_v23, %v273_v21  ;;  %v8191_v21 = vpop.f32.mrf.mxu1 }
  0xad   :  { %v340_v27 = vand.u32 4294967168, %v281_v25 }
  0xaf   :  { %v348_v28 = vor.u32 %v340_v27, %v8149_v26 }
  0xb0   :  { %v176_v29 = vpop.f32.mrf.mxu2 }
  0xb1   :  { %v274_v30 = vmul.f32 2.0, %v176_v29  ;;  %v8153_v31 = vsel %vm322_vm2, %v348_v28, 1e+30  ;;  %v315_v29 = vpop.permute.xlu1 %314 }
  0xb2   :  { %v252_v32 = vpop.f32.mrf.mxu3  ;;  %v373_v33 = vsel %vm372_vm3, %v8153_v31, inf  ;;  %vm328_vm9 = vcmp.eq.f32.partialorder %v315_v29, %v8147_v22 }
  0xb3   :  { %v282_v34 = vsub.f32 %v252_v32, %v274_v30  ;;  %374 = vmin.xlane.f32.xlu0 %v373_v33  ;;  %v8201_v33 = vpop.f32.mrf.mxu1 }
  0xb5   :  { %v341_v36 = vand.u32 4294967168, %v282_v34 }
  0xb7   :  { %v349_v37 = vor.u32 %v341_v36, %v8149_v26 }
  0xb8   :  { %v179_v38 = vpop.f32.mrf.mxu2 }
  0xb9   :  { %v275_v39 = vmul.f32 2.0, %v179_v38  ;;  %v8159_v40 = vsel %vm323_vm4, %v349_v37, 1e+30 }
  0xba   :  { %v255_v42 = vpop.f32.mrf.mxu3  ;;  %v376_v43 = vsel %vm372_vm3, %v8159_v40, inf }
  0xbb   :  { %v283_v44 = vsub.f32 %v255_v42, %v275_v39  ;;  %377 = vmin.xlane.f32.xlu2 %v376_v43  ;;  %v319_v42 = vpop.permute.xlu1 %318  ;;  %v8211_v43 = vpop.f32.mrf.mxu1 }
  0xbc   :  { %vm329_vm10 = vcmp.eq.f32.partialorder %v319_v42, %v8147_v22 }
  0xbd   :  { %v342_v45 = vand.u32 4294967168, %v283_v44 }
  0xbf   :  { %v350_v46 = vor.u32 %v342_v45, %v8149_v26 }
  0xc0   :  { %v182_v47 = vpop.f32.mrf.mxu2 }
  0xc1   :  { %v276_v48 = vmul.f32 2.0, %v182_v47  ;;  %v8165_v49 = vsel %vm324_vm5, %v350_v46, 1e+30 }
  0xc2   :  { %v258_v50 = vpop.f32.mrf.mxu3  ;;  %v379_v51 = vsel %vm372_vm3, %v8165_v49, inf }
  0xc3   :  { %v284_v52 = vsub.f32 %v258_v50, %v276_v48  ;;  %380 = vmin.xlane.f32.xlu1 %v379_v51  ;;  %v8221_v47 = vpop.f32.mrf.mxu1 }
  0xc5   :  { %v343_v55 = vand.u32 4294967168, %v284_v52 }
  0xc7   :  { %v351_v58 = vor.u32 %v343_v55, %v8149_v26 }
  0xc8   :  { %v185_v59 = vpop.f32.mrf.mxu2 }
  0xc9   :  { %v277_v60 = vmul.f32 2.0, %v185_v59  ;;  %v8175_v61 = vsel %vm325_vm6, %v351_v58, 1e+30 }
  0xca   :  { %v261_v63 = vpop.f32.mrf.mxu3  ;;  %v382_v2 = vsel %vm372_vm3, %v8175_v61, inf }
  0xcb   :  { %v285_v4 = vsub.f32 %v261_v63, %v277_v60  ;;  %383 = vmin.xlane.f32.xlu2 %v382_v2  ;;  %v8225_v48 = vpop.f32.mrf.mxu1 }
  0xcd   :  { %v344_v7 = vand.u32 4294967168, %v285_v4 }
  0xcf   :  { %v352_v12 = vor.u32 %v344_v7, %v8149_v26 }
  0xd0   :  { %v188_v13 = vpop.f32.mrf.mxu2 }
  0xd1   :  { %v278_v15 = vmul.f32 2.0, %v188_v13  ;;  %v8185_v16 = vsel %vm326_vm7, %v352_v12, 1e+30 }
  0xd2   :  { %v264_v8 = vpop.f32.mrf.mxu3  ;;  %v385_v18 = vsel %vm372_vm3, %v8185_v16, inf }
  0xd3   :  { %v286_v19 = vsub.f32 %v264_v8, %v278_v15  ;;  %386 = vmin.xlane.f32.xlu0 %v385_v18  ;;  %v8229_v22 = vpop.f32.mrf.mxu1 }
  0xd4   :  { %901 = vmatpush.msrb.mxu0 %v8229_v22  ;;  %982 = vmatpush.msrb.mxu1 %v8229_v22 }
  0xd5   :  { %v345_v23 = vand.u32 4294967168, %v286_v19  ;;  %1063 = vmatpush.msrb.mxu2 %v8229_v22  ;;  %1144 = vmatpush.msrb.mxu3 %v8229_v22 }
  0xd6   :  { %902 = vmatpush.msrb.mxu0 %v8225_v48  ;;  %983 = vmatpush.msrb.mxu1 %v8225_v48 }
  0xd7   :  { %v353_v24 = vor.u32 %v345_v23, %v8149_v26  ;;  %1064 = vmatpush.msrb.mxu2 %v8225_v48  ;;  %1145 = vmatpush.msrb.mxu3 %v8225_v48 }
  0xd8   :  { %v191_v25 = vpop.f32.mrf.mxu2  ;;  %903 = vmatpush.msrb.mxu0 %v8221_v47  ;;  %984 = vmatpush.msrb.mxu1 %v8221_v47 }
  0xd9   :  { %v279_v27 = vmul.f32 2.0, %v191_v25  ;;  %v8195_v28 = vsel %vm327_vm8, %v353_v24, 1e+30  ;;  %1065 = vmatpush.msrb.mxu2 %v8221_v47  ;;  %1146 = vmatpush.msrb.mxu3 %v8221_v47 }
  0xda   :  { %v267_v14 = vpop.f32.mrf.mxu3  ;;  %v388_v30 = vsel %vm372_vm3, %v8195_v28, inf  ;;  %904 = vmatpush.msrb.mxu0 %v8211_v43  ;;  %985 = vmatpush.msrb.mxu1 %v8211_v43 }
  0xdb   :  { %v287_v32 = vsub.f32 %v267_v14, %v279_v27  ;;  %389 = vmin.xlane.f32.xlu2 %v388_v30  ;;  %1066 = vmatpush.msrb.mxu2 %v8211_v43 }
  0xdc   :  { %905 = vmatpush.msrb.mxu0 %v8201_v33  ;;  %986 = vmatpush.msrb.mxu1 %v8201_v33 }
  0xdd   :  { %v346_v34 = vand.u32 4294967168, %v287_v32  ;;  %1067 = vmatpush.msrb.mxu2 %v8201_v33  ;;  %1147 = vmatpush.msrb.mxu3 %v8211_v43 }
  0xde   :  { %906 = vmatpush.msrb.mxu0 %v8191_v21  ;;  %987 = vmatpush.msrb.mxu1 %v8191_v21 }
  0xdf   :  { %v354_v35 = vor.u32 %v346_v34, %v8149_v26  ;;  %1068 = vmatpush.msrb.mxu2 %v8191_v21  ;;  %1148 = vmatpush.msrb.mxu3 %v8201_v33 }
  0xe0   :  { %v194_v36 = vpop.f32.mrf.mxu2  ;;  %907 = vmatpush.msrb.mxu0 %v8181_v5  ;;  %988 = vmatpush.msrb.mxu1 %v8181_v5 }
  0xe1   :  { %v280_v37 = vmul.f32 2.0, %v194_v36  ;;  %v8205_v38 = vsel %vm328_vm9, %v354_v35, 1e+30  ;;  %1069 = vmatpush.msrb.mxu2 %v8181_v5  ;;  %1149 = vmatpush.msrb.mxu3 %v8191_v21 }
  0xe2   :  { %v270_v11 = vpop.f32.mrf.mxu3  ;;  %v391_v39 = vsel %vm372_vm3, %v8205_v38, inf  ;;  %908 = vmatpush.msrb.mxu0 %v8169_v54  ;;  %989 = vmatpush.msrb.mxu1 %v8169_v54 }
  0xe3   :  { %v288_v41 = vsub.f32 %v270_v11, %v280_v37  ;;  %392 = vmin.xlane.f32.xlu2 %v391_v39  ;;  %1070 = vmatpush.msrb.mxu2 %v8169_v54 }
  0xe4   :  { %1150 = vmatpush.msrb.mxu3 %v8181_v5  ;;  %1225 = vmatpush.msra.mxu0 %v8229_v22 }
  0xe5   :  { %v347_v44 = vand.u32 4294967168, %v288_v41  ;;  %1306 = vmatpush.msra.mxu1 %v8229_v22  ;;  %1387 = vmatpush.msra.mxu2 %v8229_v22 }
  0xe6   :  { %1151 = vmatpush.msrb.mxu3 %v8169_v54  ;;  %1226 = vmatpush.msra.mxu0 %v8225_v48 }
  0xe7   :  { %v355_v45 = vor.u32 %v347_v44, %v8149_v26  ;;  %1307 = vmatpush.msra.mxu1 %v8225_v48  ;;  %1388 = vmatpush.msra.mxu2 %v8225_v48 }
  0xe8   :  { %1468 = vmatpush.msra.mxu3 %v8229_v22  ;;  %1227 = vmatpush.msra.mxu0 %v8221_v47 }
  0xe9   :  { %v8215_v46 = vsel %vm329_vm10, %v355_v45, 1e+30  ;;  %1308 = vmatpush.msra.mxu1 %v8221_v47  ;;  %1389 = vmatpush.msra.mxu2 %v8221_v47 }
  0xea   :  { %v394_v10 = vsel %vm372_vm3, %v8215_v46, inf  ;;  %1469 = vmatpush.msra.mxu3 %v8225_v48  ;;  %1228 = vmatpush.msra.mxu0 %v8211_v43 }
  0xeb   :  { %395 = vmin.xlane.f32.xlu1 %v394_v10  ;;  %1309 = vmatpush.msra.mxu1 %v8211_v43 }
  0xec   :  { %1470 = vmatpush.msra.mxu3 %v8221_v47  ;;  %1390 = vmatpush.msra.mxu2 %v8211_v43 }
  0xed   :  { %1229 = vmatpush.msra.mxu0 %v8201_v33  ;;  %1310 = vmatpush.msra.mxu1 %v8201_v33 }
  0xee   :  { %1471 = vmatpush.msra.mxu3 %v8211_v43  ;;  %1391 = vmatpush.msra.mxu2 %v8201_v33 }
  0xef   :  { %1230 = vmatpush.msra.mxu0 %v8191_v21  ;;  %1311 = vmatpush.msra.mxu1 %v8191_v21 }
  0xf0   :  { %1472 = vmatpush.msra.mxu3 %v8201_v33  ;;  %1392 = vmatpush.msra.mxu2 %v8191_v21 }
  0xf1   :  { %1231 = vmatpush.msra.mxu0 %v8181_v5  ;;  %1312 = vmatpush.msra.mxu1 %v8181_v5 }
  0xf2   :  { %1473 = vmatpush.msra.mxu3 %v8191_v21  ;;  %1393 = vmatpush.msra.mxu2 %v8181_v5 }
  0xf3   :  { %1232 = vmatpush.msra.mxu0 %v8169_v54  ;;  %1313 = vmatpush.msra.mxu1 %v8169_v54 }
  0xf4   :  { %1474 = vmatpush.msra.mxu3 %v8181_v5  ;;  %1394 = vmatpush.msra.mxu2 %v8169_v54 }
  0xf6   :  { %1475 = vmatpush.msra.mxu3 %v8169_v54 }
 0x126   :  { %v375_v0 = vpop.xlane.xlu0 %374 }
 0x127   :  { %v405_v1 = vand.u32 127, %v375_v0 }
 0x129   :  { %vm413_vm11 = vcmp.eq.s32.totalorder %v8149_v26, %v405_v1 }
 0x12a   :  { %v861_v6 = vsel %vm413_vm11, 1.0, %v12549_v3  ;;  %v8300_v50 = vsel %vm413_vm11, 1e+30, %v8153_v31 }
 0x12b   :  { %7448 = vmatmul.msk.f32.vlgmr.msrb.gmra.mxu0 %vm372_vm3, %v861_v6  ;;  %v429_v51 = vsel %vm372_vm3, %v8300_v50, inf }
 0x12c   :  { %430 = vmin.xlane.f32.xlu0 %v429_v51  ;;  %1557 = vmatpush.msrb.mxu0 %v8229_v22 }
 0x12e   :  { %v378_v52 = vpop.xlane.xlu2 %377  ;;  %1558 = vmatpush.msrb.mxu0 %v8225_v48 }
 0x12f   :  { %v406_v53 = vand.u32 127, %v378_v52 }
 0x130   :  { %1559 = vmatpush.msrb.mxu0 %v8221_v47 }
 0x131   :  { %vm414_vm12 = vcmp.eq.s32.totalorder %v8149_v26, %v406_v53 }
 0x132   :  { %v862_v55 = vsel %vm414_vm12, 1.0, %v12549_v3  ;;  %v8311_v31 = vsel %vm414_vm12, 1e+30, %v8159_v40  ;;  %1560 = vmatpush.msrb.mxu0 %v8211_v43 }
 0x133   :  { %7449 = vmatmul.msk.f32.gmra.mxu0 %vm372_vm3, %v862_v55  ;;  %v432_v56 = vsel %vm372_vm3, %v8311_v31, inf }
 0x134   :  { %433 = vmin.xlane.f32.xlu0 %v432_v56  ;;  %1561 = vmatpush.msrb.mxu0 %v8201_v33 }
 0x136   :  { %v381_v57 = vpop.xlane.xlu1 %380  ;;  %1562 = vmatpush.msrb.mxu0 %v8191_v21 }
 0x137   :  { %v407_v58 = vand.u32 127, %v381_v57 }
 0x138   :  { %1563 = vmatpush.msrb.mxu0 %v8181_v5 }
 0x139   :  { %vm415_vm13 = vcmp.eq.s32.totalorder %v8149_v26, %v407_v58 }
 0x13a   :  { %v8322_v40 = vsel %vm415_vm13, 1e+30, %v8165_v49  ;;  %1564 = vmatpush.msrb.mxu0 %v8169_v54  ;;  %v863_v60 = vsel %vm415_vm13, 1.0, %v12549_v3 }
 0x13b   :  { %v435_v59 = vsel %vm372_vm3, %v8322_v40, inf  ;;  %7450 = vmatmul.msk.f32.gmra.mxu0 %vm372_vm3, %v863_v60 }
 0x13c   :  { %436 = vmin.xlane.f32.xlu2 %v435_v59 }
 0x13e   :  { %v384_v62 = vpop.xlane.xlu2 %383 }
 0x13f   :  { %v408_v63 = vand.u32 127, %v384_v62 }
 0x141   :  { %vm416_vm14 = vcmp.eq.s32.totalorder %v8149_v26, %v408_v63 }
 0x142   :  { %v8331_v2 = vsel %vm416_vm14, 1e+30, %v8175_v61  ;;  %v864_v49 = vsel %vm416_vm14, 1.0, %v12549_v3 }
 0x143   :  { %v438_v54 = vsel %vm372_vm3, %v8331_v2, inf  ;;  %7451 = vmatmul.msk.f32.gmra.mxu0 %vm372_vm3, %v864_v49 }
 0x144   :  { %439 = vmin.xlane.f32.xlu0 %v438_v54 }
 0x146   :  { %v387_v4 = vpop.xlane.xlu0 %386 }
 0x147   :  { %v409_v5 = vand.u32 127, %v387_v4 }
 0x149   :  { %vm417_vm15 = vcmp.eq.s32.totalorder %v8149_v26, %v409_v5 }
 0x14a   :  { %v8339_v7 = vsel %vm417_vm15, 1e+30, %v8185_v16  ;;  %v865_v12 = vsel %vm417_vm15, 1.0, %v12549_v3 }
 0x14b   :  { %v441_v61 = vsel %vm372_vm3, %v8339_v7, inf  ;;  %7452 = vmatmul.msk.f32.gmra.mxu0 %vm372_vm3, %v865_v12 }
 0x14c   :  { %442 = vmin.xlane.f32.xlu1 %v441_v61 }
 0x14e   :  { %v390_v13 = vpop.xlane.xlu2 %389 }
 0x14f   :  { %v410_v15 = vand.u32 127, %v390_v13 }
 0x151   :  { %vm418_vm2 = vcmp.eq.s32.totalorder %v8149_v26, %v410_v15 }
 0x152   :  { %v8347_v8 = vsel %vm418_vm2, 1e+30, %v8195_v28  ;;  %v866_v18 = vsel %vm418_vm2, 1.0, %v12549_v3 }
 0x153   :  { %v444_v16 = vsel %vm372_vm3, %v8347_v8, inf  ;;  %7453 = vmatmul.msk.f32.gmra.mxu0 %vm372_vm3, %v866_v18 }
 0x154   :  { %445 = vmin.xlane.f32.xlu2 %v444_v16 }
 0x156   :  { %v393_v19 = vpop.xlane.xlu2 %392 }
 0x157   :  { %v411_v20 = vand.u32 127, %v393_v19 }
 0x159   :  { %vm419_vm4 = vcmp.eq.s32.totalorder %v8149_v26, %v411_v20 }
 0x15a   :  { %v8355_v21 = vsel %vm419_vm4, 1e+30, %v8205_v38  ;;  %v867_v23 = vsel %vm419_vm4, 1.0, %v12549_v3 }
 0x15b   :  { %v447_v24 = vsel %vm372_vm3, %v8355_v21, inf  ;;  %7454 = vmatmul.msk.f32.gmra.mxu0 %vm372_vm3, %v867_v23 }
 0x15c   :  { %448 = vmin.xlane.f32.xlu1 %v447_v24 }
 0x15e   :  { %v396_v25 = vpop.xlane.xlu1 %395 }
 0x15f   :  { %v412_v27 = vand.u32 127, %v396_v25 }
 0x161   :  { %vm420_vm5 = vcmp.eq.s32.totalorder %v8149_v26, %v412_v27 }
 0x162   :  { %v868_v28 = vsel %vm420_vm5, 1.0, %v12549_v3  ;;  %v8370_v36 = vsel %vm420_vm5, 1e+30, %v8215_v46 }
 0x163   :  { %7455 = vmatmul.msk.f32.gmra.mxu0 %vm372_vm3, %v868_v28  ;;  %v450_v39 = vsel %vm372_vm3, %v8370_v36, inf }
 0x19f   :  { %v431_v29 = vpop.xlane.xlu0 %430 }
 0x1a0   :  { %v461_v14 = vand.u32 127, %v431_v29 }
 0x1a2   :  { %vm469_vm6 = vcmp.eq.s32.totalorder %v8149_v26, %v461_v14 }
 0x1a3   :  { %v942_v30 = vsel %vm469_vm6, 1.0, %v12549_v3  ;;  %v477_v32 = vsel %vm469_vm6, 1e+30, %v8300_v50 }
 0x1a4   :  { %7456 = vmatmul.msk.f32.vlgmr.msrb.gmra.mxu1 %vm372_vm3, %v942_v30  ;;  %v485_v33 = vsel %vm372_vm3, %v477_v32, inf }
 0x1a5   :  { %486 = vmin.xlane.f32.xlu0 %v485_v33 }
 0x1a7   :  { %v434_v34 = vpop.xlane.xlu0 %433 }
 0x1a8   :  { %v462_v35 = vand.u32 127, %v434_v34 }
 0x1aa   :  { %vm470_vm7 = vcmp.eq.s32.totalorder %v8149_v26, %v462_v35 }
 0x1ab   :  { %v943_v37 = vsel %vm470_vm7, 1.0, %v12549_v3  ;;  %v478_v38 = vsel %vm470_vm7, 1e+30, %v8311_v31 }
 0x1ac   :  { %7457 = vmatmul.msk.f32.gmra.mxu1 %vm372_vm3, %v943_v37  ;;  %v488_v11 = vsel %vm372_vm3, %v478_v38, inf }
 0x1ad   :  { %489 = vmin.xlane.f32.xlu2 %v488_v11  ;;  %451 = vmin.xlane.f32.xlu0 %v450_v39 }
 0x1af   :  { %v437_v41 = vpop.xlane.xlu2 %436 }
 0x1b0   :  { %v463_v42 = vand.u32 127, %v437_v41 }
 0x1b2   :  { %vm471_vm8 = vcmp.eq.s32.totalorder %v8149_v26, %v463_v42 }
 0x1b3   :  { %v944_v43 = vsel %vm471_vm8, 1.0, %v12549_v3  ;;  %v8382_v44 = vsel %vm471_vm8, 1e+30, %v8322_v40 }
 0x1b4   :  { %7458 = vmatmul.msk.f32.gmra.mxu1 %vm372_vm3, %v944_v43  ;;  %v491_v45 = vsel %vm372_vm3, %v8382_v44, inf }
 0x1b5   :  { %492 = vmin.xlane.f32.xlu1 %v491_v45 }
 0x1b7   :  { %v440_v46 = vpop.xlane.xlu0 %439 }
 0x1b8   :  { %v464_v10 = vand.u32 127, %v440_v46 }
 0x1ba   :  { %vm472_vm9 = vcmp.eq.s32.totalorder %v8149_v26, %v464_v10 }
 0x1bb   :  { %v945_v47 = vsel %vm472_vm9, 1.0, %v12549_v3  ;;  %v8390_v48 = vsel %vm472_vm9, 1e+30, %v8331_v2 }
 0x1bc   :  { %7459 = vmatmul.msk.f32.gmra.mxu1 %vm372_vm3, %v945_v47  ;;  %v494_v22 = vsel %vm372_vm3, %v8390_v48, inf }
 0x1bd   :  { %495 = vmin.xlane.f32.xlu2 %v494_v22 }
 0x1bf   :  { %v443_v0 = vpop.xlane.xlu1 %442 }
 0x1c0   :  { %v465_v1 = vand.u32 127, %v443_v0 }
 0x1c2   :  { %vm473_vm10 = vcmp.eq.s32.totalorder %v8149_v26, %v465_v1 }
 0x1c3   :  { %v946_v6 = vsel %vm473_vm10, 1.0, %v12549_v3  ;;  %v8398_v50 = vsel %vm473_vm10, 1e+30, %v8339_v7 }
 0x1c4   :  { %7460 = vmatmul.msk.f32.gmra.mxu1 %vm372_vm3, %v946_v6  ;;  %v497_v51 = vsel %vm372_vm3, %v8398_v50, inf }
 0x1c5   :  { %498 = vmin.xlane.f32.xlu0 %v497_v51 }
 0x1c7   :  { %v446_v52 = vpop.xlane.xlu2 %445 }
 0x1c8   :  { %v466_v53 = vand.u32 127, %v446_v52 }
 0x1ca   :  { %vm474_vm11 = vcmp.eq.s32.totalorder %v8149_v26, %v466_v53 }
 0x1cb   :  { %v947_v55 = vsel %vm474_vm11, 1.0, %v12549_v3  ;;  %v8406_v31 = vsel %vm474_vm11, 1e+30, %v8347_v8 }
 0x1cc   :  { %7461 = vmatmul.msk.f32.gmra.mxu1 %vm372_vm3, %v947_v55  ;;  %v500_v56 = vsel %vm372_vm3, %v8406_v31, inf }
 0x1cd   :  { %501 = vmin.xlane.f32.xlu1 %v500_v56 }
 0x1cf   :  { %v449_v57 = vpop.xlane.xlu1 %448 }
 0x1d0   :  { %v467_v58 = vand.u32 127, %v449_v57 }
 0x1d2   :  { %vm475_vm12 = vcmp.eq.s32.totalorder %v8149_v26, %v467_v58 }
 0x1d3   :  { %v948_v40 = vsel %vm475_vm12, 1.0, %v12549_v3  ;;  %v8414_v59 = vsel %vm475_vm12, 1e+30, %v8355_v21 }
 0x1d4   :  { %7462 = vmatmul.msk.f32.gmra.mxu1 %vm372_vm3, %v948_v40  ;;  %v503_v60 = vsel %vm372_vm3, %v8414_v59, inf }
 0x1d5   :  { %504 = vmin.xlane.f32.xlu0 %v503_v60 }
 0x218   :  { %v487_v62 = vpop.xlane.xlu0 %486 }
 0x219   :  { %v517_v63 = vand.u32 127, %v487_v62 }
 0x21b   :  { %vm525_vm13 = vcmp.eq.s32.totalorder %v8149_v26, %v517_v63 }
 0x21c   :  { %v1023_v2 = vsel %vm525_vm13, 1.0, %v12549_v3  ;;  %v8421_v49 = vsel %vm525_vm13, 1e+30, %v477_v32 }
 0x21d   :  { %7464 = vmatmul.msk.f32.vlgmr.msrb.gmra.mxu2 %vm372_vm3, %v1023_v2  ;;  %v541_v54 = vsel %vm372_vm3, %v8421_v49, inf }
 0x21e   :  { %542 = vmin.xlane.f32.xlu2 %v541_v54 }
 0x220   :  { %v490_v4 = vpop.xlane.xlu2 %489  ;;  %v452_v5 = vpop.xlane.xlu0 %451 }
 0x221   :  { %v518_v7 = vand.u32 127, %v490_v4  ;;  %v468_v12 = vand.u32 127, %v452_v5 }
 0x223   :  { %vm476_vm14 = vcmp.eq.s32.totalorder %v8149_v26, %v468_v12  ;;  %vm526_vm15 = vcmp.eq.s32.totalorder %v8149_v26, %v518_v7 }
 0x224   :  { %v949_v61 = vsel %vm476_vm14, 1.0, %v12549_v3  ;;  %v1024_v13 = vsel %vm526_vm15, 1.0, %v12549_v3  ;;  %v8430_v15 = vsel %vm526_vm15, 1e+30, %v478_v38  ;;  %v484_v18 = vsel %vm476_vm14, 1e+30, %v8370_v36 }
 0x225   :  { %7463 = vmatmul.msk.f32.gmra.mxu1 %vm372_vm3, %v949_v61  ;;  %7465 = vmatmul.msk.f32.gmra.mxu2 %vm372_vm3, %v1024_v13  ;;  %v544_v8 = vsel %vm372_vm3, %v8430_v15, inf  ;;  %v506_v16 = vsel %vm372_vm3, %v484_v18, inf }
 0x226   :  { %545 = vmin.xlane.f32.xlu1 %v544_v8  ;;  %507 = vmin.xlane.f32.xlu2 %v506_v16 }
 0x228   :  { %v493_v19 = vpop.xlane.xlu1 %492 }
 0x229   :  { %v519_v20 = vand.u32 127, %v493_v19 }
 0x22b   :  { %vm527_vm2 = vcmp.eq.s32.totalorder %v8149_v26, %v519_v20 }
 0x22c   :  { %v1025_v21 = vsel %vm527_vm2, 1.0, %v12549_v3  ;;  %v8441_v23 = vsel %vm527_vm2, 1e+30, %v8382_v44 }
 0x22d   :  { %7466 = vmatmul.msk.f32.gmra.mxu2 %vm372_vm3, %v1025_v21  ;;  %v547_v24 = vsel %vm372_vm3, %v8441_v23, inf }
 0x22e   :  { %548 = vmin.xlane.f32.xlu0 %v547_v24 }
 0x230   :  { %v496_v25 = vpop.xlane.xlu2 %495 }
 0x231   :  { %v520_v27 = vand.u32 127, %v496_v25 }
 0x233   :  { %vm528_vm4 = vcmp.eq.s32.totalorder %v8149_v26, %v520_v27 }
 0x234   :  { %v1026_v28 = vsel %vm528_vm4, 1.0, %v12549_v3  ;;  %v8449_v29 = vsel %vm528_vm4, 1e+30, %v8390_v48 }
 0x235   :  { %7467 = vmatmul.msk.f32.gmra.mxu2 %vm372_vm3, %v1026_v28  ;;  %v550_v14 = vsel %vm372_vm3, %v8449_v29, inf }
 0x236   :  { %551 = vmin.xlane.f32.xlu1 %v550_v14 }
 0x238   :  { %v499_v30 = vpop.xlane.xlu0 %498 }
 0x239   :  { %v521_v32 = vand.u32 127, %v499_v30 }
 0x23b   :  { %vm529_vm5 = vcmp.eq.s32.totalorder %v8149_v26, %v521_v32 }
 0x23c   :  { %v1027_v33 = vsel %vm529_vm5, 1.0, %v12549_v3  ;;  %v8457_v34 = vsel %vm529_vm5, 1e+30, %v8398_v50 }
 0x23d   :  { %7468 = vmatmul.msk.f32.gmra.mxu2 %vm372_vm3, %v1027_v33  ;;  %v553_v35 = vsel %vm372_vm3, %v8457_v34, inf }
 0x23e   :  { %554 = vmin.xlane.f32.xlu2 %v553_v35 }
 0x240   :  { %v502_v36 = vpop.xlane.xlu1 %501 }
 0x241   :  { %v522_v37 = vand.u32 127, %v502_v36 }
 0x243   :  { %vm530_vm6 = vcmp.eq.s32.totalorder %v8149_v26, %v522_v37 }
 0x244   :  { %v1028_v38 = vsel %vm530_vm6, 1.0, %v12549_v3  ;;  %v8465_v11 = vsel %vm530_vm6, 1e+30, %v8406_v31 }
 0x245   :  { %7469 = vmatmul.msk.f32.gmra.mxu2 %vm372_vm3, %v1028_v38  ;;  %v556_v39 = vsel %vm372_vm3, %v8465_v11, inf }
 0x246   :  { %557 = vmin.xlane.f32.xlu0 %v556_v39 }
 0x248   :  { %v505_v41 = vpop.xlane.xlu0 %504 }
 0x249   :  { %v523_v42 = vand.u32 127, %v505_v41 }
 0x24b   :  { %vm531_vm7 = vcmp.eq.s32.totalorder %v8149_v26, %v523_v42 }
 0x24c   :  { %v1029_v43 = vsel %vm531_vm7, 1.0, %v12549_v3  ;;  %v8473_v44 = vsel %vm531_vm7, 1e+30, %v8414_v59 }
 0x24d   :  { %7470 = vmatmul.msk.f32.gmra.mxu2 %vm372_vm3, %v1029_v43  ;;  %v559_v45 = vsel %vm372_vm3, %v8473_v44, inf }
 0x24e   :  { %560 = vmin.xlane.f32.xlu2 %v559_v45 }
 0x291   :  { %v543_v46 = vpop.xlane.xlu2 %542 }
 0x292   :  { %v573_v10 = vand.u32 127, %v543_v46 }
 0x294   :  { %vm581_vm8 = vcmp.eq.s32.totalorder %v8149_v26, %v573_v10 }
 0x295   :  { %v1104_v47 = vsel %vm581_vm8, 1.0, %v12549_v3  ;;  %v8481_v48 = vsel %vm581_vm8, 1e+30, %v8421_v49 }
 0x296   :  { %7472 = vmatmul.msk.f32.vlgmr.msrb.gmra.mxu3 %vm372_vm3, %v1104_v47  ;;  %v597_v22 = vsel %vm372_vm3, %v8481_v48, inf }
 0x297   :  { %598 = vmin.xlane.f32.xlu1 %v597_v22 }
 0x299   :  { %v546_v0 = vpop.xlane.xlu1 %545  ;;  %v508_v1 = vpop.xlane.xlu2 %507 }
 0x29a   :  { %v574_v6 = vand.u32 127, %v546_v0  ;;  %v524_v50 = vand.u32 127, %v508_v1 }
 0x29c   :  { %vm582_vm9 = vcmp.eq.s32.totalorder %v8149_v26, %v574_v6  ;;  %vm532_vm10 = vcmp.eq.s32.totalorder %v8149_v26, %v524_v50 }
 0x29d   :  { %v1105_v51 = vsel %vm582_vm9, 1.0, %v12549_v3  ;;  %v8490_v52 = vsel %vm582_vm9, 1e+30, %v8430_v15  ;;  %v1030_v53 = vsel %vm532_vm10, 1.0, %v12549_v3  ;;  %v8494_v55 = vsel %vm532_vm10, 1e+30, %v484_v18 }
 0x29e   :  { %7473 = vmatmul.msk.f32.gmra.mxu3 %vm372_vm3, %v1105_v51  ;;  %v600_v31 = vsel %vm372_vm3, %v8490_v52, inf  ;;  %7471 = vmatmul.msk.f32.gmra.mxu2 %vm372_vm3, %v1030_v53  ;;  %v562_v56 = vsel %vm372_vm3, %v8494_v55, inf }
 0x29f   :  { %601 = vmin.xlane.f32.xlu0 %v600_v31  ;;  %563 = vmin.xlane.f32.xlu1 %v562_v56 }
 0x2a1   :  { %v549_v57 = vpop.xlane.xlu0 %548 }
 0x2a2   :  { %v575_v58 = vand.u32 127, %v549_v57 }
 0x2a4   :  { %vm583_vm11 = vcmp.eq.s32.totalorder %v8149_v26, %v575_v58 }
 0x2a5   :  { %v1106_v40 = vsel %vm583_vm11, 1.0, %v12549_v3  ;;  %v8504_v59 = vsel %vm583_vm11, 1e+30, %v8441_v23 }
 0x2a6   :  { %7474 = vmatmul.msk.f32.gmra.mxu3 %vm372_vm3, %v1106_v40  ;;  %v603_v60 = vsel %vm372_vm3, %v8504_v59, inf }
 0x2a7   :  { %604 = vmin.xlane.f32.xlu2 %v603_v60 }
 0x2a9   :  { %v552_v62 = vpop.xlane.xlu1 %551 }
 0x2aa   :  { %v576_v63 = vand.u32 127, %v552_v62 }
 0x2ac   :  { %vm584_vm12 = vcmp.eq.s32.totalorder %v8149_v26, %v576_v63 }
 0x2ad   :  { %v1107_v2 = vsel %vm584_vm12, 1.0, %v12549_v3  ;;  %v8512_v49 = vsel %vm584_vm12, 1e+30, %v8449_v29 }
 0x2ae   :  { %7475 = vmatmul.msk.f32.gmra.mxu3 %vm372_vm3, %v1107_v2  ;;  %v606_v54 = vsel %vm372_vm3, %v8512_v49, inf }
 0x2af   :  { %607 = vmin.xlane.f32.xlu0 %v606_v54 }
 0x2b1   :  { %v555_v4 = vpop.xlane.xlu2 %554 }
 0x2b2   :  { %v577_v5 = vand.u32 127, %v555_v4 }
 0x2b4   :  { %vm585_vm13 = vcmp.eq.s32.totalorder %v8149_v26, %v577_v5 }
 0x2b5   :  { %v1108_v7 = vsel %vm585_vm13, 1.0, %v12549_v3  ;;  %v8520_v12 = vsel %vm585_vm13, 1e+30, %v8457_v34 }
 0x2b6   :  { %7476 = vmatmul.msk.f32.gmra.mxu3 %vm372_vm3, %v1108_v7  ;;  %v609_v61 = vsel %vm372_vm3, %v8520_v12, inf }
 0x2b7   :  { %610 = vmin.xlane.f32.xlu1 %v609_v61 }
 0x2b9   :  { %v558_v13 = vpop.xlane.xlu0 %557 }
 0x2ba   :  { %v578_v15 = vand.u32 127, %v558_v13 }
 0x2bc   :  { %vm586_vm14 = vcmp.eq.s32.totalorder %v8149_v26, %v578_v15 }
 0x2bd   :  { %v1109_v8 = vsel %vm586_vm14, 1.0, %v12549_v3  ;;  %v8528_v18 = vsel %vm586_vm14, 1e+30, %v8465_v11 }
 0x2be   :  { %7477 = vmatmul.msk.f32.gmra.mxu3 %vm372_vm3, %v1109_v8  ;;  %v612_v16 = vsel %vm372_vm3, %v8528_v18, inf }
 0x2bf   :  { %613 = vmin.xlane.f32.xlu2 %v612_v16 }
 0x2c1   :  { %v561_v19 = vpop.xlane.xlu2 %560 }
 0x2c2   :  { %v579_v20 = vand.u32 127, %v561_v19 }
 0x2c4   :  { %vm587_vm15 = vcmp.eq.s32.totalorder %v8149_v26, %v579_v20 }
 0x2c5   :  { %v1110_v21 = vsel %vm587_vm15, 1.0, %v12549_v3  ;;  %v8536_v23 = vsel %vm587_vm15, 1e+30, %v8473_v44 }
 0x2c6   :  { %7478 = vmatmul.msk.f32.gmra.mxu3 %vm372_vm3, %v1110_v21  ;;  %v615_v24 = vsel %vm372_vm3, %v8536_v23, inf }
 0x2c7   :  { %616 = vmin.xlane.f32.xlu1 %v615_v24 }
 0x30a   :  { %v599_v25 = vpop.xlane.xlu1 %598 }
 0x30b   :  { %v629_v27 = vand.u32 127, %v599_v25 }
 0x30d   :  { %vm637_vm2 = vcmp.eq.s32.totalorder %v8149_v26, %v629_v27 }
 0x30e   :  { %v1185_v28 = vsel %vm637_vm2, 1.0, %v12549_v3  ;;  %v8544_v29 = vsel %vm637_vm2, 1e+30, %v8481_v48 }
 0x30f   :  { %7480 = vmatmul.msk.f32.vlgmr.msra.gmra.mxu0 %vm372_vm3, %v1185_v28  ;;  %v653_v14 = vsel %vm372_vm3, %v8544_v29, inf  ;;  %v8637_v28 = vpop.f32.mrf.mxu0 }
 0x310   :  { %654 = vmin.xlane.f32.xlu0 %v653_v14 }
 0x312   :  { %v602_v30 = vpop.xlane.xlu0 %601  ;;  %v564_v33 = vpop.xlane.xlu1 %563 }
 0x313   :  { %v630_v32 = vand.u32 127, %v602_v30  ;;  %v580_v34 = vand.u32 127, %v564_v33  ;;  %v1613_v33 = vld [vmem:[#allocation2 + $0x98] sm:$0xff] }
 0x315   :  { %vm638_vm4 = vcmp.eq.s32.totalorder %v8149_v26, %v630_v32  ;;  %vm588_vm5 = vcmp.eq.s32.totalorder %v8149_v26, %v580_v34  ;;  %v1612_v32 = vld [vmem:[#allocation2 + $0x90] sm:$0xff] }
 0x316   :  { %v1186_v35 = vsel %vm638_vm4, 1.0, %v12549_v3  ;;  %v8553_v36 = vsel %vm638_vm4, 1e+30, %v8490_v52  ;;  %v1111_v37 = vsel %vm588_vm5, 1.0, %v12549_v3  ;;  %v8560_v11 = vsel %vm588_vm5, 1e+30, %v8494_v55 }
 0x317   :  { %7481 = vmatmul.msk.f32.gmra.mxu0 %vm372_vm3, %v1186_v35  ;;  %v656_v38 = vsel %vm372_vm3, %v8553_v36, inf  ;;  %7479 = vmatmul.msk.f32.gmra.mxu3 %vm372_vm3, %v1111_v37  ;;  %v618_v39 = vsel %vm372_vm3, %v8560_v11, inf  ;;  %v1819_v34 = vpack.c.bf16 %v1613_v33, %v1612_v32  ;;  %v1610_v35 = vld [vmem:[#allocation2 + $0x80] sm:$0xff] }
 0x318   :  { %657 = vmin.xlane.f32.xlu2 %v656_v38  ;;  %619 = vmin.xlane.f32.xlu0 %v618_v39  ;;  %v1608_v39 = vld [vmem:[#allocation2 + $0x70] sm:$0xff] }
 0x319   :  { %1821 = vmatpush.bf16.msrb.mxu1 %v1819_v34 }
 0x31a   :  { %v605_v41 = vpop.xlane.xlu2 %604 }
 0x31b   :  { %v631_v42 = vand.u32 127, %v605_v41  ;;  %v1609_v41 = vld [vmem:[#allocation2 + $0x78] sm:$0xff] }
 0x31d   :  { %vm639_vm6 = vcmp.eq.s32.totalorder %v8149_v26, %v631_v42  ;;  %v91_v42 = vpop.f32.mrf.mxu0 }
 0x31e   :  { %v1187_v43 = vsel %vm639_vm6, 1.0, %v12549_v3  ;;  %v8568_v44 = vsel %vm639_vm6, 1e+30, %v8504_v59 }
 0x31f   :  { %7482 = vmatmul.msk.f32.gmra.mxu0 %vm372_vm3, %v1187_v43  ;;  %v659_v45 = vsel %vm372_vm3, %v8568_v44, inf }
 0x320   :  { %660 = vmin.xlane.f32.xlu1 %v659_v45 }
 0x322   :  { %v608_v46 = vpop.xlane.xlu0 %607 }
 0x323   :  { %v632_v10 = vand.u32 127, %v608_v46  ;;  %v1817_v46 = vpack.c.bf16 %v1609_v41, %v1608_v39 }
 0x325   :  { %vm640_vm7 = vcmp.eq.s32.totalorder %v8149_v26, %v632_v10 }
 0x326   :  { %v1188_v47 = vsel %vm640_vm7, 1.0, %v12549_v3  ;;  %v8576_v48 = vsel %vm640_vm7, 1e+30, %v8512_v49 }
 0x327   :  { %7483 = vmatmul.msk.f32.gmra.mxu0 %vm372_vm3, %v1188_v47  ;;  %v662_v22 = vsel %vm372_vm3, %v8576_v48, inf }
 0x328   :  { %663 = vmin.xlane.f32.xlu2 %v662_v22 }
 0x32a   :  { %v611_v0 = vpop.xlane.xlu1 %610 }
 0x32b   :  { %v633_v1 = vand.u32 127, %v611_v0 }
 0x32d   :  { %vm641_vm8 = vcmp.eq.s32.totalorder %v8149_v26, %v633_v1  ;;  %v8663_v1 = vpop.f32.mrf.mxu0 }
 0x32e   :  { %v1189_v6 = vsel %vm641_vm8, 1.0, %v12549_v3  ;;  %v8584_v50 = vsel %vm641_vm8, 1e+30, %v8520_v12 }
 0x32f   :  { %7484 = vmatmul.msk.f32.gmra.mxu0 %vm372_vm3, %v1189_v6  ;;  %v665_v51 = vsel %vm372_vm3, %v8584_v50, inf }
 0x330   :  { %666 = vmin.xlane.f32.xlu0 %v665_v51 }
 0x332   :  { %v614_v52 = vpop.xlane.xlu2 %613 }
 0x333   :  { %v634_v53 = vand.u32 127, %v614_v52 }
 0x335   :  { %vm642_vm9 = vcmp.eq.s32.totalorder %v8149_v26, %v634_v53 }
 0x336   :  { %v1190_v55 = vsel %vm642_vm9, 1.0, %v12549_v3  ;;  %v8592_v31 = vsel %vm642_vm9, 1e+30, %v8528_v18 }
 0x337   :  { %7485 = vmatmul.msk.f32.gmra.mxu0 %vm372_vm3, %v1190_v55  ;;  %v668_v56 = vsel %vm372_vm3, %v8592_v31, inf  ;;  %v8673_v55 = vpop.f32.mrf.mxu0 }
 0x338   :  { %669 = vmin.xlane.f32.xlu1 %v668_v56 }
 0x33a   :  { %v617_v57 = vpop.xlane.xlu1 %616 }
 0x33b   :  { %v635_v58 = vand.u32 127, %v617_v57 }
 0x33d   :  { %vm643_vm10 = vcmp.eq.s32.totalorder %v8149_v26, %v635_v58  ;;  %v1606_v58 = vld [vmem:[#allocation2 + $0x60] sm:$0xff] }
 0x33e   :  { %v1191_v40 = vsel %vm643_vm10, 1.0, %v12549_v3  ;;  %v8600_v59 = vsel %vm643_vm10, 1e+30, %v8536_v23 }
 0x33f   :  { %7486 = vmatmul.msk.f32.gmra.mxu0 %vm372_vm3, %v1191_v40  ;;  %v671_v60 = vsel %vm372_vm3, %v8600_v59, inf  ;;  %v1607_v40 = vld [vmem:[#allocation2 + $0x68] sm:$0xff] }
 0x340   :  { %672 = vmin.xlane.f32.xlu2 %v671_v60  ;;  %v1816_v60 = vpack.c.bf16 %v1607_v40, %v1606_v58 }
 0x383   :  { %v655_v62 = vpop.xlane.xlu0 %654 }
 0x384   :  { %v685_v63 = vand.u32 127, %v655_v62  ;;  %v1605_v62 = vld [vmem:[#allocation2 + $0x58] sm:$0xff] }
 0x386   :  { %vm693_vm11 = vcmp.eq.s32.totalorder %v8149_v26, %v685_v63 }
 0x387   :  { %v1266_v2 = vsel %vm693_vm11, 1.0, %v12549_v3  ;;  %v8608_v49 = vsel %vm693_vm11, 1e+30, %v8544_v29 }
 0x388   :  { %7488 = vmatmul.msk.f32.vlgmr.msra.gmra.mxu1 %vm372_vm3, %v1266_v2  ;;  %v709_v54 = vsel %vm372_vm3, %v8608_v49, inf }
 0x389   :  { %710 = vmin.xlane.f32.xlu1 %v709_v54  ;;  %v1602_v54 = vld [vmem:[#allocation2 + $0x40] sm:$0xff] }
 0x38b   :  { %v658_v4 = vpop.xlane.xlu2 %657  ;;  %v620_v7 = vpop.xlane.xlu0 %619 }
 0x38c   :  { %v686_v5 = vand.u32 127, %v658_v4  ;;  %v636_v12 = vand.u32 127, %v620_v7  ;;  %v1603_v4 = vld [vmem:[#allocation2 + $0x48] sm:$0xff]  ;;  %v1600_v7 = vld [vmem:[#allocation2 + $0x30] sm:$0xff] }
 0x38e   :  { %vm694_vm12 = vcmp.eq.s32.totalorder %v8149_v26, %v686_v5  ;;  %vm644_vm13 = vcmp.eq.s32.totalorder %v8149_v26, %v636_v12  ;;  %v1814_v5 = vpack.c.bf16 %v1603_v4, %v1602_v54  ;;  %v1601_v12 = vld [vmem:[#allocation2 + $0x38] sm:$0xff] }
 0x38f   :  { %v1267_v61 = vsel %vm694_vm12, 1.0, %v12549_v3  ;;  %v8617_v13 = vsel %vm694_vm12, 1e+30, %v8553_v36  ;;  %v1192_v15 = vsel %vm644_vm13, 1.0, %v12549_v3  ;;  %v8622_v8 = vsel %vm644_vm13, 1e+30, %v8560_v11 }
 0x390   :  { %7489 = vmatmul.msk.f32.gmra.mxu1 %vm372_vm3, %v1267_v61  ;;  %v712_v18 = vsel %vm372_vm3, %v8617_v13, inf  ;;  %7487 = vmatmul.msk.f32.gmra.mxu0 %vm372_vm3, %v1192_v15  ;;  %v674_v16 = vsel %vm372_vm3, %v8622_v8, inf  ;;  %v1611_v36 = vld [vmem:[#allocation2 + $0x88] sm:$0xff]  ;;  %v1813_v61 = vpack.c.bf16 %v1601_v12, %v1600_v7  ;;  %v1598_v15 = vld [vmem:[#allocation2 + $0x20] sm:$0xff] }
 0x391   :  { %713 = vmin.xlane.f32.xlu2 %v712_v18  ;;  %675 = vmin.xlane.f32.xlu0 %v674_v16  ;;  %v1818_v11 = vpack.c.bf16 %v1611_v36, %v1610_v35  ;;  %v1599_v18 = vld [vmem:[#allocation2 + $0x28] sm:$0xff] }
 0x393   :  { %v661_v19 = vpop.xlane.xlu1 %660  ;;  %1822 = vmatpush.bf16.msrb.mxu1 %v1818_v11 }
 0x394   :  { %v687_v20 = vand.u32 127, %v661_v19  ;;  %v1812_v19 = vpack.c.bf16 %v1599_v18, %v1598_v15 }
 0x396   :  { %vm695_vm14 = vcmp.eq.s32.totalorder %v8149_v26, %v687_v20 }
 0x397   :  { %v1268_v21 = vsel %vm695_vm14, 1.0, %v12549_v3  ;;  %v8632_v23 = vsel %vm695_vm14, 1e+30, %v8568_v44  ;;  %1823 = vmatpush.bf16.msrb.mxu1 %v1817_v46 }
 0x398   :  { %7490 = vmatmul.msk.f32.gmra.mxu1 %vm372_vm3, %v1268_v21  ;;  %v715_v24 = vsel %vm372_vm3, %v8632_v23, inf  ;;  %v8683_v21 = vpop.f32.mrf.mxu1 }
 0x399   :  { %716 = vmin.xlane.f32.xlu0 %v715_v24 }
 0x39b   :  { %v664_v25 = vpop.xlane.xlu2 %663  ;;  %1824 = vmatpush.bf16.msrb.mxu1 %v1816_v60 }
 0x39c   :  { %v688_v27 = vand.u32 127, %v664_v25 }
 0x39e   :  { %vm696_vm15 = vcmp.eq.s32.totalorder %v8149_v26, %v688_v27  ;;  %v8685_v27 = vld [vmem:[#allocation2 + $0x18] ss:$0 sm:$0xff] }
 0x39f   :  { %v1269_v29 = vsel %vm696_vm15, 1.0, %v12549_v3  ;;  %v8642_v14 = vsel %vm696_vm15, 1e+30, %v8576_v48  ;;  %v8702_v36 = vadd.f32 %v8685_v27, %v8637_v28  ;;  %v8730_v58 = vadd.f32 %v8685_v27, %v8673_v55 }
 0x3a0   :  { %7491 = vmatmul.msk.f32.gmra.mxu1 %vm372_vm3, %v1269_v29  ;;  %v718_v30 = vsel %vm372_vm3, %v8642_v14, inf  ;;  %v8695_v34 = vpop.f32.mrf.mxu1 }
 0x3a1   :  { %719 = vmin.xlane.f32.xlu1 %v718_v30  ;;  %v8689_v30 = vadd.f32 %v8685_v27, %v91_v42 }
 0x3a3   :  { %v667_v37 = vpop.xlane.xlu0 %666 }
 0x3a4   :  { %v689_v38 = vand.u32 127, %v667_v37 }
 0x3a6   :  { %vm697_vm2 = vcmp.eq.s32.totalorder %v8149_v26, %v689_v38 }
 0x3a7   :  { %v1270_v43 = vsel %vm697_vm2, 1.0, %v12549_v3  ;;  %v8650_v44 = vsel %vm697_vm2, 1e+30, %v8584_v50 }
 0x3a8   :  { %7492 = vmatmul.msk.f32.gmra.mxu1 %vm372_vm3, %v1270_v43  ;;  %v721_v45 = vsel %vm372_vm3, %v8650_v44, inf }
 0x3a9   :  { %722 = vmin.xlane.f32.xlu2 %v721_v45 }
 0x3ab   :  { %v670_v10 = vpop.xlane.xlu1 %669 }
 0x3ac   :  { %v690_v47 = vand.u32 127, %v670_v10 }
 0x3ae   :  { %vm698_vm4 = vcmp.eq.s32.totalorder %v8149_v26, %v690_v47 }
 0x3af   :  { %v1271_v48 = vsel %vm698_vm4, 1.0, %v12549_v3  ;;  %v8658_v22 = vsel %vm698_vm4, 1e+30, %v8592_v31  ;;  %v8675_v31 = vpop.f32.mrf.mxu0 }
 0x3b0   :  { %7493 = vmatmul.msk.f32.gmra.mxu1 %vm372_vm3, %v1271_v48  ;;  %v724_v0 = vsel %vm372_vm3, %v8658_v22, inf }
 0x3b1   :  { %725 = vmin.xlane.f32.xlu0 %v724_v0 }
 0x3b3   :  { %v673_v6 = vpop.xlane.xlu2 %672 }
 0x3b4   :  { %v691_v50 = vand.u32 127, %v673_v6 }
 0x3b6   :  { %vm699_vm5 = vcmp.eq.s32.totalorder %v8149_v26, %v691_v50 }
 0x3b7   :  { %v1272_v51 = vsel %vm699_vm5, 1.0, %v12549_v3  ;;  %v8668_v52 = vsel %vm699_vm5, 1e+30, %v8600_v59  ;;  %v8677_v56 = vpop.f32.mrf.mxu0  ;;  %v1604_v59 = vld [vmem:[#allocation2 + $0x50] sm:$0xff] }
 0x3b8   :  { %7494 = vmatmul.msk.f32.gmra.mxu1 %vm372_vm3, %v1272_v51  ;;  %v727_v53 = vsel %vm372_vm3, %v8668_v52, inf  ;;  %v1815_v63 = vpack.c.bf16 %v1605_v62, %v1604_v59 }
 0x3b9   :  { %728 = vmin.xlane.f32.xlu1 %v727_v53 }
 0x3ba   :  { %1825 = vmatpush.bf16.msrb.mxu1 %v1815_v63 }
 0x3be   :  { %1826 = vmatpush.bf16.msrb.mxu1 %v1814_v5 }
 0x3bf   :  { %v8679_v57 = vpop.f32.mrf.mxu0 }
 0x3c2   :  { %1827 = vmatpush.bf16.msrb.mxu1 %v1813_v61 }
 0x3c6   :  { %1828 = vmatpush.bf16.msrb.mxu1 %v1812_v19 }
 0x3c7   :  { %v8681_v2 = vpop.f32.mrf.mxu0 }
 0x3cf   :  { %v910_v16 = vpop.f32.mrf.mxu0 }
 0x3d7   :  { %v913_v20 = vpop.f32.mrf.mxu0 }
 0x3d8   :  { %v935_v37 = vadd.f32 %v913_v20, %v8689_v30 }
 0x3da   :  { %v1633_v42 = vmul.f32 0.999995, %v935_v37 }
 0x3dc   :  { %v1705_v6 = vmax.f32 %v1633_v42, 0.0 }
 0x3df   :  { %v916_v29 = vpop.f32.mrf.mxu0 }
 0x3e7   :  { %v919_v28 = vpop.f32.mrf.mxu0 }
 0x3e8   :  { %v937_v55 = vadd.f32 %v919_v28, %v8730_v58 }
 0x3ef   :  { %v922_v63 = vpop.f32.mrf.mxu0 }
 0x3f7   :  { %v925_v20 = vpop.f32.mrf.mxu0 }
 0x3fc   :  { %v711_v24 = vpop.xlane.xlu1 %710 }
 0x3fd   :  { %v741_v25 = vand.u32 127, %v711_v24 }
 0x3ff   :  { %vm749_vm6 = vcmp.eq.s32.totalorder %v8149_v26, %v741_v25  ;;  %v8754_v25 = vadd.f32 %v8685_v27, %v8675_v31 }
 0x400   :  { %v1347_v32 = vsel %vm749_vm6, 1.0, %v12549_v3  ;;  %v8693_v33 = vsel %vm749_vm6, 1e+30, %v8608_v49  ;;  %v934_v49 = vadd.f32 %v910_v16, %v8702_v36 }
 0x401   :  { %7496 = vmatmul.msk.f32.vlgmr.msra.gmra.mxu2 %vm372_vm3, %v1347_v32  ;;  %v765_v35 = vsel %vm372_vm3, %v8693_v33, inf  ;;  %v938_v31 = vadd.f32 %v922_v63, %v8754_v25 }
 0x402   :  { %766 = vmin.xlane.f32.xlu0 %v765_v35  ;;  %v1632_v48 = vmul.f32 0.999995, %v934_v49 }
 0x403   :  { %v1636_v49 = vmul.f32 0.999995, %v938_v31 }
 0x404   :  { %v714_v38 = vpop.xlane.xlu2 %713  ;;  %v676_v11 = vpop.xlane.xlu0 %675  ;;  %v1704_v51 = vmax.f32 %v1632_v48, 0.0 }
 0x405   :  { %v742_v39 = vand.u32 127, %v714_v38  ;;  %v692_v41 = vand.u32 127, %v676_v11 }
 0x406   :  { %v1776_v40 = vpack.c.bf16 %v1705_v6, %v1704_v51 }
 0x407   :  { %vm750_vm7 = vcmp.eq.s32.totalorder %v8149_v26, %v742_v39  ;;  %vm700_vm8 = vcmp.eq.s32.totalorder %v8149_v26, %v692_v41  ;;  %v928_v41 = vpop.f32.mrf.mxu0 }
 0x408   :  { %v1348_v43 = vsel %vm750_vm7, 1.0, %v12549_v3  ;;  %v8710_v45 = vsel %vm750_vm7, 1e+30, %v8617_v13  ;;  %v1273_v46 = vsel %vm700_vm8, 1.0, %v12549_v3  ;;  %v8715_v10 = vsel %vm700_vm8, 1e+30, %v8622_v8  ;;  %v8722_v13 = vpop.f32.mrf.mxu1 }
 0x409   :  { %7497 = vmatmul.msk.f32.gmra.mxu2 %vm372_vm3, %v1348_v43  ;;  %v768_v47 = vsel %vm372_vm3, %v8710_v45, inf  ;;  %7495 = vmatmul.msk.f32.gmra.mxu1 %vm372_vm3, %v1273_v46  ;;  %v730_v0 = vsel %vm372_vm3, %v8715_v10, inf  ;;  %v8726_v8 = vadd.f32 %v8685_v27, %v8663_v1 }
 0x40a   :  { %769 = vmin.xlane.f32.xlu1 %v768_v47  ;;  %731 = vmin.xlane.f32.xlu2 %v730_v0  ;;  %v1708_v47 = vmax.f32 %v1636_v49, 0.0 }
 0x40b   :  { %v936_v1 = vadd.f32 %v916_v29, %v8726_v8 }
 0x40c   :  { %v717_v50 = vpop.xlane.xlu0 %716 }
 0x40d   :  { %v743_v53 = vand.u32 127, %v717_v50  ;;  %v1634_v7 = vmul.f32 0.999995, %v936_v1  ;;  %v8782_v50 = vadd.f32 %v8685_v27, %v8679_v57 }
 0x40f   :  { %vm751_vm9 = vcmp.eq.s32.totalorder %v8149_v26, %v743_v53  ;;  %v1706_v18 = vmax.f32 %v1634_v7, 0.0  ;;  %v940_v1 = vadd.f32 %v928_v41, %v8782_v50 }
 0x410   :  { %v1349_v60 = vsel %vm751_vm9, 1.0, %v12549_v3  ;;  %v8735_v59 = vsel %vm751_vm9, 1e+30, %v8632_v23  ;;  %v8742_v4 = vpop.f32.mrf.mxu1  ;;  %v1635_v23 = vmul.f32 0.999995, %v937_v55 }
 0x411   :  { %7498 = vmatmul.msk.f32.gmra.mxu2 %vm372_vm3, %v1349_v60  ;;  %1829 = vmatmul.bf16.vlgmr.msrb.gmra.mxu1 %v1776_v40  ;;  %v771_v62 = vsel %vm372_vm3, %v8735_v59, inf  ;;  %v931_v60 = vpop.f32.mrf.mxu0 }
 0x412   :  { %772 = vmin.xlane.f32.xlu2 %v771_v62  ;;  %v1707_v16 = vmax.f32 %v1635_v23, 0.0  ;;  %v1016_v23 = vadd.f32 %v8695_v34, %v8689_v30 }
 0x414   :  { %v720_v54 = vpop.xlane.xlu1 %719  ;;  %v1777_v35 = vpack.c.bf16 %v1707_v16, %v1706_v18 }
 0x415   :  { %v744_v5 = vand.u32 127, %v720_v54 }
 0x417   :  { %vm752_vm10 = vcmp.eq.s32.totalorder %v8149_v26, %v744_v5 }
 0x418   :  { %v1350_v12 = vsel %vm752_vm10, 1.0, %v12549_v3  ;;  %v8747_v61 = vsel %vm752_vm10, 1e+30, %v8642_v14  ;;  %v8756_v29 = vpop.f32.mrf.mxu1  ;;  %v8761_v14 = vadd.f32 %v8685_v27, %v8677_v56 }
 0x419   :  { %v774_v15 = vsel %vm372_vm3, %v8747_v61, inf  ;;  %7499 = vmatmul.msk.f32.gmra.mxu2 %vm372_vm3, %v1350_v12  ;;  %v1015_v12 = vadd.f32 %v8683_v21, %v8702_v36 }
 0x41a   :  { %775 = vmin.xlane.f32.xlu0 %v774_v15  ;;  %v939_v11 = vadd.f32 %v925_v20, %v8761_v14  ;;  %v1641_v15 = vmul.f32 0.999995, %v1016_v23 }
 0x41b   :  { %v1640_v18 = vmul.f32 0.999995, %v1015_v12  ;;  %v1620_v12 = vld [vmem:[#allocation2 + $0xd0] sm:$0xff] }
 0x41c   :  { %v723_v19 = vpop.xlane.xlu2 %722  ;;  %v1637_v42 = vmul.f32 0.999995, %v939_v11  ;;  %v1713_v16 = vmax.f32 %v1641_v15, 0.0 }
 0x41d   :  { %v745_v24 = vand.u32 127, %v723_v19  ;;  %v1712_v20 = vmax.f32 %v1640_v18, 0.0 }
 0x41e   :  { %v1709_v48 = vmax.f32 %v1637_v42, 0.0 }
 0x41f   :  { %vm753_vm11 = vcmp.eq.s32.totalorder %v8149_v26, %v745_v24  ;;  %v1780_v24 = vpack.c.bf16 %v1713_v16, %v1712_v20 }
 0x420   :  { %v1351_v32 = vsel %vm753_vm11, 1.0, %v12549_v3  ;;  %v8765_v37 = vsel %vm753_vm11, 1e+30, %v8650_v44  ;;  %v1006_v28 = vpop.f32.mrf.mxu1  ;;  %v1778_v53 = vpack.c.bf16 %v1709_v48, %v1708_v47  ;;  %v1625_v48 = vld [vmem:[#allocation2 + $0xf8] sm:$0xff] }
 0x421   :  { %v777_v38 = vsel %vm372_vm3, %v8765_v37, inf  ;;  %7500 = vmatmul.msk.f32.gmra.mxu2 %vm372_vm3, %v1351_v32  ;;  %1834 = vmatmul.bf16.gmra.mxu1 %v1777_v35  ;;  %v1018_v32 = vadd.f32 %v8742_v4, %v8730_v58  ;;  %v1017_v35 = vadd.f32 %v8722_v13, %v8726_v8  ;;  %v1020_v47 = vadd.f32 %v1006_v28, %v8761_v14  ;;  %v1621_v28 = vld [vmem:[#allocation2 + $0xd8] sm:$0xff] }
 0x422   :  { %778 = vmin.xlane.f32.xlu1 %v777_v38  ;;  %v1019_v13 = vadd.f32 %v8756_v29, %v8754_v25  ;;  %v1619_v29 = vld [vmem:[#allocation2 + $0xc8] sm:$0xff] }
 0x423   :  { %v1643_v34 = vmul.f32 0.999995, %v1018_v32  ;;  %v1642_v31 = vmul.f32 0.999995, %v1017_v35  ;;  %v2192_v15 = vpack.c.bf16 %v1620_v12, %v1619_v29  ;;  %v1617_v35 = vld [vmem:[#allocation2 + $0xb8] sm:$0xff] }
 0x424   :  { %v726_v39 = vpop.xlane.xlu0 %725 }
 0x425   :  { %v746_v56 = vand.u32 127, %v726_v39  ;;  %v1715_v11 = vmax.f32 %v1643_v34, 0.0  ;;  %v1714_v21 = vmax.f32 %v1642_v31, 0.0  ;;  %v1629_v39 = vld [vmem:[#allocation2 + $0x118] sm:$0xff]  ;;  %v1618_v34 = vld [vmem:[#allocation2 + $0xc0] sm:$0xff] }
 0x427   :  { %vm754_vm12 = vcmp.eq.s32.totalorder %v8149_v26, %v746_v56  ;;  %v1630_v56 = vld [vmem:[#allocation2 + $0x120] sm:$0xff]  ;;  %v1781_v41 = vpack.c.bf16 %v1715_v11, %v1714_v21  ;;  %v2191_v11 = vpack.c.bf16 %v1618_v34, %v1617_v35 }
 0x428   :  { %v1352_v44 = vsel %vm754_vm12, 1.0, %v12549_v3  ;;  %v8775_v43 = vsel %vm754_vm12, 1e+30, %v8658_v22  ;;  %v8787_v22 = vadd.f32 %v8685_v27, %v8681_v2  ;;  %v8796_v57 = vpop.f32.mrf.mxu1  ;;  %v1638_v27 = vmul.f32 0.999995, %v940_v1 }
 0x429   :  { %v780_v46 = vsel %vm372_vm3, %v8775_v43, inf  ;;  %7501 = vmatmul.msk.f32.gmra.mxu2 %vm372_vm3, %v1352_v44  ;;  %v2197_v49 = vpack.c.bf16 %v1630_v56, %v1629_v39  ;;  %v1627_v44 = vld [vmem:[#allocation2 + $0x108] sm:$0xff] }
 0x42a   :  { %781 = vmin.xlane.f32.xlu2 %v780_v46  ;;  %v941_v2 = vadd.f32 %v931_v60, %v8787_v22  ;;  %v1710_v54 = vmax.f32 %v1638_v27, 0.0  ;;  %v1628_v46 = vld [vmem:[#allocation2 + $0x110] sm:$0xff]  ;;  %v1623_v60 = vld [vmem:[#allocation2 + $0xe8] sm:$0xff] }
 0x42b   :  { %2199 = vmatpush.bf16.msrb.mxu2 %v2197_v49  ;;  %v2196_v4 = vpack.c.bf16 %v1628_v46, %v1627_v44 }
 0x42c   :  { %v729_v0 = vpop.xlane.xlu1 %728  ;;  %v1639_v63 = vmul.f32 0.999995, %v941_v2 }
 0x42d   :  { %v747_v6 = vand.u32 127, %v729_v0  ;;  %v1626_v0 = vld [vmem:[#allocation2 + $0x100] sm:$0xff] }
 0x42f   :  { %vm755_vm13 = vcmp.eq.s32.totalorder %v8149_v26, %v747_v6  ;;  %2200 = vmatpush.bf16.msrb.mxu2 %v2196_v4  ;;  %v2195_v6 = vpack.c.bf16 %v1626_v0, %v1625_v48 }
 0x430   :  { %v1353_v51 = vsel %vm755_vm13, 1.0, %v12549_v3  ;;  %v8791_v40 = vsel %vm755_vm13, 1e+30, %v8668_v52  ;;  %v1012_v55 = vpop.f32.mrf.mxu1  ;;  %v1711_v52 = vmax.f32 %v1639_v63, 0.0  ;;  %v1072_v63 = vpop.f32.mrf.mxu2 }
 0x431   :  { %v783_v62 = vsel %vm372_vm3, %v8791_v40, inf  ;;  %7502 = vmatmul.msk.f32.gmra.mxu2 %vm372_vm3, %v1353_v51  ;;  %1839 = vmatmul.bf16.gmra.mxu1 %v1778_v53  ;;  %v1645_v51 = vmul.f32 0.999995, %v1020_v47  ;;  %v1644_v53 = vmul.f32 0.999995, %v1019_v13  ;;  %v1022_v18 = vadd.f32 %v1012_v55, %v8787_v22 }
 0x432   :  { %784 = vmin.xlane.f32.xlu0 %v783_v62  ;;  %v1779_v5 = vpack.c.bf16 %v1711_v52, %v1710_v54  ;;  %v1624_v62 = vld [vmem:[#allocation2 + $0xf0] sm:$0xff]  ;;  %v1622_v52 = vld [vmem:[#allocation2 + $0xe0] sm:$0xff] }
 0x433   :  { %2201 = vmatpush.bf16.msrb.mxu2 %v2195_v6  ;;  %v2194_v2 = vpack.c.bf16 %v1624_v62, %v1623_v60  ;;  %v1717_v27 = vmax.f32 %v1645_v51, 0.0  ;;  %v1716_v54 = vmax.f32 %v1644_v53, 0.0  ;;  %v1647_v21 = vmul.f32 0.999995, %v1022_v18 }
 0x435   :  { %v1782_v23 = vpack.c.bf16 %v1717_v27, %v1716_v54  ;;  %v1719_v46 = vmax.f32 %v1647_v21, 0.0 }
 0x437   :  { %2202 = vmatpush.bf16.msrb.mxu2 %v2194_v2 }
 0x438   :  { %v8800_v7 = vpop.f32.mrf.mxu1  ;;  %v1075_v31 = vpop.f32.mrf.mxu2 }
 0x440   :  { %v8806_v19 = vpop.f32.mrf.mxu1  ;;  %v1078_v51 = vpop.f32.mrf.mxu2 }
 0x441   :  { %1844 = vmatmul.bf16.gmra.mxu1 %v1779_v5  ;;  %v2193_v5 = vpack.c.bf16 %v1622_v52, %v1621_v28  ;;  %v1097_v28 = vadd.f32 %v1075_v31, %v8689_v30  ;;  %v8855_v31 = vld [vmem:[#allocation2 + $0xa0] ss:$0 sm:$0xff] }
 0x443   :  { %2203 = vmatpush.bf16.msrb.mxu2 %v2193_v5  ;;  %v1649_v29 = vmul.f32 0.999995, %v1097_v28 }
 0x447   :  { %2204 = vmatpush.bf16.msrb.mxu2 %v2192_v15 }
 0x448   :  { %v8812_v38 = vpop.f32.mrf.mxu1  ;;  %v1081_v18 = vpop.f32.mrf.mxu2 }
 0x44b   :  { %2205 = vmatpush.bf16.msrb.mxu2 %v2191_v11 }
 0x450   :  { %v8814_v42 = vpop.f32.mrf.mxu1 }
 0x451   :  { %1849 = vmatmul.bf16.gmra.mxu1 %v1780_v24  ;;  %v1021_v24 = vadd.f32 %v8796_v57, %v8782_v50  ;;  %v1616_v57 = vld [vmem:[#allocation2 + $0xb0] sm:$0xff] }
 0x453   :  { %v1646_v55 = vmul.f32 0.999995, %v1021_v24  ;;  %v1721_v24 = vmax.f32 %v1649_v29, 0.0 }
 0x455   :  { %v1718_v47 = vmax.f32 %v1646_v55, 0.0 }
 0x458   :  { %v8819_v1 = vpop.f32.mrf.mxu1 }
 0x460   :  { %v8822_v16 = vpop.f32.mrf.mxu1 }
 0x461   :  { %1854 = vmatmul.bf16.gmra.mxu1 %v1781_v41  ;;  %v1615_v41 = vld [vmem:[#allocation2 + $0xa8] sm:$0xff] }
 0x462   :  { %v2190_v44 = vpack.c.bf16 %v1616_v57, %v1615_v41  ;;  %v1084_v41 = vpop.f32.mrf.mxu2 }
 0x464   :  { %2206 = vmatpush.bf16.msrb.mxu2 %v2190_v44 }
 0x468   :  { %v8831_v0 = vpop.f32.mrf.mxu1 }
 0x471   :  { %1859 = vmatmul.bf16.gmra.mxu1 %v1782_v23 }
 0x475   :  { %v767_v20 = vpop.xlane.xlu0 %766 }
 0x476   :  { %v797_v32 = vand.u32 127, %v767_v20 }
 0x478   :  { %vm805_vm14 = vcmp.eq.s32.totalorder %v8149_v26, %v797_v32 }
 0x479   :  { %v1428_v39 = vsel %vm805_vm14, 1.0, %v12549_v3  ;;  %v813_v56 = vsel %vm805_vm14, 1e+30, %v8693_v33  ;;  %v1783_v33 = vpack.c.bf16 %v1719_v46, %v1718_v47 }
 0x47a   :  { %7504 = vmatmul.msk.f32.vlgmr.msra.gmra.mxu3 %vm372_vm3, %v1428_v39  ;;  %v821_v49 = vsel %vm372_vm3, %v813_v56, inf  ;;  %v1099_v56 = vadd.f32 %v1081_v18, %v8730_v58 }
 0x47b   :  { %822 = vmin.xlane.f32.xlu2 %v821_v49  ;;  %v1098_v49 = vadd.f32 %v1078_v51, %v8726_v8 }
 0x47d   :  { %v770_v4 = vpop.xlane.xlu1 %769  ;;  %v732_v13 = vpop.xlane.xlu2 %731 }
 0x47e   :  { %v798_v48 = vand.u32 127, %v770_v4  ;;  %v748_v6 = vand.u32 127, %v732_v13  ;;  %v1651_v4 = vmul.f32 0.999995, %v1099_v56  ;;  %v1650_v13 = vmul.f32 0.999995, %v1098_v49 }
 0x480   :  { %vm806_vm15 = vcmp.eq.s32.totalorder %v8149_v26, %v798_v48  ;;  %vm756_vm2 = vcmp.eq.s32.totalorder %v8149_v26, %v748_v6 }
 0x481   :  { %v1429_v53 = vsel %vm806_vm15, 1.0, %v12549_v3  ;;  %v814_v60 = vsel %vm806_vm15, 1e+30, %v8710_v45  ;;  %1864 = vmatmul.bf16.gmra.mxu1 %v1783_v33  ;;  %v1354_v62 = vsel %vm756_vm2, 1.0, %v12549_v3  ;;  %v8840_v2 = vsel %vm756_vm2, 1e+30, %v8715_v10 }
 0x482   :  { %7505 = vmatmul.msk.f32.gmra.mxu3 %vm372_vm3, %v1429_v53  ;;  %v824_v27 = vsel %vm372_vm3, %v814_v60, inf  ;;  %7503 = vmatmul.msk.f32.gmra.mxu2 %vm372_vm3, %v1354_v62  ;;  %v786_v54 = vsel %vm372_vm3, %v8840_v2, inf  ;;  %v1096_v45 = vadd.f32 %v1072_v63, %v8702_v36  ;;  %v1723_v53 = vmax.f32 %v1651_v4, 0.0 }
 0x483   :  { %825 = vmin.xlane.f32.xlu0 %v824_v27  ;;  %787 = vmin.xlane.f32.xlu1 %v786_v54  ;;  %v1722_v54 = vmax.f32 %v1650_v13, 0.0 }
 0x484   :  { %v1648_v10 = vmul.f32 0.999995, %v1096_v45 }
 0x485   :  { %v773_v52 = vpop.xlane.xlu2 %772  ;;  %v1785_v29 = vpack.c.bf16 %v1723_v53, %v1722_v54 }
 0x486   :  { %v799_v5 = vand.u32 127, %v773_v52  ;;  %v8848_v23 = vpop.f32.mrf.mxu1  ;;  %v1720_v32 = vmax.f32 %v1648_v10, 0.0  ;;  %v1087_v52 = vpop.f32.mrf.mxu2 }
 0x488   :  { %vm807_vm4 = vcmp.eq.s32.totalorder %v8149_v26, %v799_v5  ;;  %v1784_v11 = vpack.c.bf16 %v1721_v24, %v1720_v32 }
 0x489   :  { %v1430_v12 = vsel %vm807_vm4, 1.0, %v12549_v3  ;;  %v815_v15 = vsel %vm807_vm4, 1e+30, %v8735_v59 }
 0x48a   :  { %7506 = vmatmul.msk.f32.gmra.mxu3 %vm372_vm3, %v1430_v12  ;;  %v827_v20 = vsel %vm372_vm3, %v815_v15, inf  ;;  %v1101_v15 = vadd.f32 %v1087_v52, %v8761_v14 }
 0x48b   :  { %828 = vmin.xlane.f32.xlu1 %v827_v20  ;;  %v1100_v20 = vadd.f32 %v1084_v41, %v8754_v25 }
 0x48d   :  { %v776_v63 = vpop.xlane.xlu0 %775 }
 0x48e   :  { %v800_v35 = vand.u32 127, %v776_v63  ;;  %v1830_v34 = vpop.f32.mrf.mxu1 }
 0x48f   :  { %v1831_v55 = vadd.f32 %v8855_v31, %v1830_v34 }
 0x490   :  { %vm808_vm5 = vcmp.eq.s32.totalorder %v8149_v26, %v800_v35  ;;  %v1653_v35 = vmul.f32 0.999995, %v1101_v15 }
 0x491   :  { %v1431_v21 = vsel %vm808_vm5, 1.0, %v12549_v3  ;;  %v816_v59 = vsel %vm808_vm5, 1e+30, %v8747_v61  ;;  %1869 = vmatmul.bf16.gmra.mxu1 %v1784_v11  ;;  %v2010_v47 = vmul.f32 0.999995, %v1831_v55  ;;  %vm2604_vm5 = vcmask 261120  }
 0x492   :  { %v830_v39 = vsel %vm372_vm3, %v816_v59, inf  ;;  %7507 = vmatmul.msk.f32.gmra.mxu3 %vm372_vm3, %v1431_v21  ;;  %v1090_v21 = vpop.f32.mrf.mxu2  ;;  %v1725_v49 = vmax.f32 %v1653_v35, 0.0 }
 0x493   :  { %831 = vmin.xlane.f32.xlu2 %v830_v39  ;;  %v2082_v60 = vmax.f32 %v2010_v47, 0.0 }
 0x495   :  { %v779_v57 = vpop.xlane.xlu1 %778 }
 0x496   :  { %v801_v44 = vand.u32 127, %v779_v57  ;;  %v1832_v46 = vpop.f32.mrf.mxu1 }
 0x497   :  { %v1833_v61 = vadd.f32 %v8855_v31, %v1832_v46 }
 0x498   :  { %vm809_vm6 = vcmp.eq.s32.totalorder %v8149_v26, %v801_v44  ;;  %v1153_v44 = vpop.f32.mrf.mxu3 }
 0x499   :  { %v2011_v48 = vmul.f32 0.999995, %v1833_v61  ;;  %v1432_v6 = vsel %vm809_vm6, 1.0, %v12549_v3  ;;  %v817_v33 = vsel %vm809_vm6, 1e+30, %v8765_v37  ;;  %vm2639_vm6 = vcmask 7168  }
 0x49a   :  { %7508 = vmatmul.msk.f32.gmra.mxu3 %vm372_vm3, %v1432_v6  ;;  %v833_v51 = vsel %vm372_vm3, %v817_v33, inf  ;;  %v1093_v13 = vpop.f32.mrf.mxu2  ;;  %v1102_v6 = vadd.f32 %v1090_v21, %v8782_v50 }
 0x49b   :  { %v2083_v62 = vmax.f32 %v2011_v48, 0.0  ;;  %834 = vmin.xlane.f32.xlu0 %v833_v51  ;;  %v1103_v48 = vadd.f32 %v1093_v13, %v8787_v22 }
 0x49d   :  { %v782_v27 = vpop.xlane.xlu2 %781  ;;  %v2154_v28 = vpack.c.bf16 %v2083_v62, %v2082_v60  ;;  %v1655_v53 = vmul.f32 0.999995, %v1103_v48 }
 0x49e   :  { %v802_v45 = vand.u32 127, %v782_v27  ;;  %v1835_v5 = vpop.f32.mrf.mxu1  ;;  %v1654_v27 = vmul.f32 0.999995, %v1102_v6 }
 0x49f   :  { %2207 = vmatmul.bf16.vlgmr.msrb.gmra.mxu2 %v2154_v28  ;;  %v1836_v18 = vadd.f32 %v8855_v31, %v1835_v5  ;;  %v1727_v28 = vmax.f32 %v1655_v53, 0.0 }
 0x4a0   :  { %vm810_vm7 = vcmp.eq.s32.totalorder %v8149_v26, %v802_v45  ;;  %v1156_v33 = vpop.f32.mrf.mxu3  ;;  %v1726_v5 = vmax.f32 %v1654_v27, 0.0 }
 0x4a1   :  { %v1433_v37 = vsel %vm810_vm7, 1.0, %v12549_v3  ;;  %v818_v10 = vsel %vm810_vm7, 1e+30, %v8775_v43  ;;  %1874 = vmatmul.bf16.gmra.mxu1 %v1785_v29  ;;  %v2012_v34 = vmul.f32 0.999995, %v1836_v18  ;;  %v1178_v15 = vadd.f32 %v1156_v33, %v8689_v30 }
 0x4a2   :  { %v836_v12 = vsel %vm372_vm3, %v818_v10, inf  ;;  %7509 = vmatmul.msk.f32.gmra.mxu3 %vm372_vm3, %v1433_v37  ;;  %v1652_v43 = vmul.f32 0.999995, %v1100_v20  ;;  %v1787_v10 = vpack.c.bf16 %v1727_v28, %v1726_v5  ;;  %v1177_v20 = vadd.f32 %v1153_v44, %v8702_v36 }
 0x4a3   :  { %837 = vmin.xlane.f32.xlu1 %v836_v12  ;;  %v2084_v41 = vmax.f32 %v2012_v34, 0.0 }
 0x4a4   :  { %v1724_v46 = vmax.f32 %v1652_v43, 0.0  ;;  %v1656_v34 = vmul.f32 0.999995, %v1177_v20 }
 0x4a5   :  { %v785_v24 = vpop.xlane.xlu0 %784 }
 0x4a6   :  { %v803_v63 = vand.u32 127, %v785_v24  ;;  %v1837_v32 = vpop.f32.mrf.mxu1  ;;  %v1786_v61 = vpack.c.bf16 %v1725_v49, %v1724_v46 }
 0x4a7   :  { %v1838_v11 = vadd.f32 %v8855_v31, %v1837_v32 }
 0x4a8   :  { %vm811_vm8 = vcmp.eq.s32.totalorder %v8149_v26, %v803_v63  ;;  %v1159_v12 = vpop.f32.mrf.mxu3  ;;  %v1657_v63 = vmul.f32 0.999995, %v1178_v15 }
 0x4a9   :  { %v2013_v59 = vmul.f32 0.999995, %v1838_v11  ;;  %v1434_v39 = vsel %vm811_vm8, 1.0, %v12549_v3  ;;  %v819_v56 = vsel %vm811_vm8, 1e+30, %v8791_v40 }
 0x4aa   :  { %7510 = vmatmul.msk.f32.gmra.mxu3 %vm372_vm3, %v1434_v39  ;;  %v839_v55 = vsel %vm372_vm3, %v819_v56, inf  ;;  %v1729_v21 = vmax.f32 %v1657_v63, 0.0  ;;  %v1728_v56 = vmax.f32 %v1656_v34, 0.0  ;;  %v1234_v34 = vpop.f32.mrf.mxu0 }
 0x4ab   :  { %v2085_v57 = vmax.f32 %v2013_v59, 0.0  ;;  %840 = vmin.xlane.f32.xlu2 %v839_v55 }
 0x4ad   :  { %v2155_v4 = vpack.c.bf16 %v2085_v57, %v2084_v41  ;;  %v1788_v41 = vpack.c.bf16 %v1729_v21, %v1728_v56 }
 0x4ae   :  { %v1840_v47 = vpop.f32.mrf.mxu1 }
 0x4af   :  { %2212 = vmatmul.bf16.gmra.mxu2 %v2155_v4  ;;  %v1841_v40 = vadd.f32 %v8855_v31, %v1840_v47  ;;  %v1179_v4 = vadd.f32 %v1159_v12, %v8726_v8  ;;  %v8896_v47 = vpop.f32.mrf.mxu2 }
 0x4b0   :  { %v1162_v43 = vpop.f32.mrf.mxu3 }
 0x4b1   :  { %1879 = vmatmul.bf16.gmra.mxu1 %v1786_v61  ;;  %v2014_v60 = vmul.f32 0.999995, %v1841_v40  ;;  %v1180_v57 = vadd.f32 %v1162_v43, %v8730_v58  ;;  %v1658_v6 = vmul.f32 0.999995, %v1179_v4 }
 0x4b3   :  { %v2086_v45 = vmax.f32 %v2014_v60, 0.0  ;;  %v1659_v13 = vmul.f32 0.999995, %v1180_v57 }
 0x4b6   :  { %v1842_v51 = vpop.f32.mrf.mxu1 }
 0x4b7   :  { %v1843_v62 = vadd.f32 %v8855_v31, %v1842_v51  ;;  %v1731_v51 = vmax.f32 %v1659_v13, 0.0  ;;  %v1237_v13 = vpop.f32.mrf.mxu0 }
 0x4b8   :  { %v1165_v46 = vpop.f32.mrf.mxu3 }
 0x4b9   :  { %v2015_v54 = vmul.f32 0.999995, %v1843_v62  ;;  %v1730_v62 = vmax.f32 %v1658_v6, 0.0 }
 0x4bb   :  { %v2087_v52 = vmax.f32 %v2015_v54, 0.0 }
 0x4bd   :  { %v2156_v29 = vpack.c.bf16 %v2087_v52, %v2086_v45  ;;  %v8899_v45 = vpop.f32.mrf.mxu2  ;;  %v1789_v52 = vpack.c.bf16 %v1731_v51, %v1730_v62 }
 0x4be   :  { %v1845_v37 = vpop.f32.mrf.mxu1 }
 0x4bf   :  { %2217 = vmatmul.bf16.gmra.mxu2 %v2156_v29  ;;  %v1846_v18 = vadd.f32 %v8855_v31, %v1845_v37  ;;  %v1181_v37 = vadd.f32 %v1165_v46, %v8754_v25 }
 0x4c0   :  { %v1168_v54 = vpop.f32.mrf.mxu3 }
 0x4c1   :  { %1884 = vmatmul.bf16.gmra.mxu1 %v1787_v10  ;;  %v2016_v32 = vmul.f32 0.999995, %v1846_v18  ;;  %v1182_v5 = vadd.f32 %v1168_v54, %v8761_v14 }
 0x4c3   :  { %v2088_v59 = vmax.f32 %v2016_v32, 0.0  ;;  %v1661_v12 = vmul.f32 0.999995, %v1182_v5 }
 0x4c5   :  { %v8905_v63 = vpop.f32.mrf.mxu2 }
 0x4c6   :  { %v1847_v24 = vpop.f32.mrf.mxu1 }
 0x4c7   :  { %v1848_v35 = vadd.f32 %v8855_v31, %v1847_v24  ;;  %v1660_v24 = vmul.f32 0.999995, %v1181_v37 }
 0x4c8   :  { %v1171_v20 = vpop.f32.mrf.mxu3 }
 0x4c9   :  { %v2017_v11 = vmul.f32 0.999995, %v1848_v35  ;;  %v1733_v35 = vmax.f32 %v1661_v12, 0.0  ;;  %v1732_v21 = vmax.f32 %v1660_v24, 0.0 }
 0x4cb   :  { %v2089_v39 = vmax.f32 %v2017_v11, 0.0 }
 0x4cd   :  { %v2157_v55 = vpack.c.bf16 %v2089_v39, %v2088_v59  ;;  %v8911_v46 = vpop.f32.mrf.mxu2 }
 0x4ce   :  { %v1850_v49 = vpop.f32.mrf.mxu1 }
 0x4cf   :  { %2222 = vmatmul.bf16.gmra.mxu2 %v2157_v55  ;;  %v1851_v44 = vadd.f32 %v8855_v31, %v1850_v49  ;;  %v1790_v49 = vpack.c.bf16 %v1733_v35, %v1732_v21  ;;  %v1240_v35 = vpop.f32.mrf.mxu0  ;;  %v1259_v21 = vadd.f32 %v1237_v13, %v8689_v30 }
 0x4d1   :  { %1889 = vmatmul.bf16.gmra.mxu1 %v1788_v41  ;;  %v2018_v48 = vmul.f32 0.999995, %v1851_v44  ;;  %v1174_v41 = vpop.f32.mrf.mxu3 }
 0x4d2   :  { %v1184_v44 = vadd.f32 %v1174_v41, %v8787_v22  ;;  %v1665_v41 = vmul.f32 0.999995, %v1259_v21 }
 0x4d3   :  { %v2090_v53 = vmax.f32 %v2018_v48, 0.0 }
 0x4d4   :  { %v1663_v51 = vmul.f32 0.999995, %v1184_v44 }
 0x4d6   :  { %v1852_v61 = vpop.f32.mrf.mxu1 }
 0x4d7   :  { %v1853_v40 = vadd.f32 %v8855_v31, %v1852_v61  ;;  %v1183_v61 = vadd.f32 %v1171_v20, %v8782_v50 }
 0x4d9   :  { %v2019_v33 = vmul.f32 0.999995, %v1853_v40 }
 0x4db   :  { %v2091_v60 = vmax.f32 %v2019_v33, 0.0 }
 0x4dd   :  { %v2158_v27 = vpack.c.bf16 %v2091_v60, %v2090_v53 }
 0x4de   :  { %v1855_v28 = vpop.f32.mrf.mxu1 }
 0x4df   :  { %2227 = vmatmul.bf16.gmra.mxu2 %v2158_v27  ;;  %v1856_v29 = vadd.f32 %v8855_v31, %v1855_v28  ;;  %v1662_v27 = vmul.f32 0.999995, %v1183_v61 }
 0x4e1   :  { %1894 = vmatmul.bf16.gmra.mxu1 %v1789_v52  ;;  %v2020_v15 = vmul.f32 0.999995, %v1856_v29  ;;  %v1735_v29 = vmax.f32 %v1663_v51, 0.0 }
 0x4e3   :  { %v2092_v11 = vmax.f32 %v2020_v15, 0.0  ;;  %v1734_v15 = vmax.f32 %v1662_v27, 0.0 }
 0x4e6   :  { %v1857_v10 = vpop.f32.mrf.mxu1 }
 0x4e7   :  { %v1858_v18 = vadd.f32 %v8855_v31, %v1857_v10 }
 0x4e9   :  { %v2021_v32 = vmul.f32 0.999995, %v1858_v18  ;;  %v8924_v18 = vpop.f32.mrf.mxu2 }
 0x4eb   :  { %v2093_v43 = vmax.f32 %v2021_v32, 0.0 }
 0x4ed   :  { %v2159_v39 = vpack.c.bf16 %v2093_v43, %v2092_v11  ;;  %v1791_v43 = vpack.c.bf16 %v1735_v29, %v1734_v15 }
 0x4ee   :  { %v823_v59 = vpop.xlane.xlu2 %822  ;;  %v1860_v55 = vpop.f32.mrf.mxu1 }
 0x4ef   :  { %v853_v56 = vand.u32 127, %v823_v59  ;;  %2232 = vmatmul.bf16.gmra.mxu2 %v2159_v39  ;;  %v1861_v4 = vadd.f32 %v8855_v31, %v1860_v55  ;;  %v1258_v39 = vadd.f32 %v1234_v34, %v8702_v36 }
 0x4f1   :  { %vm1509_vm9 = vcmp.eq.s32.totalorder %v8149_v26, %v853_v56  ;;  %1899 = vmatmul.bf16.gmra.mxu1 %v1790_v49  ;;  %v2022_v53 = vmul.f32 0.999995, %v1861_v4  ;;  %v8933_v4 = vpop.f32.mrf.mxu2  ;;  %v1664_v61 = vmul.f32 0.999995, %v1258_v39 }
 0x4f2   :  { %v1517_v57 = vsel %vm1509_vm9, 1.0, %v12549_v3 }
 0x4f3   :  { %7512 = vmatmul.msk.f32.vlgmr.msrb.gmra.mxu0 %vm372_vm3, %v1517_v57  ;;  %v2094_v37 = vmax.f32 %v2022_v53, 0.0  ;;  %v1736_v34 = vmax.f32 %v1664_v61, 0.0 }
 0x4f6   :  { %v826_v48 = vpop.xlane.xlu0 %825  ;;  %v788_v6 = vpop.xlane.xlu1 %787 }
 0x4f7   :  { %v854_v40 = vand.u32 127, %v826_v48  ;;  %v1862_v33 = vpop.f32.mrf.mxu1  ;;  %v804_v60 = vand.u32 127, %v788_v6  ;;  %v1243_v48 = vpop.f32.mrf.mxu0  ;;  %v1737_v6 = vmax.f32 %v1665_v41, 0.0 }
 0x4f8   :  { %v1863_v62 = vadd.f32 %v8855_v31, %v1862_v33 }
 0x4f9   :  { %vm1510_vm10 = vcmp.eq.s32.totalorder %v8149_v26, %v854_v40  ;;  %vm812_vm11 = vcmp.eq.s32.totalorder %v8149_v26, %v804_v60 }
 0x4fa   :  { %v2023_v54 = vmul.f32 0.999995, %v1863_v62  ;;  %v1518_v28 = vsel %vm1510_vm10, 1.0, %v12549_v3  ;;  %v1435_v52 = vsel %vm812_vm11, 1.0, %v12549_v3  ;;  %v820_v5 = vsel %vm812_vm11, 1e+30, %v8840_v2 }
 0x4fb   :  { %7513 = vmatmul.msk.f32.gmra.mxu0 %vm372_vm3, %v1518_v28  ;;  %7511 = vmatmul.msk.f32.gmra.mxu3 %vm372_vm3, %v1435_v52  ;;  %v842_v12 = vsel %vm372_vm3, %v820_v5, inf  ;;  %v8939_v28 = vpop.f32.mrf.mxu2  ;;  %v1261_v5 = vadd.f32 %v1243_v48, %v8730_v58 }
 0x4fc   :  { %v2095_v10 = vmax.f32 %v2023_v54, 0.0  ;;  %843 = vmin.xlane.f32.xlu0 %v842_v12  ;;  %v1792_v54 = vpack.c.bf16 %v1737_v6, %v1736_v34 }
 0x4fe   :  { %v2160_v20 = vpack.c.bf16 %v2095_v10, %v2094_v37  ;;  %v829_v24 = vpop.xlane.xlu1 %828  ;;  %v1260_v10 = vadd.f32 %v1240_v35, %v8726_v8 }
 0x4ff   :  { %v1865_v32 = vpop.f32.mrf.mxu1  ;;  %v855_v11 = vand.u32 127, %v829_v24  ;;  %v1246_v29 = vpop.f32.mrf.mxu0  ;;  %v1667_v24 = vmul.f32 0.999995, %v1261_v5 }
 0x500   :  { %2237 = vmatmul.bf16.gmra.mxu2 %v2160_v20  ;;  %v1866_v59 = vadd.f32 %v8855_v31, %v1865_v32 }
 0x501   :  { %vm1511_vm12 = vcmp.eq.s32.totalorder %v8149_v26, %v855_v11  ;;  %1904 = vmatmul.bf16.gmra.mxu1 %v1791_v43  ;;  %v1666_v43 = vmul.f32 0.999995, %v1260_v10  ;;  %v1739_v39 = vmax.f32 %v1667_v24, 0.0 }
 0x502   :  { %v1519_v2 = vsel %vm1511_vm12, 1.0, %v12549_v3  ;;  %v2024_v57 = vmul.f32 0.999995, %v1866_v59 }
 0x503   :  { %7514 = vmatmul.msk.f32.gmra.mxu0 %vm372_vm3, %v1519_v2  ;;  %v1738_v35 = vmax.f32 %v1666_v43, 0.0 }
 0x504   :  { %v2096_v33 = vmax.f32 %v2024_v57, 0.0 }
 0x505   :  { %v8949_v59 = vpop.f32.mrf.mxu2  ;;  %v1793_v48 = vpack.c.bf16 %v1739_v39, %v1738_v35 }
 0x506   :  { %v832_v56 = vpop.xlane.xlu2 %831 }
 0x507   :  { %v856_v55 = vand.u32 127, %v832_v56  ;;  %v1867_v49 = vpop.f32.mrf.mxu1 }
 0x508   :  { %v1868_v44 = vadd.f32 %v8855_v31, %v1867_v49  ;;  %v1249_v49 = vpop.f32.mrf.mxu0 }
 0x509   :  { %vm1512_vm13 = vcmp.eq.s32.totalorder %v8149_v26, %v856_v55  ;;  %v1263_v6 = vadd.f32 %v1249_v49, %v8761_v14 }
 0x50a   :  { %v2025_v13 = vmul.f32 0.999995, %v1868_v44  ;;  %v1520_v40 = vsel %vm1512_vm13, 1.0, %v12549_v3 }
 0x50b   :  { %7515 = vmatmul.msk.f32.gmra.mxu0 %vm372_vm3, %v1520_v40 }
 0x50c   :  { %v2097_v51 = vmax.f32 %v2025_v13, 0.0 }
 0x50e   :  { %v2161_v53 = vpack.c.bf16 %v2097_v51, %v2096_v33  ;;  %v835_v60 = vpop.xlane.xlu0 %834  ;;  %v1262_v51 = vadd.f32 %v1246_v29, %v8754_v25 }
 0x50f   :  { %v1870_v62 = vpop.f32.mrf.mxu1  ;;  %v857_v27 = vand.u32 127, %v835_v60 }
 0x510   :  { %2242 = vmatmul.bf16.gmra.mxu2 %v2161_v53  ;;  %v1871_v37 = vadd.f32 %v8855_v31, %v1870_v62  ;;  %v1669_v53 = vmul.f32 0.999995, %v1263_v6 }
 0x511   :  { %vm1513_vm14 = vcmp.eq.s32.totalorder %v8149_v26, %v857_v27  ;;  %1909 = vmatmul.bf16.gmra.mxu1 %v1792_v54  ;;  %v1252_v27 = vpop.f32.mrf.mxu0  ;;  %v1668_v54 = vmul.f32 0.999995, %v1262_v51 }
 0x512   :  { %v1521_v52 = vsel %vm1513_vm14, 1.0, %v12549_v3  ;;  %v2026_v32 = vmul.f32 0.999995, %v1871_v37  ;;  %v1741_v37 = vmax.f32 %v1669_v53, 0.0  ;;  %v1340_v53 = vadd.f32 %v8806_v19, %v8689_v30 }
 0x513   :  { %7516 = vmatmul.msk.f32.gmra.mxu0 %vm372_vm3, %v1521_v52 }
 0x514   :  { %v2098_v56 = vmax.f32 %v2026_v32, 0.0 }
 0x516   :  { %v838_v12 = vpop.xlane.xlu1 %837 }
 0x517   :  { %v858_v15 = vand.u32 127, %v838_v12  ;;  %v1872_v20 = vpop.f32.mrf.mxu1 }
 0x518   :  { %v1873_v11 = vadd.f32 %v8855_v31, %v1872_v20 }
 0x519   :  { %vm1514_vm15 = vcmp.eq.s32.totalorder %v8149_v26, %v858_v15  ;;  %v1740_v15 = vmax.f32 %v1668_v54, 0.0  ;;  %v1673_v54 = vmul.f32 0.999995, %v1340_v53 }
 0x51a   :  { %v2027_v2 = vmul.f32 0.999995, %v1873_v11  ;;  %v1522_v21 = vsel %vm1514_vm15, 1.0, %v12549_v3  ;;  %v1255_v11 = vpop.f32.mrf.mxu0 }
 0x51b   :  { %7517 = vmatmul.msk.f32.gmra.mxu0 %vm372_vm3, %v1522_v21  ;;  %v1794_v32 = vpack.c.bf16 %v1741_v37, %v1740_v15  ;;  %v1265_v43 = vadd.f32 %v1255_v11, %v8787_v22  ;;  %v1264_v21 = vadd.f32 %v1252_v27, %v8782_v50 }
 0x51c   :  { %v2099_v55 = vmax.f32 %v2027_v2, 0.0 }
 0x51d   :  { %v1670_v49 = vmul.f32 0.999995, %v1264_v21 }
 0x51e   :  { %v2162_v41 = vpack.c.bf16 %v2099_v55, %v2098_v56  ;;  %v841_v57 = vpop.xlane.xlu2 %840  ;;  %v1671_v56 = vmul.f32 0.999995, %v1265_v43 }
 0x51f   :  { %v1875_v44 = vpop.f32.mrf.mxu1  ;;  %v859_v61 = vand.u32 127, %v841_v57 }
 0x520   :  { %2247 = vmatmul.bf16.gmra.mxu2 %v2162_v41  ;;  %v1876_v33 = vadd.f32 %v8855_v31, %v1875_v44  ;;  %v1743_v44 = vmax.f32 %v1671_v56, 0.0  ;;  %v1341_v56 = vadd.f32 %v8812_v38, %v8726_v8  ;;  %v1344_v38 = vadd.f32 %v8822_v16, %v8761_v14 }
 0x521   :  { %vm1515_vm2 = vcmp.eq.s32.totalorder %v8149_v26, %v859_v61  ;;  %1914 = vmatmul.bf16.gmra.mxu1 %v1793_v48 }
 0x522   :  { %v8953_v13 = vpop.f32.mrf.mxu2  ;;  %v1523_v40 = vsel %vm1515_vm2, 1.0, %v12549_v3  ;;  %v2028_v60 = vmul.f32 0.999995, %v1876_v33 }
 0x523   :  { %7518 = vmatmul.msk.f32.gmra.mxu0 %vm372_vm3, %v1523_v40  ;;  %v1742_v40 = vmax.f32 %v1670_v49, 0.0 }
 0x524   :  { %v2100_v10 = vmax.f32 %v2028_v60, 0.0 }
 0x525   :  { %v1795_v51 = vpack.c.bf16 %v1743_v44, %v1742_v40  ;;  %v1674_v44 = vmul.f32 0.999995, %v1341_v56 }
 0x527   :  { %v1877_v34 = vpop.f32.mrf.mxu1 }
 0x528   :  { %v1878_v62 = vadd.f32 %v8855_v31, %v1877_v34 }
 0x52a   :  { %v2029_v52 = vmul.f32 0.999995, %v1878_v62  ;;  %v8961_v5 = vpop.f32.mrf.mxu2  ;;  %v1339_v62 = vadd.f32 %v8800_v7, %v8702_v36  ;;  %v1342_v7 = vadd.f32 %v8814_v42, %v8730_v58 }
 0x52c   :  { %v2101_v12 = vmax.f32 %v2029_v52, 0.0 }
 0x52e   :  { %v2163_v20 = vpack.c.bf16 %v2101_v12, %v2100_v10  ;;  %v1672_v10 = vmul.f32 0.999995, %v1339_v62 }
 0x52f   :  { %v1880_v24 = vpop.f32.mrf.mxu1 }
 0x530   :  { %2252 = vmatmul.bf16.gmra.mxu2 %v2163_v20  ;;  %v1881_v2 = vadd.f32 %v8855_v31, %v1880_v24  ;;  %v1745_v20 = vmax.f32 %v1673_v54, 0.0  ;;  %v1744_v11 = vmax.f32 %v1672_v10, 0.0  ;;  %v1343_v10 = vadd.f32 %v8819_v1, %v8754_v25 }
 0x531   :  { %1919 = vmatmul.bf16.gmra.mxu1 %v1794_v32 }
 0x532   :  { %v8963_v29 = vpop.f32.mrf.mxu2  ;;  %v2030_v55 = vmul.f32 0.999995, %v1881_v2  ;;  %v1796_v2 = vpack.c.bf16 %v1745_v20, %v1744_v11  ;;  %v1677_v20 = vmul.f32 0.999995, %v1344_v38 }
 0x534   :  { %v2102_v61 = vmax.f32 %v2030_v55, 0.0 }
 0x537   :  { %v1882_v39 = vpop.f32.mrf.mxu1 }
 0x538   :  { %v1883_v35 = vadd.f32 %v8855_v31, %v1882_v39 }
 0x53a   :  { %v2031_v41 = vmul.f32 0.999995, %v1883_v35  ;;  %v8969_v57 = vpop.f32.mrf.mxu2  ;;  %v1675_v35 = vmul.f32 0.999995, %v1342_v7 }
 0x53c   :  { %v2103_v48 = vmax.f32 %v2031_v41, 0.0  ;;  %v1747_v40 = vmax.f32 %v1675_v35, 0.0 }
 0x53e   :  { %v2164_v6 = vpack.c.bf16 %v2103_v48, %v2102_v61 }
 0x53f   :  { %v1885_v33 = vpop.f32.mrf.mxu1 }
 0x540   :  { %2257 = vmatmul.bf16.gmra.mxu2 %v2164_v6  ;;  %v1886_v60 = vadd.f32 %v8855_v31, %v1885_v33 }
 0x541   :  { %1924 = vmatmul.bf16.gmra.mxu1 %v1795_v51  ;;  %v1746_v51 = vmax.f32 %v1674_v44, 0.0 }
 0x542   :  { %v8971_v34 = vpop.f32.mrf.mxu2  ;;  %v2032_v52 = vmul.f32 0.999995, %v1886_v60  ;;  %v8991_v60 = vld [vmem:[#allocation2 + $0x128] ss:$0 sm:$0xff] }
 0x543   :  { %v1797_v62 = vpack.c.bf16 %v1747_v40, %v1746_v51  ;;  %v2209_v54 = vadd.f32 %v8991_v60, %v8953_v13  ;;  %v2211_v13 = vadd.f32 %v8991_v60, %v8961_v5  ;;  %v1346_v40 = vadd.f32 %v8848_v23, %v8787_v22 }
 0x544   :  { %v2104_v24 = vmax.f32 %v2032_v52, 0.0 }
 0x545   :  { %v1679_v23 = vmul.f32 0.999995, %v1346_v40 }
 0x547   :  { %v1887_v27 = vpop.f32.mrf.mxu1 }
 0x548   :  { %v1888_v37 = vadd.f32 %v8855_v31, %v1887_v27 }
 0x54a   :  { %v2033_v12 = vmul.f32 0.999995, %v1888_v37  ;;  %v8979_v15 = vpop.f32.mrf.mxu2 }
 0x54c   :  { %v2105_v32 = vmax.f32 %v2033_v12, 0.0 }
 0x54e   :  { %v2165_v43 = vpack.c.bf16 %v2105_v32, %v2104_v24 }
 0x54f   :  { %v1890_v19 = vpop.f32.mrf.mxu1 }
 0x550   :  { %2262 = vmatmul.bf16.gmra.mxu2 %v2165_v43  ;;  %v1891_v39 = vadd.f32 %v8855_v31, %v1890_v19  ;;  %v1676_v43 = vmul.f32 0.999995, %v1343_v10  ;;  %v1749_v19 = vmax.f32 %v1677_v20, 0.0  ;;  %v2216_v20 = vadd.f32 %v8991_v60, %v8969_v57 }
 0x551   :  { %1929 = vmatmul.bf16.gmra.mxu1 %v1796_v2 }
 0x552   :  { %v8981_v21 = vpop.f32.mrf.mxu2  ;;  %v2034_v49 = vmul.f32 0.999995, %v1891_v39 }
 0x554   :  { %v2106_v6 = vmax.f32 %v2034_v49, 0.0 }
 0x557   :  { %v1892_v55 = vpop.f32.mrf.mxu1 }
 0x558   :  { %v1893_v41 = vadd.f32 %v8855_v31, %v1892_v55  ;;  %v1748_v55 = vmax.f32 %v1676_v43, 0.0 }
 0x55a   :  { %v2035_v61 = vmul.f32 0.999995, %v1893_v41  ;;  %v8989_v48 = vpop.f32.mrf.mxu2  ;;  %v1798_v44 = vpack.c.bf16 %v1749_v19, %v1748_v55  ;;  %v1420_v55 = vadd.f32 %v8896_v47, %v8702_v36 }
 0x55c   :  { %v2107_v33 = vmax.f32 %v2035_v61, 0.0  ;;  %v1680_v40 = vmul.f32 0.999995, %v1420_v55 }
 0x55e   :  { %v2166_v53 = vpack.c.bf16 %v2107_v33, %v2106_v6  ;;  %v2214_v6 = vadd.f32 %v8991_v60, %v8963_v29 }
 0x55f   :  { %v1895_v42 = vpop.f32.mrf.mxu1 }
 0x560   :  { %2267 = vmatmul.bf16.gmra.mxu2 %v2166_v53  ;;  %v1896_v52 = vadd.f32 %v8855_v31, %v1895_v42  ;;  %v1345_v42 = vadd.f32 %v8831_v0, %v8782_v50 }
 0x561   :  { %1934 = vmatmul.bf16.gmra.mxu1 %v1797_v62 }
 0x562   :  { %v2228_v27 = vpop.f32.mrf.mxu2  ;;  %v2036_v32 = vmul.f32 0.999995, %v1896_v52  ;;  %v1678_v52 = vmul.f32 0.999995, %v1345_v42  ;;  %v1752_v42 = vmax.f32 %v1680_v40, 0.0 }
 0x563   :  { %v2229_v37 = vadd.f32 %v8991_v60, %v2228_v27 }
 0x564   :  { %v2108_v7 = vmax.f32 %v2036_v32, 0.0  ;;  %v1750_v43 = vmax.f32 %v1678_v52, 0.0 }
 0x565   :  { %v9001_v12 = vadd.f32 %v2229_v37, %v2209_v54  ;;  %v1751_v37 = vmax.f32 %v1679_v23, 0.0 }
 0x567   :  { %v1897_v24 = vpop.f32.mrf.mxu1 }
 0x568   :  { %v1898_v11 = vadd.f32 %v8855_v31, %v1897_v24 }
 0x56a   :  { %v2037_v16 = vmul.f32 0.999995, %v1898_v11  ;;  %v2230_v2 = vpop.f32.mrf.mxu2 }
 0x56b   :  { %v2231_v56 = vadd.f32 %v8991_v60, %v2230_v2  ;;  %v1799_v2 = vpack.c.bf16 %v1751_v37, %v1750_v43 }
 0x56c   :  { %v2109_v39 = vmax.f32 %v2037_v16, 0.0 }
 0x56d   :  { %v9007_v1 = vadd.f32 %v2231_v56, %v2211_v13  ;;  %v1421_v13 = vadd.f32 %v8899_v45, %v8689_v30 }
 0x56e   :  { %v2167_v35 = vpack.c.bf16 %v2109_v39, %v2108_v7  ;;  %v2219_v39 = vadd.f32 %v8991_v60, %v8971_v34  ;;  %v2221_v34 = vadd.f32 %v8991_v60, %v8979_v15 }
 0x56f   :  { %v1900_v49 = vpop.f32.mrf.mxu1  ;;  %v844_v41 = vpop.xlane.xlu0 %843 }
 0x570   :  { %2272 = vmatmul.bf16.gmra.mxu2 %v2167_v35  ;;  %v860_v61 = vand.u32 127, %v844_v41  ;;  %v1901_v33 = vadd.f32 %v8855_v31, %v1900_v49  ;;  %v1681_v49 = vmul.f32 0.999995, %v1421_v13 }
 0x571   :  { %1939 = vmatmul.bf16.gmra.mxu1 %v1798_v44 }
 0x572   :  { %vm1516_vm4 = vcmp.eq.s32.totalorder %v8149_v26, %v860_v61  ;;  %v2233_v5 = vpop.f32.mrf.mxu2  ;;  %v2038_v27 = vmul.f32 0.999995, %v1901_v33 }
 0x573   :  { %v2234_v51 = vadd.f32 %v8991_v60, %v2233_v5  ;;  %v1524_v53 = vsel %vm1516_vm4, 1.0, %v12549_v3  ;;  %v1753_v5 = vmax.f32 %v1681_v49, 0.0 }
 0x574   :  { %7519 = vmatmul.msk.f32.gmra.mxu0 %vm372_vm3, %v1524_v53  ;;  %v2110_v24 = vmax.f32 %v2038_v27, 0.0 }
 0x575   :  { %v9020_v62 = vadd.f32 %v2234_v51, %v2214_v6  ;;  %v1800_v27 = vpack.c.bf16 %v1753_v5, %v1752_v42  ;;  %v1477_v42 = vpop.f32.mrf.mxu3 }
 0x577   :  { %v1902_v38 = vpop.f32.mrf.mxu1 }
 0x578   :  { %v1903_v54 = vadd.f32 %v8855_v31, %v1902_v38 }
 0x57a   :  { %v2039_v29 = vmul.f32 0.999995, %v1903_v54  ;;  %v2235_v10 = vpop.f32.mrf.mxu2  ;;  %v1423_v54 = vadd.f32 %v8911_v46, %v8730_v58 }
 0x57b   :  { %v2236_v11 = vadd.f32 %v8991_v60, %v2235_v10  ;;  %v1422_v10 = vadd.f32 %v8905_v63, %v8726_v8 }
 0x57c   :  { %v2111_v32 = vmax.f32 %v2039_v29, 0.0  ;;  %v2224_v29 = vadd.f32 %v8991_v60, %v8981_v21  ;;  %v2226_v21 = vadd.f32 %v8991_v60, %v8989_v48  ;;  %v1424_v48 = vadd.f32 %v8924_v18, %v8754_v25 }
 0x57d   :  { %v9026_v0 = vadd.f32 %v2236_v11, %v2216_v20 }
 0x57e   :  { %v2168_v16 = vpack.c.bf16 %v2111_v32, %v2110_v24  ;;  %v1683_v24 = vmul.f32 0.999995, %v1423_v54 }
 0x57f   :  { %v1905_v19 = vpop.f32.mrf.mxu1 }
 0x580   :  { %2277 = vmatmul.bf16.gmra.mxu2 %v2168_v16  ;;  %v1906_v57 = vadd.f32 %v8855_v31, %v1905_v19  ;;  %v1682_v16 = vmul.f32 0.999995, %v1422_v10  ;;  %v1755_v19 = vmax.f32 %v1683_v24, 0.0  ;;  %v1480_v10 = vpop.f32.mrf.mxu3 }
 0x581   :  { %1944 = vmatmul.bf16.gmra.mxu1 %v1799_v2 }
 0x582   :  { %v2040_v44 = vmul.f32 0.999995, %v1906_v57  ;;  %v1754_v57 = vmax.f32 %v1682_v16, 0.0 }
 0x583   :  { %v2238_v7 = vpop.f32.mrf.mxu2 }
 0x584   :  { %v2239_v56 = vadd.f32 %v8991_v60, %v2238_v7  ;;  %v2112_v33 = vmax.f32 %v2040_v44, 0.0  ;;  %v1801_v49 = vpack.c.bf16 %v1755_v19, %v1754_v57  ;;  %v1425_v44 = vadd.f32 %v8933_v4, %v8761_v14 }
 0x586   :  { %v9036_v35 = vadd.f32 %v2239_v56, %v2219_v39 }
 0x587   :  { %v1907_v41 = vpop.f32.mrf.mxu1 }
 0x588   :  { %v1908_v61 = vadd.f32 %v8855_v31, %v1907_v41  ;;  %v1483_v57 = vpop.f32.mrf.mxu3 }
 0x58a   :  { %v2041_v45 = vmul.f32 0.999995, %v1908_v61 }
 0x58b   :  { %v2240_v6 = vpop.f32.mrf.mxu2 }
 0x58c   :  { %v2113_v51 = vmax.f32 %v2041_v45, 0.0  ;;  %v2241_v53 = vadd.f32 %v8991_v60, %v2240_v6  ;;  %v1685_v45 = vmul.f32 0.999995, %v1425_v44  ;;  %v1501_v44 = vadd.f32 %v1477_v42, %v8702_v36 }
 0x58e   :  { %v9042_v47 = vadd.f32 %v2241_v53, %v2221_v34  ;;  %v2169_v23 = vpack.c.bf16 %v2113_v51, %v2112_v33  ;;  %v1684_v34 = vmul.f32 0.999995, %v1424_v48  ;;  %v1757_v53 = vmax.f32 %v1685_v45, 0.0 }
 0x58f   :  { %v1910_v38 = vpop.f32.mrf.mxu1 }
 0x590   :  { %2282 = vmatmul.bf16.gmra.mxu2 %v2169_v23  ;;  %v1911_v15 = vadd.f32 %v8855_v31, %v1910_v38 }
 0x591   :  { %1949 = vmatmul.bf16.gmra.mxu1 %v1800_v27  ;;  %v1756_v27 = vmax.f32 %v1684_v34, 0.0 }
 0x592   :  { %v2042_v11 = vmul.f32 0.999995, %v1911_v15 }
 0x593   :  { %v2243_v52 = vpop.f32.mrf.mxu2 }
 0x594   :  { %v2244_v37 = vadd.f32 %v8991_v60, %v2243_v52  ;;  %v2114_v13 = vmax.f32 %v2042_v11, 0.0  ;;  %v1802_v52 = vpack.c.bf16 %v1757_v53, %v1756_v27 }
 0x596   :  { %v9052_v20 = vadd.f32 %v2244_v37, %v2224_v29  ;;  %v1427_v29 = vadd.f32 %v8949_v59, %v8787_v22  ;;  %v1426_v37 = vadd.f32 %v8939_v28, %v8782_v50 }
 0x597   :  { %v1912_v32 = vpop.f32.mrf.mxu1 }
 0x598   :  { %v1913_v43 = vadd.f32 %v8855_v31, %v1912_v32  ;;  %v1687_v32 = vmul.f32 0.999995, %v1427_v29  ;;  %v1686_v16 = vmul.f32 0.999995, %v1426_v37 }
 0x59a   :  { %v2043_v46 = vmul.f32 0.999995, %v1913_v43 }
 0x59b   :  { %v2245_v2 = vpop.f32.mrf.mxu2 }
 0x59c   :  { %v2115_v7 = vmax.f32 %v2043_v46, 0.0  ;;  %v2246_v39 = vadd.f32 %v8991_v60, %v2245_v2  ;;  %v1759_v2 = vmax.f32 %v1687_v32, 0.0 }
 0x59e   :  { %v9058_v63 = vadd.f32 %v2246_v39, %v2226_v21  ;;  %v2170_v56 = vpack.c.bf16 %v2115_v7, %v2114_v13  ;;  %v1758_v7 = vmax.f32 %v1686_v16, 0.0 }
 0x59f   :  { %v1915_v55 = vpop.f32.mrf.mxu1 }
 0x5a0   :  { %2287 = vmatmul.bf16.gmra.mxu2 %v2170_v56  ;;  %v1916_v61 = vadd.f32 %v8855_v31, %v1915_v55  ;;  %v1803_v56 = vpack.c.bf16 %v1759_v2, %v1758_v7  ;;  %v1502_v55 = vadd.f32 %v1480_v10, %v8689_v30  ;;  %v1503_v10 = vadd.f32 %v1483_v57, %v8726_v8 }
 0x5a1   :  { %1954 = vmatmul.bf16.gmra.mxu1 %v1801_v49 }
 0x5a2   :  { %v2044_v5 = vmul.f32 0.999995, %v1916_v61  ;;  %v1689_v48 = vmul.f32 0.999995, %v1502_v55  ;;  %v1690_v16 = vmul.f32 0.999995, %v1503_v10 }
 0x5a3   :  { %v9060_v41 = vpop.f32.mrf.mxu2 }
 0x5a4   :  { %v2116_v23 = vmax.f32 %v2044_v5, 0.0  ;;  %v1688_v5 = vmul.f32 0.999995, %v1501_v44  ;;  %v1761_v53 = vmax.f32 %v1689_v48, 0.0 }
 0x5a6   :  { %v1760_v27 = vmax.f32 %v1688_v5, 0.0 }
 0x5a7   :  { %v1917_v40 = vpop.f32.mrf.mxu1 }
 0x5a8   :  { %v1918_v6 = vadd.f32 %v8855_v31, %v1917_v40 }
 0x5aa   :  { %v2045_v33 = vmul.f32 0.999995, %v1918_v6  ;;  %v1486_v6 = vpop.f32.mrf.mxu3 }
 0x5ab   :  { %v9068_v51 = vpop.f32.mrf.mxu2  ;;  %v1504_v29 = vadd.f32 %v1486_v6, %v8730_v58 }
 0x5ac   :  { %v2117_v38 = vmax.f32 %v2045_v33, 0.0 }
 0x5ad   :  { %v1691_v32 = vmul.f32 0.999995, %v1504_v29  ;;  %v2251_v29 = vadd.f32 %v8991_v60, %v9068_v51 }
 0x5ae   :  { %v2171_v4 = vpack.c.bf16 %v2117_v38, %v2116_v23 }
 0x5af   :  { %v1920_v54 = vpop.f32.mrf.mxu1 }
 0x5b0   :  { %2292 = vmatmul.bf16.gmra.mxu2 %v2171_v4  ;;  %v1921_v15 = vadd.f32 %v8855_v31, %v1920_v54 }
 0x5b1   :  { %1959 = vmatmul.bf16.gmra.mxu1 %v1802_v52  ;;  %v1804_v52 = vpack.c.bf16 %v1761_v53, %v1760_v27 }
 0x5b2   :  { %v2046_v11 = vmul.f32 0.999995, %v1921_v15  ;;  %v1489_v15 = vpop.f32.mrf.mxu3 }
 0x5b3   :  { %v9070_v18 = vpop.f32.mrf.mxu2 }
 0x5b4   :  { %v2118_v21 = vmax.f32 %v2046_v11, 0.0  ;;  %v2254_v51 = vadd.f32 %v8991_v60, %v9070_v18 }
 0x5b7   :  { %v1922_v24 = vpop.f32.mrf.mxu1 }
 0x5b8   :  { %v1923_v43 = vadd.f32 %v8855_v31, %v1922_v24 }
 0x5ba   :  { %v2047_v46 = vmul.f32 0.999995, %v1923_v43 }
 0x5bb   :  { %v9078_v19 = vpop.f32.mrf.mxu2 }
 0x5bc   :  { %v2119_v13 = vmax.f32 %v2047_v46, 0.0 }
 0x5be   :  { %v2172_v59 = vpack.c.bf16 %v2119_v13, %v2118_v21  ;;  %v1763_v21 = vmax.f32 %v1691_v32, 0.0 }
 0x5bf   :  { %v1925_v39 = vpop.f32.mrf.mxu1 }
 0x5c0   :  { %2297 = vmatmul.bf16.gmra.mxu2 %v2172_v59  ;;  %v1926_v49 = vadd.f32 %v8855_v31, %v1925_v39  ;;  %v1762_v59 = vmax.f32 %v1690_v16, 0.0  ;;  %v1492_v39 = vpop.f32.mrf.mxu3 }
 0x5c1   :  { %1964 = vmatmul.bf16.gmra.mxu1 %v1803_v56  ;;  %v1506_v57 = vadd.f32 %v1492_v39, %v8761_v14 }
 0x5c2   :  { %v2048_v40 = vmul.f32 0.999995, %v1926_v49  ;;  %v1805_v49 = vpack.c.bf16 %v1763_v21, %v1762_v59 }
 0x5c3   :  { %v9080_v28 = vpop.f32.mrf.mxu2  ;;  %v1693_v6 = vmul.f32 0.999995, %v1506_v57 }
 0x5c4   :  { %v2120_v23 = vmax.f32 %v2048_v40, 0.0 }
 0x5c7   :  { %v1927_v61 = vpop.f32.mrf.mxu1 }
 0x5c8   :  { %v1928_v45 = vadd.f32 %v8855_v31, %v1927_v61  ;;  %v9091_v31 = vld [vmem:[#allocation2 + $0xa0] ss:$0 sm:$0xff]  ;;  %v2249_v61 = vadd.f32 %v8991_v60, %v9060_v41  ;;  %v1495_v53 = vpop.f32.mrf.mxu3 }
 0x5ca   :  { %v2049_v34 = vmul.f32 0.999995, %v1928_v45  ;;  %v1505_v45 = vadd.f32 %v1489_v15, %v8754_v25 }
 0x5cb   :  { %v9086_v33 = vpop.f32.mrf.mxu2 }
 0x5cc   :  { %v2121_v38 = vmax.f32 %v2049_v34, 0.0 }
 0x5ce   :  { %v2173_v4 = vpack.c.bf16 %v2121_v38, %v2120_v23 }
 0x5cf   :  { %v1930_v54 = vpop.f32.mrf.mxu1 }
 0x5d0   :  { %2302 = vmatmul.bf16.gmra.mxu2 %v2173_v4  ;;  %v1931_v37 = vadd.f32 %v9091_v31, %v1930_v54  ;;  %v1692_v4 = vmul.f32 0.999995, %v1505_v45 }
 0x5d1   :  { %1969 = vmatmul.bf16.gmra.mxu1 %v1804_v52  ;;  %v1765_v52 = vmax.f32 %v1693_v6, 0.0  ;;  %v2256_v6 = vadd.f32 %v8991_v60, %v9078_v19  ;;  %v2259_v19 = vadd.f32 %v8991_v60, %v9080_v28 }
 0x5d2   :  { %v2050_v11 = vmul.f32 0.999995, %v1931_v37  ;;  %v1764_v32 = vmax.f32 %v1692_v4, 0.0 }
 0x5d3   :  { %v9088_v42 = vpop.f32.mrf.mxu2 }
 0x5d4   :  { %v2122_v13 = vmax.f32 %v2050_v11, 0.0  ;;  %v1806_v21 = vpack.c.bf16 %v1765_v52, %v1764_v32 }
 0x5d7   :  { %v1932_v24 = vpop.f32.mrf.mxu1 }
 0x5d8   :  { %v1933_v43 = vadd.f32 %v9091_v31, %v1932_v24  ;;  %v1566_v24 = vpop.f32.mrf.mxu0 }
 0x5da   :  { %v2051_v46 = vmul.f32 0.999995, %v1933_v43 }
 0x5db   :  { %v9096_v2 = vpop.f32.mrf.mxu2 }
 0x5dc   :  { %v2123_v7 = vmax.f32 %v2051_v46, 0.0 }
 0x5de   :  { %v2174_v56 = vpack.c.bf16 %v2123_v7, %v2122_v13 }
 0x5df   :  { %v1935_v55 = vpop.f32.mrf.mxu1 }
 0x5e0   :  { %2307 = vmatmul.bf16.gmra.mxu2 %v2174_v56  ;;  %v1936_v48 = vadd.f32 %v9091_v31, %v1935_v55  ;;  %v1507_v56 = vadd.f32 %v1495_v53, %v8782_v50 }
 0x5e1   :  { %1974 = vmatmul.bf16.gmra.mxu1 %v1805_v49  ;;  %v1569_v49 = vpop.f32.mrf.mxu0 }
 0x5e2   :  { %v2052_v23 = vmul.f32 0.999995, %v1936_v48 }
 0x5e3   :  { %v2268_v44 = vpop.f32.mrf.mxu2 }
 0x5e4   :  { %v2269_v40 = vadd.f32 %v8991_v60, %v2268_v44  ;;  %v2124_v37 = vmax.f32 %v2052_v23, 0.0 }
 0x5e6   :  { %v2396_v5 = vadd.f32 %v2269_v40, %v2249_v61  ;;  %v1694_v40 = vmul.f32 0.999995, %v1507_v56 }
 0x5e7   :  { %v1937_v34 = vpop.f32.mrf.mxu1 }
 0x5e8   :  { %v9105_v38 = vadd.f32 %v2396_v5, %v9001_v12  ;;  %v1938_v27 = vadd.f32 %v9091_v31, %v1937_v34  ;;  %v1498_v12 = vpop.f32.mrf.mxu3 }
 0x5e9   :  { %v1508_v13 = vadd.f32 %v1498_v12, %v8787_v22 }
 0x5ea   :  { %v2053_v54 = vmul.f32 0.999995, %v1938_v27  ;;  %v1766_v27 = vmax.f32 %v1694_v40, 0.0 }
 0x5eb   :  { %v2270_v41 = vpop.f32.mrf.mxu2  ;;  %v1695_v57 = vmul.f32 0.999995, %v1508_v13 }
 0x5ec   :  { %v2125_v10 = vmax.f32 %v2053_v54, 0.0  ;;  %v2271_v15 = vadd.f32 %v8991_v60, %v2270_v41 }
 0x5ed   :  { %v1767_v5 = vmax.f32 %v1695_v57, 0.0 }
 0x5ee   :  { %v2397_v11 = vadd.f32 %v2271_v15, %v2251_v29  ;;  %v2175_v43 = vpack.c.bf16 %v2125_v10, %v2124_v37  ;;  %v1572_v29 = vpop.f32.mrf.mxu0  ;;  %v1591_v37 = vadd.f32 %v1569_v49, %v8689_v30 }
 0x5ef   :  { %v1940_v16 = vpop.f32.mrf.mxu1  ;;  %v1807_v41 = vpack.c.bf16 %v1767_v5, %v1766_v27 }
 0x5f0   :  { %v9112_v46 = vadd.f32 %v2397_v11, %v9007_v1  ;;  %2312 = vmatmul.bf16.gmra.mxu2 %v2175_v43  ;;  %v1941_v59 = vadd.f32 %v9091_v31, %v1940_v16  ;;  %v1590_v11 = vadd.f32 %v1566_v24, %v8702_v36  ;;  %v1697_v16 = vmul.f32 0.999995, %v1591_v37 }
 0x5f1   :  { %1979 = vmatmul.bf16.gmra.mxu1 %v1806_v21 }
 0x5f2   :  { %v2054_v44 = vmul.f32 0.999995, %v1941_v59  ;;  %v1696_v30 = vmul.f32 0.999995, %v1590_v11 }
 0x5f3   :  { %v2273_v7 = vpop.f32.mrf.mxu2 }
 0x5f4   :  { %v2274_v39 = vadd.f32 %v8991_v60, %v2273_v7  ;;  %v2126_v34 = vmax.f32 %v2054_v44, 0.0  ;;  %v1768_v24 = vmax.f32 %v1696_v30, 0.0 }
 0x5f6   :  { %v2398_v55 = vadd.f32 %v2274_v39, %v2254_v51  ;;  %v1769_v51 = vmax.f32 %v1697_v16, 0.0  ;;  %v1575_v59 = vpop.f32.mrf.mxu0  ;;  %v2261_v39 = vadd.f32 %v8991_v60, %v9086_v33  ;;  %v2264_v33 = vadd.f32 %v8991_v60, %v9088_v42 }
 0x5f7   :  { %v1942_v1 = vpop.f32.mrf.mxu1 }
 0x5f8   :  { %v9121_v61 = vadd.f32 %v2398_v55, %v9020_v62  ;;  %v1943_v48 = vadd.f32 %v9091_v31, %v1942_v1  ;;  %v1808_v44 = vpack.c.bf16 %v1769_v51, %v1768_v24 }
 0x5fa   :  { %v2055_v45 = vmul.f32 0.999995, %v1943_v48  ;;  %v1593_v48 = vadd.f32 %v1575_v59, %v8730_v58 }
 0x5fb   :  { %v2275_v18 = vpop.f32.mrf.mxu2 }
 0x5fc   :  { %v2127_v23 = vmax.f32 %v2055_v45, 0.0  ;;  %v2276_v53 = vadd.f32 %v8991_v60, %v2275_v18 }
 0x5fe   :  { %v2399_v4 = vadd.f32 %v2276_v53, %v2256_v6  ;;  %v2176_v54 = vpack.c.bf16 %v2127_v23, %v2126_v34  ;;  %v1578_v18 = vpop.f32.mrf.mxu0  ;;  %v1592_v6 = vadd.f32 %v1572_v29, %v8726_v8  ;;  %v1699_v23 = vmul.f32 0.999995, %v1593_v48 }
 0x5ff   :  { %v1945_v52 = vpop.f32.mrf.mxu1 }
 0x600   :  { %v9128_v62 = vadd.f32 %v2399_v4, %v9026_v0  ;;  %2317 = vmatmul.bf16.gmra.mxu2 %v2176_v54  ;;  %v1946_v15 = vadd.f32 %v9091_v31, %v1945_v52  ;;  %v1698_v4 = vmul.f32 0.999995, %v1592_v6  ;;  %v1771_v52 = vmax.f32 %v1699_v23, 0.0 }
 0x601   :  { %1984 = vmatmul.bf16.gmra.mxu1 %v1807_v41  ;;  %v2266_v41 = vadd.f32 %v8991_v60, %v9096_v2 }
 0x602   :  { %v2056_v12 = vmul.f32 0.999995, %v1946_v15  ;;  %v1770_v29 = vmax.f32 %v1698_v4, 0.0 }
 0x603   :  { %v2278_v10 = vpop.f32.mrf.mxu2 }
 0x604   :  { %v2279_v32 = vadd.f32 %v8991_v60, %v2278_v10  ;;  %v2128_v56 = vmax.f32 %v2056_v12, 0.0  ;;  %v1594_v12 = vadd.f32 %v1578_v18, %v8754_v25 }
 0x606   :  { %v2400_v43 = vadd.f32 %v2279_v32, %v2259_v19  ;;  %v1581_v32 = vpop.f32.mrf.mxu0 }
 0x607   :  { %v1947_v0 = vpop.f32.mrf.mxu1 }
 0x608   :  { %v9137_v21 = vadd.f32 %v2400_v43, %v9036_v35  ;;  %v1948_v13 = vadd.f32 %v9091_v31, %v1947_v0  ;;  %v1809_v43 = vpack.c.bf16 %v1771_v52, %v1770_v29  ;;  %v1595_v0 = vadd.f32 %v1581_v32, %v8761_v14 }
 0x60a   :  { %v2057_v7 = vmul.f32 0.999995, %v1948_v13  ;;  %v1701_v30 = vmul.f32 0.999995, %v1595_v0 }
 0x60b   :  { %v2280_v28 = vpop.f32.mrf.mxu2 }
 0x60c   :  { %v2129_v55 = vmax.f32 %v2057_v7, 0.0  ;;  %v2281_v36 = vadd.f32 %v8991_v60, %v2280_v28  ;;  %v1700_v28 = vmul.f32 0.999995, %v1594_v12 }
 0x60e   :  { %v2401_v49 = vadd.f32 %v2281_v36, %v2261_v39  ;;  %v2177_v57 = vpack.c.bf16 %v2129_v55, %v2128_v56  ;;  %v1584_v59 = vpop.f32.mrf.mxu0  ;;  %v1773_v56 = vmax.f32 %v1701_v30, 0.0  ;;  %v1772_v24 = vmax.f32 %v1700_v28, 0.0 }
 0x60f   :  { %v1950_v1 = vpop.f32.mrf.mxu1 }
 0x610   :  { %v9144_v35 = vadd.f32 %v2401_v49, %v9042_v47  ;;  %2322 = vmatmul.bf16.gmra.mxu2 %v2177_v57  ;;  %v1951_v45 = vadd.f32 %v9091_v31, %v1950_v1  ;;  %v1810_v57 = vpack.c.bf16 %v1773_v56, %v1772_v24 }
 0x611   :  { %1989 = vmatmul.bf16.gmra.mxu1 %v1808_v44 }
 0x612   :  { %v2058_v53 = vmul.f32 0.999995, %v1951_v45 }
 0x613   :  { %v2283_v40 = vpop.f32.mrf.mxu2 }
 0x614   :  { %v2284_v5 = vadd.f32 %v8991_v60, %v2283_v40  ;;  %v2130_v37 = vmax.f32 %v2058_v53, 0.0  ;;  %v1596_v40 = vadd.f32 %v1584_v59, %v8782_v50 }
 0x616   :  { %v2402_v34 = vadd.f32 %v2284_v5, %v2264_v33  ;;  %v1587_v1 = vpop.f32.mrf.mxu0  ;;  %v1702_v6 = vmul.f32 0.999995, %v1596_v40 }
 0x617   :  { %v1952_v47 = vpop.f32.mrf.mxu1  ;;  %v1597_v44 = vadd.f32 %v1587_v1, %v8787_v22 }
 0x618   :  { %v9153_v27 = vadd.f32 %v2402_v34, %v9052_v20  ;;  %v1953_v58 = vadd.f32 %v9091_v31, %v1952_v47  ;;  %v1774_v4 = vmax.f32 %v1702_v6, 0.0 }
 0x619   :  { %v1703_v45 = vmul.f32 0.999995, %v1597_v44 }
 0x61a   :  { %v2059_v54 = vmul.f32 0.999995, %v1953_v58 }
 0x61b   :  { %v2285_v42 = vpop.f32.mrf.mxu2  ;;  %v1775_v47 = vmax.f32 %v1703_v45, 0.0 }
 0x61c   :  { %v2131_v10 = vmax.f32 %v2059_v54, 0.0  ;;  %v2286_v8 = vadd.f32 %v8991_v60, %v2285_v42 }
 0x61d   :  { %v1811_v22 = vpack.c.bf16 %v1775_v47, %v1774_v4 }
 0x61e   :  { %v2403_v19 = vadd.f32 %v2286_v8, %v2266_v41  ;;  %v2178_v15 = vpack.c.bf16 %v2131_v10, %v2130_v37 }
 0x61f   :  { %v1955_v11 = vpop.f32.mrf.mxu1 }
 0x620   :  { %v9160_v20 = vadd.f32 %v2403_v19, %v9058_v63  ;;  %2327 = vmatmul.bf16.gmra.mxu2 %v2178_v15  ;;  %v1956_v2 = vadd.f32 %v9091_v31, %v1955_v11 }
 0x621   :  { %1994 = vmatmul.bf16.gmra.mxu1 %v1809_v43 }
 0x622   :  { %v2060_v7 = vmul.f32 0.999995, %v1956_v2 }
 0x623   :  { %v9162_v16 = vpop.f32.mrf.mxu2 }
 0x624   :  { %v2132_v55 = vmax.f32 %v2060_v7, 0.0 }
 0x627   :  { %v1957_v13 = vpop.f32.mrf.mxu1 }
 0x628   :  { %v1958_v51 = vadd.f32 %v9091_v31, %v1957_v13 }
 0x62a   :  { %v2061_v63 = vmul.f32 0.999995, %v1958_v51 }
 0x62b   :  { %v9168_v39 = vpop.f32.mrf.mxu2 }
 0x62c   :  { %v2133_v36 = vmax.f32 %v2061_v63, 0.0  ;;  %v2291_v40 = vadd.f32 %v8991_v60, %v9168_v39 }
 0x62e   :  { %v2179_v49 = vpack.c.bf16 %v2133_v36, %v2132_v55  ;;  %v2289_v55 = vadd.f32 %v8991_v60, %v9162_v16 }
 0x62f   :  { %v1960_v14 = vpop.f32.mrf.mxu1 }
 0x630   :  { %2332 = vmatmul.bf16.gmra.mxu2 %v2179_v49  ;;  %v1961_v48 = vadd.f32 %v9091_v31, %v1960_v14 }
 0x631   :  { %1999 = vmatmul.bf16.gmra.mxu1 %v1810_v57 }
 0x632   :  { %v2062_v5 = vmul.f32 0.999995, %v1961_v48 }
 0x633   :  { %v9170_v25 = vpop.f32.mrf.mxu2 }
 0x634   :  { %v2134_v53 = vmax.f32 %v2062_v5, 0.0  ;;  %v2294_v47 = vadd.f32 %v8991_v60, %v9170_v25 }
 0x637   :  { %v1962_v33 = vpop.f32.mrf.mxu1 }
 0x638   :  { %v1963_v18 = vadd.f32 %v9091_v31, %v1962_v33 }
 0x63a   :  { %v2063_v34 = vmul.f32 0.999995, %v1963_v18 }
 0x63b   :  { %v2295_v23 = vpop.f32.mrf.mxu2 }
 0x63c   :  { %v2135_v58 = vmax.f32 %v2063_v34, 0.0 }
 0x63e   :  { %v2180_v54 = vpack.c.bf16 %v2135_v58, %v2134_v53 }
 0x63f   :  { %v1965_v52 = vpop.f32.mrf.mxu1 }
 0x640   :  { %2337 = vmatmul.bf16.gmra.mxu2 %v2180_v54  ;;  %v1966_v50 = vadd.f32 %v9091_v31, %v1965_v52 }
 0x641   :  { %2004 = vmatmul.bf16.gmra.mxu1 %v1811_v22 }
 0x642   :  { %v2064_v37 = vmul.f32 0.999995, %v1966_v50 }
 0x643   :  { %v2298_v42 = vpop.f32.mrf.mxu2 }
 0x644   :  { %v2136_v19 = vmax.f32 %v2064_v37, 0.0 }
 0x647   :  { %v1967_v41 = vpop.f32.mrf.mxu1 }
 0x648   :  { %v1968_v10 = vadd.f32 %v9091_v31, %v1967_v41  ;;  %v2296_v41 = vadd.f32 %v8991_v60, %v2295_v23 }
 0x64a   :  { %v2065_v8 = vmul.f32 0.999995, %v1968_v10 }
 0x64b   :  { %v9178_v29 = vpop.f32.mrf.mxu2 }
 0x64c   :  { %v2137_v15 = vmax.f32 %v2065_v8, 0.0 }
 0x64e   :  { %v2181_v32 = vpack.c.bf16 %v2137_v15, %v2136_v19 }
 0x64f   :  { %v1970_v11 = vpop.f32.mrf.mxu1 }
 0x650   :  { %2342 = vmatmul.bf16.gmra.mxu2 %v2181_v32  ;;  %v1971_v0 = vadd.f32 %v9091_v31, %v1970_v11  ;;  %v2299_v11 = vadd.f32 %v8991_v60, %v2298_v42 }
 0x652   :  { %v2066_v12 = vmul.f32 0.999995, %v1971_v0 }
 0x653   :  { %v9180_v43 = vpop.f32.mrf.mxu2 }
 0x654   :  { %v2138_v51 = vmax.f32 %v2066_v12, 0.0 }
 0x657   :  { %v1972_v2 = vpop.f32.mrf.mxu1 }
 0x658   :  { %v1973_v13 = vadd.f32 %v9091_v31, %v1972_v2 }
 0x65a   :  { %v2067_v30 = vmul.f32 0.999995, %v1973_v13 }
 0x65b   :  { %v9184_v7 = vpop.f32.mrf.mxu2 }
 0x65c   :  { %v2139_v59 = vmax.f32 %v2067_v30, 0.0 }
 0x65e   :  { %v2182_v28 = vpack.c.bf16 %v2139_v59, %v2138_v51 }
 0x65f   :  { %v1975_v63 = vpop.f32.mrf.mxu1 }
 0x660   :  { %2347 = vmatmul.bf16.gmra.mxu2 %v2182_v28  ;;  %v1976_v36 = vadd.f32 %v9091_v31, %v1975_v63  ;;  %v2301_v28 = vadd.f32 %v8991_v60, %v9178_v29 }
 0x662   :  { %v2068_v57 = vmul.f32 0.999995, %v1976_v36 }
 0x663   :  { %v2308_v56 = vpop.f32.mrf.mxu2 }
 0x664   :  { %v2309_v24 = vadd.f32 %v8991_v60, %v2308_v56  ;;  %v2140_v33 = vmax.f32 %v2068_v57, 0.0  ;;  %v2304_v57 = vadd.f32 %v8991_v60, %v9180_v43 }
 0x666   :  { %v9190_v49 = vadd.f32 %v2309_v24, %v2289_v55 }
 0x667   :  { %v1977_v14 = vpop.f32.mrf.mxu1 }
 0x668   :  { %v1978_v1 = vadd.f32 %v9091_v31, %v1977_v14 }
 0x66a   :  { %v2069_v44 = vmul.f32 0.999995, %v1978_v1 }
 0x66b   :  { %v2310_v48 = vpop.f32.mrf.mxu2 }
 0x66c   :  { %v2141_v45 = vmax.f32 %v2069_v44, 0.0  ;;  %v2311_v5 = vadd.f32 %v8991_v60, %v2310_v48 }
 0x66e   :  { %v9196_v16 = vadd.f32 %v2311_v5, %v2291_v40  ;;  %v2183_v18 = vpack.c.bf16 %v2141_v45, %v2140_v33 }
 0x66f   :  { %v1980_v6 = vpop.f32.mrf.mxu1 }
 0x670   :  { %2352 = vmatmul.bf16.gmra.mxu2 %v2183_v18  ;;  %v1981_v53 = vadd.f32 %v9091_v31, %v1980_v6  ;;  %v2306_v18 = vadd.f32 %v8991_v60, %v9184_v7 }
 0x672   :  { %v2070_v54 = vmul.f32 0.999995, %v1981_v53 }
 0x673   :  { %v2313_v34 = vpop.f32.mrf.mxu2 }
 0x674   :  { %v2314_v58 = vadd.f32 %v8991_v60, %v2313_v34  ;;  %v2142_v37 = vmax.f32 %v2070_v54, 0.0 }
 0x676   :  { %v9202_v4 = vadd.f32 %v2314_v58, %v2294_v47 }
 0x677   :  { %v1982_v39 = vpop.f32.mrf.mxu1 }
 0x678   :  { %v1983_v52 = vadd.f32 %v9091_v31, %v1982_v39 }
 0x67a   :  { %v2071_v22 = vmul.f32 0.999995, %v1983_v52 }
 0x67b   :  { %v2315_v50 = vpop.f32.mrf.mxu2 }
 0x67c   :  { %v2143_v10 = vmax.f32 %v2071_v22, 0.0  ;;  %v2316_v8 = vadd.f32 %v8991_v60, %v2315_v50 }
 0x67e   :  { %v9207_v19 = vadd.f32 %v2316_v8, %v2296_v41  ;;  %v2184_v25 = vpack.c.bf16 %v2143_v10, %v2142_v37 }
 0x67f   :  { %v1985_v15 = vpop.f32.mrf.mxu1 }
 0x680   :  { %2357 = vmatmul.bf16.gmra.mxu2 %v2184_v25  ;;  %v1986_v0 = vadd.f32 %v9091_v31, %v1985_v15 }
 0x682   :  { %v2072_v23 = vmul.f32 0.999995, %v1986_v0 }
 0x683   :  { %v2318_v32 = vpop.f32.mrf.mxu2 }
 0x684   :  { %v2319_v2 = vadd.f32 %v8991_v60, %v2318_v32  ;;  %v2144_v63 = vmax.f32 %v2072_v23, 0.0 }
 0x686   :  { %v9212_v12 = vadd.f32 %v2319_v2, %v2299_v11 }
 0x687   :  { %v1987_v13 = vpop.f32.mrf.mxu1 }
 0x688   :  { %v1988_v30 = vadd.f32 %v9091_v31, %v1987_v13 }
 0x68a   :  { %v2073_v51 = vmul.f32 0.999995, %v1988_v30 }
 0x68b   :  { %v2320_v59 = vpop.f32.mrf.mxu2 }
 0x68c   :  { %v2145_v56 = vmax.f32 %v2073_v51, 0.0  ;;  %v2321_v55 = vadd.f32 %v8991_v60, %v2320_v59 }
 0x68e   :  { %v9218_v42 = vadd.f32 %v2321_v55, %v2301_v28  ;;  %v2185_v36 = vpack.c.bf16 %v2145_v56, %v2144_v63 }
 0x68f   :  { %v1990_v24 = vpop.f32.mrf.mxu1 }
 0x690   :  { %2362 = vmatmul.bf16.gmra.mxu2 %v2185_v36  ;;  %v1991_v1 = vadd.f32 %v9091_v31, %v1990_v24 }
 0x692   :  { %v2074_v40 = vmul.f32 0.999995, %v1991_v1 }
 0x693   :  { %v2323_v14 = vpop.f32.mrf.mxu2 }
 0x694   :  { %v2324_v44 = vadd.f32 %v8991_v60, %v2323_v14  ;;  %v2146_v6 = vmax.f32 %v2074_v40, 0.0 }
 0x696   :  { %v9224_v48 = vadd.f32 %v2324_v44, %v2304_v57 }
 0x697   :  { %v1992_v29 = vpop.f32.mrf.mxu1 }
 0x698   :  { %v1993_v33 = vadd.f32 %v9091_v31, %v1992_v29 }
 0x69a   :  { %v2075_v45 = vmul.f32 0.999995, %v1993_v33 }
 0x69b   :  { %v2325_v5 = vpop.f32.mrf.mxu2 }
 0x69c   :  { %v2147_v34 = vmax.f32 %v2075_v45, 0.0  ;;  %v2326_v47 = vadd.f32 %v8991_v60, %v2325_v5 }
 0x69e   :  { %v9230_v43 = vadd.f32 %v2326_v47, %v2306_v18  ;;  %v2186_v53 = vpack.c.bf16 %v2147_v34, %v2146_v6 }
 0x69f   :  { %v1995_v58 = vpop.f32.mrf.mxu1 }
 0x6a0   :  { %2367 = vmatmul.bf16.gmra.mxu2 %v2186_v53  ;;  %v1996_v54 = vadd.f32 %v9091_v31, %v1995_v58 }
 0x6a2   :  { %v2076_v22 = vmul.f32 0.999995, %v1996_v54 }
 0x6a3   :  { %v2328_v39 = vpop.f32.mrf.mxu2 }
 0x6a4   :  { %v2148_v10 = vmax.f32 %v2076_v22, 0.0  ;;  %v2329_v5 = vadd.f32 %v8991_v60, %v2328_v39  ;;  %v2478_v22 = vld [vmem:[#allocation2 + $0x1a0] sm:$0xff] }
 0x6a7   :  { %v1997_v52 = vpop.f32.mrf.mxu1 }
 0x6a8   :  { %v1998_v50 = vadd.f32 %v9091_v31, %v1997_v52 }
 0x6aa   :  { %v2077_v41 = vmul.f32 0.999995, %v1998_v50  ;;  %v2479_v50 = vld [vmem:[#allocation2 + $0x1a8] sm:$0xff] }
 0x6ab   :  { %v2330_v37 = vpop.f32.mrf.mxu2 }
 0x6ac   :  { %v2149_v7 = vmax.f32 %v2077_v41, 0.0  ;;  %v2331_v53 = vadd.f32 %v8991_v60, %v2330_v37  ;;  %v2477_v37 = vld [vmem:[#allocation2 + $0x198] sm:$0xff] }
 0x6ae   :  { %v2187_v8 = vpack.c.bf16 %v2149_v7, %v2148_v10  ;;  %v2487_v10 = vpack.c.bf16 %v2479_v50, %v2478_v22 }
 0x6af   :  { %v2000_v25 = vpop.f32.mrf.mxu1 }
 0x6b0   :  { %2372 = vmatmul.bf16.gmra.mxu2 %v2187_v8  ;;  %v2001_v32 = vadd.f32 %v9091_v31, %v2000_v25  ;;  %2490 = vmatpush.bf16.msrb.mxu3 %v2487_v10  ;;  %v2476_v8 = vld [vmem:[#allocation2 + $0x190] sm:$0xff] }
 0x6b1   :  { %v2486_v25 = vpack.c.bf16 %v2477_v37, %v2476_v8 }
 0x6b2   :  { %v2078_v0 = vmul.f32 0.999995, %v2001_v32 }
 0x6b3   :  { %v2333_v15 = vpop.f32.mrf.mxu2 }
 0x6b4   :  { %v2150_v30 = vmax.f32 %v2078_v0, 0.0  ;;  %2491 = vmatpush.bf16.msrb.mxu3 %v2486_v25 }
 0x6b7   :  { %v2002_v11 = vpop.f32.mrf.mxu1 }
 0x6b8   :  { %v2003_v2 = vadd.f32 %v9091_v31, %v2002_v11  ;;  %v2475_v11 = vld [vmem:[#allocation2 + $0x188] sm:$0xff] }
 0x6ba   :  { %v2079_v13 = vmul.f32 0.999995, %v2003_v2 }
 0x6bb   :  { %v2335_v23 = vpop.f32.mrf.mxu2 }
 0x6bc   :  { %v2151_v51 = vmax.f32 %v2079_v13, 0.0  ;;  %v9262_v13 = vld [vmem:[#allocation2 + $0x128] ss:$0 sm:$0xff] }
 0x6be   :  { %v2188_v59 = vpack.c.bf16 %v2151_v51, %v2150_v30  ;;  %v2472_v51 = vld [vmem:[#allocation2 + $0x170] sm:$0xff] }
 0x6bf   :  { %v2005_v28 = vpop.f32.mrf.mxu1 }
 0x6c0   :  { %2377 = vmatmul.bf16.gmra.mxu2 %v2188_v59  ;;  %v2006_v56 = vadd.f32 %v9091_v31, %v2005_v28  ;;  %v2473_v59 = vld [vmem:[#allocation2 + $0x178] sm:$0xff] }
 0x6c1   :  { %v2484_v28 = vpack.c.bf16 %v2473_v59, %v2472_v51 }
 0x6c2   :  { %v2080_v36 = vmul.f32 0.999995, %v2006_v56  ;;  %v2470_v56 = vld [vmem:[#allocation2 + $0x160] sm:$0xff] }
 0x6c3   :  { %v2338_v63 = vpop.f32.mrf.mxu2 }
 0x6c4   :  { %v2152_v1 = vmax.f32 %v2080_v36, 0.0 }
 0x6c7   :  { %v2007_v55 = vpop.f32.mrf.mxu1 }
 0x6c8   :  { %v2008_v24 = vadd.f32 %v9091_v31, %v2007_v55  ;;  %v2471_v55 = vld [vmem:[#allocation2 + $0x168] sm:$0xff] }
 0x6ca   :  { %v2081_v14 = vmul.f32 0.999995, %v2008_v24  ;;  %v2483_v24 = vpack.c.bf16 %v2471_v55, %v2470_v56  ;;  %v2535_v56 = vld [vmem:[#allocation2 + $0x1d8] sm:$0xff] }
 0x6cb   :  { %v9238_v57 = vpop.f32.mrf.mxu2 }
 0x6cc   :  { %v2153_v44 = vmax.f32 %v2081_v14, 0.0  ;;  %v2339_v14 = vadd.f32 %v9262_v13, %v2338_v63 }
 0x6ce   :  { %v2189_v29 = vpack.c.bf16 %v2153_v44, %v2152_v1  ;;  %v2468_v44 = vld [vmem:[#allocation2 + $0x150] sm:$0xff] }
 0x6d0   :  { %2382 = vmatmul.bf16.gmra.mxu2 %v2189_v29  ;;  %v2469_v29 = vld [vmem:[#allocation2 + $0x158] sm:$0xff] }
 0x6d3   :  { %v9240_v40 = vpop.f32.mrf.mxu2 }
 0x6db   :  { %v9242_v33 = vpop.f32.mrf.mxu2 }
 0x6e3   :  { %v2348_v45 = vpop.f32.mrf.mxu2 }
 0x6e4   :  { %v2349_v18 = vadd.f32 %v8991_v60, %v2348_v45  ;;  %v2482_v45 = vpack.c.bf16 %v2469_v29, %v2468_v44 }
 0x6e6   :  { %v2412_v6 = vadd.f32 %v2349_v18, %v2329_v5  ;;  %v2467_v18 = vld [vmem:[#allocation2 + $0x148] sm:$0xff] }
 0x6e8   :  { %v2428_v34 = vadd.f32 %v2412_v6, %v9190_v49  ;;  %v2334_v49 = vadd.f32 %v8991_v60, %v2333_v15  ;;  %v2336_v15 = vadd.f32 %v9262_v13, %v2335_v23 }
 0x6ea   :  { %v9248_v31 = vadd.f32 %v2428_v34, %v9105_v38 }
 0x6eb   :  { %v2350_v47 = vpop.f32.mrf.mxu2 }
 0x6ec   :  { %v2351_v58 = vadd.f32 %v8991_v60, %v2350_v47  ;;  %v2341_v47 = vadd.f32 %v9262_v13, %v9238_v57 }
 0x6ee   :  { %v2413_v54 = vadd.f32 %v2351_v58, %v2331_v53  ;;  %v2464_v58 = vld [vmem:[#allocation2 + $0x130] sm:$0xff] }
 0x6f0   :  { %v2429_v52 = vadd.f32 %v2413_v54, %v9196_v16  ;;  %v2474_v16 = vld [vmem:[#allocation2 + $0x180] sm:$0xff]  ;;  %v2465_v54 = vld [vmem:[#allocation2 + $0x138] sm:$0xff] }
 0x6f1   :  { %v2485_v2 = vpack.c.bf16 %v2475_v11, %v2474_v16 }
 0x6f2   :  { %v9254_v39 = vadd.f32 %v2429_v52, %v9112_v46  ;;  %v2480_v52 = vpack.c.bf16 %v2465_v54, %v2464_v58  ;;  %v2534_v54 = vld [vmem:[#allocation2 + $0x1d0] sm:$0xff] }
 0x6f3   :  { %v2353_v41 = vpop.f32.mrf.mxu2  ;;  %2492 = vmatpush.bf16.msrb.mxu3 %v2485_v2 }
 0x6f4   :  { %v2354_v38 = vadd.f32 %v8991_v60, %v2353_v41 }
 0x6f6   :  { %v2414_v7 = vadd.f32 %v2354_v38, %v2334_v49 }
 0x6f7   :  { %2493 = vmatpush.bf16.msrb.mxu3 %v2484_v28 }
 0x6f8   :  { %v2430_v32 = vadd.f32 %v2414_v7, %v9202_v4  ;;  %v2346_v7 = vadd.f32 %v9262_v13, %v9242_v33 }
 0x6fa   :  { %v9260_v0 = vadd.f32 %v2430_v32, %v9121_v61 }
 0x6fb   :  { %v2355_v46 = vpop.f32.mrf.mxu2  ;;  %2494 = vmatpush.bf16.msrb.mxu3 %v2483_v24 }
 0x6fc   :  { %v2356_v60 = vadd.f32 %v9262_v13, %v2355_v46 }
 0x6fe   :  { %v2415_v30 = vadd.f32 %v2356_v60, %v2336_v15 }
 0x6ff   :  { %2495 = vmatpush.bf16.msrb.mxu3 %v2482_v45 }
 0x700   :  { %v2431_v4 = vadd.f32 %v2415_v30, %v9207_v19  ;;  %v2466_v19 = vld [vmem:[#allocation2 + $0x140] sm:$0xff] }
 0x702   :  { %v2439_v61 = vadd.f32 %v2431_v4, %v9128_v62  ;;  %v2481_v62 = vpack.c.bf16 %v2467_v18, %v2466_v19  ;;  %v2537_v4 = vld [vmem:[#allocation2 + $0x1e8] sm:$0xff] }
 0x703   :  { %v2358_v36 = vpop.f32.mrf.mxu2 }
 0x704   :  { %v2359_v23 = vadd.f32 %v9262_v13, %v2358_v36  ;;  %2496 = vmatpush.bf16.msrb.mxu3 %v2481_v62  ;;  %v2536_v36 = vld [vmem:[#allocation2 + $0x1e0] sm:$0xff] }
 0x705   :  { %v2541_v24 = vpack.c.bf16 %v2536_v36, %v2535_v56 }
 0x706   :  { %v2416_v1 = vadd.f32 %v2359_v23, %v2339_v14 }
 0x708   :  { %v2432_v5 = vadd.f32 %v2416_v1, %v9212_v12  ;;  %2497 = vmatpush.bf16.msrb.mxu3 %v2480_v52 }
 0x70a   :  { %v2440_v6 = vadd.f32 %v2432_v5, %v9137_v21  ;;  %v2344_v21 = vadd.f32 %v9262_v13, %v9240_v40 }
 0x70b   :  { %v2360_v34 = vpop.f32.mrf.mxu2 }
 0x70c   :  { %v2361_v63 = vadd.f32 %v9262_v13, %v2360_v34 }
 0x70e   :  { %v2417_v53 = vadd.f32 %v2361_v63, %v2341_v47 }
 0x710   :  { %v2433_v22 = vadd.f32 %v2417_v53, %v9218_v42 }
 0x712   :  { %v2441_v12 = vadd.f32 %v2433_v22, %v9144_v35  ;;  %v2531_v22 = vld [vmem:[#allocation2 + $0x1b8] sm:$0xff] }
 0x713   :  { %v2363_v50 = vpop.f32.mrf.mxu2 }
 0x714   :  { %v2364_v41 = vadd.f32 %v9262_v13, %v2363_v50 }
 0x716   :  { %v2418_v10 = vadd.f32 %v2364_v41, %v2344_v21  ;;  %v7887_v41 = vld [vmem:[#allocation2 + $0x1b0] ss:$0 sm:$0xff] }
 0x718   :  { %v2434_v57 = vadd.f32 %v2418_v10, %v9224_v48 }
 0x71a   :  { %v2442_v49 = vadd.f32 %v2434_v57, %v9153_v27 }
 0x71b   :  { %v2365_v38 = vpop.f32.mrf.mxu2 }
 0x71c   :  { %v2366_v42 = vadd.f32 %v9262_v13, %v2365_v38 }
 0x71e   :  { %v2419_v8 = vadd.f32 %v2366_v42, %v2346_v7 }
 0x720   :  { %v2435_v35 = vadd.f32 %v2419_v8, %v9230_v43 }
 0x722   :  { %v2443_v37 = vadd.f32 %v2435_v35, %v9160_v20 }
 0x723   :  { %v2368_v25 = vpop.f32.mrf.mxu2 }
 0x724   :  { %v2369_v40 = vadd.f32 %v9262_v13, %v2368_v25 }
 0x726   :  { %v2444_v16 = vadd.f32 %v9248_v31, %v2369_v40 }
 0x728   :  { %v2452_v11 = vmul.f32 0.11111111, %v2444_v16 }
 0x72b   :  { %v2370_v32 = vpop.f32.mrf.mxu2 }
 0x72c   :  { %v2371_v48 = vadd.f32 %v9262_v13, %v2370_v32 }
 0x72e   :  { %v2445_v27 = vadd.f32 %v9254_v39, %v2371_v48  ;;  %v2538_v39 = vld [vmem:[#allocation2 + $0x1f0] sm:$0xff] }
 0x72f   :  { %v2542_v55 = vpack.c.bf16 %v2538_v39, %v2537_v4  ;;  %v7889_v39 = vld [vmem:[#allocation2 + $0x200] ss:$0 sm:$0xff] }
 0x730   :  { %v2453_v46 = vmul.f32 0.11111111, %v2445_v27 }
 0x731   :  { %2561 = vmatpush.bf16.msra.mxu0 %v2542_v55 }
 0x732   :  { %v2460_v33 = vpack.c.bf16 %v2453_v46, %v2452_v11 }
 0x733   :  { %v2373_v2 = vpop.f32.mrf.mxu2 }
 0x734   :  { %2498 = vmatmul.bf16.vlgmr.msrb.gmra.mxu3 %v2460_v33  ;;  %v2374_v15 = vadd.f32 %v9262_v13, %v2373_v2 }
 0x735   :  { %2562 = vmatpush.bf16.msra.mxu0 %v2541_v24 }
 0x736   :  { %v2446_v20 = vadd.f32 %v9260_v0, %v2374_v15 }
 0x738   :  { %v2454_v51 = vmul.f32 0.11111111, %v2446_v20 }
 0x73b   :  { %v2375_v43 = vpop.f32.mrf.mxu2 }
 0x73c   :  { %v2376_v60 = vadd.f32 %v9262_v13, %v2375_v43 }
 0x73e   :  { %v2447_v30 = vadd.f32 %v2439_v61, %v2376_v60 }
 0x740   :  { %v2455_v59 = vmul.f32 0.11111111, %v2447_v30 }
 0x742   :  { %v2461_v31 = vpack.c.bf16 %v2455_v59, %v2454_v51 }
 0x743   :  { %v2378_v28 = vpop.f32.mrf.mxu2 }
 0x744   :  { %2503 = vmatmul.bf16.gmra.mxu3 %v2461_v31  ;;  %v2379_v14 = vadd.f32 %v9262_v13, %v2378_v28  ;;  %v7888_v31 = vld [vmem:[#allocation2 + $0x1f8] ss:$0 sm:$0xff] }
 0x746   :  { %v2448_v0 = vadd.f32 %v2440_v6, %v2379_v14  ;;  %v2533_v6 = vld [vmem:[#allocation2 + $0x1c8] sm:$0xff] }
 0x747   :  { %v2540_v52 = vpack.c.bf16 %v2534_v54, %v2533_v6 }
 0x748   :  { %v2456_v44 = vmul.f32 0.11111111, %v2448_v0 }
 0x749   :  { %2563 = vmatpush.bf16.msra.mxu0 %v2540_v52 }
 0x74b   :  { %v2380_v23 = vpop.f32.mrf.mxu2 }
 0x74c   :  { %v2381_v1 = vadd.f32 %v9262_v13, %v2380_v23 }
 0x74e   :  { %v2449_v61 = vadd.f32 %v2441_v12, %v2381_v1  ;;  %v2532_v12 = vld [vmem:[#allocation2 + $0x1c0] sm:$0xff] }
 0x74f   :  { %v2539_v50 = vpack.c.bf16 %v2532_v12, %v2531_v22 }
 0x750   :  { %v2457_v29 = vmul.f32 0.11111111, %v2449_v61 }
 0x751   :  { %2564 = vmatpush.bf16.msra.mxu0 %v2539_v50 }
 0x752   :  { %v2462_v45 = vpack.c.bf16 %v2457_v29, %v2456_v44 }
 0x753   :  { %v2383_v5 = vpop.f32.mrf.mxu2 }
 0x754   :  { %2508 = vmatmul.bf16.gmra.mxu3 %v2462_v45  ;;  %v2384_v19 = vadd.f32 %v9262_v13, %v2383_v5 }
 0x756   :  { %v2450_v34 = vadd.f32 %v2442_v49, %v2384_v19 }
 0x758   :  { %v2458_v63 = vmul.f32 0.11111111, %v2450_v34 }
 0x75b   :  { %v2385_v18 = vpop.f32.mrf.mxu2 }
 0x75c   :  { %v2386_v62 = vadd.f32 %v9262_v13, %v2385_v18 }
 0x75e   :  { %v2451_v47 = vadd.f32 %v2443_v37, %v2386_v62 }
 0x760   :  { %v2459_v53 = vmul.f32 0.11111111, %v2451_v47 }
 0x762   :  { %v2463_v58 = vpack.c.bf16 %v2459_v53, %v2458_v63 }
 0x764   :  { %2513 = vmatmul.bf16.gmra.mxu3 %v2463_v58 }
 0x7b7   :  { %v2499_v21 = vpop.f32.mrf.mxu3 }
 0x7b8   :  { %v2500_v10 = vadd.f32 %v7887_v41, %v2499_v21 }
 0x7ba   :  { %v2519_v38 = vmax.f32 %v2500_v10, 0.0 }
 0x7bf   :  { %v2501_v57 = vpop.f32.mrf.mxu3 }
 0x7c0   :  { %v2502_v49 = vadd.f32 %v7887_v41, %v2501_v57 }
 0x7c2   :  { %v2520_v13 = vmax.f32 %v2502_v49, 0.0 }
 0x7c4   :  { %v2527_v7 = vpack.c.bf16 %v2520_v13, %v2519_v38 }
 0x7c6   :  { %7520 = vmatmul.msk.bf16.vlgmr.msra.gmra.mxu0 %vm372_vm3, %v2527_v7 }
 0x7c7   :  { %v2504_v42 = vpop.f32.mrf.mxu3 }
 0x7c8   :  { %v2505_v8 = vadd.f32 %v7887_v41, %v2504_v42 }
 0x7ca   :  { %v2521_v25 = vmax.f32 %v2505_v8, 0.0 }
 0x7cf   :  { %v2506_v35 = vpop.f32.mrf.mxu3 }
 0x7d0   :  { %v2507_v37 = vadd.f32 %v7887_v41, %v2506_v35 }
 0x7d2   :  { %v2522_v40 = vmax.f32 %v2507_v37, 0.0 }
 0x7d4   :  { %v2528_v32 = vpack.c.bf16 %v2522_v40, %v2521_v25 }
 0x7d6   :  { %7521 = vmatmul.msk.bf16.gmra.mxu0 %vm372_vm3, %v2528_v32  ;;  %v7890_v32 = vld [vmem:[#allocation2 + $0x208] ss:$0 sm:$0xff] }
 0x7d7   :  { %v2509_v16 = vpop.f32.mrf.mxu3 }
 0x7d8   :  { %v2510_v48 = vadd.f32 %v7887_v41, %v2509_v16 }
 0x7da   :  { %v2523_v46 = vmax.f32 %v2510_v48, 0.0 }
 0x7df   :  { %v2511_v27 = vpop.f32.mrf.mxu3 }
 0x7e0   :  { %v2512_v11 = vadd.f32 %v7887_v41, %v2511_v27 }
 0x7e2   :  { %v2524_v33 = vmax.f32 %v2512_v11, 0.0 }
 0x7e4   :  { %v2529_v2 = vpack.c.bf16 %v2524_v33, %v2523_v46 }
 0x7e6   :  { %7522 = vmatmul.msk.bf16.gmra.mxu0 %vm372_vm3, %v2529_v2 }
 0x7e7   :  { %v2514_v15 = vpop.f32.mrf.mxu3 }
 0x7e8   :  { %v2515_v43 = vadd.f32 %v7887_v41, %v2514_v15 }
 0x7ea   :  { %v2525_v30 = vmax.f32 %v2515_v43, 0.0 }
 0x7ef   :  { %v2516_v20 = vpop.f32.mrf.mxu3 }
 0x7f0   :  { %v2517_v60 = vadd.f32 %v7887_v41, %v2516_v20 }
 0x7f2   :  { %v2526_v51 = vmax.f32 %v2517_v60, 0.0 }
 0x7f4   :  { %v2530_v59 = vpack.c.bf16 %v2526_v51, %v2525_v30 }
 0x7f6   :  { %7523 = vmatmul.msk.bf16.gmra.mxu0 %vm372_vm3, %v2530_v59 }
 0x843   :  { %v2566_v28 = vpop.f32.mrf.mxu0 }
 0x844   :  { %v2567_v4 = vadd.f32 %v7888_v31, %v2566_v28 }
 0x846   :  { %v2586_v56 = vmax.f32 %v2567_v4, 0.0 }
 0x848   :  { %v2596_v55 = vmul.f32 %v7889_v39, %v2586_v56 }
 0x84a   :  { %v2605_v36 = vsel %vm2604_vm5, %v2596_v55, 0.0 }
 0x84b   :  { %v2568_v24 = vpop.f32.mrf.mxu0  ;;  %2606 = vadd.xlane.f32.xlu1 %v2605_v36 }
 0x84c   :  { %v2569_v14 = vadd.f32 %v7888_v31, %v2568_v24 }
 0x84e   :  { %v2587_v23 = vmax.f32 %v2569_v14, 0.0 }
 0x850   :  { %v2597_v0 = vmul.f32 %v7889_v39, %v2587_v23 }
 0x852   :  { %v2608_v1 = vsel %vm2604_vm5, %v2597_v0, 0.0 }
 0x853   :  { %v2571_v61 = vpop.f32.mrf.mxu0  ;;  %2609 = vadd.xlane.f32.xlu2 %v2608_v1 }
 0x854   :  { %v2572_v44 = vadd.f32 %v7888_v31, %v2571_v61 }
 0x856   :  { %v2588_v29 = vmax.f32 %v2572_v44, 0.0 }
 0x858   :  { %v2598_v45 = vmul.f32 %v7889_v39, %v2588_v29 }
 0x85a   :  { %v2611_v5 = vsel %vm2604_vm5, %v2598_v45, 0.0 }
 0x85b   :  { %v2573_v19 = vpop.f32.mrf.mxu0  ;;  %2612 = vadd.xlane.f32.xlu0 %v2611_v5 }
 0x85c   :  { %v2574_v18 = vadd.f32 %v7888_v31, %v2573_v19 }
 0x85e   :  { %v2589_v34 = vmax.f32 %v2574_v18, 0.0 }
 0x860   :  { %v2599_v62 = vmul.f32 %v7889_v39, %v2589_v34 }
 0x862   :  { %v2614_v47 = vsel %vm2604_vm5, %v2599_v62, 0.0 }
 0x863   :  { %v2576_v63 = vpop.f32.mrf.mxu0  ;;  %2615 = vadd.xlane.f32.xlu1 %v2614_v47 }
 0x864   :  { %v2577_v53 = vadd.f32 %v7888_v31, %v2576_v63 }
 0x866   :  { %v2590_v58 = vmax.f32 %v2577_v53, 0.0 }
 0x868   :  { %v2600_v6 = vmul.f32 %v7889_v39, %v2590_v58 }
 0x86a   :  { %v2617_v54 = vsel %vm2604_vm5, %v2600_v6, 0.0 }
 0x86b   :  { %v2578_v52 = vpop.f32.mrf.mxu0  ;;  %2618 = vadd.xlane.f32.xlu2 %v2617_v54 }
 0x86c   :  { %v2579_v22 = vadd.f32 %v7888_v31, %v2578_v52 }
 0x86e   :  { %v2591_v12 = vmax.f32 %v2579_v22, 0.0 }
 0x870   :  { %v2601_v50 = vmul.f32 %v7889_v39, %v2591_v12 }
 0x872   :  { %v2620_v21 = vsel %vm2604_vm5, %v2601_v50, 0.0 }
 0x873   :  { %v2581_v41 = vpop.f32.mrf.mxu0  ;;  %2621 = vadd.xlane.f32.xlu0 %v2620_v21 }
 0x874   :  { %v2582_v10 = vadd.f32 %v7888_v31, %v2581_v41 }
 0x876   :  { %v2592_v57 = vmax.f32 %v2582_v10, 0.0 }
 0x878   :  { %v2602_v49 = vmul.f32 %v7889_v39, %v2592_v57 }
 0x87a   :  { %v2623_v38 = vsel %vm2604_vm5, %v2602_v49, 0.0 }
 0x87b   :  { %v2583_v13 = vpop.f32.mrf.mxu0  ;;  %2624 = vadd.xlane.f32.xlu1 %v2623_v38 }
 0x87c   :  { %v2584_v7 = vadd.f32 %v7888_v31, %v2583_v13 }
 0x87e   :  { %v2593_v42 = vmax.f32 %v2584_v7, 0.0 }
 0x880   :  { %v2603_v8 = vmul.f32 %v7889_v39, %v2593_v42 }
 0x882   :  { %v2626_v35 = vsel %vm2604_vm5, %v2603_v8, 0.0 }
 0x883   :  { %2627 = vadd.xlane.f32.xlu2 %v2626_v35 }
 0x8be   :  { %v2607_v37 = vpop.xlane.xlu1 %2606 }
 0x8bf   :  { %v2631_v27 = vadd.f32 %v7890_v32, %v2607_v37 }
 0x8c1   :  { %v2640_v43 = vsel %vm2639_vm6, %v2631_v27, 0.0 }
 0x8c6   :  { %v2610_v25 = vpop.xlane.xlu2 %2609 }
 0x8c7   :  { %v2632_v48 = vadd.f32 %v7890_v32, %v2610_v25 }
 0x8c9   :  { %v2641_v33 = vsel %vm2639_vm6, %v2632_v48, 0.0 }
 0x8ca   :  { %v2642_v30 = vadd.f32 %v2641_v33, %v2640_v43 }
 0x8ce   :  { %v2613_v40 = vpop.xlane.xlu0 %2612 }
 0x8cf   :  { %v2633_v11 = vadd.f32 %v7890_v32, %v2613_v40 }
 0x8d1   :  { %v2643_v20 = vsel %vm2639_vm6, %v2633_v11, 0.0 }
 0x8d2   :  { %v2644_v28 = vadd.f32 %v2643_v20, %v2642_v30 }
 0x8d6   :  { %v2616_v16 = vpop.xlane.xlu1 %2615 }
 0x8d7   :  { %v2634_v2 = vadd.f32 %v7890_v32, %v2616_v16 }
 0x8d9   :  { %v2645_v59 = vsel %vm2639_vm6, %v2634_v2, 0.0 }
 0x8da   :  { %v2646_v56 = vadd.f32 %v2645_v59, %v2644_v28 }
 0x8de   :  { %v2619_v46 = vpop.xlane.xlu2 %2618 }
 0x8df   :  { %v2635_v60 = vadd.f32 %v7890_v32, %v2619_v46 }
 0x8e1   :  { %v2647_v4 = vsel %vm2639_vm6, %v2635_v60, 0.0 }
 0x8e2   :  { %v2648_v36 = vadd.f32 %v2647_v4, %v2646_v56 }
 0x8e6   :  { %v2622_v15 = vpop.xlane.xlu0 %2621 }
 0x8e7   :  { %v2636_v31 = vadd.f32 %v7890_v32, %v2622_v15 }
 0x8e9   :  { %v2649_v55 = vsel %vm2639_vm6, %v2636_v31, 0.0 }
 0x8ea   :  { %v2650_v14 = vadd.f32 %v2649_v55, %v2648_v36 }
 0x8ee   :  { %v2625_v51 = vpop.xlane.xlu1 %2624 }
 0x8ef   :  { %v2637_v39 = vadd.f32 %v7890_v32, %v2625_v51 }
 0x8f1   :  { %v2651_v24 = vsel %vm2639_vm6, %v2637_v39, 0.0 }
 0x8f2   :  { %v2652_v1 = vadd.f32 %v2651_v24, %v2650_v14 }
 0x8f6   :  { %v2628_v23 = vpop.xlane.xlu2 %2627 }
 0x8f7   :  { %v2638_v0 = vadd.f32 %v7890_v32, %v2628_v23 }
 0x8f9   :  { %v2653_v61 = vsel %vm2639_vm6, %v2638_v0, 0.0 }
 0x8fa   :  { %v2654_v44 = vadd.f32 %v2653_v61, %v2652_v1 }
 0x8fc   :  { %2655 = vadd.xlane.f32.xlu0 %v2654_v44 }
 0x96f   :  { %v2656_v29 = vpop.xlane.xlu0 %2655 }
 0x970   :  { %v2657_v45 = vrot.slane %v2656_v29, 4 }
 0x972   :  { %v2658_v5 = vadd.f32 %v2657_v45, %v2656_v29 }
 0x974   :  { %v2659_v19 = vrot.slane %v2658_v5, 2 }
 0x976   :  { %v2660_v18 = vadd.f32 %v2659_v19, %v2658_v5 }
 0x978   :  { %v2661_v34 = vrot.slane %v2660_v18, 1 }
 0x97a   :  { %v2662_v62 = vadd.f32 %v2661_v34, %v2660_v18 }
 0x97c   :  { %7862 = vpush %v2662_v62 }
 0x9ad   :  { %s7863_s3 = spop %7862 }
 0x9ae   :  { %v2664_v47 = vstv %s7863_s3 }
 0x9af   :  { %v2665_v63 = vmul.f32 0.015625, %v2664_v47 }
 0x9b1   :  { %v9318_v53 = vsub.f32 %v2631_v27, %v2665_v63  ;;  %v9320_v58 = vsub.f32 %v2632_v48, %v2665_v63  ;;  %v9322_v6 = vsub.f32 %v2633_v11, %v2665_v63  ;;  %v9324_v54 = vsub.f32 %v2634_v2, %v2665_v63 }
 0x9b2   :  { %v9326_v52 = vsub.f32 %v2635_v60, %v2665_v63  ;;  %v9334_v21 = vsub.f32 %v2636_v31, %v2665_v63  ;;  %v9340_v38 = vsub.f32 %v2637_v39, %v2665_v63  ;;  %v9345_v8 = vsub.f32 %v2638_v0, %v2665_v63 }
 0x9b3   :  { %v2674_v22 = vmul.f32 %v9318_v53, %v9318_v53  ;;  %v2675_v12 = vmul.f32 %v9320_v58, %v9320_v58  ;;  %v2676_v50 = vmul.f32 %v9322_v6, %v9322_v6  ;;  %v2677_v41 = vmul.f32 %v9324_v54, %v9324_v54 }
 0x9b4   :  { %v2678_v13 = vmul.f32 %v9326_v52, %v9326_v52  ;;  %v2679_v35 = vmul.f32 %v9334_v21, %v9334_v21  ;;  %v2680_v40 = vmul.f32 %v9340_v38, %v9340_v38  ;;  %v2681_v48 = vmul.f32 %v9345_v8, %v9345_v8 }
 0x9b5   :  { %v2682_v10 = vsel %vm2639_vm6, %v2674_v22, 0.0  ;;  %v2683_v57 = vsel %vm2639_vm6, %v2675_v12, 0.0  ;;  %v2685_v7 = vsel %vm2639_vm6, %v2676_v50, 0.0  ;;  %v2687_v37 = vsel %vm2639_vm6, %v2677_v41, 0.0 }
 0x9b6   :  { %v2684_v49 = vadd.f32 %v2683_v57, %v2682_v10  ;;  %v2689_v32 = vsel %vm2639_vm6, %v2678_v13, 0.0  ;;  %v2691_v27 = vsel %vm2639_vm6, %v2679_v35, 0.0  ;;  %v2693_v46 = vsel %vm2639_vm6, %v2680_v40, 0.0 }
 0x9b7   :  { %v2695_v2 = vsel %vm2639_vm6, %v2681_v48, 0.0  ;;  %v12543_v39 = vmov 0  }
 0x9b8   :  { %v2686_v42 = vadd.f32 %v2685_v7, %v2684_v49  ;;  %7877 = vset.pattern.permute.xlu2 %v12543_v39  ;;  %7879 = vset.pattern.permute.xlu1 %v12543_v39 }
 0x9b9   :  { %7878 = vset.pattern.permute.xlu0 %v12543_v39 }
 0x9ba   :  { %v2688_v25 = vadd.f32 %v2687_v37, %v2686_v42 }
 0x9bc   :  { %v2690_v16 = vadd.f32 %v2689_v32, %v2688_v25 }
 0x9be   :  { %v2692_v11 = vadd.f32 %v2691_v27, %v2690_v16 }
 0x9c0   :  { %v2694_v33 = vadd.f32 %v2693_v46, %v2692_v11 }
 0x9c2   :  { %v2696_v15 = vadd.f32 %v2695_v2, %v2694_v33 }
 0x9c4   :  { %2697 = vadd.xlane.f32.xlu1 %v2696_v15 }
 0xa37   :  { %v2698_v43 = vpop.xlane.xlu1 %2697 }
 0xa38   :  { %v2699_v20 = vrot.slane %v2698_v43, 4 }
 0xa3a   :  { %v2700_v60 = vadd.f32 %v2699_v20, %v2698_v43 }
 0xa3c   :  { %v2701_v30 = vrot.slane %v2700_v60, 2 }
 0xa3e   :  { %v2702_v51 = vadd.f32 %v2701_v30, %v2700_v60 }
 0xa40   :  { %v2703_v59 = vrot.slane %v2702_v51, 1 }
 0xa42   :  { %v2704_v31 = vadd.f32 %v2703_v59, %v2702_v51 }
 0xa44   :  { %7864 = vpush %v2704_v31 }
 0xa75   :  { %s7865_s4 = spop %7864 }
 0xa76   :  { %v2706_v28 = vstv %s7865_s4 }
 0xa77   :  { %v2707_v4 = vmul.f32 0.015873017, %v2706_v28 }
 0xa79   :  { %7896 = vrsqrt.f32 %v2707_v4  ;;  %vm2715_vm7 = vcmp.eq.f32.partialorder %v2707_v4, inf  ;;  %v2718_v1 = vand.u32 2147483648, %v2707_v4  ;;  %vm2717_vm8 = vcmp.eq.f32.partialorder %v2707_v4, 0.0 }
 0xa7f   :  { %v7897_v56 = vpop.eup %7896 }
 0xa80   :  { %v2709_v55 = vmul.f32 %v7897_v56, %v2707_v4 }
 0xa82   :  { %v2710_v36 = vmul.f32 %v7897_v56, %v2709_v55 }
 0xa84   :  { %v2711_v24 = vmul.f32 0.5, %v2710_v36 }
 0xa86   :  { %v2712_v14 = vsub.f32 1.5, %v2711_v24 }
 0xa88   :  { %v2713_v23 = vmul.f32 %v7897_v56, %v2712_v14  ;;  %v2999_v14 = vld [vmem:[#allocation2 + $0x210] sm:$0xf] }
 0xa8a   :  { %v2714_v0 = vmul.f32 %v2713_v23, %v2707_v4 }
 0xa8c   :  { %v2716_v61 = vsel %vm2715_vm7, %v2707_v4, %v2714_v0 }
 0xa8d   :  { %v2719_v44 = vsel %vm2717_vm8, %v2718_v1, %v2716_v61 }
 0xa8e   :  { %v2720_v29 = vadd.f32 1e-05, %v2719_v44 }
 0xa90   :  { %7898 = vrcp.f32 %v2720_v29  ;;  %v2732_v18 = vand.u32 2147483648, %v2720_v29  ;;  %v2730_v62 = vand.u32 2147483647, %v2720_v29  ;;  %vm2726_vm10 = vweird.f32 %v2720_v29 }
 0xa92   :  { %v2733_v63 = vor.u32 1.1754944e-38, %v2732_v18  ;;  %vm2731_vm12 = vcmp.eq.f32.partialorder %v2730_v62, 8.507059e+37 }
 0xa96   :  { %v7899_v45 = vpop.eup %7898 }
 0xa97   :  { %v2722_v5 = vmul.f32 %v7899_v45, %v2720_v29  ;;  %vm2727_vm9 = vweird.f32 %v7899_v45 }
 0xa98   :  { %vm2728_vm11 = vmor %vm2726_vm10, %vm2727_vm9 }
 0xa99   :  { %v2723_v19 = vsub.f32 1.0, %v2722_v5 }
 0xa9b   :  { %v2724_v34 = vmul.f32 %v7899_v45, %v2723_v19 }
 0xa9d   :  { %v2725_v47 = vadd.f32 %v7899_v45, %v2724_v34 }
 0xa9f   :  { %v2729_v22 = vsel %vm2728_vm11, %v7899_v45, %v2725_v47 }
 0xaa0   :  { %v2734_v12 = vsel %vm2731_vm12, %v2733_v63, %v2729_v22 }
 0xaa1   :  { %v2737_v50 = vmul.f32 %v2734_v12, %v9322_v6  ;;  %v2736_v41 = vmul.f32 %v2734_v12, %v9320_v58  ;;  %v2735_v10 = vmul.f32 %v2734_v12, %v9318_v53  ;;  %v2739_v57 = vmul.f32 %v2734_v12, %v9326_v52 }
 0xaa2   :  { %v2738_v49 = vmul.f32 %v2734_v12, %v9324_v54  ;;  %v2741_v13 = vmul.f32 %v2734_v12, %v9340_v38  ;;  %v2740_v58 = vmul.f32 %v2734_v12, %v9334_v21  ;;  %v2742_v48 = vmul.f32 %v2734_v12, %v9345_v8 }
 0xaa3   :  { %v7526_v7 = vmul.f32 -1.442695, %v2737_v50  ;;  %v7525_v42 = vmul.f32 -1.442695, %v2736_v41  ;;  %v7524_v35 = vmul.f32 -1.442695, %v2735_v10 }
 0xaa4   :  { %v7528_v37 = vmul.f32 -1.442695, %v2739_v57  ;;  %v7527_v25 = vmul.f32 -1.442695, %v2738_v49  ;;  %v7530_v40 = vmul.f32 -1.442695, %v2741_v13 }
 0xaa5   :  { %7900 = vpow2.f32 %v7526_v7  ;;  %v7529_v38 = vmul.f32 -1.442695, %v2740_v58  ;;  %v7531_v21 = vmul.f32 -1.442695, %v2742_v48 }
 0xaa6   :  { %7902 = vpow2.f32 %v7525_v42 }
 0xaa7   :  { %7904 = vpow2.f32 %v7524_v35 }
 0xaa8   :  { %7906 = vpow2.f32 %v7528_v37 }
 0xaa9   :  { %7908 = vpow2.f32 %v7527_v25 }
 0xaaa   :  { %7910 = vpow2.f32 %v7530_v40 }
 0xaab   :  { %v7901_v53 = vpop.eup %7900 }
 0xaac   :  { %v7903_v6 = vpop.eup %7902  ;;  %v2769_v52 = vadd.f32 1.0, %v7901_v53 }
 0xaad   :  { %v7905_v54 = vpop.eup %7904  ;;  %v2768_v32 = vadd.f32 1.0, %v7903_v6 }
 0xaae   :  { %v7907_v16 = vpop.eup %7906  ;;  %7912 = vrcp.f32 %v2769_v52  ;;  %v9369_v46 = vadd.f32 1.0, %v7905_v54  ;;  %v2814_v15 = vand.u32 2147483647, %v2769_v52  ;;  %v2816_v43 = vand.u32 2147483648, %v2769_v52 }
 0xaaf   :  { %v7909_v27 = vpop.eup %7908  ;;  %7914 = vrcp.f32 %v2768_v32  ;;  %v9371_v33 = vadd.f32 1.0, %v7907_v16  ;;  %v2799_v60 = vand.u32 2147483647, %v2768_v32  ;;  %v2801_v30 = vand.u32 2147483648, %v2768_v32 }
 0xab0   :  { %v7911_v11 = vpop.eup %7910  ;;  %v9373_v2 = vadd.f32 1.0, %v7909_v27  ;;  %7916 = vpow2.f32 %v7529_v38  ;;  %vm2810_vm13 = vweird.f32 %v2769_v52  ;;  %vm2795_vm14 = vweird.f32 %v2768_v32 }
 0xab1   :  { %7918 = vrcp.f32 %v9369_v46  ;;  %v9377_v20 = vadd.f32 1.0, %v7911_v11  ;;  %vm9380_vm15 = vcmp.eq.f32.partialorder %v2814_v15, 8.507059e+37  ;;  %v2817_v55 = vor.u32 1.1754944e-38, %v2816_v43 }
 0xab2   :  { %7920 = vrcp.f32 %v9371_v33  ;;  %vm9385_vm2 = vcmp.eq.f32.partialorder %v2799_v60, 8.507059e+37  ;;  %v2802_v23 = vor.u32 1.1754944e-38, %v2801_v30  ;;  %vm2780_vm4 = vweird.f32 %v9369_v46 }
 0xab3   :  { %7922 = vrcp.f32 %v9373_v2  ;;  %v2784_v44 = vand.u32 2147483647, %v9369_v46  ;;  %v2786_v5 = vand.u32 2147483648, %v9369_v46  ;;  %vm2840_vm8 = vweird.f32 %v9371_v33 }
 0xab4   :  { %v7913_v8 = vpop.eup %7912  ;;  %7924 = vpow2.f32 %v7531_v21  ;;  %v2844_v12 = vand.u32 2147483647, %v9371_v33  ;;  %v2846_v6 = vand.u32 2147483648, %v9371_v33  ;;  %v2829_v21 = vand.u32 2147483647, %v9373_v2 }
 0xab5   :  { %v7915_v51 = vpop.eup %7914  ;;  %v2806_v59 = vmul.f32 %v7913_v8, %v2769_v52  ;;  %7926 = vrcp.f32 %v9377_v20  ;;  %vm2811_vm6 = vweird.f32 %v7913_v8  ;;  %v2787_v58 = vor.u32 1.1754944e-38, %v2786_v5 }
 0xab6   :  { %v2791_v31 = vmul.f32 %v7915_v51, %v2768_v32  ;;  %v7917_v28 = vpop.eup %7916  ;;  %vm2796_vm7 = vweird.f32 %v7915_v51  ;;  %vm2812_vm9 = vmor %vm2810_vm13, %vm2811_vm6  ;;  %v2847_v11 = vor.u32 1.1754944e-38, %v2846_v6  ;;  %vm2825_vm6 = vweird.f32 %v9373_v2 }
 0xab7   :  { %v2807_v4 = vsub.f32 1.0, %v2806_v59  ;;  %v7919_v36 = vpop.eup %7918  ;;  %vm2797_vm11 = vmor %vm2795_vm14, %vm2796_vm7  ;;  %v9405_v49 = vadd.f32 1.0, %v7917_v28  ;;  %vm2785_vm14 = vcmp.eq.f32.partialorder %v2784_v44, 8.507059e+37  ;;  %v2876_v30 = vand.u32 2147483648, %v9377_v20 }
 0xab8   :  { %v2792_v24 = vsub.f32 1.0, %v2791_v31  ;;  %v7921_v0 = vpop.eup %7920  ;;  %v2776_v61 = vmul.f32 %v7919_v36, %v9369_v46  ;;  %vm2781_vm10 = vweird.f32 %v7919_v36  ;;  %v2831_v46 = vand.u32 2147483648, %v9373_v2 }
 0xab9   :  { %v2808_v1 = vmul.f32 %v7913_v8, %v2807_v4  ;;  %v9392_v29 = vpop.eup %7922  ;;  %v2836_v19 = vmul.f32 %v7921_v0, %v9371_v33  ;;  %vm2841_vm12 = vweird.f32 %v7921_v0  ;;  %vm2782_vm13 = vmor %vm2780_vm4, %vm2781_vm10  ;;  %7928 = vrcp.f32 %v9405_v49 }
 0xaba   :  { %v2793_v45 = vmul.f32 %v7915_v51, %v2792_v24  ;;  %v2777_v34 = vsub.f32 1.0, %v2776_v61  ;;  %v2821_v62 = vmul.f32 %v9392_v29, %v9373_v2  ;;  %v7925_v47 = vpop.eup %7924  ;;  %vm2845_vm4 = vcmp.eq.f32.partialorder %v2844_v12, 8.507059e+37 }
 0xabb   :  { %v2809_v18 = vadd.f32 %v7913_v8, %v2808_v1  ;;  %v2837_v22 = vsub.f32 1.0, %v2836_v19  ;;  %v9401_v50 = vpop.eup %7926  ;;  %v9425_v32 = vadd.f32 1.0, %v7925_v47  ;;  %vm2870_vm10 = vweird.f32 %v9377_v20 }
 0xabc   :  { %v2794_v63 = vadd.f32 %v7915_v51, %v2793_v45  ;;  %v2778_v10 = vmul.f32 %v7919_v36, %v2777_v34  ;;  %v2822_v57 = vsub.f32 1.0, %v2821_v62  ;;  %v2866_v35 = vmul.f32 %v9401_v50, %v9377_v20 }
 0xabd   :  { %v2813_v41 = vsel %vm2812_vm9, %v7913_v8, %v2809_v18  ;;  %v2838_v42 = vmul.f32 %v7921_v0, %v2837_v22  ;;  %7930 = vrcp.f32 %v9425_v32  ;;  %vm2830_vm9 = vcmp.eq.f32.partialorder %v2829_v21, 8.507059e+37 }
 0xabe   :  { %v9409_v13 = vsel %vm9380_vm15, %v2817_v55, %v2813_v41  ;;  %v2798_v7 = vsel %vm2797_vm11, %v7915_v51, %v2794_v63  ;;  %v2779_v25 = vadd.f32 %v7919_v36, %v2778_v10  ;;  %v2823_v40 = vmul.f32 %v9392_v29, %v2822_v57  ;;  %vm2842_vm15 = vmor %vm2840_vm8, %vm2841_vm12 }
 0xabf   :  { %2907 = vperm.xlu1 %7879, %v9409_v13   ;;  %v9416_v37 = vsel %vm9385_vm2, %v2802_v23, %v2798_v7  ;;  %v2839_v53 = vadd.f32 %v7921_v0, %v2838_v42  ;;  %v2867_v52 = vsub.f32 1.0, %v2866_v35  ;;  %vm2826_vm2 = vweird.f32 %v9392_v29  ;;  %v7929_v43 = vpop.eup %7928  ;;  %v3000_v23 = vld [vmem:[#allocation2 + $0x218] sm:$0xf] }
 0xac0   :  { %2902 = vperm.xlu0 %7878, %v9416_v37   ;;  %v2783_v54 = vsel %vm2782_vm13, %v7919_v36, %v2779_v25  ;;  %v2824_v48 = vadd.f32 %v9392_v29, %v2823_v40  ;;  %vm2827_vm7 = vmor %vm2825_vm6, %vm2826_vm2  ;;  %vm2871_vm8 = vweird.f32 %v9401_v50  ;;  %v2832_v51 = vor.u32 1.1754944e-38, %v2831_v46  ;;  %7549 = vmatpush.msk.msrb.mxu0 %vm67_vm1, %v3000_v23 }
 0xac1   :  { %v2788_v38 = vsel %vm2785_vm14, %v2787_v58, %v2783_v54  ;;  %v2843_v16 = vsel %vm2842_vm15, %v7921_v0, %v2839_v53  ;;  %v2868_v27 = vmul.f32 %v9401_v50, %v2867_v52  ;;  %v2851_v2 = vmul.f32 %v7929_v43, %v9405_v49  ;;  %vm9446_vm11 = vmor %vm2870_vm10, %vm2871_vm8 }
 0xac2   :  { %2897 = vperm.xlu2 %7877, %v2788_v38   ;;  %v2943_v33 = vsub.f32 1.0, %v2788_v38  ;;  %v9436_v15 = vsel %vm2845_vm4, %v2847_v11, %v2843_v16  ;;  %v2828_v8 = vsel %vm2827_vm7, %v9392_v29, %v2824_v48  ;;  %v2874_v59 = vand.u32 2147483647, %v9377_v20 }
 0xac3   :  { %v2869_v60 = vadd.f32 %v9401_v50, %v2868_v27  ;;  %v2833_v31 = vsel %vm2830_vm9, %v2832_v51, %v2828_v8  ;;  %v2852_v4 = vsub.f32 1.0, %v2851_v2  ;;  %v7931_v56 = vpop.eup %7930  ;;  %v2877_v36 = vor.u32 1.1754944e-38, %v2876_v30  ;;  %v7937_v27 = vld [vmem:[%s12540_s0 + $0x18] sm:$0xff]  ;;  %v7940_v30 = vld [vmem:[%s12540_s0 + $0x30] sm:$0xff] }
 0xac4   :  { %v2861_v24 = vand.u32 2147483648, %v9405_v49  ;;  %vm2856_vm12 = vweird.f32 %v7929_v43  ;;  %v2881_v20 = vmul.f32 %v7931_v56, %v9425_v32  ;;  %v3001_v1 = vsub.f32 %v2999_v14, %v3000_v23  ;;  %v7939_v8 = vld [vmem:[%s12540_s0 + $0x38] sm:$0xff] }
 0xac5   :  { %v2873_v55 = vsel %vm9446_vm11, %v9401_v50, %v2869_v60  ;;  %v2853_v0 = vmul.f32 %v7929_v43, %v2852_v4  ;;  %v2944_v61 = vsub.f32 1.0, %v9416_v37  ;;  %vm2875_vm13 = vcmp.eq.f32.partialorder %v2874_v59, 8.507059e+37  ;;  %v9471_v37 = vld [vmem:[%s12540_s0] sm:$0xff] }
 0xac6   :  { %v2859_v44 = vand.u32 2147483647, %v9405_v49  ;;  %v2878_v29 = vsel %vm2875_vm13, %v2877_v36, %v2873_v55  ;;  %vm2855_vm14 = vweird.f32 %v9405_v49  ;;  %v2882_v5 = vsub.f32 1.0, %v2881_v20  ;;  %7532 = vmatpush.msk.msra.mxu3 %vm67_vm1, %v3001_v1 }
 0xac7   :  { %2917 = vperm.xlu1 %7879, %v9436_v15   ;;  %v2854_v45 = vadd.f32 %v7929_v43, %v2853_v0  ;;  %vm2857_vm15 = vmor %vm2855_vm14, %vm2856_vm12  ;;  %v2862_v19 = vor.u32 1.1754944e-38, %v2861_v24  ;;  %v2891_v18 = vand.u32 2147483648, %v9425_v32  ;;  %vm2886_vm2 = vweird.f32 %v7931_v56 }
 0xac8   :  { %2953 = vperm.xlu0 %7878, %v2943_v33   ;;  %v2883_v62 = vmul.f32 %v7931_v56, %v2882_v5  ;;  %v2889_v47 = vand.u32 2147483647, %v9425_v32  ;;  %vm2860_vm4 = vcmp.eq.f32.partialorder %v2859_v44, 8.507059e+37  ;;  %vm2885_vm6 = vweird.f32 %v9425_v32  ;;  %v7936_v32 = vld [vmem:[%s12540_s0 + $0x10] sm:$0xff] }
 0xac9   :  { %v2858_v34 = vsel %vm2857_vm15, %v7929_v43, %v2854_v45  ;;  %vm2887_vm7 = vmor %vm2885_vm6, %vm2886_vm2  ;;  %v2892_v12 = vor.u32 1.1754944e-38, %v2891_v18  ;;  %v2945_v10 = vsub.f32 1.0, %v9409_v13  ;;  %v2949_v7 = vsub.f32 1.0, %v2878_v29 }
 0xaca   :  { %2912 = vperm.xlu2 %7877, %v2833_v31   ;;  %v2863_v63 = vsel %vm2860_vm4, %v2862_v19, %v2858_v34  ;;  %v2884_v22 = vadd.f32 %v7931_v56, %v2883_v62  ;;  %vm2890_vm1 = vcmp.eq.f32.partialorder %v2889_v47, 8.507059e+37  ;;  %v2946_v42 = vsub.f32 1.0, %v2833_v31 }
 0xacb   :  { %v2948_v49 = vsub.f32 1.0, %v2863_v63  ;;  %v2947_v35 = vsub.f32 1.0, %v9436_v15  ;;  %v7938_v15 = vld [vmem:[%s12540_s0 + $0x20] sm:$0xff]  ;;  %vm3294_vm8 = vcmp.ge.s32.totalorder %v8149_v26, 64 }
 0xacc   :  { %v2888_v50 = vsel %vm2887_vm7, %v7931_v56, %v2884_v22  ;;  %v7941_v56 = vld [vmem:[%s12540_s0 + $0x28] sm:$0xff] }
 0xacd   :  { %v2893_v41 = vsel %vm2890_vm1, %v2892_v12, %v2888_v50 }
 0xace   :  { %v2950_v57 = vsub.f32 1.0, %v2893_v41 }
 0xacf   :  { %2927 = vperm.xlu1 %7879, %v2878_v29  }
 0xad0   :  { %2958 = vperm.xlu0 %7878, %v2944_v61  }
 0xad2   :  { %2922 = vperm.xlu2 %7877, %v2863_v63  }
 0xad7   :  { %2988 = vperm.xlu1 %7879, %v2950_v57  }
 0xad8   :  { %2963 = vperm.xlu0 %7878, %v2945_v10  }
 0xada   :  { %2932 = vperm.xlu2 %7877, %v2893_v41  }
 0xadf   :  { %2978 = vperm.xlu1 %7879, %v2948_v49  }
 0xae0   :  { %7880 = vset.pattern.permute.xlu0 %v7981_v9 }
 0xae2   :  { %2983 = vperm.xlu2 %7877, %v2949_v7  }
 0xae7   :  { %2968 = vperm.xlu1 %7879, %v2946_v42  }
 0xaea   :  { %2973 = vperm.xlu2 %7877, %v2947_v35  }
 0xaef   :  { %7881 = vset.pattern.permute.xlu1 %v7981_v9 }
 0xaf2   :  { %7882 = vset.pattern.permute.xlu2 %v7981_v9  ;;  %v7935_v9 = vld [vmem:[%s12540_s0 + $0x8] sm:$0xff] }
 0xb1c   :  { %v2898_v13 = vpop.permute.xlu2 %2897 }
 0xb1d   :  { %v9474_v25 = vmul.f32 %v9471_v37, %v2898_v13 }
 0xb1f   :  { %7533 = vmatmul.msk.f32.vlgmr.msra.gmra.mxu3 %vm42_vm0, %v9474_v25  ;;  %7550 = vmatmul.msk.f32.vlgmr.msrb.gmra.mxu0 %vm42_vm0, %v9474_v25  ;;  %v3392_v57 = vmul.f32 %v9474_v25, %v9474_v25 }
 0xb24   :  { %v2913_v40 = vpop.permute.xlu2 %2912 }
 0xb25   :  { %v9501_v11 = vmul.f32 %v7937_v27, %v2913_v40 }
 0xb27   :  { %v3395_v50 = vmul.f32 %v9501_v11, %v9501_v11 }
 0xb2c   :  { %v2923_v52 = vpop.permute.xlu2 %2922 }
 0xb2d   :  { %v9538_v55 = vmul.f32 %v7941_v56, %v2923_v52 }
 0xb2f   :  { %v3397_v22 = vmul.f32 %v9538_v55, %v9538_v55 }
 0xb31   :  { %v2908_v58 = vpop.permute.xlu1 %2907 }
 0xb32   :  { %v2903_v53 = vpop.permute.xlu0 %2902  ;;  %v9492_v38 = vmul.f32 %v7936_v32, %v2908_v58 }
 0xb33   :  { %v9483_v6 = vmul.f32 %v7935_v9, %v2903_v53 }
 0xb34   :  { %v2933_v16 = vpop.permute.xlu2 %2932  ;;  %v3394_v41 = vmul.f32 %v9492_v38, %v9492_v38 }
 0xb35   :  { %7534 = vmatmul.msk.f32.gmra.mxu3 %vm42_vm0, %v9483_v6  ;;  %7551 = vmatmul.msk.f32.gmra.mxu0 %vm42_vm0, %v9483_v6  ;;  %v9580_v19 = vmul.f32 %v7939_v8, %v2933_v16  ;;  %v3393_v10 = vmul.f32 %v9483_v6, %v9483_v6 }
 0xb37   :  { %v3399_v47 = vmul.f32 %v9580_v19, %v9580_v19 }
 0xb39   :  { %v2918_v54 = vpop.permute.xlu1 %2917 }
 0xb3a   :  { %v2954_v46 = vpop.permute.xlu0 %2953  ;;  %v9510_v43 = vmul.f32 %v7938_v15, %v2918_v54 }
 0xb3b   :  { %v9584_v18 = vmul.f32 %v9471_v37, %v2954_v46 }
 0xb3c   :  { %v2984_v21 = vpop.permute.xlu2 %2983  ;;  %v3396_v12 = vmul.f32 %v9510_v43, %v9510_v43 }
 0xb3d   :  { %7535 = vmatmul.msk.f32.gmra.mxu3 %vm42_vm0, %v9492_v38  ;;  %7552 = vmatmul.msk.f32.gmra.mxu0 %vm42_vm0, %v9492_v38  ;;  %v9520_v51 = vmul.f32 %v7940_v30, %v2984_v21  ;;  %v3400_v62 = vmul.f32 %v9584_v18, %v9584_v18 }
 0xb3f   :  { %v3406_v31 = vmul.f32 %v9520_v51, %v9520_v51 }
 0xb41   :  { %v2928_v48 = vpop.permute.xlu1 %2927 }
 0xb42   :  { %v2959_v59 = vpop.permute.xlu0 %2958  ;;  %v9558_v1 = vmul.f32 %v7940_v30, %v2928_v48  ;;  %v9754_v48 = vld [vmem:[#allocation2 + $0x220] ss:$0 sm:$0xff] }
 0xb43   :  { %v9574_v45 = vmul.f32 %v7935_v9, %v2959_v59 }
 0xb44   :  { %v2974_v28 = vpop.permute.xlu2 %2973  ;;  %v3398_v63 = vmul.f32 %v9558_v1, %v9558_v1 }
 0xb45   :  { %7536 = vmatmul.msk.f32.gmra.mxu3 %vm42_vm0, %v9501_v11  ;;  %7553 = vmatmul.msk.f32.gmra.mxu0 %vm42_vm0, %v9501_v11  ;;  %v9543_v24 = vmul.f32 %v7938_v15, %v2974_v28  ;;  %v3401_v34 = vmul.f32 %v9574_v45, %v9574_v45 }
 0xb47   :  { %v3404_v23 = vmul.f32 %v9543_v24, %v9543_v24 }
 0xb49   :  { %v2989_v33 = vpop.permute.xlu1 %2988 }
 0xb4a   :  { %v9515_v60 = vmul.f32 %v7939_v8, %v2989_v33  ;;  %v2964_v0 = vpop.permute.xlu0 %2963 }
 0xb4b   :  { %v9563_v44 = vmul.f32 %v7936_v32, %v2964_v0 }
 0xb4c   :  { %v3407_v2 = vmul.f32 %v9515_v60, %v9515_v60  ;;  %7566 = vmatpush.xpose.msk.msrb.mxu3 %vm42_vm0, %v9515_v60 }
 0xb4d   :  { %7537 = vmatmul.msk.f32.gmra.mxu3 %vm42_vm0, %v9510_v43  ;;  %7554 = vmatmul.msk.f32.gmra.mxu0 %vm42_vm0, %v9510_v43  ;;  %v3402_v5 = vmul.f32 %v9563_v44, %v9563_v44 }
 0xb4e   :  { %7598 = vmatpush.xpose.msk.msra.mxu0 %vm42_vm0, %v3407_v2 }
 0xb50   :  { %7567 = vmatpush.xpose.msk.msrb.mxu3 %vm42_vm0, %v9520_v51 }
 0xb51   :  { %v2979_v4 = vpop.permute.xlu1 %2978 }
 0xb52   :  { %v9540_v36 = vmul.f32 %v7941_v56, %v2979_v4  ;;  %7599 = vmatpush.xpose.msk.msra.mxu0 %vm42_vm0, %v3406_v31 }
 0xb54   :  { %v3405_v14 = vmul.f32 %v9540_v36, %v9540_v36  ;;  %7568 = vmatpush.xpose.msk.msrb.mxu3 %vm42_vm0, %v9540_v36 }
 0xb55   :  { %7538 = vmatmul.msk.f32.gmra.mxu3 %vm42_vm0, %v9538_v55  ;;  %7555 = vmatmul.msk.f32.gmra.mxu0 %vm42_vm0, %v9538_v55 }
 0xb56   :  { %7600 = vmatpush.xpose.msk.msra.mxu0 %vm42_vm0, %v3405_v14 }
 0xb58   :  { %7569 = vmatpush.xpose.msk.msrb.mxu3 %vm42_vm0, %v9543_v24 }
 0xb59   :  { %v2969_v20 = vpop.permute.xlu1 %2968 }
 0xb5a   :  { %v9560_v61 = vmul.f32 %v7937_v27, %v2969_v20  ;;  %7601 = vmatpush.xpose.msk.msra.mxu0 %vm42_vm0, %v3404_v23 }
 0xb5c   :  { %v3403_v29 = vmul.f32 %v9560_v61, %v9560_v61  ;;  %7570 = vmatpush.xpose.msk.msrb.mxu3 %vm42_vm0, %v9560_v61 }
 0xb5d   :  { %7539 = vmatmul.msk.f32.gmra.mxu3 %vm42_vm0, %v9558_v1  ;;  %7556 = vmatmul.msk.f32.gmra.mxu0 %vm42_vm0, %v9558_v1 }
 0xb5e   :  { %7602 = vmatpush.xpose.msk.msra.mxu0 %vm42_vm0, %v3403_v29 }
 0xb60   :  { %7571 = vmatpush.xpose.msk.msrb.mxu3 %vm42_vm0, %v9563_v44 }
 0xb62   :  { %7603 = vmatpush.xpose.msk.msra.mxu0 %vm42_vm0, %v3402_v5 }
 0xb64   :  { %7572 = vmatpush.xpose.msk.msrb.mxu3 %vm42_vm0, %v9574_v45 }
 0xb65   :  { %7540 = vmatmul.msk.f32.gmra.mxu3 %vm42_vm0, %v9580_v19  ;;  %7557 = vmatmul.msk.f32.gmra.mxu0 %vm42_vm0, %v9580_v19 }
 0xb66   :  { %7604 = vmatpush.xpose.msk.msra.mxu0 %vm42_vm0, %v3401_v34 }
 0xb68   :  { %7573 = vmatpush.xpose.msk.msrb.mxu3 %vm42_vm0, %v9584_v18 }
 0xb6a   :  { %7605 = vmatpush.xpose.msk.msra.mxu0 %vm42_vm0, %v3400_v62 }
 0xb6c   :  { %7574 = vmatpush.xpose.msk.msrb.mxu3 %vm42_vm0, %v9580_v19 }
 0xb6d   :  { %7541 = vmatmul.msk.f32.gmra.mxu3 %vm42_vm0, %v9584_v18  ;;  %7558 = vmatmul.msk.f32.gmra.mxu0 %vm42_vm0, %v9584_v18 }
 0xb6e   :  { %7606 = vmatpush.xpose.msk.msra.mxu0 %vm42_vm0, %v3399_v47 }
 0xb70   :  { %7575 = vmatpush.xpose.msk.msrb.mxu3 %vm42_vm0, %v9558_v1 }
 0xb72   :  { %7607 = vmatpush.xpose.msk.msra.mxu0 %vm42_vm0, %v3398_v63 }
 0xb74   :  { %7576 = vmatpush.xpose.msk.msrb.mxu3 %vm42_vm0, %v9538_v55 }
 0xb75   :  { %7542 = vmatmul.msk.f32.gmra.mxu3 %vm42_vm0, %v9574_v45  ;;  %7559 = vmatmul.msk.f32.gmra.mxu0 %vm42_vm0, %v9574_v45 }
 0xb76   :  { %7608 = vmatpush.xpose.msk.msra.mxu0 %vm42_vm0, %v3397_v22 }
 0xb78   :  { %7577 = vmatpush.xpose.msk.msrb.mxu3 %vm42_vm0, %v9510_v43 }
 0xb7a   :  { %7609 = vmatpush.xpose.msk.msra.mxu0 %vm42_vm0, %v3396_v12 }
 0xb7c   :  { %7578 = vmatpush.xpose.msk.msrb.mxu3 %vm42_vm0, %v9501_v11 }
 0xb7d   :  { %7543 = vmatmul.msk.f32.gmra.mxu3 %vm42_vm0, %v9563_v44  ;;  %7560 = vmatmul.msk.f32.gmra.mxu0 %vm42_vm0, %v9563_v44 }
 0xb7e   :  { %7610 = vmatpush.xpose.msk.msra.mxu0 %vm42_vm0, %v3395_v50 }
 0xb80   :  { %7579 = vmatpush.xpose.msk.msrb.mxu3 %vm42_vm0, %v9492_v38 }
 0xb82   :  { %7611 = vmatpush.xpose.msk.msra.mxu0 %vm42_vm0, %v3394_v41 }
 0xb84   :  { %7580 = vmatpush.xpose.msk.msrb.mxu3 %vm42_vm0, %v9483_v6 }
 0xb85   :  { %7544 = vmatmul.msk.f32.gmra.mxu3 %vm42_vm0, %v9560_v61  ;;  %7561 = vmatmul.msk.f32.gmra.mxu0 %vm42_vm0, %v9560_v61 }
 0xb86   :  { %7612 = vmatpush.xpose.msk.msra.mxu0 %vm42_vm0, %v3393_v10 }
 0xb88   :  { %7581 = vmatpush.xpose.msk.msrb.mxu3 %vm42_vm0, %v9474_v25 }
 0xb8a   :  { %7613 = vmatpush.xpose.msk.msra.mxu0 %vm42_vm0, %v3392_v57 }
 0xb8d   :  { %7545 = vmatmul.msk.f32.gmra.mxu3 %vm42_vm0, %v9543_v24  ;;  %7562 = vmatmul.msk.f32.gmra.mxu0 %vm42_vm0, %v9543_v24 }
 0xb95   :  { %7546 = vmatmul.msk.f32.gmra.mxu3 %vm42_vm0, %v9540_v36  ;;  %7563 = vmatmul.msk.f32.gmra.mxu0 %vm42_vm0, %v9540_v36 }
 0xb9c   :  { %v9672_v49 = vpop.f32.mrf.mxu0 }
 0xb9d   :  { %7547 = vmatmul.msk.f32.gmra.mxu3 %vm42_vm0, %v9520_v51  ;;  %7564 = vmatmul.msk.f32.gmra.mxu0 %vm42_vm0, %v9520_v51 }
 0xba2   :  { %v9678_v7 = vpop.f32.mrf.mxu3 }
 0xba5   :  { %7548 = vmatmul.msk.f32.gmra.mxu3 %vm42_vm0, %v9515_v60  ;;  %7565 = vmatmul.msk.f32.gmra.mxu0 %vm42_vm0, %v9515_v60 }
 0xbad   :  { %7582 = vmatmul.msk.f32.vlgmr.msrb.gmra.mxu3 %vm42_vm0, %v9474_v25  ;;  %7614 = vmatmul.msk.f32.vlgmr.msra.gmra.mxu0 %vm42_vm0, %v7982_v17 }
 0xbb2   :  { %v9680_v42 = vpop.f32.mrf.mxu0 }
 0xbb5   :  { %7583 = vmatmul.msk.f32.gmra.mxu3 %vm42_vm0, %v9483_v6  ;;  %7615 = vmatmul.msk.f32.gmra.mxu0 %vm42_vm0, %v7982_v17 }
 0xbb8   :  { %v9686_v35 = vpop.f32.mrf.mxu3 }
 0xbba   :  { %v9688_v13 = vpop.f32.mrf.mxu0 }
 0xbbd   :  { %7584 = vmatmul.msk.f32.gmra.mxu3 %vm42_vm0, %v9492_v38  ;;  %7616 = vmatmul.msk.f32.gmra.mxu0 %vm42_vm0, %v7982_v17 }
 0xbc0   :  { %v9694_v37 = vpop.f32.mrf.mxu3 }
 0xbc2   :  { %v9696_v25 = vpop.f32.mrf.mxu0 }
 0xbc5   :  { %7585 = vmatmul.msk.f32.gmra.mxu3 %vm42_vm0, %v9501_v11  ;;  %7617 = vmatmul.msk.f32.gmra.mxu0 %vm42_vm0, %v7982_v17 }
 0xbc8   :  { %v9702_v40 = vpop.f32.mrf.mxu3 }
 0xbca   :  { %v9704_v58 = vpop.f32.mrf.mxu0 }
 0xbcd   :  { %7586 = vmatmul.msk.f32.gmra.mxu3 %vm42_vm0, %v9510_v43  ;;  %7618 = vmatmul.msk.f32.gmra.mxu0 %vm42_vm0, %v7982_v17 }
 0xbd0   :  { %v9710_v53 = vpop.f32.mrf.mxu3 }
 0xbd1   :  { %12567 = vst [vmem:[#allocation5_spill] sm:$0xff] %v9710_v53 }
 0xbd2   :  { %v9712_v9 = vpop.f32.mrf.mxu0 }
 0xbd5   :  { %7587 = vmatmul.msk.f32.gmra.mxu3 %vm42_vm0, %v9538_v55  ;;  %7619 = vmatmul.msk.f32.gmra.mxu0 %vm42_vm0, %v7982_v17 }
 0xbd8   :  { %v9718_v6 = vpop.f32.mrf.mxu3 }
 0xbd9   :  { %12568 = vst [vmem:[#allocation6_spill] sm:$0xff] %v9718_v6 }
 0xbda   :  { %v9720_v52 = vpop.f32.mrf.mxu0 }
 0xbdd   :  { %7588 = vmatmul.msk.f32.gmra.mxu3 %vm42_vm0, %v9558_v1  ;;  %7620 = vmatmul.msk.f32.gmra.mxu0 %vm42_vm0, %v7982_v17 }
 0xbe0   :  { %v9726_v54 = vpop.f32.mrf.mxu3 }
 0xbe2   :  { %v9728_v32 = vpop.f32.mrf.mxu0 }
 0xbe3   :  { %4529 = vmatpush.msra.mxu3 %v9728_v32  ;;  %5369 = vmatpush.msra.mxu1 %v9728_v32 }
 0xbe5   :  { %7589 = vmatmul.msk.f32.gmra.mxu3 %vm42_vm0, %v9580_v19  ;;  %5370 = vmatpush.msra.mxu1 %v9720_v52 }
 0xbe6   :  { %4530 = vmatpush.msra.mxu3 %v9720_v52  ;;  %7621 = vmatmul.msk.f32.gmra.mxu0 %vm42_vm0, %v7982_v17 }
 0xbe7   :  { %5371 = vmatpush.msra.mxu1 %v9712_v9 }
 0xbe8   :  { %4531 = vmatpush.msra.mxu3 %v9712_v9  ;;  %v9740_v38 = vpop.f32.mrf.mxu3 }
 0xbe9   :  { %5372 = vmatpush.msra.mxu1 %v9704_v58 }
 0xbea   :  { %4532 = vmatpush.msra.mxu3 %v9704_v58  ;;  %v9744_v16 = vpop.f32.mrf.mxu0 }
 0xbeb   :  { %5373 = vmatpush.msra.mxu1 %v9696_v25 }
 0xbec   :  { %4533 = vmatpush.msra.mxu3 %v9696_v25 }
 0xbed   :  { %7590 = vmatmul.msk.f32.gmra.mxu3 %vm42_vm0, %v9584_v18  ;;  %5374 = vmatpush.msra.mxu1 %v9688_v13 }
 0xbee   :  { %4534 = vmatpush.msra.mxu3 %v9688_v13  ;;  %7622 = vmatmul.msk.f32.gmra.mxu0 %vm42_vm0, %v7982_v17 }
 0xbef   :  { %5375 = vmatpush.msra.mxu1 %v9680_v42 }
 0xbf0   :  { %4535 = vmatpush.msra.mxu3 %v9680_v42  ;;  %v3096_v27 = vpop.f32.mrf.mxu3 }
 0xbf1   :  { %v3097_v11 = vadd.f32 %v9754_v48, %v3096_v27  ;;  %5376 = vmatpush.msra.mxu1 %v9672_v49 }
 0xbf2   :  { %4536 = vmatpush.msra.mxu3 %v9672_v49  ;;  %v9761_v46 = vpop.f32.mrf.mxu0 }
 0xbf3   :  { %5789 = vmatpush.msrb.mxu1 %v9728_v32  ;;  %3196 = vrot.lane.b32.xlu1 %v3097_v11, %s7985_s20 }
 0xbf4   :  { %4739 = vmatpush.msrb.mxu3 %v9728_v32 }
 0xbf5   :  { %5790 = vmatpush.msrb.mxu1 %v9720_v52  ;;  %7591 = vmatmul.msk.f32.gmra.mxu3 %vm42_vm0, %v9574_v45 }
 0xbf6   :  { %4740 = vmatpush.msrb.mxu3 %v9720_v52  ;;  %7623 = vmatmul.msk.f32.gmra.mxu0 %vm42_vm0, %v7982_v17 }
 0xbf7   :  { %5791 = vmatpush.msrb.mxu1 %v9712_v9 }
 0xbf8   :  { %4741 = vmatpush.msrb.mxu3 %v9712_v9  ;;  %v3099_v21 = vpop.f32.mrf.mxu3 }
 0xbf9   :  { %5792 = vmatpush.msrb.mxu1 %v9704_v58  ;;  %v3100_v33 = vadd.f32 %v9754_v48, %v3099_v21 }
 0xbfa   :  { %4742 = vmatpush.msrb.mxu3 %v9704_v58  ;;  %v9777_v15 = vpop.f32.mrf.mxu0 }
 0xbfb   :  { %5793 = vmatpush.msrb.mxu1 %v9696_v25  ;;  %3198 = vrot.lane.b32.xlu1 %v3100_v33, %s7985_s20 }
 0xbfc   :  { %4743 = vmatpush.msrb.mxu3 %v9696_v25 }
 0xbfd   :  { %5794 = vmatpush.msrb.mxu1 %v9688_v13  ;;  %7592 = vmatmul.msk.f32.gmra.mxu3 %vm42_vm0, %v9563_v44 }
 0xbfe   :  { %4744 = vmatpush.msrb.mxu3 %v9688_v13  ;;  %7624 = vmatmul.msk.f32.gmra.mxu0 %vm42_vm0, %v7982_v17 }
 0xbff   :  { %5795 = vmatpush.msrb.mxu1 %v9680_v42 }
 0xc00   :  { %4745 = vmatpush.msrb.mxu3 %v9680_v42  ;;  %v3102_v43 = vpop.f32.mrf.mxu3 }
 0xc01   :  { %5796 = vmatpush.msrb.mxu1 %v9672_v49  ;;  %v3103_v8 = vadd.f32 %v9754_v48, %v3102_v43 }
 0xc02   :  { %4746 = vmatpush.msrb.mxu3 %v9672_v49  ;;  %v9793_v30 = vpop.f32.mrf.mxu0 }
 0xc03   :  { %3200 = vrot.lane.b32.xlu2 %v3103_v8, %s7985_s20 }
 0xc05   :  { %7593 = vmatmul.msk.f32.gmra.mxu3 %vm42_vm0, %v9560_v61 }
 0xc06   :  { %7625 = vmatmul.msk.f32.gmra.mxu0 %vm42_vm0, %v7982_v17 }
 0xc08   :  { %v3105_v2 = vpop.f32.mrf.mxu3 }
 0xc09   :  { %v3106_v59 = vadd.f32 %v9754_v48, %v3105_v2 }
 0xc0a   :  { %v9801_v31 = vpop.f32.mrf.mxu0 }
 0xc0b   :  { %3202 = vrot.lane.b32.xlu0 %v3106_v59, %s7985_s20 }
 0xc0d   :  { %7594 = vmatmul.msk.f32.gmra.mxu3 %vm42_vm0, %v9543_v24 }
 0xc0e   :  { %7626 = vmatmul.msk.f32.gmra.mxu0 %vm42_vm0, %v7982_v17 }
 0xc10   :  { %v3108_v28 = vpop.f32.mrf.mxu3 }
 0xc11   :  { %v3109_v4 = vadd.f32 %v9754_v48, %v3108_v28 }
 0xc12   :  { %v9809_v56 = vpop.f32.mrf.mxu0 }
 0xc13   :  { %3204 = vrot.lane.b32.xlu0 %v3109_v4, %s7985_s20 }
 0xc15   :  { %7595 = vmatmul.msk.f32.gmra.mxu3 %vm42_vm0, %v9540_v36 }
 0xc16   :  { %7627 = vmatmul.msk.f32.gmra.mxu0 %vm42_vm0, %v7982_v17 }
 0xc18   :  { %v3111_v55 = vpop.f32.mrf.mxu3 }
 0xc19   :  { %v3112_v14 = vadd.f32 %v9754_v48, %v3111_v55 }
 0xc1a   :  { %v9817_v24 = vpop.f32.mrf.mxu0 }
 0xc1b   :  { %3206 = vrot.lane.b32.xlu0 %v3112_v14, %s7985_s20 }
 0xc1d   :  { %7596 = vmatmul.msk.f32.gmra.mxu3 %vm42_vm0, %v9520_v51 }
 0xc1e   :  { %7628 = vmatmul.msk.f32.gmra.mxu0 %vm42_vm0, %v7982_v17 }
 0xc20   :  { %v3114_v23 = vpop.f32.mrf.mxu3 }
 0xc21   :  { %v3115_v0 = vadd.f32 %v9754_v48, %v3114_v23 }
 0xc22   :  { %v9825_v36 = vpop.f32.mrf.mxu0 }
 0xc23   :  { %4594 = vmatpush.msrb.mxu0 %v9825_v36  ;;  %5434 = vmatpush.msra.mxu2 %v9825_v36 }
 0xc24   :  { %3208 = vrot.lane.b32.xlu1 %v3115_v0, %s7985_s20 }
 0xc25   :  { %4595 = vmatpush.msrb.mxu0 %v9817_v24  ;;  %5435 = vmatpush.msra.mxu2 %v9817_v24 }
 0xc26   :  { %7597 = vmatmul.msk.f32.gmra.mxu3 %vm42_vm0, %v9515_v60  ;;  %7629 = vmatmul.msk.f32.gmra.mxu0 %vm42_vm0, %v7982_v17  ;;  %vm3261_vm0 = vcmp.lt.s32.totalorder %v8149_v26, 64 }
 0xc27   :  { %4596 = vmatpush.msrb.mxu0 %v9809_v56  ;;  %5436 = vmatpush.msra.mxu2 %v9809_v56 }
 0xc28   :  { %v3117_v51 = vpop.f32.mrf.mxu3 }
 0xc29   :  { %v3118_v20 = vadd.f32 %v9754_v48, %v3117_v51  ;;  %4597 = vmatpush.msrb.mxu0 %v9801_v31  ;;  %5437 = vmatpush.msra.mxu2 %v9801_v31 }
 0xc2a   :  { %v3473_v1 = vpop.f32.mrf.mxu0 }
 0xc2b   :  { %4598 = vmatpush.msrb.mxu0 %v9793_v30  ;;  %5438 = vmatpush.msra.mxu2 %v9793_v30 }
 0xc2c   :  { %3210 = vrot.lane.b32.xlu2 %v3118_v20, %s7985_s20 }
 0xc2d   :  { %4599 = vmatpush.msrb.mxu0 %v9777_v15  ;;  %5439 = vmatpush.msra.mxu2 %v9777_v15 }
 0xc2f   :  { %4600 = vmatpush.msrb.mxu0 %v9761_v46  ;;  %5440 = vmatpush.msra.mxu2 %v9761_v46 }
 0xc30   :  { %v3344_v17 = vpop.f32.mrf.mxu3 }
 0xc31   :  { %4601 = vmatpush.msrb.mxu0 %v9744_v16  ;;  %5441 = vmatpush.msra.mxu2 %v9744_v16  ;;  %v3521_v5 = vmul.f32 2.0, %v3344_v17 }
 0xc32   :  { %v3476_v60 = vpop.f32.mrf.mxu0 }
 0xc33   :  { %4804 = vmatpush.msra.mxu0 %v9825_v36  ;;  %5854 = vmatpush.msrb.mxu2 %v9825_v36  ;;  %v3537_v62 = vsub.f32 %v3473_v1, %v3521_v5 }
 0xc35   :  { %4805 = vmatpush.msra.mxu0 %v9817_v24  ;;  %5855 = vmatpush.msrb.mxu2 %v9817_v24  ;;  %v3569_v12 = vand.u32 4294967168, %v3537_v62 }
 0xc37   :  { %4806 = vmatpush.msra.mxu0 %v9809_v56  ;;  %5856 = vmatpush.msrb.mxu2 %v9809_v56  ;;  %v3585_v57 = vor.u32 %v3569_v12, %v8149_v26 }
 0xc38   :  { %v3347_v61 = vpop.f32.mrf.mxu3 }
 0xc39   :  { %4807 = vmatpush.msra.mxu0 %v9801_v31  ;;  %5857 = vmatpush.msrb.mxu2 %v9801_v31  ;;  %v3522_v44 = vmul.f32 2.0, %v3347_v61  ;;  %v9876_v33 = vsel %vm3261_vm0, %v3585_v57, 1e+30 }
 0xc3a   :  { %v3479_v29 = vpop.f32.mrf.mxu0 }
 0xc3b   :  { %4808 = vmatpush.msra.mxu0 %v9793_v30  ;;  %5858 = vmatpush.msrb.mxu2 %v9793_v30  ;;  %v3538_v45 = vsub.f32 %v3476_v60, %v3522_v44 }
 0xc3d   :  { %4809 = vmatpush.msra.mxu0 %v9777_v15  ;;  %5859 = vmatpush.msrb.mxu2 %v9777_v15  ;;  %v3570_v19 = vand.u32 4294967168, %v3538_v45 }
 0xc3f   :  { %4810 = vmatpush.msra.mxu0 %v9761_v46  ;;  %5860 = vmatpush.msrb.mxu2 %v9761_v46  ;;  %v3586_v34 = vor.u32 %v3570_v19, %v8149_v26 }
 0xc40   :  { %v3350_v18 = vpop.f32.mrf.mxu3 }
 0xc41   :  { %4811 = vmatpush.msra.mxu0 %v9744_v16  ;;  %5861 = vmatpush.msrb.mxu2 %v9744_v16  ;;  %v3523_v63 = vmul.f32 2.0, %v3350_v18  ;;  %v9870_v22 = vsel %vm3261_vm0, %v3586_v34, 1e+30 }
 0xc42   :  { %v3482_v47 = vpop.f32.mrf.mxu0 }
 0xc43   :  { %v3539_v50 = vsub.f32 %v3479_v29, %v3523_v63 }
 0xc45   :  { %3635 = vmin.xlane.f32.xlu0 %v9870_v22  ;;  %v3571_v11 = vand.u32 4294967168, %v3539_v50 }
 0xc47   :  { %v3587_v8 = vor.u32 %v3571_v11, %v8149_v26 }
 0xc48   :  { %v3353_v41 = vpop.f32.mrf.mxu3 }
 0xc49   :  { %v3524_v10 = vmul.f32 2.0, %v3353_v41  ;;  %v9883_v55 = vsel %vm3261_vm0, %v3587_v8, 1e+30 }
 0xc4a   :  { %v3485_v48 = vpop.f32.mrf.mxu0 }
 0xc4b   :  { %v3540_v27 = vsub.f32 %v3482_v47, %v3524_v10 }
 0xc4d   :  { %v3572_v21 = vand.u32 4294967168, %v3540_v27 }
 0xc4e   :  { %3633 = vmin.xlane.f32.xlu1 %v9876_v33 }
 0xc4f   :  { %v3588_v59 = vor.u32 %v3572_v21, %v8149_v26 }
 0xc50   :  { %v3356_v43 = vpop.f32.mrf.mxu3 }
 0xc51   :  { %v3525_v2 = vmul.f32 2.0, %v3356_v43  ;;  %v9888_v23 = vsel %vm3261_vm0, %v3588_v59, 1e+30 }
 0xc52   :  { %v3488_v28 = vpop.f32.mrf.mxu0 }
 0xc53   :  { %v3541_v4 = vsub.f32 %v3485_v48, %v3525_v2 }
 0xc55   :  { %v3573_v14 = vand.u32 4294967168, %v3541_v4  ;;  %3637 = vmin.xlane.f32.xlu2 %v9883_v55 }
 0xc56   :  { %3639 = vmin.xlane.f32.xlu1 %v9888_v23 }
 0xc57   :  { %v3589_v0 = vor.u32 %v3573_v14, %v8149_v26 }
 0xc58   :  { %v3359_v51 = vpop.f32.mrf.mxu3 }
 0xc59   :  { %v3526_v20 = vmul.f32 2.0, %v3359_v51  ;;  %v9894_v1 = vsel %vm3261_vm0, %v3589_v0, 1e+30 }
 0xc5a   :  { %3641 = vmin.xlane.f32.xlu0 %v9894_v1  ;;  %v3491_v17 = vpop.f32.mrf.mxu0 }
 0xc5b   :  { %v3542_v60 = vsub.f32 %v3488_v28, %v3526_v20 }
 0xc5d   :  { %v3574_v61 = vand.u32 4294967168, %v3542_v60 }
 0xc5f   :  { %v3590_v44 = vor.u32 %v3574_v61, %v8149_v26 }
 0xc60   :  { %v3362_v29 = vpop.f32.mrf.mxu3 }
 0xc61   :  { %v3527_v45 = vmul.f32 2.0, %v3362_v29  ;;  %v9900_v5 = vsel %vm3261_vm0, %v3590_v44, 1e+30 }
 0xc62   :  { %3643 = vmin.xlane.f32.xlu2 %v9900_v5 }
 0xc63   :  { %v3543_v19 = vsub.f32 %v3491_v17, %v3527_v45  ;;  %v3494_v18 = vpop.f32.mrf.mxu0 }
 0xc65   :  { %v3575_v34 = vand.u32 4294967168, %v3543_v19 }
 0xc67   :  { %v3591_v62 = vor.u32 %v3575_v34, %v8149_v26 }
 0xc68   :  { %v3365_v47 = vpop.f32.mrf.mxu3 }
 0xc69   :  { %v3528_v63 = vmul.f32 2.0, %v3365_v47  ;;  %v9906_v12 = vsel %vm3261_vm0, %v3591_v62, 1e+30 }
 0xc6a   :  { %3645 = vmin.xlane.f32.xlu1 %v9906_v12 }
 0xc6b   :  { %v3544_v50 = vsub.f32 %v3494_v18, %v3528_v63  ;;  %v3497_v41 = vpop.f32.mrf.mxu0 }
 0xc6d   :  { %v3576_v10 = vand.u32 4294967168, %v3544_v50 }
 0xc6f   :  { %v3592_v57 = vor.u32 %v3576_v10, %v8149_v26 }
 0xc70   :  { %v3368_v48 = vpop.f32.mrf.mxu3 }
 0xc71   :  { %v3529_v27 = vmul.f32 2.0, %v3368_v48  ;;  %v9912_v11 = vsel %vm3261_vm0, %v3592_v57, 1e+30 }
 0xc72   :  { %3647 = vmin.xlane.f32.xlu0 %v9912_v11 }
 0xc73   :  { %v3545_v21 = vsub.f32 %v3497_v41, %v3529_v27  ;;  %v3500_v43 = vpop.f32.mrf.mxu0 }
 0xc75   :  { %v3577_v8 = vand.u32 4294967168, %v3545_v21 }
 0xc77   :  { %v3593_v2 = vor.u32 %v3577_v8, %v8149_v26 }
 0xc78   :  { %v3371_v59 = vpop.f32.mrf.mxu3 }
 0xc79   :  { %v9919_v28 = vsel %vm3294_vm8, %v3593_v2, 1e+30  ;;  %v3530_v4 = vmul.f32 2.0, %v3371_v59 }
 0xc7a   :  { %3649 = vmin.xlane.f32.xlu2 %v9919_v28 }
 0xc7b   :  { %v3546_v14 = vsub.f32 %v3500_v43, %v3530_v4  ;;  %v3503_v0 = vpop.f32.mrf.mxu0 }
 0xc7d   :  { %v3578_v51 = vand.u32 4294967168, %v3546_v14  ;;  %v9946_v14 = vpop.permute.xlu0 %3202 }
 0xc7f   :  { %v3594_v20 = vor.u32 %v3578_v51, %v8149_v26 }
 0xc80   :  { %v3374_v17 = vpop.f32.mrf.mxu3 }
 0xc81   :  { %v3531_v60 = vmul.f32 2.0, %v3374_v17  ;;  %v9925_v61 = vsel %vm3294_vm8, %v3594_v20, 1e+30 }
 0xc82   :  { %3651 = vmin.xlane.f32.xlu0 %v9925_v61 }
 0xc83   :  { %v3547_v44 = vsub.f32 %v3503_v0, %v3531_v60  ;;  %v3506_v29 = vpop.f32.mrf.mxu0 }
 0xc85   :  { %v3579_v45 = vand.u32 4294967168, %v3547_v44 }
 0xc87   :  { %v3595_v19 = vor.u32 %v3579_v45, %v8149_v26 }
 0xc88   :  { %v3377_v18 = vpop.f32.mrf.mxu3 }
 0xc89   :  { %v3532_v34 = vmul.f32 2.0, %v3377_v18  ;;  %v9931_v62 = vsel %vm3294_vm8, %v3595_v19, 1e+30  ;;  %v9954_v19 = vpop.permute.xlu0 %3204 }
 0xc8a   :  { %3653 = vmin.xlane.f32.xlu1 %v9931_v62  ;;  %12569 = vst [vmem:[#allocation7_spill] sm:$0xff] %v9954_v19 }
 0xc8b   :  { %v3548_v47 = vsub.f32 %v3506_v29, %v3532_v34  ;;  %v3509_v63 = vpop.f32.mrf.mxu0  ;;  %v9956_v34 = vpop.permute.xlu1 %3196 }
 0xc8d   :  { %v3580_v50 = vand.u32 4294967168, %v3548_v47 }
 0xc8f   :  { %v3596_v41 = vor.u32 %v3580_v50, %v8149_v26 }
 0xc90   :  { %v3380_v10 = vpop.f32.mrf.mxu3 }
 0xc91   :  { %v3533_v57 = vmul.f32 2.0, %v3380_v10  ;;  %v9937_v48 = vsel %vm3294_vm8, %v3596_v41, 1e+30 }
 0xc92   :  { %3655 = vmin.xlane.f32.xlu2 %v9937_v48 }
 0xc93   :  { %v3549_v27 = vsub.f32 %v3509_v63, %v3533_v57  ;;  %v3512_v21 = vpop.f32.mrf.mxu0 }
 0xc95   :  { %v3581_v43 = vand.u32 4294967168, %v3549_v27 }
 0xc97   :  { %v3597_v8 = vor.u32 %v3581_v43, %v8149_v26 }
 0xc98   :  { %v3383_v2 = vpop.f32.mrf.mxu3 }
 0xc99   :  { %v3534_v59 = vmul.f32 2.0, %v3383_v2  ;;  %v9943_v4 = vsel %vm3294_vm8, %v3597_v8, 1e+30  ;;  %v9967_v8 = vpop.permute.xlu1 %3198 }
 0xc9a   :  { %3657 = vmin.xlane.f32.xlu0 %v9943_v4  ;;  %12571 = vst [vmem:[#allocation9_spill] sm:$0xff] %v9967_v8 }
 0xc9b   :  { %v3550_v0 = vsub.f32 %v3512_v21, %v3534_v59  ;;  %v3515_v20 = vpop.f32.mrf.mxu0  ;;  %v9964_v21 = vpop.permute.xlu0 %3206 }
 0xc9c   :  { %12570 = vst [vmem:[#allocation8_spill] sm:$0xff] %v9964_v21  ;;  %v9974_v59 = vpop.permute.xlu2 %3200 }
 0xc9d   :  { %v3582_v51 = vand.u32 4294967168, %v3550_v0 }
 0xc9f   :  { %v3598_v17 = vor.u32 %v3582_v51, %v8149_v26 }
 0xca0   :  { %v3386_v60 = vpop.f32.mrf.mxu3 }
 0xca1   :  { %v3535_v44 = vmul.f32 2.0, %v3386_v60  ;;  %v9951_v29 = vsel %vm3294_vm8, %v3598_v17, 1e+30  ;;  %v9976_v51 = vpop.permute.xlu1 %3208 }
 0xca2   :  { %3659 = vmin.xlane.f32.xlu2 %v9951_v29 }
 0xca3   :  { %v3551_v45 = vsub.f32 %v3515_v20, %v3535_v44  ;;  %v3518_v50 = vpop.f32.mrf.mxu0 }
 0xca4   :  { %v9989_v44 = vpop.permute.xlu2 %3210 }
 0xca5   :  { %v3583_v18 = vand.u32 4294967168, %v3551_v45 }
 0xca7   :  { %v3599_v47 = vor.u32 %v3583_v18, %v8149_v26 }
 0xca9   :  { %v3389_v63 = vpop.f32.mrf.mxu3  ;;  %v9961_v10 = vsel %vm3294_vm8, %v3599_v47, 1e+30 }
 0xcaa   :  { %v3536_v41 = vmul.f32 2.0, %v3389_v63  ;;  %3661 = vmin.xlane.f32.xlu1 %v9961_v10 }
 0xcac   :  { %v3552_v57 = vsub.f32 %v3518_v50, %v3536_v41 }
 0xcae   :  { %v3584_v27 = vand.u32 4294967168, %v3552_v57 }
 0xcb0   :  { %v3600_v43 = vor.u32 %v3584_v27, %v8149_v26 }
 0xcb2   :  { %v9971_v2 = vsel %vm3294_vm8, %v3600_v43, 1e+30 }
 0xcb3   :  { %3663 = vmin.xlane.f32.xlu0 %v9971_v2 }
 0xcb8   :  { %v3636_v0 = vpop.xlane.xlu0 %3635 }
 0xcb9   :  { %v3682_v20 = vand.u32 127, %v3636_v0 }
 0xcbb   :  { %vm9979_vm9 = vcmp.eq.s32.totalorder %v8149_v26, %v3682_v20 }
 0xcbc   :  { %v9986_v60 = vsel %vm9979_vm9, 1e+30, %v9870_v22  ;;  %v4474_v0 = vsel %vm9979_vm9, 1.0, %v12549_v3 }
 0xcbd   :  { %3731 = vmin.xlane.f32.xlu0 %v9986_v60 }
 0xcc1   :  { %v3634_v45 = vpop.xlane.xlu1 %3633 }
 0xcc2   :  { %v3681_v18 = vand.u32 127, %v3634_v45 }
 0xcc4   :  { %vm3697_vm10 = vcmp.eq.s32.totalorder %v8149_v26, %v3681_v18 }
 0xcc5   :  { %v4473_v47 = vsel %vm3697_vm10, 1.0, %v12549_v3  ;;  %v9994_v63 = vsel %vm3697_vm10, 1e+30, %v9876_v33 }
 0xcc6   :  { %7638 = vmatmul.msk.f32.vlgmr.msra.gmra.mxu3 %vm372_vm3, %v4473_v47  ;;  %3729 = vmin.xlane.f32.xlu1 %v9994_v63 }
 0xcc7   :  { %4949 = vmatpush.msra.mxu3 %v9728_v32 }
 0xcc8   :  { %v3638_v22 = vpop.xlane.xlu2 %3637 }
 0xcc9   :  { %4950 = vmatpush.msra.mxu3 %v9720_v52  ;;  %v3683_v50 = vand.u32 127, %v3638_v22  ;;  %v3640_v41 = vpop.xlane.xlu1 %3639 }
 0xcca   :  { %v3684_v57 = vand.u32 127, %v3640_v41 }
 0xccb   :  { %4951 = vmatpush.msra.mxu3 %v9712_v9  ;;  %vm10002_vm11 = vcmp.eq.s32.totalorder %v8149_v26, %v3683_v50 }
 0xccc   :  { %v10009_v33 = vsel %vm10002_vm11, 1e+30, %v9883_v55  ;;  %vm10012_vm12 = vcmp.eq.s32.totalorder %v8149_v26, %v3684_v57  ;;  %v4475_v18 = vsel %vm10002_vm11, 1.0, %v12549_v3 }
 0xccd   :  { %4952 = vmatpush.msra.mxu3 %v9704_v58  ;;  %3733 = vmin.xlane.f32.xlu2 %v10009_v33  ;;  %v10024_v20 = vsel %vm10012_vm12, 1e+30, %v9888_v23  ;;  %v3642_v55 = vpop.xlane.xlu0 %3641  ;;  %v4476_v41 = vsel %vm10012_vm12, 1.0, %v12549_v3 }
 0xcce   :  { %3735 = vmin.xlane.f32.xlu1 %v10024_v20  ;;  %7639 = vmatmul.msk.f32.gmra.mxu3 %vm372_vm3, %v4474_v0  ;;  %v3685_v45 = vand.u32 127, %v3642_v55 }
 0xccf   :  { %4953 = vmatpush.msra.mxu3 %v9696_v25 }
 0xcd0   :  { %vm10030_vm13 = vcmp.eq.s32.totalorder %v8149_v26, %v3685_v45 }
 0xcd1   :  { %4954 = vmatpush.msra.mxu3 %v9688_v13  ;;  %v10038_v23 = vsel %vm10030_vm13, 1e+30, %v9894_v1  ;;  %v4477_v43 = vsel %vm10030_vm13, 1.0, %v12549_v3 }
 0xcd2   :  { %3737 = vmin.xlane.f32.xlu0 %v10038_v23 }
 0xcd3   :  { %4955 = vmatpush.msra.mxu3 %v9680_v42 }
 0xcd5   :  { %4956 = vmatpush.msra.mxu3 %v9672_v49  ;;  %v3644_v47 = vpop.xlane.xlu2 %3643 }
 0xcd6   :  { %7640 = vmatmul.msk.f32.gmra.mxu3 %vm372_vm3, %v4475_v18  ;;  %v3686_v22 = vand.u32 127, %v3644_v47 }
 0xcd8   :  { %vm10048_vm14 = vcmp.eq.s32.totalorder %v8149_v26, %v3686_v22 }
 0xcd9   :  { %v10055_v1 = vsel %vm10048_vm14, 1e+30, %v9900_v5  ;;  %v4478_v17 = vsel %vm10048_vm14, 1.0, %v12549_v3 }
 0xcda   :  { %3739 = vmin.xlane.f32.xlu2 %v10055_v1 }
 0xcdd   :  { %v3646_v57 = vpop.xlane.xlu1 %3645 }
 0xcde   :  { %v3687_v27 = vand.u32 127, %v3646_v57  ;;  %7641 = vmatmul.msk.f32.gmra.mxu3 %vm372_vm3, %v4476_v41 }
 0xce0   :  { %vm10063_vm15 = vcmp.eq.s32.totalorder %v8149_v26, %v3687_v27 }
 0xce1   :  { %v10070_v5 = vsel %vm10063_vm15, 1e+30, %v9906_v12  ;;  %v4479_v50 = vsel %vm10063_vm15, 1.0, %v12549_v3 }
 0xce2   :  { %3741 = vmin.xlane.f32.xlu2 %v10070_v5 }
 0xce5   :  { %v3648_v55 = vpop.xlane.xlu0 %3647 }
 0xce6   :  { %v3688_v45 = vand.u32 127, %v3648_v55  ;;  %7642 = vmatmul.msk.f32.gmra.mxu3 %vm372_vm3, %v4477_v43 }
 0xce8   :  { %vm10078_vm2 = vcmp.eq.s32.totalorder %v8149_v26, %v3688_v45 }
 0xce9   :  { %v10085_v12 = vsel %vm10078_vm2, 1e+30, %v9912_v11  ;;  %v4480_v45 = vsel %vm10078_vm2, 1.0, %v12549_v3 }
 0xcea   :  { %3743 = vmin.xlane.f32.xlu2 %v10085_v12 }
 0xced   :  { %v3650_v47 = vpop.xlane.xlu2 %3649 }
 0xcee   :  { %7643 = vmatmul.msk.f32.gmra.mxu3 %vm372_vm3, %v4478_v17  ;;  %v3689_v22 = vand.u32 127, %v3650_v47 }
 0xcf0   :  { %v7630_v41 = vadd.s32 4294967232, %v3689_v22  ;;  %vm3705_vm4 = vcmp.eq.s32.totalorder %v8149_v26, %v3689_v22 }
 0xcf1   :  { %v10094_v57 = vsel %vm3705_vm4, 1e+30, %v9919_v28 }
 0xcf2   :  { %vm4481_vm6 = vcmp.eq.s32.totalorder %v8149_v26, %v7630_v41  ;;  %3745 = vmin.xlane.f32.xlu2 %v10094_v57 }
 0xcf3   :  { %v4489_v11 = vsel %vm4481_vm6, 1.0, %v12549_v3 }
 0xcf4   :  { %7646 = vmatmul.msk.f32.vlgmr.msrb.gmra.mxu0 %vm372_vm3, %v4489_v11 }
 0xcf5   :  { %5014 = vmatpush.msrb.mxu0 %v9825_v36  ;;  %v3652_v27 = vpop.xlane.xlu0 %3651 }
 0xcf6   :  { %7644 = vmatmul.msk.f32.gmra.mxu3 %vm372_vm3, %v4479_v50  ;;  %v3690_v43 = vand.u32 127, %v3652_v27 }
 0xcf7   :  { %5015 = vmatpush.msrb.mxu0 %v9817_v24 }
 0xcf8   :  { %v7631_v28 = vadd.s32 4294967232, %v3690_v43  ;;  %vm3706_vm7 = vcmp.eq.s32.totalorder %v8149_v26, %v3690_v43 }
 0xcf9   :  { %5016 = vmatpush.msrb.mxu0 %v9809_v56  ;;  %v10109_v55 = vsel %vm3706_vm7, 1e+30, %v9925_v61 }
 0xcfa   :  { %3747 = vmin.xlane.f32.xlu1 %v10109_v55  ;;  %vm4482_vm1 = vcmp.eq.s32.totalorder %v8149_v26, %v7631_v28 }
 0xcfb   :  { %5017 = vmatpush.msrb.mxu0 %v9801_v31  ;;  %v4490_v0 = vsel %vm4482_vm1, 1.0, %v12549_v3 }
 0xcfc   :  { %7647 = vmatmul.msk.f32.gmra.mxu0 %vm372_vm3, %v4490_v0 }
 0xcfd   :  { %5018 = vmatpush.msrb.mxu0 %v9793_v30  ;;  %v3654_v17 = vpop.xlane.xlu1 %3653 }
 0xcfe   :  { %7645 = vmatmul.msk.f32.gmra.mxu3 %vm372_vm3, %v4480_v45  ;;  %v3691_v61 = vand.u32 127, %v3654_v17 }
 0xcff   :  { %5019 = vmatpush.msrb.mxu0 %v9777_v15 }
 0xd00   :  { %v7632_v47 = vadd.s32 4294967232, %v3691_v61  ;;  %vm3707_vm0 = vcmp.eq.s32.totalorder %v8149_v26, %v3691_v61 }
 0xd01   :  { %5020 = vmatpush.msrb.mxu0 %v9761_v46  ;;  %v10125_v22 = vsel %vm3707_vm0, 1e+30, %v9931_v62 }
 0xd02   :  { %3749 = vmin.xlane.f32.xlu0 %v10125_v22  ;;  %vm4483_vm8 = vcmp.eq.s32.totalorder %v8149_v26, %v7632_v47 }
 0xd03   :  { %5021 = vmatpush.msrb.mxu0 %v9744_v16  ;;  %v4491_v18 = vsel %vm4483_vm8, 1.0, %v12549_v3 }
 0xd04   :  { %7648 = vmatmul.msk.f32.gmra.mxu0 %vm372_vm3, %v4491_v18 }
 0xd05   :  { %v3656_v41 = vpop.xlane.xlu2 %3655 }
 0xd06   :  { %v3692_v11 = vand.u32 127, %v3656_v41 }
 0xd08   :  { %v7633_v50 = vadd.s32 4294967232, %v3692_v11  ;;  %vm3708_vm9 = vcmp.eq.s32.totalorder %v8149_v26, %v3692_v11 }
 0xd09   :  { %v10134_v27 = vsel %vm3708_vm9, 1e+30, %v9937_v48 }
 0xd0a   :  { %3751 = vmin.xlane.f32.xlu2 %v10134_v27  ;;  %vm4484_vm10 = vcmp.eq.s32.totalorder %v8149_v26, %v7633_v50 }
 0xd0b   :  { %v4492_v62 = vsel %vm4484_vm10, 1.0, %v12549_v3 }
 0xd0c   :  { %7649 = vmatmul.msk.f32.gmra.mxu0 %vm372_vm3, %v4492_v62 }
 0xd0d   :  { %v3658_v43 = vpop.xlane.xlu0 %3657 }
 0xd0e   :  { %v3693_v28 = vand.u32 127, %v3658_v43 }
 0xd10   :  { %v7634_v0 = vadd.s32 4294967232, %v3693_v28  ;;  %vm3709_vm11 = vcmp.eq.s32.totalorder %v8149_v26, %v3693_v28 }
 0xd11   :  { %v10142_v45 = vsel %vm3709_vm11, 1e+30, %v9943_v4 }
 0xd12   :  { %3753 = vmin.xlane.f32.xlu2 %v10142_v45  ;;  %vm4485_vm12 = vcmp.eq.s32.totalorder %v8149_v26, %v7634_v0 }
 0xd13   :  { %v4493_v48 = vsel %vm4485_vm12, 1.0, %v12549_v3 }
 0xd14   :  { %7650 = vmatmul.msk.f32.gmra.mxu0 %vm372_vm3, %v4493_v48 }
 0xd15   :  { %v3660_v17 = vpop.xlane.xlu2 %3659 }
 0xd16   :  { %v3694_v61 = vand.u32 127, %v3660_v17 }
 0xd18   :  { %v7635_v47 = vadd.s32 4294967232, %v3694_v61  ;;  %vm3710_vm13 = vcmp.eq.s32.totalorder %v8149_v26, %v3694_v61 }
 0xd19   :  { %v10150_v18 = vsel %vm3710_vm13, 1e+30, %v9951_v29 }
 0xd1a   :  { %3755 = vmin.xlane.f32.xlu1 %v10150_v18  ;;  %vm4486_vm14 = vcmp.eq.s32.totalorder %v8149_v26, %v7635_v47 }
 0xd1b   :  { %v4494_v4 = vsel %vm4486_vm14, 1.0, %v12549_v3 }
 0xd1c   :  { %7651 = vmatmul.msk.f32.gmra.mxu0 %vm372_vm3, %v4494_v4 }
 0xd1d   :  { %v3662_v41 = vpop.xlane.xlu1 %3661 }
 0xd1e   :  { %v3695_v11 = vand.u32 127, %v3662_v41 }
 0xd20   :  { %v7636_v50 = vadd.s32 4294967232, %v3695_v11  ;;  %vm3711_vm15 = vcmp.eq.s32.totalorder %v8149_v26, %v3695_v11 }
 0xd21   :  { %v10158_v62 = vsel %vm3711_vm15, 1e+30, %v9961_v10 }
 0xd22   :  { %3757 = vmin.xlane.f32.xlu0 %v10158_v62  ;;  %vm4487_vm2 = vcmp.eq.s32.totalorder %v8149_v26, %v7636_v50 }
 0xd23   :  { %v4495_v29 = vsel %vm4487_vm2, 1.0, %v12549_v3 }
 0xd24   :  { %7652 = vmatmul.msk.f32.gmra.mxu0 %vm372_vm3, %v4495_v29 }
 0xd26   :  { %v3664_v43 = vpop.xlane.xlu0 %3663 }
 0xd27   :  { %v3696_v28 = vand.u32 127, %v3664_v43 }
 0xd29   :  { %v7637_v0 = vadd.s32 4294967232, %v3696_v28  ;;  %vm3712_vm4 = vcmp.eq.s32.totalorder %v8149_v26, %v3696_v28 }
 0xd2a   :  { %v10166_v48 = vsel %vm3712_vm4, 1e+30, %v9971_v2 }
 0xd2b   :  { %3759 = vmin.xlane.f32.xlu2 %v10166_v48  ;;  %vm4488_vm6 = vcmp.eq.s32.totalorder %v8149_v26, %v7637_v0 }
 0xd2c   :  { %v4496_v10 = vsel %vm4488_vm6, 1.0, %v12549_v3 }
 0xd2d   :  { %7653 = vmatmul.msk.f32.gmra.mxu0 %vm372_vm3, %v4496_v10 }
 0xd30   :  { %v3732_v47 = vpop.xlane.xlu0 %3731 }
 0xd31   :  { %v3778_v2 = vand.u32 127, %v3732_v47 }
 0xd33   :  { %vm3794_vm1 = vcmp.eq.s32.totalorder %v8149_v26, %v3778_v2 }
 0xd34   :  { %v4684_v0 = vsel %vm3794_vm1, 1.0, %v12549_v3 }
 0xd39   :  { %v3730_v17 = vpop.xlane.xlu1 %3729 }
 0xd3a   :  { %v3777_v61 = vand.u32 127, %v3730_v17 }
 0xd3c   :  { %vm3793_vm7 = vcmp.eq.s32.totalorder %v8149_v26, %v3777_v61  ;;  %v10198_v61 = vsel %vm3794_vm1, 1e+30, %v9986_v60 }
 0xd3d   :  { %v4683_v4 = vsel %vm3793_vm7, 1.0, %v12549_v3  ;;  %v10175_v41 = vsel %vm3793_vm7, 1e+30, %v9994_v63 }
 0xd3e   :  { %7662 = vmatmul.msk.f32.vlgmr.msrb.gmra.mxu3 %vm372_vm3, %v4683_v4  ;;  %3825 = vmin.xlane.f32.xlu1 %v10175_v41 }
 0xd3f   :  { %5159 = vmatpush.msrb.mxu3 %v9728_v32 }
 0xd40   :  { %v3734_v29 = vpop.xlane.xlu2 %3733 }
 0xd41   :  { %5160 = vmatpush.msrb.mxu3 %v9720_v52  ;;  %v3736_v11 = vpop.xlane.xlu1 %3735  ;;  %v3779_v10 = vand.u32 127, %v3734_v29 }
 0xd42   :  { %v3780_v50 = vand.u32 127, %v3736_v11 }
 0xd43   :  { %5161 = vmatpush.msrb.mxu3 %v9712_v9  ;;  %vm3795_vm9 = vcmp.eq.s32.totalorder %v8149_v26, %v3779_v10 }
 0xd44   :  { %vm10184_vm0 = vcmp.eq.s32.totalorder %v8149_v26, %v3780_v50  ;;  %v4685_v60 = vsel %vm3795_vm9, 1.0, %v12549_v3  ;;  %v10220_v2 = vsel %vm3795_vm9, 1e+30, %v10009_v33 }
 0xd45   :  { %5162 = vmatpush.msrb.mxu3 %v9704_v58  ;;  %v10192_v43 = vsel %vm10184_vm0, 1e+30, %v10024_v20  ;;  %v3738_v28 = vpop.xlane.xlu0 %3737  ;;  %v4686_v50 = vsel %vm10184_vm0, 1.0, %v12549_v3 }
 0xd46   :  { %3831 = vmin.xlane.f32.xlu0 %v10192_v43  ;;  %v3781_v17 = vand.u32 127, %v3738_v28  ;;  %7663 = vmatmul.msk.f32.gmra.mxu3 %vm372_vm3, %v4684_v0 }
 0xd47   :  { %5163 = vmatpush.msrb.mxu3 %v9696_v25  ;;  %3827 = vmin.xlane.f32.xlu1 %v10198_v61 }
 0xd48   :  { %vm10203_vm8 = vcmp.eq.s32.totalorder %v8149_v26, %v3781_v17 }
 0xd49   :  { %5164 = vmatpush.msrb.mxu3 %v9688_v13  ;;  %v10211_v47 = vsel %vm10203_vm8, 1e+30, %v10038_v23 }
 0xd4a   :  { %3833 = vmin.xlane.f32.xlu2 %v10211_v47 }
 0xd4b   :  { %5165 = vmatpush.msrb.mxu3 %v9680_v42 }
 0xd4d   :  { %5166 = vmatpush.msrb.mxu3 %v9672_v49  ;;  %v3740_v4 = vpop.xlane.xlu2 %3739 }
 0xd4e   :  { %7664 = vmatmul.msk.f32.gmra.mxu3 %vm372_vm3, %v4685_v60  ;;  %v3782_v23 = vand.u32 127, %v3740_v4 }
 0xd4f   :  { %3829 = vmin.xlane.f32.xlu1 %v10220_v2 }
 0xd50   :  { %vm10224_vm10 = vcmp.eq.s32.totalorder %v8149_v26, %v3782_v23 }
 0xd51   :  { %v10235_v33 = vsel %vm10224_vm10, 1e+30, %v10055_v1  ;;  %v4687_v1 = vsel %vm10203_vm8, 1.0, %v12549_v3  ;;  %v4688_v20 = vsel %vm10224_vm10, 1.0, %v12549_v3 }
 0xd55   :  { %v3742_v29 = vpop.xlane.xlu2 %3741 }
 0xd56   :  { %7665 = vmatmul.msk.f32.gmra.mxu3 %vm372_vm3, %v4686_v50  ;;  %v3783_v28 = vand.u32 127, %v3742_v29 }
 0xd57   :  { %3835 = vmin.xlane.f32.xlu1 %v10235_v33 }
 0xd58   :  { %vm10239_vm11 = vcmp.eq.s32.totalorder %v8149_v26, %v3783_v28 }
 0xd59   :  { %v10246_v63 = vsel %vm10239_vm11, 1e+30, %v10070_v5  ;;  %v4689_v11 = vsel %vm10239_vm11, 1.0, %v12549_v3 }
 0xd5a   :  { %3837 = vmin.xlane.f32.xlu2 %v10246_v63 }
 0xd5d   :  { %v3744_v10 = vpop.xlane.xlu2 %3743 }
 0xd5e   :  { %7666 = vmatmul.msk.f32.gmra.mxu3 %vm372_vm3, %v4687_v1  ;;  %v3784_v17 = vand.u32 127, %v3744_v10 }
 0xd60   :  { %vm10254_vm12 = vcmp.eq.s32.totalorder %v8149_v26, %v3784_v17 }
 0xd61   :  { %v10261_v5 = vsel %vm10254_vm12, 1e+30, %v10085_v12 }
 0xd62   :  { %3839 = vmin.xlane.f32.xlu2 %v10261_v5 }
 0xd65   :  { %v3746_v4 = vpop.xlane.xlu2 %3745 }
 0xd66   :  { %7667 = vmatmul.msk.f32.gmra.mxu3 %vm372_vm3, %v4688_v20  ;;  %v3785_v23 = vand.u32 127, %v3746_v4  ;;  %v4690_v20 = vsel %vm10254_vm12, 1.0, %v12549_v3 }
 0xd68   :  { %v7654_v50 = vadd.s32 4294967232, %v3785_v23  ;;  %vm3801_vm13 = vcmp.eq.s32.totalorder %v8149_v26, %v3785_v23 }
 0xd69   :  { %v10270_v29 = vsel %vm3801_vm13, 1e+30, %v10094_v57 }
 0xd6a   :  { %vm4691_vm14 = vcmp.eq.s32.totalorder %v8149_v26, %v7654_v50  ;;  %3841 = vmin.xlane.f32.xlu1 %v10270_v29 }
 0xd6b   :  { %v4699_v12 = vsel %vm4691_vm14, 1.0, %v12549_v3 }
 0xd6c   :  { %7670 = vmatmul.msk.f32.vlgmr.msra.gmra.mxu0 %vm372_vm3, %v4699_v12 }
 0xd6d   :  { %5224 = vmatpush.msra.mxu0 %v9825_v36  ;;  %v3748_v28 = vpop.xlane.xlu1 %3747 }
 0xd6e   :  { %7668 = vmatmul.msk.f32.gmra.mxu3 %vm372_vm3, %v4689_v11  ;;  %v3786_v1 = vand.u32 127, %v3748_v28 }
 0xd6f   :  { %5225 = vmatpush.msra.mxu0 %v9817_v24 }
 0xd70   :  { %v7655_v57 = vadd.s32 4294967232, %v3786_v1  ;;  %vm3802_vm15 = vcmp.eq.s32.totalorder %v8149_v26, %v3786_v1 }
 0xd71   :  { %5226 = vmatpush.msra.mxu0 %v9809_v56  ;;  %v4603_v10 = vpop.f32.mrf.mxu0  ;;  %v10285_v17 = vsel %vm3802_vm15, 1e+30, %v10109_v55 }
 0xd72   :  { %3843 = vmin.xlane.f32.xlu0 %v10285_v17  ;;  %vm4692_vm2 = vcmp.eq.s32.totalorder %v8149_v26, %v7655_v57 }
 0xd73   :  { %5227 = vmatpush.msra.mxu0 %v9801_v31  ;;  %v4700_v0 = vsel %vm4692_vm2, 1.0, %v12549_v3 }
 0xd74   :  { %7671 = vmatmul.msk.f32.gmra.mxu0 %vm372_vm3, %v4700_v0 }
 0xd75   :  { %5228 = vmatpush.msra.mxu0 %v9793_v30  ;;  %v3750_v4 = vpop.xlane.xlu0 %3749 }
 0xd76   :  { %7669 = vmatmul.msk.f32.gmra.mxu3 %vm372_vm3, %v4690_v20  ;;  %v3787_v55 = vand.u32 127, %v3750_v4 }
 0xd77   :  { %5229 = vmatpush.msra.mxu0 %v9777_v15 }
 0xd78   :  { %v7656_v23 = vadd.s32 4294967232, %v3787_v55  ;;  %vm3803_vm10 = vcmp.eq.s32.totalorder %v8149_v26, %v3787_v55 }
 0xd79   :  { %5230 = vmatpush.msra.mxu0 %v9761_v46  ;;  %v4606_v50 = vpop.f32.mrf.mxu0 }
 0xd7a   :  { %vm4693_vm4 = vcmp.eq.s32.totalorder %v8149_v26, %v7656_v23 }
 0xd7b   :  { %5231 = vmatpush.msra.mxu0 %v9744_v16  ;;  %v4701_v12 = vsel %vm4693_vm4, 1.0, %v12549_v3 }
 0xd7c   :  { %7672 = vmatmul.msk.f32.gmra.mxu0 %vm372_vm3, %v4701_v12 }
 0xd7d   :  { %v3752_v60 = vpop.xlane.xlu2 %3751 }
 0xd7e   :  { %v3788_v11 = vand.u32 127, %v3752_v60 }
 0xd80   :  { %v7657_v28 = vadd.s32 4294967232, %v3788_v11  ;;  %vm3804_vm13 = vcmp.eq.s32.totalorder %v8149_v26, %v3788_v11 }
 0xd81   :  { %v10303_v1 = vpop.f32.mrf.mxu0 }
 0xd82   :  { %vm4694_vm6 = vcmp.eq.s32.totalorder %v8149_v26, %v7657_v28 }
 0xd83   :  { %4637 = vrot.lane.b32.xlu1 %v4606_v50, %s7985_s20  ;;  %v4702_v57 = vsel %vm4694_vm6, 1.0, %v12549_v3 }
 0xd84   :  { %7673 = vmatmul.msk.f32.gmra.mxu0 %vm372_vm3, %v4702_v57 }
 0xd85   :  { %v3754_v0 = vpop.xlane.xlu2 %3753 }
 0xd86   :  { %v3789_v20 = vand.u32 127, %v3754_v0  ;;  %4635 = vrot.lane.b32.xlu0 %v4603_v10, %s7985_s20 }
 0xd88   :  { %v7658_v4 = vadd.s32 4294967232, %v3789_v20  ;;  %vm3805_vm7 = vcmp.eq.s32.totalorder %v8149_v26, %v3789_v20 }
 0xd89   :  { %v4612_v23 = vpop.f32.mrf.mxu0  ;;  %v10312_v12 = vsel %vm3805_vm7, 1e+30, %v10142_v45 }
 0xd8a   :  { %3849 = vmin.xlane.f32.xlu2 %v10312_v12  ;;  %vm4695_vm1 = vcmp.eq.s32.totalorder %v8149_v26, %v7658_v4 }
 0xd8b   :  { %4641 = vrot.lane.b32.xlu1 %v4612_v23, %s7985_s20  ;;  %v4703_v50 = vsel %vm4695_vm1, 1.0, %v12549_v3 }
 0xd8c   :  { %7674 = vmatmul.msk.f32.gmra.mxu0 %vm372_vm3, %v4703_v50 }
 0xd8d   :  { %v3756_v60 = vpop.xlane.xlu1 %3755 }
 0xd8e   :  { %v3790_v28 = vand.u32 127, %v3756_v60 }
 0xd90   :  { %v7659_v10 = vadd.s32 4294967232, %v3790_v28  ;;  %vm3806_vm11 = vcmp.eq.s32.totalorder %v8149_v26, %v3790_v28 }
 0xd91   :  { %v4615_v57 = vpop.f32.mrf.mxu0 }
 0xd92   :  { %vm4696_vm0 = vcmp.eq.s32.totalorder %v8149_v26, %v7659_v10 }
 0xd93   :  { %v4704_v0 = vsel %vm4696_vm0, 1.0, %v12549_v3 }
 0xd94   :  { %7675 = vmatmul.msk.f32.gmra.mxu0 %vm372_vm3, %v4704_v0 }
 0xd95   :  { %v10322_v45 = vpop.xlane.xlu0 %3757 }
 0xd96   :  { %v12545_v20 = vand.u32 127, %v10322_v45 }
 0xd98   :  { %v7660_v4 = vadd.s32 4294967232, %v12545_v20 }
 0xd99   :  { %v10327_v23 = vpop.f32.mrf.mxu0 }
 0xd9a   :  { %vm4697_vm8 = vcmp.eq.s32.totalorder %v8149_v26, %v7660_v4 }
 0xd9b   :  { %v4705_v50 = vsel %vm4697_vm8, 1.0, %v12549_v3 }
 0xd9c   :  { %7676 = vmatmul.msk.f32.gmra.mxu0 %vm372_vm3, %v4705_v50  ;;  %v10345_v50 = vsel %vm3803_vm10, 1e+30, %v10125_v22 }
 0xd9e   :  { %v10332_v60 = vpop.xlane.xlu2 %3759 }
 0xd9f   :  { %v12546_v10 = vand.u32 127, %v10332_v60 }
 0xda1   :  { %v7661_v0 = vadd.s32 4294967232, %v12546_v10  ;;  %v10337_v39 = vpop.f32.mrf.mxu0 }
 0xda3   :  { %vm4698_vm9 = vcmp.eq.s32.totalorder %v8149_v26, %v7661_v0 }
 0xda4   :  { %v4706_v20 = vsel %vm4698_vm9, 1.0, %v12549_v3 }
 0xda5   :  { %7677 = vmatmul.msk.f32.gmra.mxu0 %vm372_vm3, %v4706_v20  ;;  %v10355_v20 = vsel %vm3806_vm11, 1e+30, %v10150_v18 }
 0xdaa   :  { %v4624_v4 = vpop.f32.mrf.mxu0 }
 0xdab   :  { %4649 = vrot.lane.b32.xlu2 %v4624_v4, %s7985_s20 }
 0xdb0   :  { %3845 = vmin.xlane.f32.xlu0 %v10345_v50 }
 0xdb1   :  { %v3826_v21 = vpop.xlane.xlu1 %3825 }
 0xdb2   :  { %v3873_v10 = vand.u32 127, %v3826_v21  ;;  %v10365_v21 = vsel %vm3804_vm13, 1e+30, %v10134_v27 }
 0xdb4   :  { %vm10350_vm12 = vcmp.eq.s32.totalorder %v8149_v26, %v3873_v10 }
 0xdb5   :  { %v4893_v55 = vsel %vm10350_vm12, 1.0, %v12549_v3  ;;  %3851 = vmin.xlane.f32.xlu1 %v10355_v20 }
 0xdb6   :  { %7686 = vmatmul.msk.f32.vlgmr.msra.gmra.mxu3 %vm372_vm3, %v4893_v55 }
 0xdb7   :  { %5579 = vmatpush.msra.mxu3 %v9728_v32 }
 0xdb8   :  { %3847 = vmin.xlane.f32.xlu0 %v10365_v21 }
 0xdb9   :  { %5580 = vmatpush.msra.mxu3 %v9720_v52  ;;  %v3832_v4 = vpop.xlane.xlu0 %3831 }
 0xdba   :  { %v3828_v22 = vpop.xlane.xlu1 %3827 }
 0xdbb   :  { %v3874_v18 = vand.u32 127, %v3828_v22  ;;  %5581 = vmatpush.msra.mxu3 %v9712_v9 }
 0xdbd   :  { %vm10371_vm14 = vcmp.eq.s32.totalorder %v8149_v26, %v3874_v18  ;;  %5582 = vmatpush.msra.mxu3 %v9704_v58  ;;  %v3876_v18 = vand.u32 127, %v3832_v4 }
 0xdbe   :  { %v4894_v27 = vsel %vm10371_vm14, 1.0, %v12549_v3 }
 0xdbf   :  { %7687 = vmatmul.msk.f32.gmra.mxu3 %vm372_vm3, %v4894_v27  ;;  %v3834_v27 = vpop.xlane.xlu2 %3833  ;;  %vm10394_vm2 = vcmp.eq.s32.totalorder %v8149_v26, %v3876_v18 }
 0xdc0   :  { %5583 = vmatpush.msra.mxu3 %v9696_v25  ;;  %v3877_v6 = vand.u32 127, %v3834_v27 }
 0xdc2   :  { %5584 = vmatpush.msra.mxu3 %v9688_v13  ;;  %v3830_v11 = vpop.xlane.xlu1 %3829  ;;  %vm3893_vm4 = vcmp.eq.s32.totalorder %v8149_v26, %v3877_v6 }
 0xdc3   :  { %v3875_v10 = vand.u32 127, %v3830_v11 }
 0xdc4   :  { %5585 = vmatpush.msra.mxu3 %v9680_v42 }
 0xdc5   :  { %vm10384_vm15 = vcmp.eq.s32.totalorder %v8149_v26, %v3875_v10  ;;  %v4896_v10 = vsel %vm10394_vm2, 1.0, %v12549_v3 }
 0xdc6   :  { %5586 = vmatpush.msra.mxu3 %v9672_v49  ;;  %v4895_v22 = vsel %vm10384_vm15, 1.0, %v12549_v3 }
 0xdc7   :  { %7688 = vmatmul.msk.f32.gmra.mxu3 %vm372_vm3, %v4895_v22  ;;  %v10407_v22 = vsel %vm3893_vm4, 1e+30, %v10211_v47 }
 0xdca   :  { %v3836_v18 = vpop.xlane.xlu1 %3835 }
 0xdcb   :  { %v3878_v27 = vand.u32 127, %v3836_v18 }
 0xdcc   :  { %4639 = vrot.lane.b32.xlu0 %v10303_v1, %s7985_s20  ;;  %v4897_v1 = vsel %vm3893_vm4, 1.0, %v12549_v3 }
 0xdcd   :  { %v3838_v4 = vpop.xlane.xlu2 %3837  ;;  %vm10418_vm7 = vcmp.eq.s32.totalorder %v8149_v26, %v3878_v27 }
 0xdce   :  { %4643 = vrot.lane.b32.xlu1 %v4615_v57, %s7985_s20  ;;  %v3879_v19 = vand.u32 127, %v3838_v4 }
 0xdcf   :  { %7689 = vmatmul.msk.f32.gmra.mxu3 %vm372_vm3, %v4896_v10 }
 0xdd0   :  { %vm10413_vm6 = vcmp.eq.s32.totalorder %v8149_v26, %v3879_v19  ;;  %v4898_v19 = vsel %vm10418_vm7, 1.0, %v12549_v3 }
 0xdd1   :  { %v10425_v47 = vsel %vm10413_vm6, 1e+30, %v10246_v63 }
 0xdd4   :  { %3929 = vmin.xlane.f32.xlu2 %v10407_v22 }
 0xdd5   :  { %v3840_v27 = vpop.xlane.xlu2 %3839 }
 0xdd7   :  { %7690 = vmatmul.msk.f32.gmra.mxu3 %vm372_vm3, %v4897_v1 }
 0xddc   :  { %3933 = vmin.xlane.f32.xlu2 %v10425_v47 }
 0xddd   :  { %v3842_v10 = vpop.xlane.xlu1 %3841 }
 0xdde   :  { %v3881_v4 = vand.u32 127, %v3842_v10 }
 0xddf   :  { %7691 = vmatmul.msk.f32.gmra.mxu3 %vm372_vm3, %v4898_v19  ;;  %v3880_v19 = vand.u32 127, %v3840_v27 }
 0xde0   :  { %v7678_v18 = vadd.s32 4294967232, %v3881_v4  ;;  %vm3897_vm1 = vcmp.eq.s32.totalorder %v8149_v26, %v3881_v4  ;;  %v4899_v4 = vsel %vm10413_vm6, 1.0, %v12549_v3 }
 0xde1   :  { %v10434_v1 = vsel %vm3897_vm1, 1e+30, %v10270_v29  ;;  %vm10453_vm8 = vcmp.eq.s32.totalorder %v8149_v26, %v3880_v19 }
 0xde2   :  { %vm4901_vm0 = vcmp.eq.s32.totalorder %v8149_v26, %v7678_v18  ;;  %v4900_v27 = vsel %vm10453_vm8, 1.0, %v12549_v3 }
 0xde3   :  { %v4909_v63 = vsel %vm4901_vm0, 1.0, %v12549_v3 }
 0xde4   :  { %3937 = vmin.xlane.f32.xlu2 %v10434_v1  ;;  %7694 = vmatmul.msk.f32.vlgmr.msrb.gmra.mxu0 %vm372_vm3, %v4909_v63 }
 0xde5   :  { %5644 = vmatpush.msrb.mxu0 %v9825_v36  ;;  %v10441_v10 = vpop.xlane.xlu0 %3843 }
 0xde6   :  { %v12547_v29 = vand.u32 127, %v10441_v10  ;;  %v12614_v28 = vand.u32 127, %v10441_v10 }
 0xde7   :  { %7692 = vmatmul.msk.f32.gmra.mxu3 %vm372_vm3, %v4899_v4  ;;  %5645 = vmatpush.msrb.mxu0 %v9817_v24  ;;  %v12610_v4 = vand.u32 127, %v10322_v45 }
 0xde8   :  { %v7679_v18 = vadd.s32 4294967232, %v12547_v29 }
 0xde9   :  { %5646 = vmatpush.msrb.mxu0 %v9809_v56  ;;  %vm3807_vm10 = vcmp.eq.s32.totalorder %v8149_v26, %v12610_v4 }
 0xdea   :  { %vm4902_vm9 = vcmp.eq.s32.totalorder %v8149_v26, %v7679_v18  ;;  %v10473_v19 = vsel %vm3807_vm10, 1e+30, %v10158_v62  ;;  %v10479_v18 = vsel %vm10350_vm12, 1e+30, %v10175_v41 }
 0xdeb   :  { %5647 = vmatpush.msrb.mxu0 %v9801_v31  ;;  %v4910_v57 = vsel %vm4902_vm9, 1.0, %v12549_v3 }
 0xdec   :  { %7695 = vmatmul.msk.f32.gmra.mxu0 %vm372_vm3, %v4910_v57  ;;  %v4813_v57 = vpop.f32.mrf.mxu0 }
 0xded   :  { %5648 = vmatpush.msrb.mxu0 %v9793_v30 }
 0xdef   :  { %7693 = vmatmul.msk.f32.gmra.mxu3 %vm372_vm3, %v4900_v27  ;;  %5649 = vmatpush.msrb.mxu0 %v9777_v15 }
 0xdf1   :  { %5650 = vmatpush.msrb.mxu0 %v9761_v46 }
 0xdf3   :  { %5651 = vmatpush.msrb.mxu0 %v9744_v16 }
 0xdf4   :  { %v4816_v6 = vpop.f32.mrf.mxu0 }
 0xdf5   :  { %v10489_v45 = vpop.permute.xlu1 %4637 }
 0xdf6   :  { %3853 = vmin.xlane.f32.xlu0 %v10473_v19  ;;  %12611 = vst [vmem:[#allocation10_spill] sm:$0xff] %v10489_v45 }
 0xdf8   :  { %3921 = vmin.xlane.f32.xlu1 %v10479_v18  ;;  %v10487_v62 = vpop.permute.xlu0 %4635 }
 0xdfc   :  { %4845 = vrot.lane.b32.xlu2 %v4813_v57, %s7985_s20 }
 0xdfd   :  { %v10493_v29 = vpop.permute.xlu1 %4641  ;;  %v3850_v57 = vpop.xlane.xlu2 %3849 }
 0xdfe   :  { %12612 = vst [vmem:[#allocation11_spill] sm:$0xff] %v10493_v29  ;;  %v3885_v8 = vand.u32 127, %v3850_v57 }
 0xe0a   :  { %4645 = vrot.lane.b32.xlu0 %v10327_v23, %s7985_s20 }
 0xe11   :  { %4647 = vrot.lane.b32.xlu1 %v10337_v39, %s7985_s20 }
 0xe23   :  { %v3846_v27 = vpop.xlane.xlu0 %3845 }
 0xe24   :  { %v3883_v4 = vand.u32 127, %v3846_v27  ;;  %v12613_v27 = vand.u32 127, %v10332_v60  ;;  %v10516_v60 = vsel %vm10371_vm14, 1e+30, %v10198_v61  ;;  %v10531_v61 = vsel %vm10384_vm15, 1e+30, %v10220_v2 }
 0xe25   :  { %vm3898_vm14 = vcmp.eq.s32.totalorder %v8149_v26, %v12614_v28  ;;  %v10547_v2 = vsel %vm10418_vm7, 1e+30, %v10235_v33  ;;  %vm3901_vm15 = vcmp.eq.s32.totalorder %v8149_v26, %v3885_v8 }
 0xe26   :  { %v7680_v0 = vadd.s32 4294967232, %v3883_v4  ;;  %vm3808_vm4 = vcmp.eq.s32.totalorder %v8149_v26, %v12613_v27  ;;  %v10551_v55 = vsel %vm3898_vm14, 1e+30, %v10285_v17 }
 0xe28   :  { %vm4903_vm11 = vcmp.eq.s32.totalorder %v8149_v26, %v7680_v0  ;;  %v3852_v57 = vpop.xlane.xlu1 %3851 }
 0xe29   :  { %v4911_v41 = vsel %vm4903_vm11, 1.0, %v12549_v3 }
 0xe2a   :  { %7696 = vmatmul.msk.f32.gmra.mxu0 %vm372_vm3, %v4911_v41  ;;  %v7682_v41 = vadd.s32 4294967232, %v3885_v8 }
 0xe2b   :  { %v3848_v23 = vpop.xlane.xlu0 %3847 }
 0xe2c   :  { %v3884_v53 = vand.u32 127, %v3848_v23  ;;  %v10508_v23 = vsel %vm3808_vm4, 1e+30, %v10166_v48  ;;  %vm4905_vm6 = vcmp.eq.s32.totalorder %v8149_v26, %v7682_v41  ;;  %v10523_v48 = vsel %vm10394_vm2, 1e+30, %v10192_v43  ;;  %v10575_v41 = vpop.f32.mrf.mxu3 }
 0xe2d   :  { %v10538_v43 = vsel %vm10453_vm8, 1e+30, %v10261_v5  ;;  %vm3899_vm2 = vcmp.eq.s32.totalorder %v8149_v26, %v3883_v4  ;;  %v10557_v5 = vsel %vm3901_vm15, 1e+30, %v10312_v12 }
 0xe2e   :  { %v7681_v39 = vadd.s32 4294967232, %v3884_v53  ;;  %vm3900_vm12 = vcmp.eq.s32.totalorder %v8149_v26, %v3884_v53  ;;  %v3886_v53 = vand.u32 127, %v3852_v57  ;;  %v10561_v11 = vsel %vm3899_vm2, 1e+30, %v10345_v50  ;;  %v4819_v57 = vpop.f32.mrf.mxu0 }
 0xe2f   :  { %v10498_v45 = vsel %vm3900_vm12, 1e+30, %v10365_v21  ;;  %v4913_v21 = vsel %vm4905_vm6, 1.0, %v12549_v3 }
 0xe30   :  { %3943 = vmin.xlane.f32.xlu2 %v10498_v45  ;;  %vm4904_vm13 = vcmp.eq.s32.totalorder %v8149_v26, %v7681_v39  ;;  %v7683_v39 = vadd.s32 4294967232, %v3886_v53  ;;  %vm3902_vm8 = vcmp.eq.s32.totalorder %v8149_v26, %v3886_v53 }
 0xe31   :  { %v4912_v0 = vsel %vm4904_vm13, 1.0, %v12549_v3 }
 0xe32   :  { %7697 = vmatmul.msk.f32.gmra.mxu0 %vm372_vm3, %v4912_v0  ;;  %vm4906_vm1 = vcmp.eq.s32.totalorder %v8149_v26, %v7683_v39 }
 0xe33   :  { %v4914_v27 = vsel %vm4906_vm1, 1.0, %v12549_v3 }
 0xe34   :  { %3855 = vmin.xlane.f32.xlu0 %v10508_v23 }
 0xe3a   :  { %7698 = vmatmul.msk.f32.gmra.mxu0 %vm372_vm3, %v4913_v21 }
 0xe3b   :  { %3923 = vmin.xlane.f32.xlu1 %v10516_v60 }
 0xe3c   :  { %3927 = vmin.xlane.f32.xlu0 %v10523_v48 }
 0xe3e   :  { %v10564_v33 = vpop.permute.xlu0 %4639 }
 0xe3f   :  { %12615 = vst [vmem:[#allocation12_spill] sm:$0xff] %v10564_v33 }
 0xe40   :  { %v10566_v17 = vpop.permute.xlu1 %4643 }
 0xe41   :  { %12616 = vst [vmem:[#allocation13_spill] sm:$0xff] %v10566_v17 }
 0xe42   :  { %7699 = vmatmul.msk.f32.gmra.mxu0 %vm372_vm3, %v4914_v27  ;;  %v10594_v27 = vsel %vm3902_vm8, 1e+30, %v10355_v20 }
 0xe43   :  { %3925 = vmin.xlane.f32.xlu1 %v10531_v61 }
 0xe44   :  { %3935 = vmin.xlane.f32.xlu0 %v10538_v43 }
 0xe4b   :  { %3931 = vmin.xlane.f32.xlu1 %v10547_v2 }
 0xe4c   :  { %3939 = vmin.xlane.f32.xlu0 %v10551_v55 }
 0xe53   :  { %3945 = vmin.xlane.f32.xlu1 %v10557_v5 }
 0xe54   :  { %3941 = vmin.xlane.f32.xlu0 %v10561_v11 }
 0xe68   :  { %4847 = vrot.lane.b32.xlu0 %v4816_v6, %s7985_s20 }
 0xe69   :  { %v3854_v8 = vpop.xlane.xlu0 %3853 }
 0xe6a   :  { %v3887_v10 = vand.u32 127, %v3854_v8 }
 0xe6b   :  { %v3922_v63 = vpop.xlane.xlu1 %3921 }
 0xe6c   :  { %v3969_v4 = vand.u32 127, %v3922_v63  ;;  %v7684_v12 = vadd.s32 4294967232, %v3887_v10  ;;  %vm3903_vm9 = vcmp.eq.s32.totalorder %v8149_v26, %v3887_v10 }
 0xe6d   :  { %v10601_v8 = vsel %vm3903_vm9, 1e+30, %v10473_v19 }
 0xe6e   :  { %vm3985_vm7 = vcmp.eq.s32.totalorder %v8149_v26, %v3969_v4  ;;  %vm4907_vm0 = vcmp.eq.s32.totalorder %v8149_v26, %v7684_v12  ;;  %v10606_v12 = vpop.f32.mrf.mxu3 }
 0xe6f   :  { %v5103_v0 = vsel %vm3985_vm7, 1.0, %v12549_v3  ;;  %v10573_v50 = vsel %vm3985_vm7, 1e+30, %v10479_v18  ;;  %v4915_v21 = vsel %vm4907_vm0, 1.0, %v12549_v3  ;;  %v10590_v18 = vpop.permute.xlu2 %4649  ;;  %12620 = vst [vmem:[#allocation17_spill] sm:$0xff] %v10606_v12 }
 0xe70   :  { %7710 = vmatmul.msk.f32.vlgmr.msrb.gmra.mxu3 %vm372_vm3, %v5103_v0  ;;  %4017 = vmin.xlane.f32.xlu1 %v10573_v50  ;;  %12617 = vst [vmem:[#allocation14_spill] sm:$0xff] %v10590_v18 }
 0xe71   :  { %5999 = vmatpush.msrb.mxu3 %v9728_v32  ;;  %4849 = vrot.lane.b32.xlu0 %v4819_v57, %s7985_s20 }
 0xe72   :  { %7700 = vmatmul.msk.f32.gmra.mxu0 %vm372_vm3, %v4915_v21 }
 0xe73   :  { %6000 = vmatpush.msrb.mxu3 %v9720_v52 }
 0xe75   :  { %6001 = vmatpush.msrb.mxu3 %v9712_v9 }
 0xe76   :  { %v10638_v17 = vpop.f32.mrf.mxu3 }
 0xe77   :  { %6002 = vmatpush.msrb.mxu3 %v9704_v58  ;;  %v3930_v39 = vpop.xlane.xlu2 %3929  ;;  %12625 = vst [vmem:[#allocation18_spill] sm:$0xff] %v10638_v17 }
 0xe78   :  { %v3973_v63 = vand.u32 127, %v3930_v39 }
 0xe79   :  { %6003 = vmatpush.msrb.mxu3 %v9696_v25 }
 0xe7a   :  { %vm10609_vm10 = vcmp.eq.s32.totalorder %v8149_v26, %v3973_v63 }
 0xe7b   :  { %6004 = vmatpush.msrb.mxu3 %v9688_v13  ;;  %v10618_v19 = vsel %vm10609_vm10, 1e+30, %v10407_v22 }
 0xe7c   :  { %v10598_v6 = vpop.permute.xlu0 %4645 }
 0xe7d   :  { %6005 = vmatpush.msrb.mxu3 %v9680_v42  ;;  %12618 = vst [vmem:[#allocation15_spill] sm:$0xff] %v10598_v6 }
 0xe7f   :  { %6006 = vmatpush.msrb.mxu3 %v9672_v49  ;;  %v3934_v28 = vpop.xlane.xlu2 %3933 }
 0xe80   :  { %v3975_v57 = vand.u32 127, %v3934_v28 }
 0xe82   :  { %vm10633_vm13 = vcmp.eq.s32.totalorder %v8149_v26, %v3975_v57 }
 0xe83   :  { %v10604_v4 = vpop.permute.xlu1 %4647 }
 0xe84   :  { %12619 = vst [vmem:[#allocation16_spill] sm:$0xff] %v10604_v4 }
 0xe87   :  { %v10613_v53 = vpop.xlane.xlu2 %3937 }
 0xe88   :  { %v12548_v21 = vand.u32 127, %v10613_v53 }
 0xe8a   :  { %v7702_v22 = vadd.s32 4294967232, %v12548_v21 }
 0xe8c   :  { %vm5111_vm6 = vcmp.eq.s32.totalorder %v8149_v26, %v7702_v22 }
 0xe9b   :  { %3947 = vmin.xlane.f32.xlu0 %v10594_v27 }
 0xea3   :  { %3949 = vmin.xlane.f32.xlu0 %v10601_v8 }
 0xea7   :  { %v3856_v10 = vpop.xlane.xlu0 %3855 }
 0xea8   :  { %v3888_v0 = vand.u32 127, %v3856_v10 }
 0xeaa   :  { %v7685_v39 = vadd.s32 4294967232, %v3888_v0  ;;  %vm3904_vm11 = vcmp.eq.s32.totalorder %v8149_v26, %v3888_v0 }
 0xeab   :  { %4025 = vmin.xlane.f32.xlu0 %v10618_v19  ;;  %v10624_v63 = vsel %vm3904_vm11, 1e+30, %v10508_v23 }
 0xeac   :  { %3951 = vmin.xlane.f32.xlu1 %v10624_v63  ;;  %vm4908_vm12 = vcmp.eq.s32.totalorder %v8149_v26, %v7685_v39  ;;  %v10643_v39 = vsel %vm10633_vm13, 1e+30, %v10425_v47 }
 0xead   :  { %v4916_v18 = vsel %vm4908_vm12, 1.0, %v12549_v3 }
 0xeae   :  { %v3924_v10 = vpop.xlane.xlu1 %3923  ;;  %7701 = vmatmul.msk.f32.gmra.mxu0 %vm372_vm3, %v4916_v18 }
 0xeaf   :  { %v3970_v28 = vand.u32 127, %v3924_v10  ;;  %v3928_v23 = vpop.xlane.xlu0 %3927 }
 0xeb0   :  { %v3972_v0 = vand.u32 127, %v3928_v23 }
 0xeb1   :  { %vm3986_vm4 = vcmp.eq.s32.totalorder %v8149_v26, %v3970_v28 }
 0xeb2   :  { %v10646_v10 = vsel %vm3986_vm4, 1e+30, %v10516_v60  ;;  %v5104_v18 = vsel %vm3986_vm4, 1.0, %v12549_v3  ;;  %vm10653_vm1 = vcmp.eq.s32.totalorder %v8149_v26, %v3972_v0  ;;  %v5119_v60 = vsel %vm5111_vm6, 1.0, %v12549_v3 }
 0xeb3   :  { %4029 = vmin.xlane.f32.xlu0 %v10643_v39  ;;  %4019 = vmin.xlane.f32.xlu2 %v10646_v10  ;;  %v10661_v47 = vsel %vm10653_vm1, 1e+30, %v10523_v48 }
 0xeb4   :  { %7711 = vmatmul.msk.f32.gmra.mxu3 %vm372_vm3, %v5104_v18  ;;  %4023 = vmin.xlane.f32.xlu1 %v10661_v47  ;;  %v10668_v18 = vpop.permute.xlu2 %4845 }
 0xeb5   :  { %12628 = vst [vmem:[#allocation19_spill] sm:$0xff] %v10668_v18 }
 0xeb6   :  { %v3926_v22 = vpop.xlane.xlu1 %3925  ;;  %7718 = vmatmul.msk.f32.vlgmr.msra.gmra.mxu0 %vm372_vm3, %v5119_v60  ;;  %v10791_v60 = vpop.f32.mrf.mxu0 }
 0xeb7   :  { %v3971_v28 = vand.u32 127, %v3926_v22  ;;  %6064 = vmatpush.msra.mxu0 %v9825_v36  ;;  %v3936_v23 = vpop.xlane.xlu0 %3935  ;;  %v10681_v22 = vpop.f32.mrf.mxu3 }
 0xeb8   :  { %v3976_v0 = vand.u32 127, %v3936_v23  ;;  %12631 = vst [vmem:[#allocation20_spill] sm:$0xff] %v10681_v22 }
 0xeb9   :  { %vm3987_vm14 = vcmp.eq.s32.totalorder %v8149_v26, %v3971_v28  ;;  %6065 = vmatpush.msra.mxu0 %v9817_v24 }
 0xeba   :  { %v10672_v48 = vsel %vm3987_vm14, 1e+30, %v10531_v61  ;;  %v5105_v21 = vsel %vm3987_vm14, 1.0, %v12549_v3  ;;  %vm10677_vm15 = vcmp.eq.s32.totalorder %v8149_v26, %v3976_v0 }
 0xebb   :  { %4021 = vmin.xlane.f32.xlu2 %v10672_v48  ;;  %6066 = vmatpush.msra.mxu0 %v9809_v56  ;;  %v10688_v61 = vsel %vm10677_vm15, 1e+30, %v10538_v43 }
 0xebc   :  { %7712 = vmatmul.msk.f32.gmra.mxu3 %vm372_vm3, %v5105_v21  ;;  %4031 = vmin.xlane.f32.xlu1 %v10688_v61  ;;  %v3944_v21 = vpop.xlane.xlu2 %3943 }
 0xebd   :  { %6067 = vmatpush.msra.mxu0 %v9801_v31  ;;  %v3980_v22 = vand.u32 127, %v3944_v21 }
 0xebe   :  { %v3932_v28 = vpop.xlane.xlu1 %3931 }
 0xebf   :  { %v3974_v23 = vand.u32 127, %v3932_v28  ;;  %6068 = vmatpush.msra.mxu0 %v9793_v30  ;;  %v3940_v0 = vpop.xlane.xlu0 %3939  ;;  %v12634_v28 = vmov 0.0   ;;  %vm3996_vm9 = vcmp.eq.s32.totalorder %v8149_v26, %v3980_v22  ;;  %v7705_v20 = vadd.s32 4294967232, %v3980_v22 }
 0xec0   :  { %v3978_v3 = vand.u32 127, %v3940_v0  ;;  %v5106_v0 = vsel %vm10653_vm1, 1.0, %v12634_v28  ;;  %v5107_v17 = vsel %vm10609_vm10, 1.0, %v12634_v28 }
 0xec1   :  { %vm10694_vm2 = vcmp.eq.s32.totalorder %v8149_v26, %v3974_v23  ;;  %6069 = vmatpush.msra.mxu0 %v9777_v15  ;;  %vm5114_vm4 = vcmp.eq.s32.totalorder %v8149_v26, %v7705_v20 }
 0xec2   :  { %v10702_v43 = vsel %vm10694_vm2, 1e+30, %v10547_v2  ;;  %v7703_v6 = vadd.s32 4294967232, %v3978_v3  ;;  %vm3994_vm7 = vcmp.eq.s32.totalorder %v8149_v26, %v3978_v3  ;;  %v10716_v2 = vpop.f32.mrf.mxu3  ;;  %v12636_v3 = vand.u32 127, %v10613_v53 }
 0xec3   :  { %4027 = vmin.xlane.f32.xlu2 %v10702_v43  ;;  %6070 = vmatpush.msra.mxu0 %v9761_v46  ;;  %v10712_v23 = vsel %vm3994_vm7, 1e+30, %v10551_v55  ;;  %12635 = vst [vmem:[#allocation21_spill] sm:$0xff] %v10716_v2 }
 0xec4   :  { %7713 = vmatmul.msk.f32.gmra.mxu3 %vm372_vm3, %v5106_v0  ;;  %4035 = vmin.xlane.f32.xlu0 %v10712_v23  ;;  %vm5112_vm0 = vcmp.eq.s32.totalorder %v8149_v26, %v7703_v6  ;;  %vm3993_vm8 = vcmp.eq.s32.totalorder %v8149_v26, %v12636_v3 }
 0xec5   :  { %6071 = vmatpush.msra.mxu0 %v9744_v16  ;;  %v5120_v57 = vsel %vm5112_vm0, 1.0, %v12634_v28  ;;  %v10726_v21 = vsel %vm3993_vm8, 1e+30, %v10434_v1 }
 0xec6   :  { %7719 = vmatmul.msk.f32.gmra.mxu0 %vm372_vm3, %v5120_v57  ;;  %v3946_v0 = vpop.xlane.xlu1 %3945  ;;  %v10738_v57 = vsel %vm3996_vm9, 1e+30, %v10498_v45  ;;  %v5108_v45 = vsel %vm10694_vm2, 1.0, %v12634_v28 }
 0xec7   :  { %v3942_v55 = vpop.xlane.xlu0 %3941  ;;  %v3981_v6 = vand.u32 127, %v3946_v0  ;;  %v5110_v0 = vsel %vm10677_vm15, 1.0, %v12634_v28 }
 0xec8   :  { %v3979_v29 = vand.u32 127, %v3942_v55 }
 0xec9   :  { %vm3997_vm10 = vcmp.eq.s32.totalorder %v8149_v26, %v3981_v6  ;;  %v7706_v22 = vadd.s32 4294967232, %v3981_v6 }
 0xeca   :  { %v7704_v2 = vadd.s32 4294967232, %v3979_v29  ;;  %vm3995_vm11 = vcmp.eq.s32.totalorder %v8149_v26, %v3979_v29  ;;  %v10746_v29 = vpop.f32.mrf.mxu3 }
 0xecb   :  { %4033 = vmin.xlane.f32.xlu2 %v10726_v21  ;;  %v10735_v53 = vsel %vm3995_vm11, 1e+30, %v10561_v11  ;;  %12637 = vst [vmem:[#allocation22_spill] sm:$0xff] %v10746_v29  ;;  %v10749_v11 = vsel %vm3997_vm10, 1e+30, %v10557_v5  ;;  %v5109_v5 = vsel %vm10633_vm13, 1.0, %v12634_v28  ;;  %vm5115_vm6 = vcmp.eq.s32.totalorder %v8149_v26, %v7706_v22 }
 0xecc   :  { %7714 = vmatmul.msk.f32.gmra.mxu3 %vm372_vm3, %v5107_v17  ;;  %4037 = vmin.xlane.f32.xlu1 %v10735_v53  ;;  %vm5113_vm12 = vcmp.eq.s32.totalorder %v8149_v26, %v7704_v2  ;;  %v5122_v17 = vsel %vm5114_vm4, 1.0, %v12634_v28  ;;  %v5123_v18 = vsel %vm5115_vm6, 1.0, %v12634_v28 }
 0xecd   :  { %4039 = vmin.xlane.f32.xlu0 %v10738_v57  ;;  %v5121_v1 = vsel %vm5113_vm12, 1.0, %v12634_v28 }
 0xece   :  { %7720 = vmatmul.msk.f32.gmra.mxu0 %vm372_vm3, %v5121_v1 }
 0xed2   :  { %v10759_v2 = vpop.f32.mrf.mxu3 }
 0xed3   :  { %4041 = vmin.xlane.f32.xlu2 %v10749_v11  ;;  %12638 = vst [vmem:[#allocation23_spill] sm:$0xff] %v10759_v2 }
 0xed4   :  { %7715 = vmatmul.msk.f32.gmra.mxu3 %vm372_vm3, %v5108_v45 }
 0xed6   :  { %7721 = vmatmul.msk.f32.gmra.mxu0 %vm372_vm3, %v5122_v17 }
 0xeda   :  { %v10771_v55 = vpop.f32.mrf.mxu3 }
 0xedb   :  { %12639 = vst [vmem:[#allocation24_spill] sm:$0xff] %v10771_v55 }
 0xedc   :  { %7716 = vmatmul.msk.f32.gmra.mxu3 %vm372_vm3, %v5109_v5 }
 0xede   :  { %7722 = vmatmul.msk.f32.gmra.mxu0 %vm372_vm3, %v5123_v18 }
 0xee3   :  { %v4018_v3 = vpop.xlane.xlu1 %4017 }
 0xee4   :  { %v4065_v6 = vand.u32 127, %v4018_v3  ;;  %7717 = vmatmul.msk.f32.gmra.mxu3 %vm372_vm3, %v5110_v0 }
 0xee6   :  { %vm4081_vm13 = vcmp.eq.s32.totalorder %v8149_v26, %v4065_v6 }
 0xee7   :  { %v5313_v4 = vsel %vm4081_vm13, 1.0, %v12634_v28  ;;  %v10777_v1 = vsel %vm4081_vm13, 1e+30, %v10573_v50  ;;  %v10789_v50 = vpop.permute.xlu0 %4847 }
 0xee8   :  { %7734 = vmatmul.msk.f32.vlgmr.msra.gmra.mxu1 %vm372_vm3, %v5313_v4  ;;  %4113 = vmin.xlane.f32.xlu2 %v10777_v1  ;;  %12640 = vst [vmem:[#allocation25_spill] sm:$0xff] %v10789_v50 }
 0xee9   :  { %6217 = vmatpush.msra.mxu1 %v9728_v32  ;;  %v10795_v32 = vpop.f32.mrf.mxu0 }
 0xeeb   :  { %6218 = vmatpush.msra.mxu1 %v9720_v52 }
 0xeed   :  { %6219 = vmatpush.msra.mxu1 %v9712_v9 }
 0xeef   :  { %6220 = vmatpush.msra.mxu1 %v9704_v58  ;;  %v10793_v20 = vpop.permute.xlu0 %4849 }
 0xef0   :  { %12641 = vst [vmem:[#allocation26_spill] sm:$0xff] %v10793_v20 }
 0xef1   :  { %6221 = vmatpush.msra.mxu1 %v9696_v25  ;;  %v10797_v45 = vpop.f32.mrf.mxu0 }
 0xef3   :  { %6222 = vmatpush.msra.mxu1 %v9688_v13 }
 0xef5   :  { %6223 = vmatpush.msra.mxu1 %v9680_v42 }
 0xef7   :  { %6224 = vmatpush.msra.mxu1 %v9672_v49 }
 0xef9   :  { %v10811_v5 = vpop.f32.mrf.mxu0 }
 0xf0e   :  { %v3948_v52 = vpop.xlane.xlu0 %3947 }
 0xf0f   :  { %v3982_v9 = vand.u32 127, %v3948_v52 }
 0xf11   :  { %v7707_v58 = vadd.s32 4294967232, %v3982_v9  ;;  %vm3998_vm1 = vcmp.eq.s32.totalorder %v8149_v26, %v3982_v9 }
 0xf12   :  { %v10801_v13 = vsel %vm3998_vm1, 1e+30, %v10594_v27 }
 0xf13   :  { %4043 = vmin.xlane.f32.xlu1 %v10801_v13  ;;  %vm5116_vm14 = vcmp.eq.s32.totalorder %v8149_v26, %v7707_v58  ;;  %v10832_v58 = vpop.f32.mrf.mxu0 }
 0xf14   :  { %v5124_v49 = vsel %vm5116_vm14, 1.0, %v12634_v28 }
 0xf15   :  { %7723 = vmatmul.msk.f32.gmra.mxu0 %vm372_vm3, %v5124_v49 }
 0xf16   :  { %v3950_v42 = vpop.xlane.xlu0 %3949 }
 0xf17   :  { %v3983_v25 = vand.u32 127, %v3950_v42 }
 0xf19   :  { %v7708_v17 = vadd.s32 4294967232, %v3983_v25  ;;  %vm3999_vm15 = vcmp.eq.s32.totalorder %v8149_v26, %v3983_v25 }
 0xf1a   :  { %v10809_v22 = vsel %vm3999_vm15, 1e+30, %v10601_v8 }
 0xf1b   :  { %4045 = vmin.xlane.f32.xlu1 %v10809_v22  ;;  %vm5117_vm2 = vcmp.eq.s32.totalorder %v8149_v26, %v7708_v17 }
 0xf1c   :  { %v5125_v27 = vsel %vm5117_vm2, 1.0, %v12634_v28 }
 0xf1d   :  { %7724 = vmatmul.msk.f32.gmra.mxu0 %vm372_vm3, %v5125_v27 }
 0xf1e   :  { %v4026_v18 = vpop.xlane.xlu0 %4025 }
 0xf1f   :  { %v4069_v3 = vand.u32 127, %v4026_v18  ;;  %v3952_v0 = vpop.xlane.xlu1 %3951 }
 0xf20   :  { %v3984_v6 = vand.u32 127, %v3952_v0 }
 0xf21   :  { %vm10818_vm7 = vcmp.eq.s32.totalorder %v8149_v26, %v4069_v3 }
 0xf22   :  { %v10825_v8 = vsel %vm10818_vm7, 1e+30, %v10618_v19  ;;  %v7709_v52 = vadd.s32 4294967232, %v3984_v6  ;;  %vm4000_vm0 = vcmp.eq.s32.totalorder %v8149_v26, %v3984_v6  ;;  %v5317_v2 = vsel %vm10818_vm7, 1.0, %v12634_v28 }
 0xf23   :  { %4121 = vmin.xlane.f32.xlu1 %v10825_v8  ;;  %v10830_v9 = vsel %vm4000_vm0, 1e+30, %v10624_v63 }
 0xf24   :  { %4047 = vmin.xlane.f32.xlu2 %v10830_v9  ;;  %vm5118_vm8 = vcmp.eq.s32.totalorder %v8149_v26, %v7709_v52 }
 0xf25   :  { %v5126_v42 = vsel %vm5118_vm8, 1.0, %v12634_v28 }
 0xf26   :  { %v4030_v49 = vpop.xlane.xlu0 %4029  ;;  %v4020_v25 = vpop.xlane.xlu2 %4019  ;;  %7725 = vmatmul.msk.f32.gmra.mxu0 %vm372_vm3, %v5126_v42 }
 0xf27   :  { %v4071_v19 = vand.u32 127, %v4030_v49  ;;  %v4066_v17 = vand.u32 127, %v4020_v25  ;;  %v4024_v27 = vpop.xlane.xlu1 %4023  ;;  %v10866_v49 = vpop.f32.mrf.mxu0 }
 0xf28   :  { %v4068_v18 = vand.u32 127, %v4024_v27 }
 0xf29   :  { %vm4082_vm9 = vcmp.eq.s32.totalorder %v8149_v26, %v4066_v17  ;;  %vm10840_vm11 = vcmp.eq.s32.totalorder %v8149_v26, %v4071_v19 }
 0xf2a   :  { %v10847_v3 = vsel %vm10840_vm11, 1e+30, %v10643_v39  ;;  %v5314_v0 = vsel %vm4082_vm9, 1.0, %v12634_v28  ;;  %v10851_v6 = vsel %vm4082_vm9, 1e+30, %v10646_v10  ;;  %vm10856_vm12 = vcmp.eq.s32.totalorder %v8149_v26, %v4068_v18 }
 0xf2b   :  { %4125 = vmin.xlane.f32.xlu1 %v10847_v3  ;;  %7735 = vmatmul.msk.f32.gmra.mxu1 %vm372_vm3, %v5314_v0  ;;  %v10864_v39 = vsel %vm10856_vm12, 1e+30, %v10661_v47 }
 0xf2c   :  { %4115 = vmin.xlane.f32.xlu0 %v10851_v6  ;;  %4119 = vmin.xlane.f32.xlu2 %v10864_v39 }
 0xf2e   :  { %v4022_v10 = vpop.xlane.xlu2 %4021 }
 0xf2f   :  { %v4067_v42 = vand.u32 127, %v4022_v10  ;;  %v4032_v25 = vpop.xlane.xlu1 %4031  ;;  %v10887_v10 = vpop.f32.mrf.mxu0 }
 0xf30   :  { %v4072_v19 = vand.u32 127, %v4032_v25 }
 0xf31   :  { %vm4083_vm10 = vcmp.eq.s32.totalorder %v8149_v26, %v4067_v42 }
 0xf32   :  { %v5315_v17 = vsel %vm4083_vm10, 1.0, %v12634_v28  ;;  %v10872_v27 = vsel %vm4083_vm10, 1e+30, %v10672_v48  ;;  %vm10875_vm4 = vcmp.eq.s32.totalorder %v8149_v26, %v4072_v19 }
 0xf33   :  { %7736 = vmatmul.msk.f32.gmra.mxu1 %vm372_vm3, %v5315_v17  ;;  %v10884_v47 = vsel %vm10875_vm4, 1e+30, %v10688_v61  ;;  %v5316_v17 = vsel %vm10856_vm12, 1.0, %v12634_v28 }
 0xf34   :  { %4117 = vmin.xlane.f32.xlu0 %v10872_v27  ;;  %4127 = vmin.xlane.f32.xlu2 %v10884_v47 }
 0xf36   :  { %v4028_v0 = vpop.xlane.xlu2 %4027 }
 0xf37   :  { %v4070_v48 = vand.u32 127, %v4028_v0  ;;  %v4036_v42 = vpop.xlane.xlu0 %4035 }
 0xf38   :  { %v4074_v19 = vand.u32 127, %v4036_v42  ;;  %v10909_v42 = vpop.f32.mrf.mxu0 }
 0xf39   :  { %vm10890_vm6 = vcmp.eq.s32.totalorder %v8149_v26, %v4070_v48  ;;  %12652 = vst [vmem:[#allocation27_spill] sm:$0xff] %v10909_v42 }
 0xf3a   :  { %v10900_v61 = vsel %vm10890_vm6, 1e+30, %v10702_v43  ;;  %vm4090_vm13 = vcmp.eq.s32.totalorder %v8149_v26, %v4074_v19 }
 0xf3b   :  { %7737 = vmatmul.msk.f32.gmra.mxu1 %vm372_vm3, %v5316_v17  ;;  %v10906_v0 = vsel %vm4090_vm13, 1e+30, %v10712_v23 }
 0xf3c   :  { %4123 = vmin.xlane.f32.xlu0 %v10900_v61  ;;  %4131 = vmin.xlane.f32.xlu1 %v10906_v0 }
 0xf3e   :  { %v4034_v48 = vpop.xlane.xlu2 %4033 }
 0xf3f   :  { %v4073_v52 = vand.u32 127, %v4034_v48  ;;  %v4038_v20 = vpop.xlane.xlu1 %4037 }
 0xf40   :  { %v4040_v50 = vpop.xlane.xlu0 %4039  ;;  %v4075_v55 = vand.u32 127, %v4038_v20 }
 0xf41   :  { %vm4089_vm1 = vcmp.eq.s32.totalorder %v8149_v26, %v4073_v52  ;;  %v7726_v43 = vadd.s32 4294967232, %v4073_v52  ;;  %v4076_v17 = vand.u32 127, %v4040_v50  ;;  %v7727_v50 = vadd.s32 4294967232, %v4074_v19 }
 0xf42   :  { %v10916_v23 = vsel %vm4089_vm1, 1e+30, %v10726_v21  ;;  %vm4091_vm15 = vcmp.eq.s32.totalorder %v8149_v26, %v4075_v55 }
 0xf43   :  { %vm5321_vm14 = vcmp.eq.s32.totalorder %v8149_v26, %v7726_v43  ;;  %7738 = vmatmul.msk.f32.gmra.mxu1 %vm372_vm3, %v5317_v2  ;;  %v10924_v20 = vsel %vm4091_vm15, 1e+30, %v10735_v53  ;;  %vm4092_vm2 = vcmp.eq.s32.totalorder %v8149_v26, %v4076_v17  ;;  %vm5322_vm0 = vcmp.eq.s32.totalorder %v8149_v26, %v7727_v50  ;;  %v10937_v53 = vpop.f32.mrf.mxu0 }
 0xf44   :  { %v5329_v48 = vsel %vm5321_vm14, 1.0, %v12634_v28  ;;  %4129 = vmin.xlane.f32.xlu0 %v10916_v23  ;;  %4133 = vmin.xlane.f32.xlu2 %v10924_v20  ;;  %v10929_v21 = vsel %vm4092_vm2, 1e+30, %v10738_v57  ;;  %v5318_v57 = vsel %vm10890_vm6, 1.0, %v12634_v28 }
 0xf45   :  { %7742 = vmatmul.msk.f32.vlgmr.msra.gmra.mxu2 %vm372_vm3, %v5329_v48  ;;  %4135 = vmin.xlane.f32.xlu1 %v10929_v21 }
 0xf46   :  { %6282 = vmatpush.msra.mxu2 %v9825_v36  ;;  %v4042_v2 = vpop.xlane.xlu2 %4041  ;;  %v7728_v36 = vadd.s32 4294967232, %v4075_v55  ;;  %v7729_v55 = vadd.s32 4294967232, %v4076_v17 }
 0xf47   :  { %v4077_v4 = vand.u32 127, %v4042_v2 }
 0xf48   :  { %6283 = vmatpush.msra.mxu2 %v9817_v24  ;;  %v5330_v24 = vsel %vm5322_vm0, 1.0, %v12634_v28  ;;  %vm5323_vm8 = vcmp.eq.s32.totalorder %v8149_v26, %v7728_v36  ;;  %vm5324_vm9 = vcmp.eq.s32.totalorder %v8149_v26, %v7729_v55 }
 0xf49   :  { %vm4093_vm7 = vcmp.eq.s32.totalorder %v8149_v26, %v4077_v4  ;;  %v5332_v52 = vsel %vm5324_vm9, 1.0, %v12634_v28 }
 0xf4a   :  { %6284 = vmatpush.msra.mxu2 %v9809_v56  ;;  %v10944_v19 = vsel %vm4093_vm7, 1e+30, %v10749_v11  ;;  %v10952_v56 = vpop.f32.mrf.mxu3 }
 0xf4b   :  { %7739 = vmatmul.msk.f32.gmra.mxu1 %vm372_vm3, %v5318_v57  ;;  %12653 = vst [vmem:[#allocation28_spill] sm:$0xff] %v10952_v56  ;;  %v10961_v11 = vpop.f32.mrf.mxu0 }
 0xf4c   :  { %6285 = vmatpush.msra.mxu2 %v9801_v31  ;;  %4137 = vmin.xlane.f32.xlu0 %v10944_v19  ;;  %v5319_v31 = vsel %vm10840_vm11, 1.0, %v12634_v28  ;;  %12654 = vst [vmem:[#allocation29_spill] sm:$0xff] %v10961_v11 }
 0xf4d   :  { %7743 = vmatmul.msk.f32.gmra.mxu2 %vm372_vm3, %v5330_v24 }
 0xf4e   :  { %6286 = vmatpush.msra.mxu2 %v9793_v30  ;;  %v5331_v30 = vsel %vm5323_vm8, 1.0, %v12634_v28 }
 0xf50   :  { %6287 = vmatpush.msra.mxu2 %v9777_v15 }
 0xf52   :  { %6288 = vmatpush.msra.mxu2 %v9761_v46  ;;  %v10966_v15 = vpop.f32.mrf.mxu3  ;;  %v5320_v46 = vsel %vm10875_vm4, 1.0, %v12634_v28 }
 0xf53   :  { %7740 = vmatmul.msk.f32.gmra.mxu1 %vm372_vm3, %v5319_v31  ;;  %12655 = vst [vmem:[#allocation30_spill] sm:$0xff] %v10966_v15  ;;  %v10975_v43 = vpop.f32.mrf.mxu0 }
 0xf54   :  { %6289 = vmatpush.msra.mxu2 %v9744_v16  ;;  %v7730_v16 = vadd.s32 4294967232, %v4077_v4  ;;  %12656 = vst [vmem:[#allocation31_spill] sm:$0xff] %v10975_v43 }
 0xf55   :  { %7744 = vmatmul.msk.f32.gmra.mxu2 %vm372_vm3, %v5331_v30 }
 0xf56   :  { %vm5325_vm12 = vcmp.eq.s32.totalorder %v8149_v26, %v7730_v16 }
 0xf57   :  { %v5333_v50 = vsel %vm5325_vm12, 1.0, %v12634_v28 }
 0xf5a   :  { %v10985_v18 = vpop.f32.mrf.mxu3 }
 0xf5b   :  { %7741 = vmatmul.msk.f32.gmra.mxu1 %vm372_vm3, %v5320_v46  ;;  %v4114_v63 = vpop.xlane.xlu2 %4113  ;;  %12657 = vst [vmem:[#allocation32_spill] sm:$0xff] %v10985_v18  ;;  %v10989_v2 = vpop.f32.mrf.mxu0 }
 0xf5c   :  { %v4161_v25 = vand.u32 127, %v4114_v63  ;;  %12658 = vst [vmem:[#allocation33_spill] sm:$0xff] %v10989_v2 }
 0xf5d   :  { %7745 = vmatmul.msk.f32.gmra.mxu2 %vm372_vm3, %v5332_v52 }
 0xf5e   :  { %vm4177_vm11 = vcmp.eq.s32.totalorder %v8149_v26, %v4161_v25 }
 0xf5f   :  { %v5523_v17 = vsel %vm4177_vm11, 1.0, %v12634_v28  ;;  %v10980_v48 = vsel %vm4177_vm11, 1e+30, %v10777_v1 }
 0xf60   :  { %7758 = vmatmul.msk.f32.vlgmr.msra.gmra.mxu3 %vm372_vm3, %v5523_v17  ;;  %4209 = vmin.xlane.f32.xlu0 %v10980_v48 }
 0xf62   :  { %v10991_v4 = vpop.f32.mrf.mxu3 }
 0xf63   :  { %12659 = vst [vmem:[#allocation34_spill] sm:$0xff] %v10991_v4  ;;  %v10993_v57 = vpop.f32.mrf.mxu0 }
 0xf64   :  { %12660 = vst [vmem:[#allocation35_spill] sm:$0xff] %v10993_v57 }
 0xf65   :  { %7746 = vmatmul.msk.f32.gmra.mxu2 %vm372_vm3, %v5333_v50 }
 0xf6a   :  { %v10995_v1 = vpop.f32.mrf.mxu3 }
 0xf6b   :  { %v10997_v24 = vpop.f32.mrf.mxu0 }
 0xf6c   :  { %12661 = vst [vmem:[#allocation36_spill] sm:$0xff] %v10997_v24 }
 0xf72   :  { %v11001_v31 = vpop.f32.mrf.mxu3 }
 0xf73   :  { %v10999_v36 = vpop.f32.mrf.mxu0 }
 0xf74   :  { %12662 = vst [vmem:[#allocation37_spill] sm:$0xff] %v10999_v36 }
 0xf7a   :  { %v11009_v52 = vpop.f32.mrf.mxu3 }
 0xf7b   :  { %v11004_v63 = vpop.f32.mrf.mxu0  ;;  %12664 = vst [vmem:[#allocation39_spill] sm:$0xff] %v11009_v52 }
 0xf7c   :  { %12663 = vst [vmem:[#allocation38_spill] sm:$0xff] %v11004_v63 }
 0xf82   :  { %v11024_v52 = vpop.f32.mrf.mxu3 }
 0xf83   :  { %12666 = vst [vmem:[#allocation41_spill] sm:$0xff] %v11024_v52 }
 0xf86   :  { %v4044_v30 = vpop.xlane.xlu1 %4043 }
 0xf87   :  { %v4078_v55 = vand.u32 127, %v4044_v30 }
 0xf89   :  { %vm4094_vm10 = vcmp.eq.s32.totalorder %v8149_v26, %v4078_v55  ;;  %v7731_v46 = vadd.s32 4294967232, %v4078_v55 }
 0xf8a   :  { %v11007_v25 = vsel %vm4094_vm10, 1e+30, %v10801_v13  ;;  %v11021_v13 = vpop.f32.mrf.mxu0 }
 0xf8b   :  { %4139 = vmin.xlane.f32.xlu2 %v11007_v25  ;;  %vm5326_vm4 = vcmp.eq.s32.totalorder %v8149_v26, %v7731_v46  ;;  %12665 = vst [vmem:[#allocation40_spill] sm:$0xff] %v11021_v13 }
 0xf8c   :  { %v5334_v16 = vsel %vm5326_vm4, 1.0, %v12634_v28 }
 0xf8d   :  { %7747 = vmatmul.msk.f32.gmra.mxu2 %vm372_vm3, %v5334_v16 }
 0xf8e   :  { %v4046_v17 = vpop.xlane.xlu1 %4045 }
 0xf8f   :  { %v4079_v50 = vand.u32 127, %v4046_v17 }
 0xf91   :  { %vm4095_vm6 = vcmp.eq.s32.totalorder %v8149_v26, %v4079_v50  ;;  %v7732_v30 = vadd.s32 4294967232, %v4079_v50 }
 0xf92   :  { %v11017_v55 = vsel %vm4095_vm6, 1e+30, %v10809_v22 }
 0xf93   :  { %4141 = vmin.xlane.f32.xlu2 %v11017_v55  ;;  %vm5327_vm13 = vcmp.eq.s32.totalorder %v8149_v26, %v7732_v30 }
 0xf94   :  { %v5335_v46 = vsel %vm5327_vm13, 1.0, %v12634_v28 }
 0xf95   :  { %7748 = vmatmul.msk.f32.gmra.mxu2 %vm372_vm3, %v5335_v46 }
 0xf96   :  { %v4122_v16 = vpop.xlane.xlu1 %4121 }
 0xf97   :  { %v4165_v17 = vand.u32 127, %v4122_v16  ;;  %v4048_v24 = vpop.xlane.xlu2 %4047  ;;  %v11042_v16 = vpop.f32.mrf.mxu3 }
 0xf98   :  { %v4080_v22 = vand.u32 127, %v4048_v24  ;;  %12669 = vst [vmem:[#allocation42_spill] sm:$0xff] %v11042_v16  ;;  %v11046_v24 = vpop.f32.mrf.mxu0 }
 0xf99   :  { %vm11028_vm1 = vcmp.eq.s32.totalorder %v8149_v26, %v4165_v17  ;;  %12670 = vst [vmem:[#allocation43_spill] sm:$0xff] %v11046_v24 }
 0xf9a   :  { %v11035_v30 = vsel %vm11028_vm1, 1e+30, %v10825_v8  ;;  %vm4096_vm14 = vcmp.eq.s32.totalorder %v8149_v26, %v4080_v22  ;;  %v7733_v18 = vadd.s32 4294967232, %v4080_v22 }
 0xf9b   :  { %4217 = vmin.xlane.f32.xlu2 %v11035_v30  ;;  %v11040_v46 = vsel %vm4096_vm14, 1e+30, %v10830_v9 }
 0xf9c   :  { %4143 = vmin.xlane.f32.xlu0 %v11040_v46  ;;  %vm5328_vm15 = vcmp.eq.s32.totalorder %v8149_v26, %v7733_v18 }
 0xf9d   :  { %v5336_v8 = vsel %vm5328_vm15, 1.0, %v12634_v28 }
 0xf9e   :  { %v4126_v17 = vpop.xlane.xlu1 %4125  ;;  %7749 = vmatmul.msk.f32.gmra.mxu2 %vm372_vm3, %v5336_v8 }
 0xf9f   :  { %v4167_v52 = vand.u32 127, %v4126_v17  ;;  %v4116_v4 = vpop.xlane.xlu0 %4115  ;;  %v4120_v2 = vpop.xlane.xlu2 %4119 }
 0xfa0   :  { %v4162_v22 = vand.u32 127, %v4116_v4  ;;  %v11068_v4 = vpop.f32.mrf.mxu0  ;;  %v4164_v24 = vand.u32 127, %v4120_v2 }
 0xfa1   :  { %vm11051_vm2 = vcmp.eq.s32.totalorder %v8149_v26, %v4167_v52  ;;  %12673 = vst [vmem:[#allocation44_spill] sm:$0xff] %v11068_v4  ;;  %v11070_v52 = vpop.f32.mrf.mxu3 }
 0xfa2   :  { %v11058_v16 = vsel %vm11051_vm2, 1e+30, %v10847_v3  ;;  %vm4178_vm7 = vcmp.eq.s32.totalorder %v8149_v26, %v4162_v22  ;;  %12674 = vst [vmem:[#allocation45_spill] sm:$0xff] %v11070_v52  ;;  %vm11082_vm8 = vcmp.eq.s32.totalorder %v8149_v26, %v4164_v24 }
 0xfa3   :  { %4221 = vmin.xlane.f32.xlu2 %v11058_v16  ;;  %v11063_v18 = vsel %vm4178_vm7, 1e+30, %v10851_v6  ;;  %v5524_v17 = vsel %vm4178_vm7, 1.0, %v12634_v28  ;;  %v5526_v2 = vsel %vm11082_vm8, 1.0, %v12634_v28 }
 0xfa4   :  { %4211 = vmin.xlane.f32.xlu1 %v11063_v18  ;;  %7759 = vmatmul.msk.f32.gmra.mxu3 %vm372_vm3, %v5524_v17 }
 0xfa7   :  { %v4118_v8 = vpop.xlane.xlu0 %4117  ;;  %v4128_v24 = vpop.xlane.xlu2 %4127 }
 0xfa8   :  { %v4163_v3 = vand.u32 127, %v4118_v8  ;;  %v5251_v56 = vpop.f32.mrf.mxu0 }
 0xfa9   :  { %v11086_v4 = vpop.f32.mrf.mxu3 }
 0xfaa   :  { %vm11073_vm0 = vcmp.eq.s32.totalorder %v8149_v26, %v4163_v3  ;;  %12679 = vst [vmem:[#allocation46_spill] sm:$0xff] %v11086_v4 }
 0xfab   :  { %v5525_v6 = vsel %vm11073_vm0, 1.0, %v12634_v28 }
 0xfac   :  { %7760 = vmatmul.msk.f32.gmra.mxu3 %vm372_vm3, %v5525_v6 }
 0xfaf   :  { %v4124_v17 = vpop.xlane.xlu0 %4123  ;;  %v4132_v8 = vpop.xlane.xlu1 %4131 }
 0xfb0   :  { %v4170_v3 = vand.u32 127, %v4132_v8  ;;  %5277 = vrot.lane.b32.xlu0 %v5251_v56, %s7985_s20  ;;  %v4166_v11 = vand.u32 127, %v4124_v17 }
 0xfb1   :  { %v11103_v43 = vpop.f32.mrf.mxu3 }
 0xfb2   :  { %vm4186_vm9 = vcmp.eq.s32.totalorder %v8149_v26, %v4170_v3  ;;  %12680 = vst [vmem:[#allocation47_spill] sm:$0xff] %v11103_v43  ;;  %vm11119_vm10 = vcmp.eq.s32.totalorder %v8149_v26, %v4166_v11 }
 0xfb3   :  { %v11095_v6 = vsel %vm4186_vm9, 1e+30, %v10906_v0  ;;  %v5254_v0 = vpop.f32.mrf.mxu0 }
 0xfb4   :  { %7761 = vmatmul.msk.f32.gmra.mxu3 %vm372_vm3, %v5526_v2  ;;  %4227 = vmin.xlane.f32.xlu2 %v11095_v6  ;;  %v5527_v2 = vsel %vm11028_vm1, 1.0, %v12634_v28 }
 0xfb7   :  { %v11098_v13 = vpop.xlane.xlu0 %4129  ;;  %v4134_v50 = vpop.xlane.xlu2 %4133 }
 0xfb8   :  { %v12551_v8 = vand.u32 127, %v11098_v13  ;;  %v4136_v4 = vpop.xlane.xlu1 %4135  ;;  %v12693_v22 = vand.u32 127, %v11098_v13 }
 0xfb9   :  { %v4172_v15 = vand.u32 127, %v4136_v4  ;;  %v7751_v4 = vadd.s32 4294967232, %v4170_v3  ;;  %v11128_v3 = vpop.f32.mrf.mxu3 }
 0xfba   :  { %v7750_v56 = vadd.s32 4294967232, %v12551_v8  ;;  %12683 = vst [vmem:[#allocation48_spill] sm:$0xff] %v11128_v3  ;;  %vm4185_vm7 = vcmp.eq.s32.totalorder %v8149_v26, %v12693_v22 }
 0xfbb   :  { %vm4188_vm12 = vcmp.eq.s32.totalorder %v8149_v26, %v4172_v15  ;;  %vm5532_vm4 = vcmp.eq.s32.totalorder %v8149_v26, %v7751_v4  ;;  %v5529_v4 = vsel %vm11051_vm2, 1.0, %v12634_v28  ;;  %v7753_v8 = vadd.s32 4294967232, %v4172_v15 }
 0xfbc   :  { %vm5531_vm11 = vcmp.eq.s32.totalorder %v8149_v26, %v7750_v56  ;;  %7762 = vmatmul.msk.f32.gmra.mxu3 %vm372_vm3, %v5527_v2  ;;  %v11113_v63 = vsel %vm4188_vm12, 1e+30, %v10929_v21  ;;  %v4171_v56 = vand.u32 127, %v4134_v50  ;;  %v5528_v21 = vsel %vm11119_vm10, 1.0, %v12634_v28 }
 0xfbd   :  { %v5539_v42 = vsel %vm5531_vm11, 1.0, %v12634_v28  ;;  %5279 = vrot.lane.b32.xlu1 %v5254_v0, %s7985_s20  ;;  %4231 = vmin.xlane.f32.xlu2 %v11113_v63  ;;  %v5540_v2 = vsel %vm5532_vm4, 1.0, %v12634_v28  ;;  %v4168_v50 = vand.u32 127, %v4128_v24  ;;  %vm5534_vm1 = vcmp.eq.s32.totalorder %v8149_v26, %v7753_v8 }
 0xfbe   :  { %7766 = vmatmul.msk.f32.vlgmr.msrb.gmra.mxu0 %vm372_vm3, %v5539_v42  ;;  %v7752_v42 = vadd.s32 4294967232, %v4171_v56  ;;  %vm4187_vm2 = vcmp.eq.s32.totalorder %v8149_v26, %v4171_v56 }
 0xfbf   :  { %v11135_v0 = vpop.xlane.xlu0 %4137  ;;  %vm11146_vm13 = vcmp.eq.s32.totalorder %v8149_v26, %v4168_v50 }
 0xfc0   :  { %vm5533_vm6 = vcmp.eq.s32.totalorder %v8149_v26, %v7752_v42  ;;  %v12552_v9 = vand.u32 127, %v11135_v0  ;;  %v5530_v15 = vsel %vm11146_vm13, 1.0, %v12634_v28 }
 0xfc1   :  { %v11143_v3 = vpop.f32.mrf.mxu3 }
 0xfc2   :  { %12684 = vst [vmem:[#allocation49_spill] sm:$0xff] %v11143_v3  ;;  %v7754_v50 = vadd.s32 4294967232, %v12552_v9 }
 0xfc4   :  { %7763 = vmatmul.msk.f32.gmra.mxu3 %vm372_vm3, %v5528_v21  ;;  %v5541_v21 = vsel %vm5533_vm6, 1.0, %v12634_v28  ;;  %vm5535_vm15 = vcmp.eq.s32.totalorder %v8149_v26, %v7754_v50 }
 0xfc6   :  { %7767 = vmatmul.msk.f32.gmra.mxu0 %vm372_vm3, %v5540_v2 }
 0xfc8   :  { %v11132_v11 = vpop.f32.mrf.mxu2 }
 0xfcc   :  { %7764 = vmatmul.msk.f32.gmra.mxu3 %vm372_vm3, %v5529_v4 }
 0xfce   :  { %7768 = vmatmul.msk.f32.gmra.mxu0 %vm372_vm3, %v5541_v21  ;;  %v5542_v21 = vsel %vm5534_vm1, 1.0, %v12634_v28 }
 0xfd0   :  { %v11150_v42 = vpop.f32.mrf.mxu2 }
 0xfd3   :  { %v4210_v24 = vpop.xlane.xlu0 %4209 }
 0xfd4   :  { %v4257_v4 = vand.u32 127, %v4210_v24  ;;  %7765 = vmatmul.msk.f32.gmra.mxu3 %vm372_vm3, %v5530_v15  ;;  %v11171_v24 = vpop.f32.mrf.mxu3  ;;  %v11177_v15 = vsel %vm11082_vm8, 1e+30, %v10864_v39  ;;  %v11194_v39 = vsel %vm11073_vm0, 1e+30, %v10872_v27 }
 0xfd5   :  { %12689 = vst [vmem:[#allocation50_spill] sm:$0xff] %v11171_v24 }
 0xfd6   :  { %vm11162_vm14 = vcmp.eq.s32.totalorder %v8149_v26, %v4257_v4  ;;  %7769 = vmatmul.msk.f32.gmra.mxu0 %vm372_vm3, %v5542_v21  ;;  %v5543_v4 = vsel %vm5535_vm15, 1.0, %v12634_v28  ;;  %v11186_v21 = vsel %vm11146_vm13, 1e+30, %v10884_v47  ;;  %v11207_v47 = vsel %vm11119_vm10, 1e+30, %v10900_v61 }
 0xfd7   :  { %v5733_v8 = vsel %vm11162_vm14, 1.0, %v12634_v28 }
 0xfd8   :  { %v5449_v43 = vpop.f32.mrf.mxu2  ;;  %7782 = vmatmul.msk.f32.vlgmr.msrb.gmra.mxu1 %vm372_vm3, %v5733_v8 }
 0xfd9   :  { %5479 = vrot.lane.b32.xlu2 %v5449_v43, %s7985_s20  ;;  %v11199_v43 = vsel %vm4187_vm2, 1e+30, %v10924_v20  ;;  %v11216_v20 = vsel %vm4185_vm7, 1e+30, %v10916_v23 }
 0xfda   :  { %4215 = vmin.xlane.f32.xlu0 %v11177_v15 }
 0xfdc   :  { %v11188_v8 = vpop.f32.mrf.mxu3 }
 0xfdd   :  { %12690 = vst [vmem:[#allocation51_spill] sm:$0xff] %v11188_v8 }
 0xfde   :  { %7770 = vmatmul.msk.f32.gmra.mxu0 %vm372_vm3, %v5543_v4 }
 0xfe0   :  { %v5452_v2 = vpop.f32.mrf.mxu2 }
 0xfe2   :  { %4223 = vmin.xlane.f32.xlu0 %v11186_v21 }
 0xfe4   :  { %v11201_v52 = vpop.f32.mrf.mxu3 }
 0xfe5   :  { %12691 = vst [vmem:[#allocation52_spill] sm:$0xff] %v11201_v52 }
 0xfe7   :  { %4213 = vmin.xlane.f32.xlu1 %v11194_v39 }
 0xfe8   :  { %v5455_v9 = vpop.f32.mrf.mxu2 }
 0xfea   :  { %4229 = vmin.xlane.f32.xlu0 %v11199_v43 }
 0xfec   :  { %v11210_v27 = vpop.f32.mrf.mxu3 }
 0xfed   :  { %12692 = vst [vmem:[#allocation53_spill] sm:$0xff] %v11210_v27 }
 0xfef   :  { %4219 = vmin.xlane.f32.xlu1 %v11207_v47 }
 0xff4   :  { %v11219_v56 = vpop.f32.mrf.mxu3 }
 0xff5   :  { %12694 = vst [vmem:[#allocation54_spill] sm:$0xff] %v11219_v56 }
 0xff7   :  { %4225 = vmin.xlane.f32.xlu1 %v11216_v20 }
 0xffc   :  { %v11227_v23 = vpop.f32.mrf.mxu3 }
 0xffd   :  { %12695 = vst [vmem:[#allocation55_spill] sm:$0xff] %v11227_v23 }
 0xffe   :  { %v4140_v50 = vpop.xlane.xlu2 %4139  ;;  %5481 = vrot.lane.b32.xlu0 %v5452_v2, %s7985_s20 }
 0xfff   :  { %v4174_v17 = vand.u32 127, %v4140_v50 }
0x1001   :  { %v7755_v61 = vadd.s32 4294967232, %v4174_v17  ;;  %vm4190_vm12 = vcmp.eq.s32.totalorder %v8149_v26, %v4174_v17 }
0x1003   :  { %vm5536_vm0 = vcmp.eq.s32.totalorder %v8149_v26, %v7755_v61 }
0x1004   :  { %v5544_v4 = vsel %vm5536_vm0, 1.0, %v12634_v28 }
0x1005   :  { %7771 = vmatmul.msk.f32.gmra.mxu0 %vm372_vm3, %v5544_v4  ;;  %v11239_v4 = vpop.f32.mrf.mxu3 }
0x1006   :  { %v11225_v13 = vpop.xlane.xlu2 %4141  ;;  %12696 = vst [vmem:[#allocation56_spill] sm:$0xff] %v11239_v4 }
0x1007   :  { %v12553_v22 = vand.u32 127, %v11225_v13 }
0x1009   :  { %v7756_v56 = vadd.s32 4294967232, %v12553_v22 }
0x100b   :  { %vm5537_vm8 = vcmp.eq.s32.totalorder %v8149_v26, %v7756_v56 }
0x100c   :  { %v5545_v2 = vsel %vm5537_vm8, 1.0, %v12634_v28 }
0x100d   :  { %7772 = vmatmul.msk.f32.gmra.mxu0 %vm372_vm3, %v5545_v2 }
0x100f   :  { %v11237_v61 = vpop.xlane.xlu0 %4143 }
0x1010   :  { %5475 = vrot.lane.b32.xlu1 %v11132_v11, %s7985_s20  ;;  %v5458_v50 = vpop.f32.mrf.mxu2  ;;  %v12554_v23 = vand.u32 127, %v11237_v61 }
0x1012   :  { %v7757_v52 = vadd.s32 4294967232, %v12554_v23  ;;  %v11255_v23 = vpop.f32.mrf.mxu3 }
0x1013   :  { %12699 = vst [vmem:[#allocation57_spill] sm:$0xff] %v11255_v23 }
0x1014   :  { %vm5538_vm9 = vcmp.eq.s32.totalorder %v8149_v26, %v7757_v52 }
0x1015   :  { %v5546_v56 = vsel %vm5538_vm9, 1.0, %v12634_v28 }
0x1016   :  { %7773 = vmatmul.msk.f32.gmra.mxu0 %vm372_vm3, %v5546_v56  ;;  %v11263_v56 = vsel %vm4190_vm12, 1e+30, %v11007_v25 }
0x1017   :  { %v4212_v22 = vpop.xlane.xlu1 %4211 }
0x1018   :  { %v4258_v2 = vand.u32 127, %v4212_v22  ;;  %5477 = vrot.lane.b32.xlu1 %v11150_v42, %s7985_s20  ;;  %v5461_v11 = vpop.f32.mrf.mxu2 }
0x1019   :  { %5487 = vrot.lane.b32.xlu2 %v5461_v11, %s7985_s20 }
0x101a   :  { %vm11251_vm11 = vcmp.eq.s32.totalorder %v8149_v26, %v4258_v2  ;;  %v5186_v22 = vpop.f32.mrf.mxu3  ;;  %v11266_v2 = vld [vmem:[#allocation2 + $0x220] ss:$0 sm:$0xff] }
0x101b   :  { %v5734_v52 = vsel %vm11251_vm11, 1.0, %v12634_v28  ;;  %v3091_v11 = vadd.f32 %v11266_v2, %v9726_v54  ;;  %v3094_v17 = vadd.f32 %v11266_v2, %v9740_v38  ;;  %v12700_v38 = vand.u32 127, %v11135_v0 }
0x101c   :  { %7783 = vmatmul.msk.f32.gmra.mxu1 %vm372_vm3, %v5734_v52  ;;  %v3076_v3 = vadd.f32 %v11266_v2, %v9686_v35 }
0x101d   :  { %v11273_v27 = vsel %vm372_vm3, %v3091_v11, %v9976_v51  ;;  %v11280_v8 = vsel %vm372_vm3, %v3094_v17, %v9989_v44  ;;  %vm4189_vm10 = vcmp.eq.s32.totalorder %v8149_v26, %v12700_v38  ;;  %v11293_v44 = vsel %vm11251_vm11, 1e+30, %v11063_v18 }
0x1022   :  { %v5278_v42 = vpop.permute.xlu0 %5277  ;;  %v5189_v25 = vpop.f32.mrf.mxu3 }
0x1023   :  { %v5295_v23 = vsel %vm372_vm3, %v5186_v22, %v5278_v42 }
0x1024   :  { %v5303_v52 = vadd.f32 %v5295_v23, %v11273_v27  ;;  %v11300_v23 = vpop.f32.mrf.mxu1 }
0x1026   :  { %v6427_v54 = vmul.f32 0.999995, %v5303_v52 }
0x1028   :  { %4235 = vmin.xlane.f32.xlu0 %v11263_v56  ;;  %v6499_v36 = vmax.f32 %v6427_v54, 0.0 }
0x102c   :  { %v11305_v18 = vpop.f32.mrf.mxu1 }
0x102f   :  { %v5280_v24 = vpop.permute.xlu1 %5279 }
0x1030   :  { %v5296_v29 = vsel %vm372_vm3, %v5189_v25, %v5280_v24  ;;  %v11296_v24 = vsel %vm4189_vm10, 1e+30, %v10944_v19 }
0x1031   :  { %v5304_v22 = vadd.f32 %v5296_v29, %v11280_v8  ;;  %v4218_v29 = vpop.xlane.xlu2 %4217 }
0x1033   :  { %v6428_v42 = vmul.f32 0.999995, %v5304_v22 }
0x1035   :  { %v6500_v51 = vmax.f32 %v6428_v42, 0.0 }
0x1037   :  { %v11284_v11 = vpack.c.bf16 %v6500_v51, %v6499_v36 }
0x1039   :  { %v4222_v36 = vpop.xlane.xlu2 %4221 }
0x103c   :  { %5483 = vrot.lane.b32.xlu0 %v5455_v9, %s7985_s20 }
0x1041   :  { %v11302_v9 = vpop.xlane.xlu2 %4227 }
0x1042   :  { %4307 = vmin.xlane.f32.xlu2 %v11293_v44  ;;  %4233 = vmin.xlane.f32.xlu1 %v11296_v24 }
0x1049   :  { %v11312_v25 = vpop.xlane.xlu2 %4231 }
0x104d   :  { %v4216_v0 = vpop.xlane.xlu0 %4215 }
0x104e   :  { %v4260_v54 = vand.u32 127, %v4216_v0 }
0x1050   :  { %vm11317_vm6 = vcmp.eq.s32.totalorder %v8149_v26, %v4260_v54  ;;  %v4263_v54 = vand.u32 127, %v4222_v36 }
0x1052   :  { %vm11351_vm2 = vcmp.eq.s32.totalorder %v8149_v26, %v4263_v54 }
0x1055   :  { %v4224_v22 = vpop.xlane.xlu0 %4223 }
0x1056   :  { %v4264_v57 = vand.u32 127, %v4224_v22 }
0x1058   :  { %vm11387_vm0 = vcmp.eq.s32.totalorder %v8149_v26, %v4264_v57 }
0x105a   :  { %v4214_v52 = vpop.xlane.xlu1 %4213 }
0x105b   :  { %v4259_v17 = vand.u32 127, %v4214_v52  ;;  %5485 = vrot.lane.b32.xlu1 %v5458_v50, %s7985_s20  ;;  %v5736_v52 = vsel %vm11317_vm6, 1.0, %v12634_v28 }
0x105d   :  { %vm4275_vm4 = vcmp.eq.s32.totalorder %v8149_v26, %v4259_v17  ;;  %v5384_v17 = vpop.f32.mrf.mxu1 }
0x105e   :  { %v11309_v19 = vsel %vm4275_vm4, 1e+30, %v11194_v39  ;;  %v5735_v4 = vsel %vm4275_vm4, 1.0, %v12634_v28  ;;  %v12703_v39 = vand.u32 127, %v11225_v13 }
0x105f   :  { %4309 = vmin.xlane.f32.xlu2 %v11309_v19  ;;  %7784 = vmatmul.msk.f32.gmra.mxu1 %vm372_vm3, %v5735_v4  ;;  %v4261_v4 = vand.u32 127, %v4218_v29  ;;  %v11429_v29 = vsel %vm11162_vm14, 1e+30, %v10980_v48 }
0x1060   :  { %vm4191_vm13 = vcmp.eq.s32.totalorder %v8149_v26, %v12703_v39 }
0x1061   :  { %v11340_v13 = vsel %vm4191_vm13, 1e+30, %v11017_v55  ;;  %vm11346_vm15 = vcmp.eq.s32.totalorder %v8149_v26, %v4261_v4  ;;  %v3079_v55 = vadd.f32 %v11266_v2, %v9694_v37 }
0x1062   :  { %v4220_v42 = vpop.xlane.xlu1 %4219  ;;  %v5737_v54 = vsel %vm11346_vm15, 1.0, %v12634_v28 }
0x1063   :  { %v4262_v51 = vand.u32 127, %v4220_v42  ;;  %v5480_v42 = vpop.permute.xlu2 %5479  ;;  %v11361_v4 = vsel %vm372_vm3, %v3079_v55, %v9974_v59  ;;  %v3082_v59 = vadd.f32 %v11266_v2, %v9702_v40 }
0x1065   :  { %vm11325_vm1 = vcmp.eq.s32.totalorder %v8149_v26, %v4262_v51  ;;  %v11343_v51 = vpop.xlane.xlu0 %4229  ;;  %v11383_v22 = vsel %vm372_vm3, %v3082_v59, %v9946_v14 }
0x1066   :  { %v11332_v0 = vsel %vm11325_vm1, 1e+30, %v11207_v47  ;;  %4237 = vmin.xlane.f32.xlu0 %v11340_v13  ;;  %v4267_v12 = vand.u32 127, %v11343_v51  ;;  %v5738_v14 = vsel %vm11325_vm1, 1.0, %v12634_v28 }
0x1067   :  { %12706 = vst [vmem:[#allocation58_spill] sm:$0xff] %v11332_v0  ;;  %4315 = vmin.xlane.f32.xlu2 %v11332_v0  ;;  %7785 = vmatmul.msk.f32.gmra.mxu1 %vm372_vm3, %v5736_v52  ;;  %v5501_v52 = vsel %vm372_vm3, %v5384_v17, %v5480_v42  ;;  %v12556_v0 = vand.u32 127, %v11302_v9  ;;  %v5387_v42 = vpop.f32.mrf.mxu1 }
0x1068   :  { %v5509_v37 = vadd.f32 %v5501_v52, %v11361_v4  ;;  %vm4283_vm1 = vcmp.eq.s32.totalorder %v8149_v26, %v4267_v12 }
0x1069   :  { %v7775_v55 = vadd.s32 4294967232, %v12556_v0 }
0x106a   :  { %v4226_v47 = vpop.xlane.xlu1 %4225  ;;  %v6431_v52 = vmul.f32 0.999995, %v5509_v37  ;;  %v11400_v37 = vsel %vm11387_vm0, 1e+30, %v11186_v21  ;;  %v12558_v21 = vand.u32 127, %v11312_v25 }
0x106b   :  { %v4265_v36 = vand.u32 127, %v4226_v47  ;;  %v11369_v47 = vsel %vm11351_vm2, 1e+30, %v11058_v16  ;;  %vm5742_vm8 = vcmp.eq.s32.totalorder %v8149_v26, %v7775_v55  ;;  %v5464_v55 = vpop.f32.mrf.mxu2 }
0x106c   :  { %v6503_v57 = vmax.f32 %v6431_v52, 0.0 }
0x106d   :  { %v7774_v33 = vadd.s32 4294967232, %v4265_v36  ;;  %vm4281_vm9 = vcmp.eq.s32.totalorder %v8149_v26, %v4265_v36  ;;  %v7777_v36 = vadd.s32 4294967232, %v12558_v21 }
0x106f   :  { %vm5741_vm7 = vcmp.eq.s32.totalorder %v8149_v26, %v7774_v33  ;;  %7786 = vmatmul.msk.f32.gmra.mxu1 %vm372_vm3, %v5737_v54  ;;  %4317 = vmin.xlane.f32.xlu2 %v11369_v47  ;;  %vm5744_vm12 = vcmp.eq.s32.totalorder %v8149_v26, %v7777_v36 }
0x1070   :  { %v5749_v17 = vsel %vm5741_vm7, 1.0, %v12634_v28  ;;  %v5482_v16 = vpop.permute.xlu0 %5481 }
0x1071   :  { %7790 = vmatmul.msk.f32.vlgmr.msrb.gmra.mxu2 %vm372_vm3, %v5749_v17  ;;  %v5502_v33 = vsel %vm372_vm3, %v5387_v42, %v5482_v16  ;;  %v5750_v17 = vsel %vm5742_vm8, 1.0, %v12634_v28  ;;  %v7776_v42 = vadd.s32 4294967232, %v4267_v12  ;;  %v11418_v16 = vsel %vm4281_vm9, 1e+30, %v11216_v20 }
0x1072   :  { %v5510_v40 = vadd.f32 %v5502_v33, %v11383_v22  ;;  %v3073_v20 = vadd.f32 %v11266_v2, %v9678_v7  ;;  %v5752_v7 = vsel %vm5744_vm12, 1.0, %v12634_v28 }
0x1073   :  { %vm5743_vm11 = vcmp.eq.s32.totalorder %v8149_v26, %v7776_v42 }
0x1074   :  { %v6432_v0 = vmul.f32 0.999995, %v5510_v40  ;;  %v5751_v33 = vsel %vm5743_vm11, 1.0, %v12634_v28 }
0x1076   :  { %v6504_v59 = vmax.f32 %v6432_v0, 0.0  ;;  %v5739_v0 = vsel %vm11351_vm2, 1.0, %v12634_v28 }
0x1077   :  { %7787 = vmatmul.msk.f32.gmra.mxu1 %vm372_vm3, %v5738_v14  ;;  %4319 = vmin.xlane.f32.xlu2 %v11400_v37  ;;  %v5740_v14 = vsel %vm11387_vm0, 1.0, %v12634_v28 }
0x1078   :  { %v11408_v38 = vpack.c.bf16 %v6504_v59, %v6503_v57  ;;  %v11442_v57 = vsel %vm372_vm3, %v3073_v20, %v9956_v34  ;;  %v12714_v59 = vld [vmem:[#allocation9_spill] sm:$0xff]  ;;  %v12715_v20 = vand.u32 127, %v11302_v9 }
0x1079   :  { %7791 = vmatmul.msk.f32.gmra.mxu2 %vm372_vm3, %v5750_v17  ;;  %v11455_v34 = vsel %vm372_vm3, %v3076_v3, %v12714_v59 }
0x107a   :  { %5489 = vrot.lane.b32.xlu0 %v5464_v55, %s7985_s20  ;;  %vm4282_vm10 = vcmp.eq.s32.totalorder %v8149_v26, %v12715_v20 }
0x107f   :  { %7788 = vmatmul.msk.f32.gmra.mxu1 %vm372_vm3, %v5739_v0  ;;  %4321 = vmin.xlane.f32.xlu2 %v11418_v16 }
0x1081   :  { %7792 = vmatmul.msk.f32.gmra.mxu2 %vm372_vm3, %v5751_v33 }
0x1082   :  { %v5476_v52 = vpop.permute.xlu1 %5475 }
0x1083   :  { %v5499_v40 = vsel %vm372_vm3, %v11300_v23, %v5476_v52  ;;  %v12713_v23 = vand.u32 127, %v11237_v61  ;;  %v11469_v52 = vsel %vm11317_vm6, 1e+30, %v11177_v15 }
0x1084   :  { %v5507_v48 = vadd.f32 %v5499_v40, %v11442_v57 }
0x1085   :  { %4305 = vmin.xlane.f32.xlu1 %v11429_v29  ;;  %vm4192_vm14 = vcmp.eq.s32.totalorder %v8149_v26, %v12713_v23 }
0x1086   :  { %v6429_v42 = vmul.f32 0.999995, %v5507_v48  ;;  %v11461_v0 = vsel %vm4192_vm14, 1e+30, %v11040_v46  ;;  %v11475_v46 = vsel %vm11346_vm15, 1e+30, %v11035_v30 }
0x1087   :  { %7789 = vmatmul.msk.f32.gmra.mxu1 %vm372_vm3, %v5740_v14  ;;  %v11482_v14 = vsel %vm4282_vm10, 1e+30, %v11095_v6 }
0x1088   :  { %v6501_v61 = vmax.f32 %v6429_v42, 0.0  ;;  %v12716_v42 = vld [vmem:[#allocation5_spill] sm:$0xff] }
0x1089   :  { %7793 = vmatmul.msk.f32.gmra.mxu2 %vm372_vm3, %v5752_v7 }
0x108a   :  { %v5478_v54 = vpop.permute.xlu1 %5477 }
0x108b   :  { %v5500_v17 = vsel %vm372_vm3, %v11305_v18, %v5478_v54  ;;  %v5653_v18 = vpop.f32.mrf.mxu0  ;;  %v11502_v54 = vpop.permute.xlu2 %5487 }
0x108c   :  { %v5508_v55 = vadd.f32 %v5500_v17, %v11455_v34 }
0x108d   :  { %4239 = vmin.xlane.f32.xlu1 %v11461_v0 }
0x108e   :  { %v6430_v35 = vmul.f32 0.999995, %v5508_v55  ;;  %v3085_v55 = vadd.f32 %v11266_v2, %v12716_v42 }
0x1090   :  { %v6502_v33 = vmax.f32 %v6430_v35, 0.0 }
0x1092   :  { %v11464_v36 = vpack.c.bf16 %v6502_v33, %v6501_v61  ;;  %v12717_v33 = vld [vmem:[#allocation7_spill] sm:$0xff] }
0x1093   :  { %v5656_v40 = vpop.f32.mrf.mxu0 }
0x1095   :  { %4311 = vmin.xlane.f32.xlu1 %v11469_v52 }
0x109b   :  { %v11486_v15 = vpop.f32.mrf.mxu0  ;;  %v11488_v50 = vpop.xlane.xlu0 %4235 }
0x109c   :  { %v12557_v48 = vand.u32 127, %v11488_v50 }
0x109e   :  { %v7779_v3 = vadd.s32 4294967232, %v12557_v48 }
0x10a0   :  { %vm5746_vm13 = vcmp.eq.s32.totalorder %v8149_v26, %v7779_v3  ;;  %v12719_v3 = vld [vmem:[#allocation8_spill] sm:$0xff] }
0x10a1   :  { %v5754_v59 = vsel %vm5746_vm13, 1.0, %v12634_v28 }
0x10a3   :  { %v5662_v23 = vpop.f32.mrf.mxu0 }
0x10a4   :  { %4313 = vmin.xlane.f32.xlu0 %v11475_v46 }
0x10ab   :  { %v11510_v61 = vpop.f32.mrf.mxu0 }
0x10ac   :  { %4323 = vmin.xlane.f32.xlu0 %v11482_v14 }
0x10ae   :  { %5685 = vrot.lane.b32.xlu1 %v5653_v18, %s7985_s20  ;;  %v5484_v17 = vpop.permute.xlu0 %5483  ;;  %v11514_v18 = vsel %vm372_vm3, %v3085_v55, %v12717_v33 }
0x10b3   :  { %v5668_v48 = vpop.f32.mrf.mxu0 }
0x10b5   :  { %v4234_v30 = vpop.xlane.xlu1 %4233  ;;  %v4308_v20 = vpop.xlane.xlu2 %4307 }
0x10b6   :  { %v4269_v39 = vand.u32 127, %v4234_v30  ;;  %v12718_v30 = vld [vmem:[#allocation6_spill] sm:$0xff] }
0x10b8   :  { %vm4285_vm4 = vcmp.eq.s32.totalorder %v8149_v26, %v4269_v39  ;;  %v7778_v9 = vadd.s32 4294967232, %v4269_v39  ;;  %v3088_v39 = vadd.f32 %v11266_v2, %v12718_v30  ;;  %v11532_v30 = vsel %vm4283_vm1, 1e+30, %v11199_v43 }
0x10b9   :  { %v11493_v7 = vsel %vm4285_vm4, 1e+30, %v11296_v24  ;;  %v5390_v24 = vpop.f32.mrf.mxu1 }
0x10ba   :  { %4329 = vmin.xlane.f32.xlu2 %v11493_v7  ;;  %vm5745_vm6 = vcmp.eq.s32.totalorder %v8149_v26, %v7778_v9  ;;  %v5503_v35 = vsel %vm372_vm3, %v5390_v24, %v5484_v17 }
0x10bb   :  { %v5753_v6 = vsel %vm5745_vm6, 1.0, %v12634_v28  ;;  %v5671_v12 = vpop.f32.mrf.mxu0 }
0x10bc   :  { %7794 = vmatmul.msk.f32.gmra.mxu2 %vm372_vm3, %v5753_v6 }
0x10c0   :  { %5687 = vrot.lane.b32.xlu0 %v5656_v40, %s7985_s20  ;;  %v5511_v40 = vadd.f32 %v5503_v35, %v11514_v18 }
0x10c1   :  { %v5393_v9 = vpop.f32.mrf.mxu1 }
0x10c2   :  { %v6433_v17 = vmul.f32 0.999995, %v5511_v40 }
0x10c4   :  { %7795 = vmatmul.msk.f32.gmra.mxu2 %vm372_vm3, %v5754_v59  ;;  %v11521_v59 = vsel %vm372_vm3, %v3088_v39, %v12719_v3  ;;  %v6505_v35 = vmax.f32 %v6433_v17, 0.0 }
0x10cd   :  { %v5486_v6 = vpop.permute.xlu1 %5485 }
0x10ce   :  { %v5504_v24 = vsel %vm372_vm3, %v5393_v9, %v5486_v6 }
0x10cf   :  { %v5512_v42 = vadd.f32 %v5504_v24, %v11521_v59 }
0x10d1   :  { %v6434_v55 = vmul.f32 0.999995, %v5512_v42 }
0x10d2   :  { %5695 = vrot.lane.b32.xlu2 %v5668_v48, %s7985_s20  ;;  %v4310_v33 = vpop.xlane.xlu2 %4309 }
0x10d3   :  { %v6506_v21 = vmax.f32 %v6434_v55, 0.0 }
0x10d5   :  { %v11529_v2 = vpack.c.bf16 %v6506_v21, %v6505_v35  ;;  %v4354_v35 = vand.u32 127, %v4308_v20 }
0x10d7   :  { %vm11582_vm8 = vcmp.eq.s32.totalorder %v8149_v26, %v4354_v35  ;;  %v6376_v35 = vld [vmem:[#allocation2 + $0x290] sm:$0xff] }
0x10d8   :  { %4325 = vmin.xlane.f32.xlu1 %v11532_v30 }
0x10d9   :  { %v11539_v48 = vpop.xlane.xlu0 %4237 }
0x10da   :  { %4853 = vrot.lane.b32.xlu2 %v10795_v32, %s7985_s20  ;;  %v11537_v40 = vpop.xlane.xlu2 %4315  ;;  %v12560_v39 = vand.u32 127, %v11539_v48  ;;  %v12720_v32 = vand.u32 127, %v11312_v25 }
0x10dc   :  { %v7780_v51 = vadd.s32 4294967232, %v12560_v39  ;;  %vm4284_vm2 = vcmp.eq.s32.totalorder %v8149_v26, %v12720_v32  ;;  %v6369_v39 = vld [vmem:[#allocation2 + $0x258] sm:$0xff] }
0x10dd   :  { %v11556_v6 = vsel %vm4284_vm2, 1e+30, %v11113_v63 }
0x10de   :  { %vm5747_vm15 = vcmp.eq.s32.totalorder %v8149_v26, %v7780_v51  ;;  %v6377_v51 = vld [vmem:[#allocation2 + $0x298] sm:$0xff] }
0x10df   :  { %v5755_v43 = vsel %vm5747_vm15, 1.0, %v12634_v28 }
0x10e0   :  { %7796 = vmatmul.msk.f32.gmra.mxu2 %vm372_vm3, %v5755_v43 }
0x10e2   :  { %5697 = vrot.lane.b32.xlu2 %v5671_v12, %s7985_s20  ;;  %v11548_v21 = vpop.xlane.xlu2 %4317  ;;  %v6378_v12 = vld [vmem:[#allocation2 + $0x2a0] sm:$0xff] }
0x10e3   :  { %v6584_v43 = vpack.c.bf16 %v6378_v12, %v6377_v51  ;;  %v6373_v12 = vld [vmem:[#allocation2 + $0x278] sm:$0xff] }
0x10e5   :  { %7846 = vmatpush.bf16.msra.mxu3 %v6584_v43  ;;  %6586 = vmatpush.bf16.msrb.mxu2 %v6584_v43  ;;  %v6374_v43 = vld [vmem:[#allocation2 + $0x280] sm:$0xff] }
0x10ea   :  { %v11553_v9 = vpop.xlane.xlu2 %4319  ;;  %4327 = vmin.xlane.f32.xlu0 %v11556_v6 }
0x10f1   :  { %5691 = vrot.lane.b32.xlu1 %v5662_v23, %s7985_s20 }
0x10f2   :  { %v11560_v3 = vpop.xlane.xlu2 %4321 }
0x10f3   :  { %v4361_v24 = vand.u32 127, %v11560_v3 }
0x10f5   :  { %v7798_v17 = vadd.s32 4294967232, %v4361_v24  ;;  %vm4377_vm2 = vcmp.eq.s32.totalorder %v8149_v26, %v4361_v24  ;;  %v5863_v24 = vpop.f32.mrf.mxu2 }
0x10f7   :  { %vm5951_vm7 = vcmp.eq.s32.totalorder %v8149_v26, %v7798_v17  ;;  %v6370_v17 = vld [vmem:[#allocation2 + $0x260] sm:$0xff] }
0x10f8   :  { %v5959_v25 = vsel %vm5951_vm7, 1.0, %v12634_v28  ;;  %v4306_v42 = vpop.xlane.xlu1 %4305 }
0x10f9   :  { %v4353_v55 = vand.u32 127, %v4306_v42  ;;  %7814 = vmatmul.msk.f32.vlgmr.msra.gmra.mxu0 %vm372_vm3, %v5959_v25  ;;  %v5944_v42 = vsel %vm11582_vm8, 1.0, %v12634_v28 }
0x10fb   :  { %vm11569_vm0 = vcmp.eq.s32.totalorder %v8149_v26, %v4353_v55  ;;  %v4355_v55 = vand.u32 127, %v4310_v33 }
0x10fc   :  { %v5943_v23 = vsel %vm11569_vm0, 1.0, %v12634_v28 }
0x10fd   :  { %7806 = vmatmul.msk.f32.vlgmr.msrb.gmra.mxu3 %vm372_vm3, %v5943_v23  ;;  %v6375_v23 = vld [vmem:[#allocation2 + $0x288] sm:$0xff]  ;;  %vm11599_vm11 = vcmp.eq.s32.totalorder %v8149_v26, %v4355_v55 }
0x10fe   :  { %5689 = vrot.lane.b32.xlu0 %v11486_v15, %s7985_s20  ;;  %v6583_v51 = vpack.c.bf16 %v6376_v35, %v6375_v23  ;;  %v6372_v23 = vld [vmem:[#allocation2 + $0x270] sm:$0xff] }
0x1100   :  { %v11579_v32 = vpop.xlane.xlu1 %4239  ;;  %7847 = vmatpush.bf16.msra.mxu3 %v6583_v51  ;;  %6587 = vmatpush.bf16.msrb.mxu2 %v6583_v51  ;;  %v5674_v51 = vpop.f32.mrf.mxu0 }
0x1101   :  { %v12559_v25 = vand.u32 127, %v11579_v32 }
0x1103   :  { %v7781_v20 = vadd.s32 4294967232, %v12559_v25 }
0x1105   :  { %7807 = vmatmul.msk.f32.gmra.mxu3 %vm372_vm3, %v5944_v42  ;;  %vm5748_vm9 = vcmp.eq.s32.totalorder %v8149_v26, %v7781_v20  ;;  %v4386_v20 = vsel %vm11582_vm8, 1e+30, %v11293_v44  ;;  %v6582_v42 = vpack.c.bf16 %v6374_v43, %v6373_v12  ;;  %v11611_v44 = vpop.permute.xlu0 %5489  ;;  %v6580_v43 = vpack.c.bf16 %v6370_v17, %v6369_v39 }
0x1106   :  { %v5756_v15 = vsel %vm5748_vm9, 1.0, %v12634_v28  ;;  %4855 = vrot.lane.b32.xlu0 %v10797_v45, %s7985_s20  ;;  %v5945_v45 = vsel %vm11599_vm11, 1.0, %v12634_v28 }
0x1107   :  { %7797 = vmatmul.msk.f32.gmra.mxu2 %vm372_vm3, %v5756_v15  ;;  %v6371_v15 = vld [vmem:[#allocation2 + $0x268] sm:$0xff]  ;;  %7848 = vmatpush.bf16.msra.mxu3 %v6582_v42 }
0x1108   :  { %v4312_v33 = vpop.xlane.xlu1 %4311  ;;  %6588 = vmatpush.bf16.msrb.mxu2 %v6582_v42  ;;  %v6581_v55 = vpack.c.bf16 %v6372_v23, %v6371_v15  ;;  %v12729_v23 = vand.u32 127, %v11488_v50  ;;  %v6363_v50 = vld [vmem:[#allocation2 + $0x228] sm:$0xff] }
0x1109   :  { %v4356_v35 = vand.u32 127, %v4312_v33  ;;  %v6367_v33 = vld [vmem:[#allocation2 + $0x248] sm:$0xff] }
0x110a   :  { %vm4286_vm14 = vcmp.eq.s32.totalorder %v8149_v26, %v12729_v23 }
0x110b   :  { %4403 = vmin.xlane.f32.xlu2 %v4386_v20  ;;  %vm11614_vm12 = vcmp.eq.s32.totalorder %v8149_v26, %v4356_v35  ;;  %7849 = vmatpush.bf16.msra.mxu3 %v6581_v55  ;;  %v6368_v20 = vld [vmem:[#allocation2 + $0x250] sm:$0xff]  ;;  %v11626_v39 = vsel %vm4286_vm14, 1e+30, %v11263_v56  ;;  %v4358_v56 = vand.u32 127, %v11537_v40  ;;  %v4359_v40 = vand.u32 127, %v11548_v21 }
0x110c   :  { %6589 = vmatpush.bf16.msrb.mxu2 %v6581_v55  ;;  %v5946_v42 = vsel %vm11614_vm12, 1.0, %v12634_v28  ;;  %v6579_v15 = vpack.c.bf16 %v6368_v20, %v6367_v33  ;;  %v6365_v55 = vld [vmem:[#allocation2 + $0x238] sm:$0xff]  ;;  %v6364_v33 = vld [vmem:[#allocation2 + $0x230] sm:$0xff]  ;;  %v4360_v21 = vand.u32 127, %v11553_v9 }
0x110d   :  { %7808 = vmatmul.msk.f32.gmra.mxu3 %vm372_vm3, %v5945_v45  ;;  %vm11640_vm4 = vcmp.eq.s32.totalorder %v8149_v26, %v4358_v56  ;;  %vm11653_vm13 = vcmp.eq.s32.totalorder %v8149_v26, %v4359_v40  ;;  %v5396_v40 = vpop.f32.mrf.mxu1 }
0x110e   :  { %5699 = vrot.lane.b32.xlu0 %v5674_v51, %s7985_s20  ;;  %v6366_v51 = vld [vmem:[#allocation2 + $0x240] sm:$0xff]  ;;  %vm11665_vm15 = vcmp.eq.s32.totalorder %v8149_v26, %v4360_v21  ;;  %v5588_v21 = vpop.f32.mrf.mxu3 }
0x110f   :  { %7850 = vmatpush.bf16.msra.mxu3 %v6580_v43  ;;  %v5950_v9 = vsel %vm11665_vm15, 1.0, %v12634_v28 }
0x1110   :  { %6590 = vmatpush.bf16.msrb.mxu2 %v6580_v43  ;;  %v6578_v43 = vpack.c.bf16 %v6366_v51, %v6365_v55  ;;  %v5948_v55 = vsel %vm11640_vm4, 1.0, %v12634_v28 }
0x1113   :  { %7851 = vmatpush.bf16.msra.mxu3 %v6579_v15 }
0x1114   :  { %6591 = vmatpush.bf16.msrb.mxu2 %v6579_v15 }
0x1115   :  { %7809 = vmatmul.msk.f32.gmra.mxu3 %vm372_vm3, %v5946_v42  ;;  %v6577_v42 = vpack.c.bf16 %v6364_v33, %v6363_v50  ;;  %v5949_v50 = vsel %vm11653_vm13, 1.0, %v12634_v28 }
0x1117   :  { %v4314_v45 = vpop.xlane.xlu0 %4313  ;;  %7852 = vmatpush.bf16.msra.mxu3 %v6578_v43 }
0x1118   :  { %v4357_v35 = vand.u32 127, %v4314_v45  ;;  %6592 = vmatpush.bf16.msrb.mxu2 %v6578_v43 }
0x111a   :  { %vm11630_vm10 = vcmp.eq.s32.totalorder %v8149_v26, %v4357_v35 }
0x111b   :  { %4331 = vmin.xlane.f32.xlu1 %v11626_v39  ;;  %v5947_v20 = vsel %vm11630_vm10, 1.0, %v12634_v28  ;;  %7853 = vmatpush.bf16.msra.mxu3 %v6577_v42 }
0x111c   :  { %6593 = vmatpush.bf16.msrb.mxu2 %v6577_v42  ;;  %v12751_v42 = vld [vmem:[#allocation38_spill] sm:$0xff] }
0x111d   :  { %7810 = vmatmul.msk.f32.gmra.mxu3 %vm372_vm3, %v5947_v20 }
0x111f   :  { %v4324_v15 = vpop.xlane.xlu0 %4323 }
0x1120   :  { %v4362_v45 = vand.u32 127, %v4324_v15 }
0x1122   :  { %v7799_v35 = vadd.s32 4294967232, %v4362_v45  ;;  %vm4378_vm7 = vcmp.eq.s32.totalorder %v8149_v26, %v4362_v45 }
0x1123   :  { %v4394_v15 = vsel %vm4378_vm7, 1e+30, %v11482_v14  ;;  %v12738_v14 = vand.u32 127, %v11539_v48 }
0x1124   :  { %vm5952_vm6 = vcmp.eq.s32.totalorder %v8149_v26, %v7799_v35 }
0x1125   :  { %7811 = vmatmul.msk.f32.gmra.mxu3 %vm372_vm3, %v5948_v55  ;;  %v5960_v51 = vsel %vm5952_vm6, 1.0, %v12634_v28  ;;  %vm4287_vm9 = vcmp.eq.s32.totalorder %v8149_v26, %v12738_v14 }
0x1126   :  { %7815 = vmatmul.msk.f32.gmra.mxu0 %vm372_vm3, %v5960_v51  ;;  %v12739_v51 = vand.u32 127, %v11579_v32  ;;  %v5399_v32 = vpop.f32.mrf.mxu1 }
0x1128   :  { %vm4288_vm14 = vcmp.eq.s32.totalorder %v8149_v26, %v12739_v51 }
0x112d   :  { %v4330_v33 = vpop.xlane.xlu2 %4329  ;;  %7812 = vmatmul.msk.f32.gmra.mxu3 %vm372_vm3, %v5949_v50 }
0x112e   :  { %v4365_v20 = vand.u32 127, %v4330_v33  ;;  %v11703_v33 = vsel %vm4288_vm14, 1e+30, %v11461_v0  ;;  %v5505_v0 = vsel %vm372_vm3, %v5396_v40, %v11502_v54 }
0x1130   :  { %vm4381_vm1 = vcmp.eq.s32.totalorder %v8149_v26, %v4365_v20 }
0x1131   :  { %v4397_v56 = vsel %vm4381_vm1, 1e+30, %v11493_v7  ;;  %v4393_v7 = vsel %vm4377_vm2, 1e+30, %v11418_v16 }
0x1132   :  { %4425 = vmin.xlane.f32.xlu2 %v4397_v56  ;;  %v5506_v56 = vsel %vm372_vm3, %v5399_v32, %v11611_v44 }
0x1134   :  { %5693 = vrot.lane.b32.xlu1 %v11510_v61, %s7985_s20  ;;  %v5686_v61 = vpop.permute.xlu1 %5685 }
0x1135   :  { %7813 = vmatmul.msk.f32.gmra.mxu3 %vm372_vm3, %v5950_v9 }
0x1138   :  { %4417 = vmin.xlane.f32.xlu0 %v4393_v7  ;;  %v5591_v7 = vpop.f32.mrf.mxu3 }
0x113d   :  { %6669 = vmatmul.bf16.vlgmr.msra.gmra.mxu3 %v11284_v11  ;;  %v5688_v11 = vpop.permute.xlu0 %5687 }
0x113e   :  { %v5710_v32 = vsel %vm372_vm3, %v5591_v7, %v5688_v11 }
0x1140   :  { %4419 = vmin.xlane.f32.xlu0 %v4394_v15  ;;  %v5513_v15 = vadd.f32 %v5505_v0, %v11273_v27  ;;  %v5594_v40 = vpop.f32.mrf.mxu3 }
0x1148   :  { %v5597_v11 = vpop.f32.mrf.mxu3 }
0x114a   :  { %4859 = vrot.lane.b32.xlu2 %v10832_v58, %s7985_s20  ;;  %v11693_v58 = vsel %vm4287_vm9, 1e+30, %v11340_v13  ;;  %v7802_v13 = vadd.s32 4294967232, %v4365_v20  ;;  %v5514_v20 = vadd.f32 %v5506_v56, %v11280_v8 }
0x114b   :  { %v4326_v35 = vpop.xlane.xlu1 %4325 }
0x114c   :  { %v4363_v3 = vand.u32 127, %v4326_v35  ;;  %vm5955_vm1 = vcmp.eq.s32.totalorder %v8149_v26, %v7802_v13 }
0x114d   :  { %6674 = vmatmul.bf16.gmra.mxu3 %v11464_v36  ;;  %v5963_v9 = vsel %vm5955_vm1, 1.0, %v12634_v28 }
0x114e   :  { %v7800_v55 = vadd.s32 4294967232, %v4363_v3  ;;  %vm4379_vm2 = vcmp.eq.s32.totalorder %v8149_v26, %v4363_v3 }
0x1150   :  { %vm5953_vm8 = vcmp.eq.s32.totalorder %v8149_v26, %v7800_v55 }
0x1151   :  { %v5961_v16 = vsel %vm5953_vm8, 1.0, %v12634_v28 }
0x1152   :  { %7816 = vmatmul.msk.f32.gmra.mxu0 %vm372_vm3, %v5961_v16  ;;  %v6436_v16 = vmul.f32 0.999995, %v5514_v20 }
0x1154   :  { %5895 = vrot.lane.b32.xlu0 %v5863_v24, %s7985_s20  ;;  %v6435_v24 = vmul.f32 0.999995, %v5513_v15  ;;  %v6508_v14 = vmax.f32 %v6436_v16, 0.0 }
0x1156   :  { %v6507_v51 = vmax.f32 %v6435_v24, 0.0 }
0x1158   :  { %v6560_v13 = vpack.c.bf16 %v6508_v14, %v6507_v51  ;;  %v5600_v51 = vpop.f32.mrf.mxu3 }
0x115d   :  { %6679 = vmatmul.bf16.gmra.mxu3 %v11408_v38  ;;  %v4328_v36 = vpop.xlane.xlu0 %4327  ;;  %v11707_v38 = vpop.permute.xlu2 %5695 }
0x115e   :  { %4333 = vmin.xlane.f32.xlu1 %v11693_v58  ;;  %v4364_v45 = vand.u32 127, %v4328_v36 }
0x1160   :  { %v7801_v50 = vadd.s32 4294967232, %v4364_v45  ;;  %vm4380_vm7 = vcmp.eq.s32.totalorder %v8149_v26, %v4364_v45 }
0x1162   :  { %vm5954_vm6 = vcmp.eq.s32.totalorder %v8149_v26, %v7801_v50 }
0x1163   :  { %v5962_v48 = vsel %vm5954_vm6, 1.0, %v12634_v28 }
0x1164   :  { %7817 = vmatmul.msk.f32.gmra.mxu0 %vm372_vm3, %v5962_v48 }
0x1165   :  { %v4854_v35 = vpop.permute.xlu2 %4853 }
0x1166   :  { %4335 = vmin.xlane.f32.xlu1 %v11703_v33  ;;  %v4873_v44 = vsel %vm372_vm3, %v10995_v1, %v4854_v35  ;;  %v5709_v1 = vsel %vm372_vm3, %v5588_v21, %v5686_v61  ;;  %v5692_v61 = vpop.permute.xlu1 %5691  ;;  %v4396_v21 = vsel %vm4380_vm7, 1e+30, %v11556_v6 }
0x1167   :  { %v4881_v36 = vadd.f32 %v4873_v44, %v11514_v18  ;;  %v5717_v3 = vadd.f32 %v5709_v1, %v11442_v57  ;;  %v5712_v14 = vsel %vm372_vm3, %v5597_v11, %v5692_v61  ;;  %v4385_v11 = vsel %vm11569_vm0, 1e+30, %v11429_v29 }
0x1169   :  { %v6409_v50 = vmul.f32 0.999995, %v4881_v36  ;;  %v6437_v7 = vmul.f32 0.999995, %v5717_v3 }
0x116b   :  { %v6481_v0 = vmax.f32 %v6409_v50, 0.0 }
0x116c   :  { %7818 = vmatmul.msk.f32.gmra.mxu0 %vm372_vm3, %v5963_v9  ;;  %v4395_v9 = vsel %vm4379_vm2, 1e+30, %v11532_v30  ;;  %v6509_v30 = vmax.f32 %v6437_v7, 0.0 }
0x116d   :  { %6684 = vmatmul.bf16.gmra.mxu3 %v11529_v2 }
0x1170   :  { %v5690_v55 = vpop.permute.xlu0 %5689 }
0x1171   :  { %v5711_v44 = vsel %vm372_vm3, %v5594_v40, %v5690_v55  ;;  %v5603_v40 = vpop.f32.mrf.mxu3 }
0x1178   :  { %v4856_v2 = vpop.permute.xlu0 %4855 }
0x1179   :  { %v4874_v54 = vsel %vm372_vm3, %v11001_v31, %v4856_v2  ;;  %v5718_v31 = vadd.f32 %v5710_v32, %v11455_v34  ;;  %v5719_v2 = vadd.f32 %v5711_v44, %v11361_v4  ;;  %v5606_v1 = vpop.f32.mrf.mxu3 }
0x117a   :  { %v4882_v48 = vadd.f32 %v4874_v54, %v11521_v59  ;;  %v5720_v54 = vadd.f32 %v5712_v14, %v11383_v22 }
0x117b   :  { %v6438_v35 = vmul.f32 0.999995, %v5718_v31  ;;  %v6439_v6 = vmul.f32 0.999995, %v5719_v2 }
0x117c   :  { %v6410_v56 = vmul.f32 0.999995, %v4882_v48  ;;  %v6440_v48 = vmul.f32 0.999995, %v5720_v54 }
0x117d   :  { %6689 = vmatmul.bf16.gmra.mxu3 %v6560_v13  ;;  %v6511_v55 = vmax.f32 %v6439_v6, 0.0 }
0x117e   :  { %v6482_v20 = vmax.f32 %v6410_v56, 0.0  ;;  %4421 = vmin.xlane.f32.xlu0 %v4395_v9  ;;  %v6512_v13 = vmax.f32 %v6440_v48, 0.0  ;;  %v5714_v56 = vsel %vm372_vm3, %v5603_v40, %v11707_v38 }
0x117f   :  { %4851 = vrot.lane.b32.xlu1 %v10791_v60, %s7985_s20  ;;  %v6510_v60 = vmax.f32 %v6438_v35, 0.0  ;;  %v5722_v9 = vadd.f32 %v5714_v56, %v11521_v59 }
0x1180   :  { %v11733_v15 = vpack.c.bf16 %v6482_v20, %v6481_v0  ;;  %v6562_v32 = vpack.c.bf16 %v6512_v13, %v6511_v55  ;;  %v5700_v31 = vpop.permute.xlu0 %5699 }
0x1181   :  { %v6561_v16 = vpack.c.bf16 %v6510_v60, %v6509_v30  ;;  %v6442_v3 = vmul.f32 0.999995, %v5722_v9  ;;  %v5609_v60 = vpop.f32.mrf.mxu3  ;;  %v5698_v30 = vpop.permute.xlu2 %5697 }
0x1182   :  { %v5715_v63 = vsel %vm372_vm3, %v5606_v1, %v5698_v30  ;;  %v4388_v30 = vsel %vm11614_vm12, 1e+30, %v11469_v52 }
0x1183   :  { %v6514_v61 = vmax.f32 %v6442_v3, 0.0  ;;  %v5723_v2 = vadd.f32 %v5715_v63, %v11273_v27 }
0x1185   :  { %v6443_v48 = vmul.f32 0.999995, %v5723_v2 }
0x1186   :  { %4423 = vmin.xlane.f32.xlu0 %v4396_v21 }
0x1187   :  { %v6515_v13 = vmax.f32 %v6443_v48, 0.0 }
0x1189   :  { %v11761_v54 = vpop.f32.mrf.mxu3 }
0x118d   :  { %6694 = vmatmul.bf16.gmra.mxu3 %v6561_v16 }
0x118e   :  { %v4332_v24 = vpop.xlane.xlu1 %4331 }
0x118f   :  { %v4366_v36 = vand.u32 127, %v4332_v24  ;;  %v5716_v24 = vsel %vm372_vm3, %v5609_v60, %v5700_v31 }
0x1190   :  { %v5724_v29 = vadd.f32 %v5716_v24, %v11280_v8 }
0x1191   :  { %v7803_v45 = vadd.s32 4294967232, %v4366_v36  ;;  %vm4382_vm9 = vcmp.eq.s32.totalorder %v8149_v26, %v4366_v36  ;;  %v11766_v56 = vpop.f32.mrf.mxu3 }
0x1192   :  { %v6444_v6 = vmul.f32 0.999995, %v5724_v29 }
0x1193   :  { %vm5956_vm8 = vcmp.eq.s32.totalorder %v8149_v26, %v7803_v45 }
0x1194   :  { %v5964_v50 = vsel %vm5956_vm8, 1.0, %v12634_v28  ;;  %v6516_v55 = vmax.f32 %v6444_v6, 0.0  ;;  %v4387_v6 = vsel %vm11599_vm11, 1e+30, %v11309_v19 }
0x1195   :  { %7819 = vmatmul.msk.f32.gmra.mxu0 %vm372_vm3, %v5964_v50 }
0x119d   :  { %6699 = vmatmul.bf16.gmra.mxu3 %v6562_v32  ;;  %v6564_v32 = vpack.c.bf16 %v6516_v55, %v6515_v13  ;;  %v4389_v55 = vsel %vm11630_vm10, 1e+30, %v11475_v46 }
0x11a6   :  { %v5694_v0 = vpop.permute.xlu1 %5693 }
0x11a7   :  { %v5713_v20 = vsel %vm372_vm3, %v5600_v51, %v5694_v0  ;;  %v4398_v51 = vsel %vm4382_vm9, 1e+30, %v11626_v39 }
0x11a8   :  { %v5721_v35 = vadd.f32 %v5713_v20, %v11514_v18 }
0x11a9   :  { %4401 = vmin.xlane.f32.xlu1 %v4385_v11 }
0x11aa   :  { %v6441_v7 = vmul.f32 0.999995, %v5721_v35 }
0x11ab   :  { %v4418_v38 = vpop.xlane.xlu0 %4417 }
0x11ac   :  { %v6513_v21 = vmax.f32 %v6441_v7, 0.0  ;;  %v4457_v16 = vand.u32 127, %v4418_v38  ;;  %v4404_v38 = vpop.xlane.xlu2 %4403 }
0x11ad   :  { %v4450_v13 = vand.u32 127, %v4404_v38 }
0x11ae   :  { %v6563_v44 = vpack.c.bf16 %v6514_v61, %v6513_v21  ;;  %v7822_v14 = vadd.s32 4294967232, %v4457_v16 }
0x11af   :  { %vm6154_vm11 = vcmp.eq.s32.totalorder %v8149_v26, %v4450_v13  ;;  %v12743_v13 = vld [vmem:[#allocation12_spill] sm:$0xff] }
0x11b0   :  { %6704 = vmatmul.bf16.gmra.mxu3 %v6563_v44  ;;  %vm6169_vm0 = vcmp.eq.s32.totalorder %v8149_v26, %v7822_v14 }
0x11b1   :  { %4427 = vmin.xlane.f32.xlu1 %v4398_v51  ;;  %v6177_v36 = vsel %vm6169_vm0, 1.0, %v12634_v28 }
0x11b2   :  { %7838 = vmatmul.msk.f32.vlgmr.msra.gmra.mxu2 %vm372_vm3, %v6177_v36 }
0x11b3   :  { %v4420_v45 = vpop.xlane.xlu0 %4419 }
0x11b4   :  { %v4458_v50 = vand.u32 127, %v4420_v45  ;;  %v4426_v14 = vpop.xlane.xlu2 %4425 }
0x11b5   :  { %v4461_v29 = vand.u32 127, %v4426_v14 }
0x11b6   :  { %v7823_v39 = vadd.s32 4294967232, %v4458_v50 }
0x11b7   :  { %v7826_v12 = vadd.s32 4294967232, %v4461_v29  ;;  %v12742_v29 = vld [vmem:[#allocation35_spill] sm:$0xff] }
0x11b8   :  { %vm6170_vm14 = vcmp.eq.s32.totalorder %v8149_v26, %v7823_v39 }
0x11b9   :  { %v6178_v40 = vsel %vm6170_vm14, 1.0, %v12634_v28  ;;  %vm6173_vm12 = vcmp.eq.s32.totalorder %v8149_v26, %v7826_v12 }
0x11ba   :  { %7839 = vmatmul.msk.f32.gmra.mxu2 %vm372_vm3, %v6178_v40  ;;  %v6181_v2 = vsel %vm6173_vm12, 1.0, %v12634_v28 }
0x11c0   :  { %6709 = vmatmul.bf16.gmra.mxu3 %v6564_v32 }
0x11c6   :  { %v11781_v21 = vpop.permute.xlu0 %5895 }
0x11ca   :  { %4857 = vrot.lane.b32.xlu1 %v10811_v5, %s7985_s20 }
0x11d1   :  { %v4334_v1 = vpop.xlane.xlu1 %4333 }
0x11d2   :  { %v4367_v9 = vand.u32 127, %v4334_v1  ;;  %v6162_v1 = vsel %vm6154_vm11, 1.0, %v12634_v28 }
0x11d4   :  { %vm4383_vm6 = vcmp.eq.s32.totalorder %v8149_v26, %v4367_v9  ;;  %v7804_v31 = vadd.s32 4294967232, %v4367_v9  ;;  %v4391_v9 = vsel %vm11653_vm13, 1e+30, %v11369_v47 }
0x11d5   :  { %v4399_v0 = vsel %vm4383_vm6, 1e+30, %v11693_v58  ;;  %v5866_v58 = vpop.f32.mrf.mxu2 }
0x11d6   :  { %4429 = vmin.xlane.f32.xlu0 %v4399_v0  ;;  %vm5957_vm1 = vcmp.eq.s32.totalorder %v8149_v26, %v7804_v31  ;;  %v11823_v31 = vpop.f32.mrf.mxu0 }
0x11d7   :  { %v5965_v20 = vsel %vm5957_vm1, 1.0, %v12634_v28 }
0x11d8   :  { %7820 = vmatmul.msk.f32.gmra.mxu0 %vm372_vm3, %v5965_v20  ;;  %v11829_v20 = vpop.f32.mrf.mxu3 }
0x11d9   :  { %v4336_v3 = vpop.xlane.xlu1 %4335 }
0x11da   :  { %v4368_v35 = vand.u32 127, %v4336_v3  ;;  %v11833_v3 = vpop.permute.xlu2 %4859 }
0x11dc   :  { %vm4384_vm2 = vcmp.eq.s32.totalorder %v8149_v26, %v4368_v35  ;;  %v7805_v11 = vadd.s32 4294967232, %v4368_v35 }
0x11dd   :  { %v4400_v5 = vsel %vm4384_vm2, 1e+30, %v11703_v33  ;;  %v5869_v61 = vpop.f32.mrf.mxu2 }
0x11de   :  { %4431 = vmin.xlane.f32.xlu2 %v4400_v5  ;;  %vm5958_vm7 = vcmp.eq.s32.totalorder %v8149_v26, %v7805_v11  ;;  %v11827_v0 = vpop.f32.mrf.mxu0 }
0x11df   :  { %v5966_v7 = vsel %vm5958_vm7, 1.0, %v12634_v28 }
0x11e0   :  { %7821 = vmatmul.msk.f32.gmra.mxu0 %vm372_vm3, %v5966_v7  ;;  %v11841_v5 = vpop.f32.mrf.mxu3 }
0x11e5   :  { %v5872_v16 = vpop.f32.mrf.mxu2 }
0x11e6   :  { %v11835_v35 = vpop.f32.mrf.mxu0 }
0x11ea   :  { %5897 = vrot.lane.b32.xlu0 %v5866_v58, %s7985_s20  ;;  %v12740_v58 = vld [vmem:[#allocation10_spill] sm:$0xff] }
0x11ed   :  { %v5875_v45 = vpop.f32.mrf.mxu2 }
0x11f1   :  { %v4422_v60 = vpop.xlane.xlu0 %4421  ;;  %v11800_v50 = vpop.permute.xlu1 %4851 }
0x11f2   :  { %v4459_v33 = vand.u32 127, %v4422_v60 }
0x11f4   :  { %4407 = vmin.xlane.f32.xlu1 %v4388_v30  ;;  %v7824_v44 = vadd.s32 4294967232, %v4459_v33 }
0x11f5   :  { %v5878_v17 = vpop.f32.mrf.mxu2 }
0x11f6   :  { %5901 = vrot.lane.b32.xlu2 %v5872_v16, %s7985_s20  ;;  %vm6171_vm8 = vcmp.eq.s32.totalorder %v8149_v26, %v7824_v44  ;;  %v6082_v16 = vpop.f32.mrf.mxu0 }
0x11f7   :  { %v6179_v24 = vsel %vm6171_vm8, 1.0, %v12634_v28 }
0x11f8   :  { %7840 = vmatmul.msk.f32.gmra.mxu2 %vm372_vm3, %v6179_v24 }
0x11f9   :  { %v4424_v51 = vpop.xlane.xlu0 %4423 }
0x11fa   :  { %v4460_v63 = vand.u32 127, %v4424_v51 }
0x11fc   :  { %v7825_v36 = vadd.s32 4294967232, %v4460_v63 }
0x11fe   :  { %vm6172_vm9 = vcmp.eq.s32.totalorder %v8149_v26, %v7825_v36  ;;  %v11858_v36 = vpop.f32.mrf.mxu3 }
0x11ff   :  { %v6180_v52 = vsel %vm6172_vm9, 1.0, %v12634_v28 }
0x1200   :  { %7841 = vmatmul.msk.f32.gmra.mxu2 %vm372_vm3, %v6180_v52 }
0x1208   :  { %7842 = vmatmul.msk.f32.gmra.mxu2 %vm372_vm3, %v6181_v2 }
0x120d   :  { %5903 = vrot.lane.b32.xlu1 %v5875_v45, %s7985_s20 }
0x1214   :  { %4405 = vmin.xlane.f32.xlu0 %v4387_v6 }
0x121c   :  { %v4402_v48 = vpop.xlane.xlu1 %4401 }
0x121d   :  { %v4449_v39 = vand.u32 127, %v4402_v48  ;;  %v11861_v48 = vpop.f32.mrf.mxu0 }
0x121f   :  { %vm6153_vm0 = vcmp.eq.s32.totalorder %v8149_v26, %v4449_v39  ;;  %4409 = vmin.xlane.f32.xlu2 %v4389_v55 }
0x1220   :  { %v6161_v40 = vsel %vm6153_vm0, 1.0, %v12634_v28 }
0x1221   :  { %7830 = vmatmul.msk.f32.vlgmr.msra.gmra.mxu1 %vm372_vm3, %v6161_v40 }
0x1224   :  { %v4428_v32 = vpop.xlane.xlu1 %4427 }
0x1225   :  { %v4462_v19 = vand.u32 127, %v4428_v32  ;;  %v12744_v32 = vld [vmem:[#allocation18_spill] sm:$0xff] }
0x1227   :  { %v7827_v25 = vadd.s32 4294967232, %v4462_v19  ;;  %v4661_v19 = vsel %vm372_vm3, %v12744_v32, %v12743_v13 }
0x1228   :  { %5899 = vrot.lane.b32.xlu0 %v5869_v61, %s7985_s20  ;;  %v12741_v61 = vld [vmem:[#allocation17_spill] sm:$0xff] }
0x1229   :  { %vm6174_vm14 = vcmp.eq.s32.totalorder %v8149_v26, %v7827_v25  ;;  %7831 = vmatmul.msk.f32.gmra.mxu1 %vm372_vm3, %v6162_v1  ;;  %v4660_v38 = vsel %vm372_vm3, %v12741_v61, %v12740_v58  ;;  %v12745_v1 = vld [vmem:[#allocation11_spill] sm:$0xff]  ;;  %v11879_v61 = vpop.f32.mrf.mxu0 }
0x122a   :  { %v6182_v46 = vsel %vm6174_vm14, 1.0, %v12634_v28 }
0x122b   :  { %7843 = vmatmul.msk.f32.gmra.mxu2 %vm372_vm3, %v6182_v46  ;;  %v12746_v46 = vld [vmem:[#allocation20_spill] sm:$0xff] }
0x1230   :  { %5055 = vrot.lane.b32.xlu0 %v10866_v49, %s7985_s20  ;;  %v11831_v49 = vpop.f32.mrf.mxu2 }
0x1237   :  { %4413 = vmin.xlane.f32.xlu1 %v4391_v9  ;;  %5905 = vrot.lane.b32.xlu2 %v5878_v17, %s7985_s20  ;;  %v4662_v17 = vsel %vm372_vm3, %v12746_v46, %v12745_v1  ;;  %v12747_v9 = vld [vmem:[#allocation58_spill] sm:$0xff]  ;;  %v12755_v1 = vld [vmem:[#allocation16_spill] sm:$0xff]  ;;  %v12756_v46 = vld [vmem:[#allocation23_spill] sm:$0xff] }
0x1238   :  { %5057 = vrot.lane.b32.xlu0 %v10887_v10, %s7985_s20  ;;  %v4659_v10 = vsel %vm372_vm3, %v10575_v41, %v10487_v62  ;;  %v4668_v62 = vadd.f32 %v4660_v38, %v11455_v34  ;;  %v5798_v41 = vpop.f32.mrf.mxu1 }
0x1239   :  { %v4667_v30 = vadd.f32 %v4659_v10, %v11442_v57  ;;  %v5919_v14 = vsel %vm372_vm3, %v5798_v41, %v11781_v21 }
0x123a   :  { %v6398_v63 = vmul.f32 0.999995, %v4668_v62  ;;  %v5927_v12 = vadd.f32 %v5919_v14, %v11442_v57  ;;  %v12749_v14 = vld [vmem:[#allocation15_spill] sm:$0xff] }
0x123b   :  { %v6397_v24 = vmul.f32 0.999995, %v4667_v30  ;;  %v12748_v30 = vld [vmem:[#allocation37_spill] sm:$0xff] }
0x123c   :  { %v6470_v2 = vmax.f32 %v6398_v63, 0.0  ;;  %v6445_v55 = vmul.f32 0.999995, %v5927_v12 }
0x123d   :  { %v6469_v52 = vmax.f32 %v6397_v24, 0.0 }
0x123f   :  { %5061 = vrot.lane.b32.xlu2 %v10937_v53, %s7985_s20  ;;  %v5884_v53 = vpop.f32.mrf.mxu2  ;;  %v6541_v39 = vpack.c.bf16 %v6470_v2, %v6469_v52 }
0x1240   :  { %v5801_v45 = vpop.f32.mrf.mxu1 }
0x1249   :  { %v4430_v47 = vpop.xlane.xlu0 %4429 }
0x124a   :  { %v4463_v43 = vand.u32 127, %v4430_v47  ;;  %v4390_v47 = vsel %vm11640_vm4, 1e+30, %v12747_v9 }
0x124c   :  { %v7828_v11 = vadd.s32 4294967232, %v4463_v43  ;;  %v4669_v43 = vadd.f32 %v4661_v19, %v11361_v4 }
0x124e   :  { %vm6175_vm10 = vcmp.eq.s32.totalorder %v8149_v26, %v7828_v11  ;;  %v6517_v11 = vmax.f32 %v6445_v55, 0.0  ;;  %v6399_v38 = vmul.f32 0.999995, %v4669_v43  ;;  %v12757_v43 = vld [vmem:[#allocation14_spill] sm:$0xff] }
0x124f   :  { %v6183_v7 = vsel %vm6175_vm10, 1.0, %v12634_v28 }
0x1250   :  { %5909 = vrot.lane.b32.xlu1 %v5884_v53, %s7985_s20  ;;  %7844 = vmatmul.msk.f32.gmra.mxu2 %vm372_vm3, %v6183_v7  ;;  %v11876_v53 = vpop.f32.mrf.mxu3  ;;  %v4670_v7 = vadd.f32 %v4662_v17, %v11383_v22  ;;  %v4665_v17 = vsel %vm372_vm3, %v12756_v46, %v12755_v1 }
0x1251   :  { %v4432_v60 = vpop.xlane.xlu2 %4431 }
0x1252   :  { %v4464_v33 = vand.u32 127, %v4432_v60  ;;  %v4392_v60 = vsel %vm11665_vm15, 1e+30, %v11400_v37  ;;  %v6400_v23 = vmul.f32 0.999995, %v4670_v7  ;;  %v12752_v37 = vld [vmem:[#allocation13_spill] sm:$0xff]  ;;  %v5804_v7 = vpop.f32.mrf.mxu1 }
0x1254   :  { %v7829_v44 = vadd.s32 4294967232, %v4464_v33  ;;  %v6471_v33 = vmax.f32 %v6399_v38, 0.0  ;;  %v6472_v62 = vmax.f32 %v6400_v23, 0.0  ;;  %v12759_v38 = vld [vmem:[#allocation29_spill] sm:$0xff] }
0x1256   :  { %vm6176_vm13 = vcmp.eq.s32.totalorder %v8149_v26, %v7829_v44  ;;  %v11888_v44 = vpop.f32.mrf.mxu0  ;;  %v6542_v24 = vpack.c.bf16 %v6472_v62, %v6471_v33 }
0x1257   :  { %v6184_v51 = vsel %vm6176_vm13, 1.0, %v12634_v28 }
0x1258   :  { %5069 = vrot.lane.b32.xlu1 %v12742_v29, %s7985_s20  ;;  %7845 = vmatmul.msk.f32.gmra.mxu2 %vm372_vm3, %v6184_v51  ;;  %v11886_v41 = vpop.f32.mrf.mxu3  ;;  %v12750_v51 = vld [vmem:[#allocation22_spill] sm:$0xff]  ;;  %v12753_v29 = vld [vmem:[#allocation21_spill] sm:$0xff] }
0x1259   :  { %v4664_v63 = vsel %vm372_vm3, %v12750_v51, %v12749_v14  ;;  %v4663_v52 = vsel %vm372_vm3, %v12753_v29, %v12752_v37  ;;  %v5902_v62 = vpop.permute.xlu2 %5901  ;;  %v12760_v29 = vld [vmem:[#allocation31_spill] sm:$0xff] }
0x125a   :  { %v4672_v12 = vadd.f32 %v4664_v63, %v11521_v59  ;;  %v4671_v2 = vadd.f32 %v4663_v52, %v11514_v18  ;;  %v5807_v37 = vpop.f32.mrf.mxu1 }
0x125c   :  { %v5898_v6 = vpop.permute.xlu0 %5897 }
0x125d   :  { %v5920_v21 = vsel %vm372_vm3, %v5801_v45, %v5898_v6  ;;  %v12754_v6 = vld [vmem:[#allocation27_spill] sm:$0xff] }
0x125e   :  { %v5928_v40 = vadd.f32 %v5920_v21, %v11455_v34  ;;  %v6402_v21 = vmul.f32 0.999995, %v4672_v12  ;;  %v6094_v55 = vpop.f32.mrf.mxu0  ;;  %v12762_v12 = vld [vmem:[#allocation30_spill] sm:$0xff] }
0x1260   :  { %v6446_v25 = vmul.f32 0.999995, %v5928_v40  ;;  %6111 = vrot.lane.b32.xlu1 %v6082_v16, %s7985_s20  ;;  %6594 = vmatmul.bf16.vlgmr.msrb.gmra.mxu2 %v6541_v39  ;;  %v6291_v16 = vpop.f32.mrf.mxu2  ;;  %v11904_v39 = vpop.f32.mrf.mxu3  ;;  %v6401_v40 = vmul.f32 0.999995, %v4671_v2  ;;  %v6474_v13 = vmax.f32 %v6402_v21, 0.0  ;;  %v12764_v21 = vld [vmem:[#allocation19_spill] sm:$0xff] }
0x1262   :  { %v6518_v10 = vmax.f32 %v6446_v25, 0.0  ;;  %4411 = vmin.xlane.f32.xlu0 %v4390_v47  ;;  %v6473_v32 = vmax.f32 %v6401_v40, 0.0  ;;  %v11919_v47 = vpop.permute.xlu1 %4857 }
0x1264   :  { %v6565_v58 = vpack.c.bf16 %v6518_v10, %v6517_v11  ;;  %v6543_v25 = vpack.c.bf16 %v6474_v13, %v6473_v32  ;;  %v12758_v11 = vld [vmem:[#allocation24_spill] sm:$0xff] }
0x1265   :  { %v4666_v10 = vsel %vm372_vm3, %v12758_v11, %v12757_v43  ;;  %v5922_v43 = vsel %vm372_vm3, %v5807_v37, %v5902_v62 }
0x1266   :  { %6714 = vmatmul.bf16.gmra.mxu3 %v6565_v58  ;;  %v4674_v58 = vadd.f32 %v4666_v10, %v11280_v8  ;;  %v5810_v10 = vpop.f32.mrf.mxu1 }
0x1268   :  { %5267 = vrot.lane.b32.xlu1 %v12748_v30, %s7985_s20  ;;  %4415 = vmin.xlane.f32.xlu2 %v4392_v60  ;;  %v11900_v45 = vpop.f32.mrf.mxu2  ;;  %v11917_v9 = vpop.f32.mrf.mxu3  ;;  %v6404_v33 = vmul.f32 0.999995, %v4674_v58  ;;  %v12766_v58 = vld [vmem:[#allocation43_spill] sm:$0xff] }
0x1270   :  { %5269 = vrot.lane.b32.xlu1 %v12751_v42, %s7985_s20  ;;  %6599 = vmatmul.bf16.gmra.mxu2 %v6542_v24  ;;  %v11932_v14 = vpop.f32.mrf.mxu3  ;;  %v6476_v42 = vmax.f32 %v6404_v33, 0.0 }
0x1276   :  { %5059 = vrot.lane.b32.xlu0 %v12754_v6, %s7985_s20  ;;  %v12763_v6 = vld [vmem:[#allocation40_spill] sm:$0xff] }
0x1278   :  { %6119 = vrot.lane.b32.xlu1 %v6094_v55, %s7985_s20  ;;  %v12765_v55 = vld [vmem:[#allocation28_spill] sm:$0xff] }
0x1279   :  { %v4869_v40 = vsel %vm372_vm3, %v12765_v55, %v12764_v21 }
0x127a   :  { %v4877_v46 = vadd.f32 %v4869_v40, %v11442_v57 }
0x127b   :  { %v11907_v19 = vpop.f32.mrf.mxu2 }
0x127e   :  { %5907 = vrot.lane.b32.xlu0 %v11831_v49, %s7985_s20  ;;  %v4673_v49 = vadd.f32 %v4665_v17, %v11273_v27  ;;  %v11951_v17 = vpop.f32.mrf.mxu3 }
0x1280   :  { %6323 = vrot.lane.b32.xlu1 %v6291_v16, %s7985_s20  ;;  %6107 = vrot.lane.b32.xlu2 %v11827_v0, %s7985_s20  ;;  %v6403_v60 = vmul.f32 0.999995, %v4673_v49  ;;  %v4408_v16 = vpop.xlane.xlu1 %4407  ;;  %v5930_v49 = vadd.f32 %v5922_v43, %v11383_v22 }
0x1281   :  { %6604 = vmatmul.bf16.gmra.mxu2 %v6543_v25  ;;  %v4452_v63 = vand.u32 127, %v4408_v16 }
0x1282   :  { %v6475_v24 = vmax.f32 %v6403_v60, 0.0  ;;  %v6448_v33 = vmul.f32 0.999995, %v5930_v49 }
0x1283   :  { %v6300_v23 = vpop.f32.mrf.mxu2  ;;  %vm6156_vm15 = vcmp.eq.s32.totalorder %v8149_v26, %v4452_v63 }
0x1284   :  { %v6544_v52 = vpack.c.bf16 %v6476_v42, %v6475_v24  ;;  %v6164_v25 = vsel %vm6156_vm15, 1.0, %v12634_v28  ;;  %v12767_v24 = vld [vmem:[#allocation33_spill] sm:$0xff]  ;;  %v12768_v42 = vld [vmem:[#allocation34_spill] sm:$0xff] }
0x1285   :  { %v4872_v37 = vsel %vm372_vm3, %v12768_v42, %v11800_v50 }
0x1286   :  { %5063 = vrot.lane.b32.xlu0 %v12759_v38, %s7985_s20  ;;  %v6405_v38 = vmul.f32 0.999995, %v4877_v46  ;;  %v4880_v40 = vadd.f32 %v4872_v37, %v11383_v22 }
0x1287   :  { %v4406_v0 = vpop.xlane.xlu0 %4405 }
0x1288   :  { %v4451_v30 = vand.u32 127, %v4406_v0  ;;  %6329 = vrot.lane.b32.xlu1 %v6300_v23, %s7985_s20  ;;  %6113 = vrot.lane.b32.xlu2 %v11861_v48, %s7985_s20  ;;  %v12761_v48 = vld [vmem:[#allocation25_spill] sm:$0xff]  ;;  %v5904_v21 = vpop.permute.xlu1 %5903 }
0x1289   :  { %v4870_v2 = vsel %vm372_vm3, %v12762_v12, %v12761_v48  ;;  %v12769_v48 = vld [vmem:[#allocation26_spill] sm:$0xff]  ;;  %v12770_v12 = vld [vmem:[#allocation32_spill] sm:$0xff] }
0x128a   :  { %vm6155_vm4 = vcmp.eq.s32.totalorder %v8149_v26, %v4451_v30  ;;  %v4878_v32 = vadd.f32 %v4870_v2, %v11455_v34  ;;  %v4871_v2 = vsel %vm372_vm3, %v12770_v12, %v12769_v48  ;;  %v6388_v48 = vld [vmem:[#allocation2 + $0x2f0] sm:$0xff] }
0x128b   :  { %v6163_v51 = vsel %vm6155_vm4, 1.0, %v12634_v28  ;;  %v4879_v50 = vadd.f32 %v4871_v2, %v11361_v4  ;;  %v6389_v2 = vld [vmem:[#allocation2 + $0x2f8] sm:$0xff] }
0x128c   :  { %7832 = vmatmul.msk.f32.gmra.mxu1 %vm372_vm3, %v6163_v51  ;;  %v6406_v11 = vmul.f32 0.999995, %v4878_v32  ;;  %v11966_v51 = vpop.f32.mrf.mxu3  ;;  %v5923_v32 = vsel %vm372_vm3, %v5810_v10, %v5904_v21  ;;  %v12771_v10 = vld [vmem:[#allocation36_spill] sm:$0xff] }
0x128d   :  { %v5931_v46 = vadd.f32 %v5923_v32, %v11514_v18  ;;  %v6407_v43 = vmul.f32 0.999995, %v4879_v50  ;;  %v6386_v32 = vld [vmem:[#allocation2 + $0x2e0] sm:$0xff] }
0x128e   :  { %5065 = vrot.lane.b32.xlu0 %v12760_v29, %s7985_s20  ;;  %v6478_v23 = vmax.f32 %v6406_v11, 0.0 }
0x1290   :  { %5271 = vrot.lane.b32.xlu2 %v12763_v6, %s7985_s20  ;;  %v5813_v6 = vpop.f32.mrf.mxu1 }
0x1291   :  { %6609 = vmatmul.bf16.gmra.mxu2 %v6544_v52 }
0x1292   :  { %v4410_v13 = vpop.xlane.xlu2 %4409 }
0x1293   :  { %v4453_v1 = vand.u32 127, %v4410_v13 }
0x1294   :  { %7833 = vmatmul.msk.f32.gmra.mxu1 %vm372_vm3, %v6164_v25  ;;  %v11985_v11 = vpop.f32.mrf.mxu3 }
0x1295   :  { %vm6157_vm6 = vcmp.eq.s32.totalorder %v8149_v26, %v4453_v1  ;;  %v6303_v1 = vpop.f32.mrf.mxu2 }
0x1296   :  { %6105 = vrot.lane.b32.xlu0 %v11823_v31, %s7985_s20  ;;  %v6165_v30 = vsel %vm6157_vm6, 1.0, %v12634_v28  ;;  %v6477_v31 = vmax.f32 %v6405_v38, 0.0  ;;  %v6449_v38 = vmul.f32 0.999995, %v5931_v46  ;;  %v6385_v46 = vld [vmem:[#allocation2 + $0x2d8] sm:$0xff] }
0x1298   :  { %5273 = vrot.lane.b32.xlu2 %v12766_v58, %s7985_s20  ;;  %v6545_v63 = vpack.c.bf16 %v6478_v23, %v6477_v31  ;;  %v6395_v31 = vld [vmem:[#allocation2 + $0x328] sm:$0xff] }
0x129a   :  { %v5900_v60 = vpop.permute.xlu0 %5899  ;;  %v5906_v52 = vpop.permute.xlu2 %5905 }
0x129b   :  { %v5921_v0 = vsel %vm372_vm3, %v5804_v7, %v5900_v60  ;;  %v6520_v7 = vmax.f32 %v6448_v33, 0.0  ;;  %v5924_v13 = vsel %vm372_vm3, %v5813_v6, %v5906_v52  ;;  %v6479_v60 = vmax.f32 %v6407_v43, 0.0  ;;  %v6391_v52 = vld [vmem:[#allocation2 + $0x308] sm:$0xff] }
0x129c   :  { %v5929_v16 = vadd.f32 %v5921_v0, %v11361_v4  ;;  %7834 = vmatmul.msk.f32.gmra.mxu1 %vm372_vm3, %v6165_v30  ;;  %v5932_v25 = vadd.f32 %v5924_v13, %v11521_v59  ;;  %v6521_v30 = vmax.f32 %v6449_v38, 0.0  ;;  %v11989_v33 = vpop.f32.mrf.mxu3  ;;  %v12773_v6 = vld [vmem:[#allocation41_spill] sm:$0xff] }
0x129d   :  { %v4876_v21 = vsel %vm372_vm3, %v12773_v6, %v11833_v3 }
0x129e   :  { %v6447_v62 = vmul.f32 0.999995, %v5929_v16  ;;  %5067 = vrot.lane.b32.xlu0 %v12767_v24, %s7985_s20  ;;  %v6450_v49 = vmul.f32 0.999995, %v5932_v25  ;;  %v6394_v16 = vld [vmem:[#allocation2 + $0x320] sm:$0xff]  ;;  %v4884_v13 = vadd.f32 %v4876_v21, %v11280_v8  ;;  %v6387_v25 = vld [vmem:[#allocation2 + $0x2e8] sm:$0xff] }
0x129f   :  { %v6962_v24 = vpack.c.bf16 %v6395_v31, %v6394_v16  ;;  %v6958_v3 = vpack.c.bf16 %v6387_v25, %v6386_v32  ;;  %v6382_v31 = vld [vmem:[#allocation2 + $0x2c0] sm:$0xff] }
0x12a0   :  { %v6519_v29 = vmax.f32 %v6447_v62, 0.0  ;;  %6325 = vrot.lane.b32.xlu2 %v11900_v45, %s7985_s20  ;;  %v6408_v45 = vmul.f32 0.999995, %v4880_v40  ;;  %v6522_v23 = vmax.f32 %v6450_v49, 0.0  ;;  %v6392_v62 = vld [vmem:[#allocation2 + $0x310] sm:$0xff]  ;;  %v6959_v40 = vpack.c.bf16 %v6389_v2, %v6388_v48 }
0x12a1   :  { %6614 = vmatmul.bf16.gmra.mxu2 %v6545_v63  ;;  %v6393_v63 = vld [vmem:[#allocation2 + $0x318] sm:$0xff]  ;;  %7854 = vmatpush.bf16.msrb.mxu1 %v6962_v24 }
0x12a2   :  { %v6566_v55 = vpack.c.bf16 %v6520_v7, %v6519_v29  ;;  %v6480_v58 = vmax.f32 %v6408_v45, 0.0  ;;  %6964 = vmatpush.bf16.msrb.mxu0 %v6962_v24  ;;  %v6961_v42 = vpack.c.bf16 %v6393_v63, %v6392_v62  ;;  %v12772_v7 = vld [vmem:[#allocation39_spill] sm:$0xff]  ;;  %v6412_v45 = vmul.f32 0.999995, %v4884_v13  ;;  %v6383_v62 = vld [vmem:[#allocation2 + $0x2c8] sm:$0xff] }
0x12a3   :  { %v4875_v29 = vsel %vm372_vm3, %v12772_v7, %v11919_v47  ;;  %v12774_v47 = vld [vmem:[#allocation44_spill] sm:$0xff]  ;;  %v6380_v7 = vld [vmem:[#allocation2 + $0x2b0] sm:$0xff] }
0x12a4   :  { %6719 = vmatmul.bf16.gmra.mxu3 %v6566_v55  ;;  %v6546_v0 = vpack.c.bf16 %v6480_v58, %v6479_v60  ;;  %v11993_v37 = vpop.f32.mrf.mxu3  ;;  %v4883_v55 = vadd.f32 %v4875_v29, %v11273_v27  ;;  %v6484_v38 = vmax.f32 %v6412_v45, 0.0  ;;  %v5816_v45 = vpop.f32.mrf.mxu1 }
0x12a5   :  { %7855 = vmatpush.bf16.msrb.mxu1 %v6961_v42 }
0x12a6   :  { %6109 = vrot.lane.b32.xlu0 %v11835_v35, %s7985_s20  ;;  %v6567_v35 = vpack.c.bf16 %v6522_v23, %v6521_v30  ;;  %6965 = vmatpush.bf16.msrb.mxu0 %v6961_v42  ;;  %v6956_v42 = vpack.c.bf16 %v6383_v62, %v6382_v31 }
0x12a8   :  { %6331 = vrot.lane.b32.xlu2 %v6303_v1, %s7985_s20  ;;  %v6384_v1 = vld [vmem:[#allocation2 + $0x2d0] sm:$0xff] }
0x12a9   :  { %v6957_v58 = vpack.c.bf16 %v6385_v46, %v6384_v1  ;;  %v12028_v1 = vld [vmem:[#allocation2 + $0x2a8] ss:$0 sm:$0xff] }
0x12aa   :  { %v4414_v2 = vpop.xlane.xlu1 %4413 }
0x12ac   :  { %v12008_v50 = vpop.f32.mrf.mxu3 }
0x12ae   :  { %5265 = vrot.lane.b32.xlu0 %v12771_v10, %s7985_s20  ;;  %v6306_v49 = vpop.f32.mrf.mxu2  ;;  %v12775_v10 = vld [vmem:[#allocation45_spill] sm:$0xff] }
0x12b1   :  { %6619 = vmatmul.bf16.gmra.mxu2 %v6546_v0 }
0x12b4   :  { %6724 = vmatmul.bf16.gmra.mxu3 %v6567_v35  ;;  %v12014_v30 = vpop.f32.mrf.mxu3  ;;  %v12776_v35 = vld [vmem:[#allocation42_spill] sm:$0xff] }
0x12b6   :  { %6115 = vrot.lane.b32.xlu0 %v11879_v61, %s7985_s20  ;;  %v6390_v61 = vld [vmem:[#allocation2 + $0x300] sm:$0xff] }
0x12b7   :  { %v6960_v12 = vpack.c.bf16 %v6391_v52, %v6390_v61 }
0x12b9   :  { %7856 = vmatpush.bf16.msrb.mxu1 %v6960_v12  ;;  %6966 = vmatpush.bf16.msrb.mxu0 %v6960_v12  ;;  %v5062_v12 = vpop.permute.xlu2 %5061 }
0x12bd   :  { %7857 = vmatpush.bf16.msrb.mxu1 %v6959_v40  ;;  %6967 = vmatpush.bf16.msrb.mxu0 %v6959_v40  ;;  %v6692_v40 = vpop.f32.mrf.mxu3 }
0x12be   :  { %6117 = vrot.lane.b32.xlu0 %v11888_v44, %s7985_s20  ;;  %v5056_v44 = vpop.permute.xlu0 %5055 }
0x12bf   :  { %v5079_v16 = vsel %vm372_vm3, %v12776_v35, %v5056_v44  ;;  %v4455_v44 = vand.u32 127, %v4414_v2 }
0x12c0   :  { %v5087_v29 = vadd.f32 %v5079_v16, %v11442_v57 }
0x12c1   :  { %6624 = vmatmul.bf16.gmra.mxu2 %v11733_v15  ;;  %v6411_v15 = vmul.f32 0.999995, %v4883_v55  ;;  %7858 = vmatpush.bf16.msrb.mxu1 %v6958_v3  ;;  %vm6159_vm2 = vcmp.eq.s32.totalorder %v8149_v26, %v4455_v44 }
0x12c2   :  { %6968 = vmatpush.bf16.msrb.mxu0 %v6958_v3  ;;  %v6413_v21 = vmul.f32 0.999995, %v5087_v29  ;;  %v6167_v3 = vsel %vm6159_vm2, 1.0, %v12634_v28  ;;  %v5910_v35 = vpop.permute.xlu1 %5909 }
0x12c3   :  { %v6483_v43 = vmax.f32 %v6411_v15, 0.0 }
0x12c4   :  { %v6485_v15 = vmax.f32 %v6413_v21, 0.0 }
0x12c5   :  { %v6548_v23 = vpack.c.bf16 %v6484_v38, %v6483_v43  ;;  %7859 = vmatpush.bf16.msrb.mxu1 %v6957_v58  ;;  %v12777_v43 = vld [vmem:[#allocation47_spill] sm:$0xff]  ;;  %v6688_v38 = vadd.f32 %v12028_v1, %v12008_v50 }
0x12c6   :  { %5275 = vrot.lane.b32.xlu0 %v12774_v47, %s7985_s20  ;;  %v5058_v60 = vpop.permute.xlu0 %5057  ;;  %6969 = vmatpush.bf16.msrb.mxu0 %v6957_v58 }
0x12c7   :  { %v5080_v0 = vsel %vm372_vm3, %v12775_v10, %v5058_v60  ;;  %v6686_v60 = vadd.f32 %v12028_v1, %v11993_v37 }
0x12c8   :  { %v5088_v24 = vadd.f32 %v5080_v0, %v11455_v34  ;;  %v6812_v0 = vmul.f32 0.999995, %v6688_v38 }
0x12c9   :  { %7860 = vmatpush.bf16.msrb.mxu1 %v6956_v42  ;;  %v6811_v62 = vmul.f32 0.999995, %v6686_v60  ;;  %v6691_v60 = vadd.f32 %v12028_v1, %v12014_v30 }
0x12ca   :  { %6970 = vmatpush.bf16.msrb.mxu0 %v6956_v42  ;;  %v6414_v6 = vmul.f32 0.999995, %v5088_v24  ;;  %v12778_v24 = vld [vmem:[#allocation46_spill] sm:$0xff]  ;;  %v5819_v42 = vpop.f32.mrf.mxu1  ;;  %v6884_v29 = vmax.f32 %v6812_v0, 0.0 }
0x12cc   :  { %v6486_v13 = vmax.f32 %v6414_v6, 0.0 }
0x12ce   :  { %6327 = vrot.lane.b32.xlu0 %v11907_v19, %s7985_s20  ;;  %v6381_v19 = vld [vmem:[#allocation2 + $0x2b8] sm:$0xff]  ;;  %v6549_v25 = vpack.c.bf16 %v6486_v13, %v6485_v15 }
0x12cf   :  { %v6955_v52 = vpack.c.bf16 %v6381_v19, %v6380_v7  ;;  %v5926_v19 = vsel %vm372_vm3, %v5819_v42, %v5910_v35 }
0x12d0   :  { %v5934_v6 = vadd.f32 %v5926_v19, %v11280_v8 }
0x12d1   :  { %6629 = vmatmul.bf16.gmra.mxu2 %v6548_v23  ;;  %7861 = vmatpush.bf16.msrb.mxu1 %v6955_v52  ;;  %v12037_v23 = vpop.f32.mrf.mxu3 }
0x12d2   :  { %6971 = vmatpush.bf16.msrb.mxu0 %v6955_v52 }
0x12d3   :  { %v6309_v63 = vpop.f32.mrf.mxu2 }
0x12d4   :  { %6335 = vrot.lane.b32.xlu1 %v6309_v63, %s7985_s20 }
0x12d5   :  { %v4412_v61 = vpop.xlane.xlu0 %4411 }
0x12d6   :  { %v4454_v48 = vand.u32 127, %v4412_v61  ;;  %6333 = vrot.lane.b32.xlu0 %v6306_v49, %s7985_s20  ;;  %v5082_v49 = vsel %vm372_vm3, %v12777_v43, %v5062_v12  ;;  %v6883_v12 = vmax.f32 %v6811_v62, 0.0 }
0x12d7   :  { %v5090_v10 = vadd.f32 %v5082_v49, %v11383_v22 }
0x12d8   :  { %vm6158_vm1 = vcmp.eq.s32.totalorder %v8149_v26, %v4454_v48  ;;  %v6937_v44 = vpack.c.bf16 %v6884_v29, %v6883_v12 }
0x12d9   :  { %v6166_v55 = vsel %vm6158_vm1, 1.0, %v12634_v28  ;;  %v6416_v7 = vmul.f32 0.999995, %v5090_v10 }
0x12da   :  { %7835 = vmatmul.msk.f32.gmra.mxu1 %vm372_vm3, %v6166_v55  ;;  %v6697_v55 = vpop.f32.mrf.mxu3 }
0x12db   :  { %v6312_v47 = vpop.f32.mrf.mxu2  ;;  %v4416_v32 = vpop.xlane.xlu2 %4415  ;;  %v6488_v2 = vmax.f32 %v6416_v7, 0.0 }
0x12dc   :  { %6337 = vrot.lane.b32.xlu2 %v6312_v47, %s7985_s20  ;;  %v4456_v46 = vand.u32 127, %v4416_v32 }
0x12de   :  { %vm6160_vm7 = vcmp.eq.s32.totalorder %v8149_v26, %v4456_v46 }
0x12df   :  { %v6168_v50 = vsel %vm6160_vm7, 1.0, %v12634_v28 }
0x12e1   :  { %6634 = vmatmul.bf16.gmra.mxu2 %v6549_v25 }
0x12e2   :  { %7836 = vmatmul.msk.f32.gmra.mxu1 %vm372_vm3, %v6167_v3  ;;  %v6452_v3 = vmul.f32 0.999995, %v5934_v6  ;;  %v12056_v62 = vpop.f32.mrf.mxu3 }
0x12e3   :  { %v6595_v58 = vpop.f32.mrf.mxu2  ;;  %v6108_v29 = vpop.permute.xlu2 %6107 }
0x12e4   :  { %v6596_v16 = vadd.f32 %v12028_v1, %v6595_v58  ;;  %v6693_v58 = vadd.f32 %v12028_v1, %v6692_v40  ;;  %v6524_v10 = vmax.f32 %v6452_v3, 0.0 }
0x12e6   :  { %v6775_v61 = vmul.f32 0.999995, %v6596_v16  ;;  %v6814_v35 = vmul.f32 0.999995, %v6693_v58 }
0x12e8   :  { %v5060_v31 = vpop.permute.xlu0 %5059  ;;  %v6847_v13 = vmax.f32 %v6775_v61, 0.0  ;;  %v6886_v42 = vmax.f32 %v6814_v35, 0.0 }
0x12e9   :  { %v5081_v63 = vsel %vm372_vm3, %v12778_v24, %v5060_v31  ;;  %v6813_v24 = vmul.f32 0.999995, %v6691_v60 }
0x12ea   :  { %v5089_v37 = vadd.f32 %v5081_v63, %v11361_v4  ;;  %7837 = vmatmul.msk.f32.gmra.mxu1 %vm372_vm3, %v6168_v50  ;;  %v12779_v63 = vld [vmem:[#allocation48_spill] sm:$0xff] }
0x12eb   :  { %v6597_v26 = vpop.f32.mrf.mxu2  ;;  %v6885_v30 = vmax.f32 %v6813_v24, 0.0 }
0x12ec   :  { %v6415_v52 = vmul.f32 0.999995, %v5089_v37  ;;  %v6598_v48 = vadd.f32 %v12028_v1, %v6597_v26 }
0x12ed   :  { %v6938_v12 = vpack.c.bf16 %v6886_v42, %v6885_v30 }
0x12ee   :  { %v6487_v21 = vmax.f32 %v6415_v52, 0.0  ;;  %v6776_v28 = vmul.f32 0.999995, %v6598_v48 }
0x12f0   :  { %v6848_v47 = vmax.f32 %v6776_v28, 0.0  ;;  %v5908_v15 = vpop.permute.xlu0 %5907  ;;  %v6550_v32 = vpack.c.bf16 %v6488_v2, %v6487_v21  ;;  %v12780_v2 = vld [vmem:[#allocation49_spill] sm:$0xff] }
0x12f1   :  { %v5925_v25 = vsel %vm372_vm3, %v5816_v45, %v5908_v15  ;;  %v6698_v15 = vadd.f32 %v12028_v1, %v6697_v55 }
0x12f2   :  { %v6919_v46 = vpack.c.bf16 %v6848_v47, %v6847_v13  ;;  %v5933_v43 = vadd.f32 %v5925_v25, %v11273_v27  ;;  %6639 = vmatmul.bf16.gmra.mxu2 %v6550_v32  ;;  %7062 = vmatmul.bf16.vlgmr.msrb.gmra.mxu1 %v6937_v44  ;;  %v6702_v13 = vpop.f32.mrf.mxu3  ;;  %v6130_v47 = vsel %vm372_vm3, %v11766_v56, %v6108_v29  ;;  %v5070_v32 = vpop.permute.xlu1 %5069 }
0x12f3   :  { %v6600_v49 = vpop.f32.mrf.mxu2 }
0x12f4   :  { %v6451_v38 = vmul.f32 0.999995, %v5933_v43  ;;  %6972 = vmatmul.bf16.vlgmr.msrb.gmra.mxu0 %v6919_v46  ;;  %v6601_v16 = vadd.f32 %v12028_v1, %v6600_v49  ;;  %v6696_v46 = vadd.f32 %v12028_v1, %v12037_v23  ;;  %v6138_v43 = vadd.f32 %v6130_v47, %v11455_v34  ;;  %v12781_v23 = vld [vmem:[#allocation51_spill] sm:$0xff] }
0x12f6   :  { %v6523_v0 = vmax.f32 %v6451_v38, 0.0  ;;  %v6777_v7 = vmul.f32 0.999995, %v6601_v16  ;;  %v6816_v38 = vmul.f32 0.999995, %v6698_v15  ;;  %v6703_v15 = vadd.f32 %v12028_v1, %v6702_v13 }
0x12f7   :  { %v6815_v55 = vmul.f32 0.999995, %v6696_v46  ;;  %v6454_v35 = vmul.f32 0.999995, %v6138_v43  ;;  %v6701_v46 = vadd.f32 %v12028_v1, %v12056_v62 }
0x12f8   :  { %v5064_v45 = vpop.permute.xlu0 %5063  ;;  %v6568_v31 = vpack.c.bf16 %v6524_v10, %v6523_v0  ;;  %v6849_v61 = vmax.f32 %v6777_v7, 0.0  ;;  %v6888_v24 = vmax.f32 %v6816_v38, 0.0  ;;  %v6818_v38 = vmul.f32 0.999995, %v6703_v15 }
0x12f9   :  { %v5083_v50 = vsel %vm372_vm3, %v12779_v63, %v5064_v45  ;;  %v6887_v7 = vmax.f32 %v6815_v55, 0.0  ;;  %v6526_v30 = vmax.f32 %v6454_v35, 0.0 }
0x12fa   :  { %6729 = vmatmul.bf16.gmra.mxu3 %v6568_v31  ;;  %v5091_v19 = vadd.f32 %v5083_v50, %v11514_v18  ;;  %v12075_v45 = vpop.f32.mrf.mxu3  ;;  %v5086_v31 = vsel %vm372_vm3, %v12781_v23, %v5070_v32  ;;  %v6890_v23 = vmax.f32 %v6818_v38, 0.0 }
0x12fb   :  { %v6602_v40 = vpop.f32.mrf.mxu2 }
0x12fc   :  { %v6603_v37 = vadd.f32 %v12028_v1, %v6602_v40  ;;  %v6417_v21 = vmul.f32 0.999995, %v5091_v19 }
0x12fe   :  { %v6778_v26 = vmul.f32 0.999995, %v6603_v37  ;;  %v6489_v49 = vmax.f32 %v6417_v21, 0.0  ;;  %v5094_v37 = vadd.f32 %v5086_v31, %v11280_v8  ;;  %v6114_v31 = vpop.permute.xlu2 %6113 }
0x1300   :  { %v6850_v52 = vmax.f32 %v6778_v26, 0.0  ;;  %v5066_v48 = vpop.permute.xlu0 %5065  ;;  %v6420_v21 = vmul.f32 0.999995, %v5094_v37 }
0x1301   :  { %v5084_v6 = vsel %vm372_vm3, %v12780_v2, %v5066_v48  ;;  %v12782_v2 = vld [vmem:[#allocation50_spill] sm:$0xff] }
0x1302   :  { %v5092_v28 = vadd.f32 %v5084_v6, %v11521_v59  ;;  %7067 = vmatmul.bf16.gmra.mxu1 %v6938_v12  ;;  %v6920_v44 = vpack.c.bf16 %v6850_v52, %v6849_v61  ;;  %v6939_v52 = vpack.c.bf16 %v6888_v24, %v6887_v7  ;;  %v6492_v43 = vmax.f32 %v6420_v21, 0.0 }
0x1303   :  { %v6133_v21 = vsel %vm372_vm3, %v11858_v36, %v6114_v31  ;;  %v12109_v36 = vpop.f32.mrf.mxu1 }
0x1304   :  { %v6418_v25 = vmul.f32 0.999995, %v5092_v28  ;;  %v6605_v3 = vpop.f32.mrf.mxu2  ;;  %6977 = vmatmul.bf16.gmra.mxu0 %v6920_v44 }
0x1305   :  { %v6606_v0 = vadd.f32 %v12028_v1, %v6605_v3  ;;  %v6707_v3 = vpop.f32.mrf.mxu3 }
0x1306   :  { %v6490_v58 = vmax.f32 %v6418_v25, 0.0 }
0x1307   :  { %v6779_v40 = vmul.f32 0.999995, %v6606_v0 }
0x1308   :  { %v6106_v60 = vpop.permute.xlu0 %6105  ;;  %v6551_v10 = vpack.c.bf16 %v6490_v58, %v6489_v49 }
0x1309   :  { %v6129_v56 = vsel %vm372_vm3, %v11761_v54, %v6106_v60  ;;  %v6112_v54 = vpop.permute.xlu1 %6111  ;;  %v6851_v48 = vmax.f32 %v6779_v40, 0.0 }
0x130a   :  { %v6137_v16 = vadd.f32 %v6129_v56, %v11442_v57  ;;  %6644 = vmatmul.bf16.gmra.mxu2 %v6551_v10  ;;  %v6132_v44 = vsel %vm372_vm3, %v11841_v5, %v6112_v54  ;;  %v6817_v56 = vmul.f32 0.999995, %v6701_v46 }
0x130b   :  { %v6140_v49 = vadd.f32 %v6132_v44, %v11383_v22  ;;  %v6708_v44 = vadd.f32 %v12028_v1, %v6707_v3 }
0x130c   :  { %v6453_v63 = vmul.f32 0.999995, %v6137_v16  ;;  %v6607_v50 = vpop.f32.mrf.mxu2  ;;  %v12783_v16 = vld [vmem:[#allocation53_spill] sm:$0xff] }
0x130d   :  { %v6608_v42 = vadd.f32 %v12028_v1, %v6607_v50  ;;  %v6456_v55 = vmul.f32 0.999995, %v6140_v49  ;;  %v12098_v54 = vpop.f32.mrf.mxu3  ;;  %v5272_v49 = vpop.permute.xlu2 %5271  ;;  %v6820_v38 = vmul.f32 0.999995, %v6708_v44 }
0x130e   :  { %v6525_v19 = vmax.f32 %v6453_v63, 0.0 }
0x130f   :  { %v6780_v26 = vmul.f32 0.999995, %v6608_v42  ;;  %v6889_v42 = vmax.f32 %v6817_v56, 0.0  ;;  %v6528_v7 = vmax.f32 %v6456_v55, 0.0 }
0x1310   :  { %v5068_v29 = vpop.permute.xlu0 %5067  ;;  %v6569_v61 = vpack.c.bf16 %v6526_v30, %v6525_v19 }
0x1311   :  { %v6852_v12 = vmax.f32 %v6780_v26, 0.0  ;;  %v5085_v6 = vsel %vm372_vm3, %v12782_v2, %v5068_v29  ;;  %v5268_v60 = vpop.permute.xlu1 %5267  ;;  %v6940_v29 = vpack.c.bf16 %v6890_v23, %v6889_v42  ;;  %v6892_v23 = vmax.f32 %v6820_v38, 0.0 }
0x1312   :  { %v5093_v28 = vadd.f32 %v5085_v6, %v11273_v27  ;;  %6734 = vmatmul.bf16.gmra.mxu3 %v6569_v61  ;;  %7072 = vmatmul.bf16.gmra.mxu1 %v6939_v52  ;;  %v5290_v62 = vsel %vm372_vm3, %v12783_v16, %v5268_v60  ;;  %v12786_v16 = vld [vmem:[#allocation54_spill] sm:$0xff] }
0x1313   :  { %v6921_v47 = vpack.c.bf16 %v6852_v12, %v6851_v48  ;;  %v5298_v37 = vadd.f32 %v5290_v62, %v11455_v34  ;;  %v12784_v48 = vld [vmem:[#allocation52_spill] sm:$0xff] }
0x1314   :  { %v6419_v32 = vmul.f32 0.999995, %v5093_v28  ;;  %v6610_v25 = vpop.f32.mrf.mxu2 }
0x1315   :  { %6982 = vmatmul.bf16.gmra.mxu0 %v6921_v47  ;;  %v6611_v5 = vadd.f32 %v12028_v1, %v6610_v25  ;;  %v6422_v2 = vmul.f32 0.999995, %v5298_v37 }
0x1316   :  { %v6491_v58 = vmax.f32 %v6419_v32, 0.0  ;;  %v6706_v32 = vadd.f32 %v12028_v1, %v12075_v45 }
0x1317   :  { %v6781_v50 = vmul.f32 0.999995, %v6611_v5  ;;  %v6494_v25 = vmax.f32 %v6422_v2, 0.0  ;;  %v12785_v5 = vld [vmem:[#allocation55_spill] sm:$0xff] }
0x1318   :  { %v6110_v10 = vpop.permute.xlu0 %6109  ;;  %v6552_v0 = vpack.c.bf16 %v6492_v43, %v6491_v58  ;;  %v6141_v43 = vadd.f32 %v6133_v21, %v11514_v18  ;;  %v5292_v3 = vsel %vm372_vm3, %v12785_v5, %v5272_v49  ;;  %v6819_v56 = vmul.f32 0.999995, %v6706_v32  ;;  %v6229_v21 = vpop.f32.mrf.mxu1  ;;  %v12787_v5 = vld [vmem:[#allocation57_spill] sm:$0xff] }
0x1319   :  { %v6131_v13 = vsel %vm372_vm3, %v11829_v20, %v6110_v10  ;;  %v6853_v61 = vmax.f32 %v6781_v50, 0.0  ;;  %v5270_v46 = vpop.permute.xlu1 %5269  ;;  %v5300_v31 = vadd.f32 %v5292_v3, %v11383_v22  ;;  %v5274_v32 = vpop.permute.xlu2 %5273 }
0x131a   :  { %v6139_v35 = vadd.f32 %v6131_v13, %v11361_v4  ;;  %6649 = vmatmul.bf16.gmra.mxu2 %v6552_v0  ;;  %v6712_v0 = vpop.f32.mrf.mxu3  ;;  %v6457_v55 = vmul.f32 0.999995, %v6141_v43  ;;  %v5291_v62 = vsel %vm372_vm3, %v12786_v16, %v5270_v46  ;;  %v6891_v42 = vmax.f32 %v6819_v56, 0.0  ;;  %v12788_v56 = vld [vmem:[#allocation56_spill] sm:$0xff] }
0x131b   :  { %v6711_v43 = vadd.f32 %v12028_v1, %v12098_v54 }
0x131c   :  { %v6455_v24 = vmul.f32 0.999995, %v6139_v35  ;;  %v6612_v63 = vpop.f32.mrf.mxu2 }
0x131d   :  { %v6613_v40 = vadd.f32 %v12028_v1, %v6612_v63  ;;  %v6821_v3 = vmul.f32 0.999995, %v6711_v43 }
0x131e   :  { %v6527_v20 = vmax.f32 %v6455_v24, 0.0 }
0x131f   :  { %v6782_v30 = vmul.f32 0.999995, %v6613_v40 }
0x1320   :  { %v5266_v19 = vpop.permute.xlu0 %5265  ;;  %v6570_v26 = vpack.c.bf16 %v6528_v7, %v6527_v20  ;;  %v5299_v7 = vadd.f32 %v5291_v62, %v11361_v4  ;;  %v6232_v54 = vpop.f32.mrf.mxu1 }
0x1321   :  { %v6854_v52 = vmax.f32 %v6782_v30, 0.0  ;;  %v5289_v12 = vsel %vm372_vm3, %v12784_v48, %v5266_v19  ;;  %v6120_v30 = vpop.permute.xlu1 %6119  ;;  %v6424_v19 = vmul.f32 0.999995, %v5300_v31 }
0x1322   :  { %v5297_v6 = vadd.f32 %v5289_v12, %v11442_v57  ;;  %6739 = vmatmul.bf16.gmra.mxu3 %v6570_v26  ;;  %7077 = vmatmul.bf16.gmra.mxu1 %v6940_v29 }
0x1323   :  { %v6922_v28 = vpack.c.bf16 %v6854_v52, %v6853_v61  ;;  %v6941_v61 = vpack.c.bf16 %v6892_v23, %v6891_v42  ;;  %v6715_v52 = vpop.f32.mrf.mxu3  ;;  %v6326_v42 = vpop.permute.xlu2 %6325 }
0x1324   :  { %v6421_v47 = vmul.f32 0.999995, %v5297_v6  ;;  %v6615_v15 = vpop.f32.mrf.mxu2  ;;  %v6423_v6 = vmul.f32 0.999995, %v5299_v7 }
0x1325   :  { %6987 = vmatmul.bf16.gmra.mxu0 %v6922_v28  ;;  %v6616_v13 = vadd.f32 %v12028_v1, %v6615_v15  ;;  %v6136_v28 = vsel %vm372_vm3, %v11904_v39, %v6120_v30  ;;  %v6496_v15 = vmax.f32 %v6424_v19, 0.0  ;;  %v6348_v19 = vsel %vm372_vm3, %v6229_v21, %v6326_v42 }
0x1326   :  { %v6493_v58 = vmax.f32 %v6421_v47, 0.0  ;;  %v6713_v47 = vadd.f32 %v12028_v1, %v6712_v0  ;;  %v6144_v49 = vadd.f32 %v6136_v28, %v11280_v8  ;;  %v6356_v28 = vadd.f32 %v6348_v19, %v11455_v34 }
0x1327   :  { %v6783_v50 = vmul.f32 0.999995, %v6616_v13  ;;  %v6716_v21 = vadd.f32 %v12028_v1, %v6715_v52 }
0x1328   :  { %v6116_v60 = vpop.permute.xlu0 %6115  ;;  %v6553_v10 = vpack.c.bf16 %v6494_v25, %v6493_v58  ;;  %v6822_v58 = vmul.f32 0.999995, %v6713_v47  ;;  %v6460_v13 = vmul.f32 0.999995, %v6144_v49  ;;  %v6462_v43 = vmul.f32 0.999995, %v6356_v28 }
0x1329   :  { %v6134_v45 = vsel %vm372_vm3, %v11876_v53, %v6116_v60  ;;  %v6529_v53 = vmax.f32 %v6457_v55, 0.0  ;;  %v6855_v48 = vmax.f32 %v6783_v50, 0.0  ;;  %v5293_v55 = vsel %vm372_vm3, %v12788_v56, %v5274_v32 }
0x132a   :  { %v6142_v35 = vadd.f32 %v6134_v45, %v11521_v59  ;;  %6654 = vmatmul.bf16.gmra.mxu2 %v6553_v10  ;;  %v6532_v50 = vmax.f32 %v6460_v13, 0.0  ;;  %v6823_v49 = vmul.f32 0.999995, %v6716_v21 }
0x132b   :  { %v6717_v45 = vpop.f32.mrf.mxu3 }
0x132c   :  { %v6458_v24 = vmul.f32 0.999995, %v6142_v35  ;;  %v6617_v63 = vpop.f32.mrf.mxu2  ;;  %v6894_v35 = vmax.f32 %v6822_v58, 0.0 }
0x132d   :  { %v6618_v40 = vadd.f32 %v12028_v1, %v6617_v63  ;;  %v6893_v63 = vmax.f32 %v6821_v3, 0.0 }
0x132e   :  { %v6530_v37 = vmax.f32 %v6458_v24, 0.0 }
0x132f   :  { %v6784_v20 = vmul.f32 0.999995, %v6618_v40  ;;  %v5301_v40 = vadd.f32 %v5293_v55, %v11514_v18  ;;  %v6942_v30 = vpack.c.bf16 %v6894_v35, %v6893_v63 }
0x1330   :  { %v6118_v26 = vpop.permute.xlu0 %6117  ;;  %v6571_v29 = vpack.c.bf16 %v6530_v37, %v6529_v53  ;;  %v6324_v53 = vpop.permute.xlu1 %6323 }
0x1331   :  { %v6856_v12 = vmax.f32 %v6784_v20, 0.0  ;;  %v6135_v2 = vsel %vm372_vm3, %v11886_v41, %v6118_v26  ;;  %v6495_v41 = vmax.f32 %v6423_v6, 0.0  ;;  %v6718_v6 = vadd.f32 %v12028_v1, %v6717_v45 }
0x1332   :  { %6744 = vmatmul.bf16.gmra.mxu3 %v6571_v29  ;;  %7082 = vmatmul.bf16.gmra.mxu1 %v6941_v61  ;;  %v6143_v25 = vadd.f32 %v6135_v2, %v11273_v27  ;;  %v6425_v61 = vmul.f32 0.999995, %v5301_v40 }
0x1333   :  { %v6923_v44 = vpack.c.bf16 %v6856_v12, %v6855_v48  ;;  %v6554_v10 = vpack.c.bf16 %v6496_v15, %v6495_v41  ;;  %v6347_v48 = vsel %vm372_vm3, %v12109_v36, %v6324_v53  ;;  %v6720_v12 = vpop.f32.mrf.mxu3  ;;  %v6235_v15 = vpop.f32.mrf.mxu1 }
0x1334   :  { %v6620_v46 = vpop.f32.mrf.mxu2  ;;  %v6459_v38 = vmul.f32 0.999995, %v6143_v25  ;;  %v6355_v32 = vadd.f32 %v6347_v48, %v11442_v57  ;;  %v6497_v25 = vmax.f32 %v6425_v61, 0.0  ;;  %v6721_v42 = vadd.f32 %v12028_v1, %v6720_v12 }
0x1335   :  { %6992 = vmatmul.bf16.gmra.mxu0 %v6923_v44  ;;  %v6621_v39 = vadd.f32 %v12028_v1, %v6620_v46  ;;  %v6824_v46 = vmul.f32 0.999995, %v6718_v6 }
0x1336   :  { %v6531_v16 = vmax.f32 %v6459_v38, 0.0  ;;  %v6461_v58 = vmul.f32 0.999995, %v6355_v32  ;;  %v6825_v19 = vmul.f32 0.999995, %v6721_v42 }
0x1337   :  { %v6785_v31 = vmul.f32 0.999995, %v6621_v39  ;;  %v6896_v38 = vmax.f32 %v6824_v46, 0.0  ;;  %v6332_v46 = vpop.permute.xlu2 %6331 }
0x1338   :  { %v5276_v60 = vpop.permute.xlu0 %5275  ;;  %v6572_v20 = vpack.c.bf16 %v6532_v50, %v6531_v16  ;;  %v6533_v52 = vmax.f32 %v6461_v58, 0.0  ;;  %v6897_v6 = vmax.f32 %v6825_v19, 0.0 }
0x1339   :  { %v5294_v0 = vsel %vm372_vm3, %v12787_v5, %v5276_v60  ;;  %v6857_v26 = vmax.f32 %v6785_v31, 0.0  ;;  %v6534_v60 = vmax.f32 %v6462_v43, 0.0 }
0x133a   :  { %6659 = vmatmul.bf16.gmra.mxu2 %v6554_v10  ;;  %v5302_v62 = vadd.f32 %v5294_v0, %v11521_v59  ;;  %v6895_v0 = vmax.f32 %v6823_v49, 0.0 }
0x133b   :  { %v6722_v10 = vpop.f32.mrf.mxu3  ;;  %v6238_v57 = vpop.f32.mrf.mxu1  ;;  %v6573_v56 = vpack.c.bf16 %v6534_v60, %v6533_v52 }
0x133c   :  { %v6622_v23 = vpop.f32.mrf.mxu2  ;;  %v6426_v37 = vmul.f32 0.999995, %v5302_v62  ;;  %v6943_v45 = vpack.c.bf16 %v6896_v38, %v6895_v0  ;;  %v6330_v62 = vpop.permute.xlu1 %6329  ;;  %v6351_v43 = vsel %vm372_vm3, %v6238_v57, %v6332_v46 }
0x133d   :  { %v6623_v24 = vadd.f32 %v12028_v1, %v6622_v23  ;;  %v6350_v23 = vsel %vm372_vm3, %v6235_v15, %v6330_v62  ;;  %v6359_v38 = vadd.f32 %v6351_v43, %v11514_v18 }
0x133e   :  { %v6498_v44 = vmax.f32 %v6426_v37, 0.0  ;;  %v6358_v40 = vadd.f32 %v6350_v23, %v11383_v22 }
0x133f   :  { %v6786_v7 = vmul.f32 0.999995, %v6623_v24  ;;  %v6723_v24 = vadd.f32 %v12028_v1, %v6722_v10  ;;  %v6465_v0 = vmul.f32 0.999995, %v6359_v38  ;;  %v6338_v18 = vpop.permute.xlu2 %6337 }
0x1340   :  { %v6555_v41 = vpack.c.bf16 %v6498_v44, %v6497_v25  ;;  %v6328_v3 = vpop.permute.xlu0 %6327 }
0x1341   :  { %v6858_v29 = vmax.f32 %v6786_v7, 0.0  ;;  %v6349_v55 = vsel %vm372_vm3, %v6232_v54, %v6328_v3  ;;  %v6826_v53 = vmul.f32 0.999995, %v6723_v24 }
0x1342   :  { %6749 = vmatmul.bf16.gmra.mxu3 %v6572_v20  ;;  %7087 = vmatmul.bf16.gmra.mxu1 %v6942_v30  ;;  %v6357_v63 = vadd.f32 %v6349_v55, %v11361_v4  ;;  %v6464_v30 = vmul.f32 0.999995, %v6358_v40 }
0x1343   :  { %v6924_v2 = vpack.c.bf16 %v6858_v29, %v6857_v26  ;;  %v6725_v7 = vpop.f32.mrf.mxu3  ;;  %v6898_v26 = vmax.f32 %v6826_v53, 0.0 }
0x1344   :  { %v6625_v47 = vpop.f32.mrf.mxu2  ;;  %v6463_v37 = vmul.f32 0.999995, %v6357_v63  ;;  %v6726_v60 = vadd.f32 %v12028_v1, %v6725_v7 }
0x1345   :  { %6997 = vmatmul.bf16.gmra.mxu0 %v6924_v2  ;;  %v6626_v36 = vadd.f32 %v12028_v1, %v6625_v47  ;;  %v6536_v2 = vmax.f32 %v6464_v30, 0.0  ;;  %v6944_v44 = vpack.c.bf16 %v6898_v26, %v6897_v6 }
0x1346   :  { %v6535_v29 = vmax.f32 %v6463_v37, 0.0  ;;  %v6827_v52 = vmul.f32 0.999995, %v6726_v60  ;;  %v6336_v40 = vpop.permute.xlu1 %6335 }
0x1347   :  { %v6787_v39 = vmul.f32 0.999995, %v6626_v36 }
0x1348   :  { %v6334_v12 = vpop.permute.xlu0 %6333  ;;  %v6574_v47 = vpack.c.bf16 %v6536_v2, %v6535_v29  ;;  %v6899_v55 = vmax.f32 %v6827_v52, 0.0 }
0x1349   :  { %v6859_v35 = vmax.f32 %v6787_v39, 0.0 }
0x134a   :  { %6664 = vmatmul.bf16.gmra.mxu2 %v6555_v41 }
0x134b   :  { %v6727_v15 = vpop.f32.mrf.mxu3 }
0x134c   :  { %v6627_v34 = vpop.f32.mrf.mxu2  ;;  %v6728_v36 = vadd.f32 %v12028_v1, %v6727_v15 }
0x134d   :  { %v6628_v5 = vadd.f32 %v12028_v1, %v6627_v34 }
0x134e   :  { %v6828_v10 = vmul.f32 0.999995, %v6728_v36 }
0x134f   :  { %v6788_v13 = vmul.f32 0.999995, %v6628_v5 }
0x1350   :  { %v6900_v3 = vmax.f32 %v6828_v10, 0.0 }
0x1351   :  { %v6860_v16 = vmax.f32 %v6788_v13, 0.0 }
0x1352   :  { %6754 = vmatmul.bf16.gmra.mxu3 %v6573_v56  ;;  %7092 = vmatmul.bf16.gmra.mxu1 %v6943_v45  ;;  %v6945_v62 = vpack.c.bf16 %v6900_v3, %v6899_v55 }
0x1353   :  { %v6925_v31 = vpack.c.bf16 %v6860_v16, %v6859_v35 }
0x1354   :  { %v6630_v50 = vpop.f32.mrf.mxu2 }
0x1355   :  { %7002 = vmatmul.bf16.gmra.mxu0 %v6925_v31  ;;  %v6631_v20 = vadd.f32 %v12028_v1, %v6630_v50 }
0x1357   :  { %v6241_v54 = vpop.f32.mrf.mxu1  ;;  %v6789_v48 = vmul.f32 0.999995, %v6631_v20 }
0x1358   :  { %v6352_v32 = vsel %vm372_vm3, %v6241_v54, %v6334_v12 }
0x1359   :  { %v6861_v21 = vmax.f32 %v6789_v48, 0.0  ;;  %v6360_v49 = vadd.f32 %v6352_v32, %v11521_v59  ;;  %v6537_v59 = vmax.f32 %v6465_v0, 0.0 }
0x135b   :  { %v6466_v39 = vmul.f32 0.999995, %v6360_v49 }
0x135c   :  { %v6632_v61 = vpop.f32.mrf.mxu2 }
0x135d   :  { %v6633_v4 = vadd.f32 %v12028_v1, %v6632_v61  ;;  %v6538_v57 = vmax.f32 %v6466_v39, 0.0 }
0x135f   :  { %v6790_v28 = vmul.f32 0.999995, %v6633_v4  ;;  %v6244_v22 = vpop.f32.mrf.mxu1  ;;  %v6575_v23 = vpack.c.bf16 %v6538_v57, %v6537_v59 }
0x1360   :  { %v6353_v42 = vsel %vm372_vm3, %v6244_v22, %v6336_v40 }
0x1361   :  { %v6862_v25 = vmax.f32 %v6790_v28, 0.0  ;;  %v6361_v37 = vadd.f32 %v6353_v42, %v11273_v27 }
0x1362   :  { %6759 = vmatmul.bf16.gmra.mxu3 %v6574_v47  ;;  %7097 = vmatmul.bf16.gmra.mxu1 %v6944_v44 }
0x1363   :  { %v6926_v41 = vpack.c.bf16 %v6862_v25, %v6861_v21  ;;  %v6467_v26 = vmul.f32 0.999995, %v6361_v37 }
0x1364   :  { %v6635_v58 = vpop.f32.mrf.mxu2 }
0x1365   :  { %7007 = vmatmul.bf16.gmra.mxu0 %v6926_v41  ;;  %v6636_v5 = vadd.f32 %v12028_v1, %v6635_v58  ;;  %v6539_v2 = vmax.f32 %v6467_v26, 0.0 }
0x1367   :  { %v6247_v34 = vpop.f32.mrf.mxu1  ;;  %v6791_v45 = vmul.f32 0.999995, %v6636_v5 }
0x1368   :  { %v6354_v24 = vsel %vm372_vm3, %v6247_v34, %v6338_v18 }
0x1369   :  { %v6863_v31 = vmax.f32 %v6791_v45, 0.0  ;;  %v6362_v54 = vadd.f32 %v6354_v24, %v11280_v8 }
0x136b   :  { %v6468_v30 = vmul.f32 0.999995, %v6362_v54 }
0x136c   :  { %v6637_v13 = vpop.f32.mrf.mxu2 }
0x136d   :  { %v6638_v56 = vadd.f32 %v12028_v1, %v6637_v13  ;;  %v6540_v61 = vmax.f32 %v6468_v30, 0.0 }
0x136f   :  { %v6792_v35 = vmul.f32 0.999995, %v6638_v56  ;;  %v12164_v16 = vpop.f32.mrf.mxu1  ;;  %v6576_v44 = vpack.c.bf16 %v6540_v61, %v6539_v2 }
0x1371   :  { %v6864_v63 = vmax.f32 %v6792_v35, 0.0  ;;  %v12167_v50 = vpop.f32.mrf.mxu0 }
0x1372   :  { %6764 = vmatmul.bf16.gmra.mxu3 %v6575_v23  ;;  %7102 = vmatmul.bf16.gmra.mxu1 %v6945_v62 }
0x1373   :  { %v6927_v7 = vpack.c.bf16 %v6864_v63, %v6863_v31 }
0x1375   :  { %7012 = vmatmul.bf16.gmra.mxu0 %v6927_v7  ;;  %v6640_v53 = vpop.f32.mrf.mxu2 }
0x1376   :  { %v6641_v29 = vadd.f32 %v12028_v1, %v6640_v53 }
0x1377   :  { %v12172_v20 = vpop.f32.mrf.mxu1 }
0x1378   :  { %v6793_v6 = vmul.f32 0.999995, %v6641_v29 }
0x1379   :  { %v12174_v19 = vpop.f32.mrf.mxu0 }
0x137a   :  { %v6865_v12 = vmax.f32 %v6793_v6, 0.0 }
0x137d   :  { %v6642_v48 = vpop.f32.mrf.mxu2  ;;  %v6730_v4 = vpop.f32.mrf.mxu3 }
0x137e   :  { %v6643_v28 = vadd.f32 %v12028_v1, %v6642_v48  ;;  %v6731_v15 = vadd.f32 %v12028_v1, %v6730_v4 }
0x137f   :  { %v12178_v8 = vpop.f32.mrf.mxu1 }
0x1380   :  { %v6794_v22 = vmul.f32 0.999995, %v6643_v28  ;;  %v6829_v25 = vmul.f32 0.999995, %v6731_v15 }
0x1381   :  { %v12180_v27 = vpop.f32.mrf.mxu0 }
0x1382   :  { %v6866_v47 = vmax.f32 %v6794_v22, 0.0  ;;  %6769 = vmatmul.bf16.gmra.mxu3 %v6576_v44  ;;  %v6901_v49 = vmax.f32 %v6829_v25, 0.0  ;;  %v12211_v22 = vld [vmem:[#allocation2 + $0x330] ss:$0 sm:$0xff] }
0x1383   :  { %v7064_v25 = vadd.f32 %v12211_v22, %v12164_v16 }
0x1384   :  { %v6928_v21 = vpack.c.bf16 %v6866_v47, %v6865_v12 }
0x1385   :  { %v6732_v32 = vpop.f32.mrf.mxu3 }
0x1386   :  { %v6733_v46 = vadd.f32 %v12028_v1, %v6732_v32  ;;  %7017 = vmatmul.bf16.gmra.mxu0 %v6928_v21 }
0x1387   :  { %v12184_v43 = vpop.f32.mrf.mxu1 }
0x1388   :  { %v6830_v41 = vmul.f32 0.999995, %v6733_v46 }
0x1389   :  { %v12186_v36 = vpop.f32.mrf.mxu0 }
0x138a   :  { %v6902_v58 = vmax.f32 %v6830_v41, 0.0 }
0x138c   :  { %v6946_v38 = vpack.c.bf16 %v6902_v58, %v6901_v49 }
0x138d   :  { %v6645_v60 = vpop.f32.mrf.mxu2 }
0x138e   :  { %7107 = vmatmul.bf16.gmra.mxu1 %v6946_v38  ;;  %v6646_v10 = vadd.f32 %v12028_v1, %v6645_v60 }
0x138f   :  { %v12188_v34 = vpop.f32.mrf.mxu1 }
0x1390   :  { %v6795_v52 = vmul.f32 0.999995, %v6646_v10 }
0x1392   :  { %v12191_v39 = vpop.f32.mrf.mxu0  ;;  %v6867_v45 = vmax.f32 %v6795_v52, 0.0 }
0x1395   :  { %v6647_v5 = vpop.f32.mrf.mxu2  ;;  %v6735_v0 = vpop.f32.mrf.mxu3 }
0x1396   :  { %v6648_v3 = vadd.f32 %v12028_v1, %v6647_v5  ;;  %v6736_v59 = vadd.f32 %v12028_v1, %v6735_v0  ;;  %v6974_v5 = vadd.f32 %v12211_v22, %v12167_v50 }
0x1397   :  { %v12194_v57 = vpop.f32.mrf.mxu1 }
0x1398   :  { %v6796_v13 = vmul.f32 0.999995, %v6648_v3  ;;  %v6831_v23 = vmul.f32 0.999995, %v6736_v59 }
0x139a   :  { %v6868_v56 = vmax.f32 %v6796_v13, 0.0  ;;  %v12197_v55 = vpop.f32.mrf.mxu0  ;;  %v6903_v40 = vmax.f32 %v6831_v23, 0.0 }
0x139c   :  { %v6929_v35 = vpack.c.bf16 %v6868_v56, %v6867_v45 }
0x139d   :  { %v6650_v18 = vpop.f32.mrf.mxu2  ;;  %v6737_v62 = vpop.f32.mrf.mxu3 }
0x139e   :  { %v6738_v31 = vadd.f32 %v12028_v1, %v6737_v62  ;;  %7022 = vmatmul.bf16.gmra.mxu0 %v6929_v35  ;;  %v6651_v42 = vadd.f32 %v12028_v1, %v6650_v18 }
0x139f   :  { %v12200_v24 = vpop.f32.mrf.mxu1 }
0x13a0   :  { %v6832_v63 = vmul.f32 0.999995, %v6738_v31  ;;  %v6797_v26 = vmul.f32 0.999995, %v6651_v42 }
0x13a2   :  { %v6904_v7 = vmax.f32 %v6832_v63, 0.0  ;;  %v12203_v54 = vpop.f32.mrf.mxu0  ;;  %v6869_v4 = vmax.f32 %v6797_v26, 0.0 }
0x13a4   :  { %v6947_v53 = vpack.c.bf16 %v6904_v7, %v6903_v40 }
0x13a5   :  { %v6652_v37 = vpop.f32.mrf.mxu2  ;;  %v6740_v30 = vpop.f32.mrf.mxu3 }
0x13a6   :  { %v6653_v29 = vadd.f32 %v12028_v1, %v6652_v37  ;;  %7112 = vmatmul.bf16.gmra.mxu1 %v6947_v53  ;;  %v6741_v6 = vadd.f32 %v12028_v1, %v6740_v30  ;;  %v7069_v37 = vadd.f32 %v12211_v22, %v12178_v8 }
0x13a7   :  { %v12206_v61 = vpop.f32.mrf.mxu1 }
0x13a8   :  { %v6798_v48 = vmul.f32 0.999995, %v6653_v29  ;;  %v6833_v15 = vmul.f32 0.999995, %v6741_v6 }
0x13aa   :  { %v6870_v2 = vmax.f32 %v6798_v48, 0.0  ;;  %v12209_v28 = vpop.f32.mrf.mxu0  ;;  %v6905_v49 = vmax.f32 %v6833_v15, 0.0 }
0x13ac   :  { %v6930_v44 = vpack.c.bf16 %v6870_v2, %v6869_v4 }
0x13ad   :  { %v6655_v12 = vpop.f32.mrf.mxu2  ;;  %v6742_v47 = vpop.f32.mrf.mxu3 }
0x13ae   :  { %v6743_v21 = vadd.f32 %v12028_v1, %v6742_v47  ;;  %7027 = vmatmul.bf16.gmra.mxu0 %v6930_v44  ;;  %v6656_v58 = vadd.f32 %v12028_v1, %v6655_v12  ;;  %v6979_v44 = vadd.f32 %v12211_v22, %v12180_v27 }
0x13af   :  { %v7083_v32 = vpop.f32.mrf.mxu1 }
0x13b0   :  { %v6834_v46 = vmul.f32 0.999995, %v6743_v21  ;;  %v7084_v41 = vadd.f32 %v12211_v22, %v7083_v32  ;;  %v6799_v45 = vmul.f32 0.999995, %v6656_v58 }
0x13b2   :  { %v6906_v38 = vmax.f32 %v6834_v46, 0.0  ;;  %v12218_v60 = vadd.f32 %v7084_v41, %v7064_v25  ;;  %v6993_v10 = vpop.f32.mrf.mxu0  ;;  %v6871_v18 = vmax.f32 %v6799_v45, 0.0 }
0x13b3   :  { %v6994_v0 = vadd.f32 %v12211_v22, %v6993_v10 }
0x13b4   :  { %v6948_v52 = vpack.c.bf16 %v6906_v38, %v6905_v49 }
0x13b5   :  { %v12223_v3 = vadd.f32 %v6994_v0, %v6974_v5  ;;  %v6657_v13 = vpop.f32.mrf.mxu2  ;;  %v6745_v16 = vpop.f32.mrf.mxu3 }
0x13b6   :  { %v6658_v56 = vadd.f32 %v12028_v1, %v6657_v13  ;;  %7117 = vmatmul.bf16.gmra.mxu1 %v6948_v52  ;;  %v6746_v23 = vadd.f32 %v12028_v1, %v6745_v16 }
0x13b7   :  { %v12226_v59 = vpop.f32.mrf.mxu1 }
0x13b8   :  { %v6800_v35 = vmul.f32 0.999995, %v6658_v56  ;;  %v6835_v42 = vmul.f32 0.999995, %v6746_v23 }
0x13ba   :  { %v6872_v62 = vmax.f32 %v6800_v35, 0.0  ;;  %v12229_v31 = vpop.f32.mrf.mxu0  ;;  %v6907_v29 = vmax.f32 %v6835_v42, 0.0 }
0x13bc   :  { %v6931_v50 = vpack.c.bf16 %v6872_v62, %v6871_v18  ;;  %v6984_v62 = vadd.f32 %v12211_v22, %v12191_v39 }
0x13bd   :  { %v6660_v63 = vpop.f32.mrf.mxu2  ;;  %v6747_v40 = vpop.f32.mrf.mxu3 }
0x13be   :  { %v6748_v7 = vadd.f32 %v12028_v1, %v6747_v40  ;;  %7032 = vmatmul.bf16.gmra.mxu0 %v6931_v50  ;;  %v6661_v48 = vadd.f32 %v12028_v1, %v6660_v63  ;;  %v7943_v50 = vld [vmem:[%s12540_s0 + $0x8] sm:$0xff]  ;;  %v12789_v40 = vmov 0  }
0x13bf   :  { %v7088_v53 = vpop.f32.mrf.mxu1  ;;  %vm7226_vm3 = vcmp.eq.f32.partialorder %v7943_v50, 0.0  ;;  %vm7303_vm11 = vcmp.eq.f32.partialorder %v7943_v50, 1.0 }
0x13c0   :  { %v6836_v30 = vmul.f32 0.999995, %v6748_v7  ;;  %v7089_v26 = vadd.f32 %v12211_v22, %v7088_v53  ;;  %v6801_v32 = vmul.f32 0.999995, %v6661_v48  ;;  %v7234_v42 = vsel %vm7226_vm3, 1, %v12789_v40 }
0x13c1   :  { %7245 = vperm.xlu1 %7881, %v7234_v42  }
0x13c2   :  { %v6908_v4 = vmax.f32 %v6836_v30, 0.0  ;;  %v12236_v2 = vadd.f32 %v7089_v26, %v7069_v37  ;;  %v6998_v6 = vpop.f32.mrf.mxu0  ;;  %v6873_v41 = vmax.f32 %v6801_v32, 0.0  ;;  %v12260_v30 = vld [vmem:[#allocation2 + $0x2a8] ss:$0 sm:$0xff] }
0x13c3   :  { %v6999_v12 = vadd.f32 %v12211_v22, %v6998_v6  ;;  %v6676_v50 = vadd.f32 %v12260_v30, %v11951_v17 }
0x13c4   :  { %v6949_v47 = vpack.c.bf16 %v6908_v4, %v6907_v29 }
0x13c5   :  { %v12241_v15 = vadd.f32 %v6999_v12, %v6979_v44  ;;  %v6662_v21 = vpop.f32.mrf.mxu2  ;;  %v6750_v8 = vpop.f32.mrf.mxu3  ;;  %v12271_v12 = vld [vmem:[%s12540_s0 + $0x18] sm:$0xff] }
0x13c6   :  { %v6663_v25 = vadd.f32 %v12028_v1, %v6662_v21  ;;  %7122 = vmatmul.bf16.gmra.mxu1 %v6949_v47  ;;  %v6751_v58 = vadd.f32 %v12028_v1, %v6750_v8  ;;  %vm7228_vm8 = vcmp.eq.f32.partialorder %v12271_v12, 0.0  ;;  %vm7305_vm4 = vcmp.eq.f32.partialorder %v12271_v12, 1.0 }
0x13c7   :  { %v12247_v27 = vpop.f32.mrf.mxu1  ;;  %v7236_v21 = vsel %vm7228_vm8, 1, %v12789_v40 }
0x13c8   :  { %v6802_v46 = vmul.f32 0.999995, %v6663_v25  ;;  %v6837_v52 = vmul.f32 0.999995, %v6751_v58  ;;  %v6671_v58 = vadd.f32 %v12260_v30, %v11917_v9 }
0x13c9   :  { %7251 = vperm.xlu1 %7881, %v7236_v21   ;;  %v6678_v21 = vadd.f32 %v12260_v30, %v11966_v51  ;;  %v7950_v51 = vld [vmem:[%s12540_s0 + $0x10] sm:$0xff] }
0x13ca   :  { %v6874_v49 = vmax.f32 %v6802_v46, 0.0  ;;  %v12245_v38 = vpop.f32.mrf.mxu0  ;;  %v6909_v45 = vmax.f32 %v6837_v52, 0.0  ;;  %v6673_v46 = vadd.f32 %v12260_v30, %v11932_v14  ;;  %v6989_v52 = vadd.f32 %v12211_v22, %v12203_v54  ;;  %v12291_v14 = vld [vmem:[%s12540_s0 + $0x30] sm:$0xff] }
0x13cb   :  { %vm7231_vm12 = vcmp.eq.f32.partialorder %v12291_v14, 0.0  ;;  %vm7227_vm13 = vcmp.eq.f32.partialorder %v7950_v51, 0.0  ;;  %vm7308_vm1 = vcmp.eq.f32.partialorder %v12291_v14, 1.0  ;;  %vm7304_vm7 = vcmp.eq.f32.partialorder %v7950_v51, 1.0 }
0x13cc   :  { %v6932_v10 = vpack.c.bf16 %v6874_v49, %v6873_v41  ;;  %v6806_v9 = vmul.f32 0.999995, %v6673_v46  ;;  %v7239_v54 = vsel %vm7231_vm12, 1, %v12789_v40  ;;  %v6808_v46 = vmul.f32 0.999995, %v6678_v21 }
0x13cd   :  { %v6665_v5 = vpop.f32.mrf.mxu2  ;;  %v6752_v0 = vpop.f32.mrf.mxu3 }
0x13ce   :  { %v6753_v13 = vadd.f32 %v12028_v1, %v6752_v0  ;;  %7037 = vmatmul.bf16.gmra.mxu0 %v6932_v10  ;;  %v6666_v56 = vadd.f32 %v12028_v1, %v6665_v5 }
0x13cf   :  { %v12263_v26 = vpop.f32.mrf.mxu1 }
0x13d0   :  { %v6838_v16 = vmul.f32 0.999995, %v6753_v13  ;;  %v6803_v1 = vmul.f32 0.999995, %v6666_v56 }
0x13d1   :  { %7260 = vperm.xlu1 %7881, %v7239_v54   ;;  %v7951_v54 = vld [vmem:[%s12540_s0 + $0x38] sm:$0xff] }
0x13d2   :  { %v6910_v35 = vmax.f32 %v6838_v16, 0.0  ;;  %v7003_v18 = vpop.f32.mrf.mxu0  ;;  %v6875_v48 = vmax.f32 %v6803_v1, 0.0  ;;  %v7946_v16 = vld [vmem:[%s12540_s0] sm:$0xff]  ;;  %vm7309_vm15 = vcmp.eq.f32.partialorder %v7951_v54, 1.0  ;;  %vm7232_vm2 = vcmp.eq.f32.partialorder %v7951_v54, 0.0 }
0x13d3   :  { %v7004_v23 = vadd.f32 %v12211_v22, %v7003_v18  ;;  %vm7225_vm9 = vcmp.eq.f32.partialorder %v7946_v16, 0.0  ;;  %vm7302_vm14 = vcmp.eq.f32.partialorder %v7946_v16, 1.0 }
0x13d4   :  { %v6950_v63 = vpack.c.bf16 %v6910_v35, %v6909_v45  ;;  %v7233_v56 = vsel %vm7225_vm9, 1, %v12789_v40 }
0x13d5   :  { %v12258_v7 = vadd.f32 %v7004_v23, %v6984_v62  ;;  %v6667_v53 = vpop.f32.mrf.mxu2  ;;  %v6755_v37 = vpop.f32.mrf.mxu3  ;;  %7242 = vperm.xlu0 %7880, %v7233_v56   ;;  %v6805_v62 = vmul.f32 0.999995, %v6671_v58  ;;  %v6878_v23 = vmax.f32 %v6806_v9, 0.0  ;;  %v6880_v9 = vmax.f32 %v6808_v46, 0.0 }
0x13d6   :  { %v6668_v39 = vadd.f32 %v12260_v30, %v6667_v53  ;;  %7127 = vmatmul.bf16.gmra.mxu1 %v6950_v63  ;;  %v6756_v6 = vadd.f32 %v12260_v30, %v6755_v37  ;;  %v12304_v37 = vld [vmem:[%s12540_s0 + $0x28] sm:$0xff] }
0x13d7   :  { %v12278_v49 = vpop.f32.mrf.mxu1  ;;  %v6877_v63 = vmax.f32 %v6805_v62, 0.0  ;;  %vm7230_vm0 = vcmp.eq.f32.partialorder %v12304_v37, 0.0  ;;  %v7313_v62 = vsel %vm7305_vm4, 1, %v12789_v40  ;;  %vm7307_vm3 = vcmp.eq.f32.partialorder %v12304_v37, 1.0 }
0x13d8   :  { %v6804_v29 = vmul.f32 0.999995, %v6668_v39  ;;  %v6839_v32 = vmul.f32 0.999995, %v6756_v6  ;;  %v7238_v39 = vsel %vm7230_vm0, 1, %v12789_v40 }
0x13d9   :  { %v6934_v1 = vpack.c.bf16 %v6878_v23, %v6877_v63  ;;  %v7317_v23 = vsel %vm7309_vm15, 1, %v12789_v40 }
0x13da   :  { %v6876_v4 = vmax.f32 %v6804_v29, 0.0  ;;  %v12266_v44 = vpop.f32.mrf.mxu0  ;;  %v6911_v10 = vmax.f32 %v6839_v32, 0.0  ;;  %v7311_v29 = vsel %vm7303_vm11, 1, %v12789_v40 }
0x13db   :  { %7322 = vperm.xlu1 %7881, %v7311_v29   ;;  %v6683_v29 = vadd.f32 %v12260_v30, %v11989_v33  ;;  %v7240_v33 = vsel %vm7232_vm2, 1, %v12789_v40 }
0x13dc   :  { %v6933_v47 = vpack.c.bf16 %v6876_v4, %v6875_v48 }
0x13dd   :  { %v6757_v8 = vpop.f32.mrf.mxu3  ;;  %7257 = vperm.xlu0 %7880, %v7238_v39  }
0x13de   :  { %v6758_v25 = vadd.f32 %v12260_v30, %v6757_v8  ;;  %7042 = vmatmul.bf16.gmra.mxu0 %v6933_v47 }
0x13df   :  { %v12299_v53 = vpop.f32.mrf.mxu1 }
0x13e0   :  { %v6840_v41 = vmul.f32 0.999995, %v6758_v25 }
0x13e2   :  { %v6912_v5 = vmax.f32 %v6840_v41, 0.0  ;;  %v7008_v0 = vpop.f32.mrf.mxu0  ;;  %v7949_v41 = vld [vmem:[%s12540_s0 + $0x20] sm:$0xff] }
0x13e3   :  { %v7009_v13 = vadd.f32 %v12211_v22, %v7008_v0  ;;  %vm7306_vm10 = vcmp.eq.f32.partialorder %v7949_v41, 1.0  ;;  %vm7229_vm6 = vcmp.eq.f32.partialorder %v7949_v41, 0.0 }
0x13e4   :  { %v6951_v45 = vpack.c.bf16 %v6912_v5, %v6911_v10  ;;  %v7310_v10 = vsel %vm7302_vm14, 1, %v12789_v40  ;;  %v7314_v5 = vsel %vm7306_vm10, 1, %v12789_v40 }
0x13e5   :  { %v12296_v35 = vadd.f32 %v7009_v13, %v6989_v52  ;;  %v6760_v18 = vpop.f32.mrf.mxu3  ;;  %7319 = vperm.xlu0 %7880, %v7310_v10   ;;  %7331 = vperm.xlu1 %7881, %v7314_v5   ;;  %v7235_v52 = vsel %vm7227_vm13, 1, %v12789_v40  ;;  %v6807_v13 = vmul.f32 0.999995, %v6676_v50  ;;  %v6810_v50 = vmul.f32 0.999995, %v6683_v29 }
0x13e6   :  { %7132 = vmatmul.bf16.gmra.mxu1 %v6951_v45  ;;  %v6761_v42 = vadd.f32 %v12260_v30, %v6760_v18  ;;  %7248 = vperm.xlu2 %7882, %v7235_v52   ;;  %v7094_v29 = vadd.f32 %v12211_v22, %v12263_v26  ;;  %v7099_v26 = vadd.f32 %v12211_v22, %v12299_v53 }
0x13e7   :  { %v12324_v17 = vpop.f32.mrf.mxu1  ;;  %v6879_v45 = vmax.f32 %v6807_v13, 0.0 }
0x13e8   :  { %v6841_v6 = vmul.f32 0.999995, %v6761_v42  ;;  %v7237_v42 = vsel %vm7229_vm6, 1, %v12789_v40 }
0x13e9   :  { %v6935_v18 = vpack.c.bf16 %v6880_v9, %v6879_v45  ;;  %v7312_v45 = vsel %vm7304_vm7, 1, %v12789_v40 }
0x13ea   :  { %v12309_v48 = vpop.f32.mrf.mxu0  ;;  %v6913_v32 = vmax.f32 %v6841_v6, 0.0 }
0x13ed   :  { %v6762_v4 = vpop.f32.mrf.mxu3  ;;  %7328 = vperm.xlu0 %7880, %v7313_v62   ;;  %7340 = vperm.xlu1 %7881, %v7317_v23  }
0x13ee   :  { %v6763_v47 = vadd.f32 %v12260_v30, %v6762_v4  ;;  %7047 = vmatmul.bf16.gmra.mxu0 %v6934_v1  ;;  %7254 = vperm.xlu2 %7882, %v7237_v42   ;;  %v7315_v42 = vsel %vm7307_vm3, 1, %v12789_v40 }
0x13ef   :  { %v12338_v12 = vpop.f32.mrf.mxu1 }
0x13f0   :  { %v6842_v8 = vmul.f32 0.999995, %v6763_v47  ;;  %v6681_v47 = vadd.f32 %v12260_v30, %v11985_v11 }
0x13f2   :  { %v6914_v25 = vmax.f32 %v6842_v8, 0.0  ;;  %v12327_v16 = vpop.f32.mrf.mxu0  ;;  %v6809_v41 = vmul.f32 0.999995, %v6681_v47 }
0x13f4   :  { %v6952_v58 = vpack.c.bf16 %v6914_v25, %v6913_v32  ;;  %v7316_v25 = vsel %vm7308_vm1, 1, %v12789_v40  ;;  %v6881_v11 = vmax.f32 %v6809_v41, 0.0  ;;  %v7096_v40 = vadd.f32 %v12211_v22, %v12278_v49 }
0x13f5   :  { %v6765_v0 = vpop.f32.mrf.mxu3  ;;  %7337 = vperm.xlu0 %7880, %v7316_v25   ;;  %v7014_v49 = vadd.f32 %v12211_v22, %v12327_v16 }
0x13f6   :  { %7137 = vmatmul.bf16.gmra.mxu1 %v6952_v58  ;;  %v6766_v56 = vadd.f32 %v12260_v30, %v6765_v0  ;;  %v6882_v58 = vmax.f32 %v6810_v50, 0.0  ;;  %7263 = vperm.xlu2 %7882, %v7240_v33  }
0x13f7   :  { %v7105_v10 = vpop.f32.mrf.mxu1 }
0x13f8   :  { %v6843_v1 = vmul.f32 0.999995, %v6766_v56  ;;  %v6936_v52 = vpack.c.bf16 %v6882_v58, %v6881_v11  ;;  %v7101_v11 = vadd.f32 %v12211_v22, %v12324_v17 }
0x13fa   :  { %v12342_v6 = vpop.f32.mrf.mxu0  ;;  %v6915_v21 = vmax.f32 %v6843_v1, 0.0 }
0x13fb   :  { %v7016_v17 = vadd.f32 %v12211_v22, %v12342_v6 }
0x13fd   :  { %v6767_v63 = vpop.f32.mrf.mxu3 }
0x13fe   :  { %v6768_v39 = vadd.f32 %v12260_v30, %v6767_v63  ;;  %7052 = vmatmul.bf16.gmra.mxu0 %v6935_v18  ;;  %7325 = vperm.xlu2 %7882, %v7312_v45  }
0x1400   :  { %v6844_v4 = vmul.f32 0.999995, %v6768_v39 }
0x1402   :  { %v6916_v8 = vmax.f32 %v6844_v4, 0.0 }
0x1403   :  { %v7018_v5 = vpop.f32.mrf.mxu0 }
0x1404   :  { %v6953_v32 = vpack.c.bf16 %v6916_v8, %v6915_v21 }
0x1405   :  { %v6770_v46 = vpop.f32.mrf.mxu3 }
0x1406   :  { %7142 = vmatmul.bf16.gmra.mxu1 %v6953_v32  ;;  %v6771_v0 = vadd.f32 %v12260_v30, %v6770_v46  ;;  %7334 = vperm.xlu2 %7882, %v7315_v42  }
0x1408   :  { %v6845_v13 = vmul.f32 0.999995, %v6771_v0 }
0x140a   :  { %v6917_v18 = vmax.f32 %v6845_v13, 0.0 }
0x140b   :  { %v7108_v54 = vpop.f32.mrf.mxu1  ;;  %v7020_v23 = vpop.f32.mrf.mxu0 }
0x140d   :  { %v6772_v14 = vpop.f32.mrf.mxu3 }
0x140e   :  { %v6773_v9 = vadd.f32 %v12260_v30, %v6772_v14  ;;  %7057 = vmatmul.bf16.gmra.mxu0 %v6936_v52 }
0x1410   :  { %v6846_v56 = vmul.f32 0.999995, %v6773_v9 }
0x1412   :  { %v6918_v62 = vmax.f32 %v6846_v56, 0.0  ;;  %v7104_v56 = vadd.f32 %v12211_v22, %v12338_v12 }
0x1413   :  { %v12354_v1 = vpop.f32.mrf.mxu1 }
0x1414   :  { %v6954_v63 = vpack.c.bf16 %v6918_v62, %v6917_v18 }
0x1416   :  { %7147 = vmatmul.bf16.gmra.mxu1 %v6954_v63 }
0x141b   :  { %v7023_v30 = vpop.f32.mrf.mxu0 }
0x1423   :  { %v12356_v39 = vpop.f32.mrf.mxu0  ;;  %v7113_v51 = vpop.f32.mrf.mxu1 }
0x1424   :  { %v7114_v4 = vadd.f32 %v12211_v22, %v7113_v51 }
0x1426   :  { %v12361_v47 = vadd.f32 %v7114_v4, %v7094_v29  ;;  %v7106_v29 = vadd.f32 %v12211_v22, %v7105_v10  ;;  %v7019_v4 = vadd.f32 %v12211_v22, %v7018_v5 }
0x142b   :  { %v12363_v21 = vpop.f32.mrf.mxu0  ;;  %v7115_v8 = vpop.f32.mrf.mxu1 }
0x142c   :  { %v7116_v37 = vadd.f32 %v12211_v22, %v7115_v8 }
0x142e   :  { %v12368_v50 = vadd.f32 %v7116_v37, %v7096_v40 }
0x1433   :  { %v12370_v32 = vpop.f32.mrf.mxu0  ;;  %v7118_v25 = vpop.f32.mrf.mxu1 }
0x1434   :  { %v7119_v46 = vadd.f32 %v12211_v22, %v7118_v25 }
0x1436   :  { %v12375_v41 = vadd.f32 %v7119_v46, %v7099_v26  ;;  %v7021_v46 = vadd.f32 %v12211_v22, %v7020_v23 }
0x143b   :  { %v7033_v33 = vpop.f32.mrf.mxu0  ;;  %v7120_v58 = vpop.f32.mrf.mxu1 }
0x143c   :  { %v7034_v0 = vadd.f32 %v12211_v22, %v7033_v33  ;;  %v7121_v52 = vadd.f32 %v12211_v22, %v7120_v58 }
0x143e   :  { %v7161_v14 = vadd.f32 %v7034_v0, %v7014_v49  ;;  %v12383_v13 = vadd.f32 %v7121_v52, %v7101_v11 }
0x1440   :  { %v12386_v53 = vadd.f32 %v7161_v14, %v12223_v3 }
0x1443   :  { %v7035_v9 = vpop.f32.mrf.mxu0  ;;  %v7123_v45 = vpop.f32.mrf.mxu1 }
0x1444   :  { %v7036_v16 = vadd.f32 %v12211_v22, %v7035_v9  ;;  %v7124_v18 = vadd.f32 %v12211_v22, %v7123_v45  ;;  %v12414_v9 = vpop.permute.xlu1 %7245  ;;  %v7006_v45 = vadd.f32 %v12211_v22, %v12266_v44 }
0x1445   :  { %vm7266_vm11 = vcmp.eq.s32.totalorder %v12414_v9, 1 }
0x1446   :  { %v12394_v62 = vadd.f32 %v7036_v16, %v7016_v17  ;;  %v7181_v63 = vadd.f32 %v7124_v18, %v7104_v56  ;;  %v6986_v16 = vadd.f32 %v12211_v22, %v12197_v55  ;;  %v7029_v55 = vadd.f32 %v12211_v22, %v12363_v21 }
0x1447   :  { %v7071_v21 = vadd.f32 %v12211_v22, %v12184_v43 }
0x1448   :  { %v7197_v42 = vadd.f32 %v7181_v63, %v12218_v60  ;;  %v7109_v60 = vadd.f32 %v12211_v22, %v7108_v54  ;;  %v7086_v54 = vadd.f32 %v12211_v22, %v12226_v59  ;;  %v7158_v59 = vadd.f32 %v7006_v45, %v6986_v16 }
0x144b   :  { %v7038_v51 = vpop.f32.mrf.mxu0  ;;  %v7125_v3 = vpop.f32.mrf.mxu1 }
0x144c   :  { %v7039_v12 = vadd.f32 %v12211_v22, %v7038_v51  ;;  %v7126_v8 = vadd.f32 %v12211_v22, %v7125_v3  ;;  %v12429_v3 = vpop.permute.xlu2 %7248 }
0x144d   :  { %vm7267_vm4 = vcmp.eq.s32.totalorder %v12429_v3, 1 }
0x144e   :  { %v7163_v6 = vadd.f32 %v7039_v12, %v7019_v4  ;;  %v7182_v40 = vadd.f32 %v7126_v8, %v7106_v29  ;;  %v12431_v29 = vpop.permute.xlu1 %7251 }
0x144f   :  { %vm7268_vm2 = vcmp.eq.s32.totalorder %v12431_v29, 1 }
0x1450   :  { %v12402_v37 = vadd.f32 %v7163_v6, %v12241_v15  ;;  %v7024_v15 = vadd.f32 %v12211_v22, %v7023_v30  ;;  %v7066_v30 = vadd.f32 %v12211_v22, %v12172_v20  ;;  %v7243_v6 = vpop.permute.xlu0 %7242 }
0x1451   :  { %vm7265_vm8 = vcmp.eq.s32.totalorder %v7243_v6, 1 }
0x1452   :  { %v7174_v63 = vadd.f32 %v7086_v54, %v7066_v30 }
0x1453   :  { %v7040_v25 = vpop.f32.mrf.mxu0  ;;  %v7128_v26 = vpop.f32.mrf.mxu1 }
0x1454   :  { %v7041_v33 = vadd.f32 %v12211_v22, %v7040_v25  ;;  %v7129_v10 = vadd.f32 %v12211_v22, %v7128_v26  ;;  %v7198_v44 = vadd.f32 %v7182_v40, %v7174_v63  ;;  %v7091_v40 = vadd.f32 %v12211_v22, %v12247_v27 }
0x1455   :  { %v7031_v27 = vadd.f32 %v12211_v22, %v12370_v32  ;;  %v7074_v32 = vadd.f32 %v12211_v22, %v12188_v34  ;;  %v6996_v63 = vadd.f32 %v12211_v22, %v12229_v31  ;;  %v7076_v34 = vadd.f32 %v12211_v22, %v12194_v57 }
0x1456   :  { %v12408_v5 = vadd.f32 %v7041_v33, %v7021_v46  ;;  %v7183_v58 = vadd.f32 %v7129_v10, %v7109_v60  ;;  %v7255_v46 = vpop.permute.xlu2 %7254  ;;  %v7011_v60 = vadd.f32 %v12211_v22, %v12309_v48  ;;  %v7111_v33 = vadd.f32 %v12211_v22, %v12354_v1 }
0x1457   :  { %v7176_v1 = vadd.f32 %v7091_v40, %v7071_v21  ;;  %vm7269_vm12 = vcmp.eq.s32.totalorder %v7255_v46, 1 }
0x1458   :  { %v7199_v11 = vadd.f32 %v7183_v58, %v12236_v2  ;;  %v12459_v43 = vpop.permute.xlu0 %7257 }
0x1459   :  { %vm7270_vm10 = vcmp.eq.s32.totalorder %v12459_v43, 1 }
0x145b   :  { %v7043_v49 = vpop.f32.mrf.mxu0  ;;  %v7130_v0 = vpop.f32.mrf.mxu1 }
0x145c   :  { %v7044_v52 = vadd.f32 %v12211_v22, %v7043_v49  ;;  %v7131_v25 = vadd.f32 %v12211_v22, %v7130_v0 }
0x145e   :  { %v7165_v14 = vadd.f32 %v7044_v52, %v7024_v15  ;;  %v7184_v0 = vadd.f32 %v7131_v25, %v7111_v33  ;;  %v12457_v15 = vpop.permute.xlu1 %7260  ;;  %v12461_v54 = vpop.permute.xlu2 %7263 }
0x145f   :  { %vm7271_vm6 = vcmp.eq.s32.totalorder %v12457_v15, 1  ;;  %vm7272_vm3 = vcmp.eq.s32.totalorder %v12461_v54, 1 }
0x1460   :  { %v7189_v23 = vadd.f32 %v7165_v14, %v12258_v7  ;;  %v7026_v7 = vadd.f32 %v12211_v22, %v12356_v39  ;;  %v7200_v14 = vadd.f32 %v7184_v0, %v7176_v1 }
0x1462   :  { %v12420_v56 = vadd.f32 %v7197_v42, %v7189_v23 }
0x1463   :  { %v7045_v2 = vpop.f32.mrf.mxu0  ;;  %v7133_v17 = vpop.f32.mrf.mxu1 }
0x1464   :  { %v7046_v18 = vadd.f32 %v12211_v22, %v7045_v2 }
0x1466   :  { %v7166_v51 = vadd.f32 %v7046_v18, %v7026_v7  ;;  %v7323_v7 = vpop.permute.xlu1 %7322  ;;  %v12481_v31 = vpop.permute.xlu2 %7325 }
0x1467   :  { %vm7343_vm14 = vcmp.eq.s32.totalorder %v7323_v7, 1  ;;  %vm7344_vm15 = vcmp.eq.s32.totalorder %v12481_v31, 1 }
0x1468   :  { %v7190_v42 = vadd.f32 %v7166_v51, %v7158_v59  ;;  %v7134_v59 = vadd.f32 %v12211_v22, %v7133_v17  ;;  %v7320_v51 = vpop.permute.xlu0 %7319 }
0x1469   :  { %vm7342_vm9 = vcmp.eq.s32.totalorder %v7320_v51, 1  ;;  %v6981_v51 = vadd.f32 %v12211_v22, %v12186_v36 }
0x146a   :  { %v12433_v4 = vadd.f32 %v7198_v44, %v7190_v42  ;;  %v6976_v42 = vadd.f32 %v12211_v22, %v12174_v19 }
0x146b   :  { %v7048_v20 = vpop.f32.mrf.mxu0  ;;  %v7135_v12 = vpop.f32.mrf.mxu1 }
0x146c   :  { %v7049_v39 = vadd.f32 %v12211_v22, %v7048_v20  ;;  %v7154_v25 = vadd.f32 %v6996_v63, %v6976_v42  ;;  %v7001_v42 = vadd.f32 %v12211_v22, %v12245_v38 }
0x146e   :  { %v7167_v8 = vadd.f32 %v7049_v39, %v7029_v55  ;;  %v7186_v40 = vadd.f32 %v12394_v62, %v7154_v25  ;;  %v7332_v21 = vpop.permute.xlu1 %7331  ;;  %v7156_v25 = vadd.f32 %v7001_v42, %v6981_v51 }
0x146f   :  { %vm7346_vm0 = vcmp.eq.s32.totalorder %v7332_v21, 1 }
0x1470   :  { %v7191_v26 = vadd.f32 %v7167_v8, %v12296_v35  ;;  %v6991_v35 = vadd.f32 %v12211_v22, %v12209_v28 }
0x1472   :  { %v12446_v10 = vadd.f32 %v7199_v11, %v7191_v26  ;;  %v7160_v11 = vadd.f32 %v7011_v60, %v6991_v35  ;;  %v7136_v35 = vadd.f32 %v12211_v22, %v7135_v12 }
0x1473   :  { %v7050_v58 = vpop.f32.mrf.mxu0  ;;  %v12450_v49 = vpop.f32.mrf.mxu1 }
0x1474   :  { %v7051_v48 = vadd.f32 %v12211_v22, %v7050_v58  ;;  %v7079_v58 = vadd.f32 %v12211_v22, %v12200_v24  ;;  %v7139_v9 = vadd.f32 %v12211_v22, %v12450_v49 }
0x1476   :  { %v7168_v52 = vadd.f32 %v7051_v48, %v7031_v27 }
0x1478   :  { %v7192_v23 = vadd.f32 %v7168_v52, %v7160_v11 }
0x147a   :  { %v12463_v45 = vadd.f32 %v7200_v14, %v7192_v23  ;;  %v12494_v23 = vpop.permute.xlu0 %7328 }
0x147b   :  { %v7053_v28 = vpop.f32.mrf.mxu0  ;;  %v12465_v2 = vpop.f32.mrf.mxu1  ;;  %vm7345_vm7 = vcmp.eq.s32.totalorder %v12494_v23, 1 }
0x147c   :  { %v7054_v30 = vadd.f32 %v12211_v22, %v7053_v28 }
0x147e   :  { %v7169_v16 = vadd.f32 %v7074_v32, %v7054_v30 }
0x1480   :  { %v7193_v18 = vadd.f32 %v12361_v47, %v7169_v16  ;;  %v7335_v16 = vpop.permute.xlu2 %7334 }
0x1481   :  { %vm7347_vm13 = vcmp.eq.s32.totalorder %v7335_v16, 1 }
0x1482   :  { %v7201_v44 = vadd.f32 %v7193_v18, %v12386_v53 }
0x1483   :  { %v7055_v20 = vpop.f32.mrf.mxu0  ;;  %v7143_v55 = vpop.f32.mrf.mxu1 }
0x1484   :  { %v7056_v39 = vadd.f32 %v12211_v22, %v7055_v20  ;;  %v7144_v47 = vadd.f32 %v12211_v22, %v7143_v55  ;;  %v7209_v8 = vadd.f32 %v7201_v44, %v7134_v59  ;;  %v7081_v44 = vadd.f32 %v12211_v22, %v12206_v61 }
0x1486   :  { %v7170_v17 = vadd.f32 %v7076_v34, %v7056_v39  ;;  %v7213_v26 = vadd.f32 %v12420_v56, %v7144_v47  ;;  %v7217_v53 = vmul.f32 0.11111111, %v7209_v8 }
0x1488   :  { %v7194_v19 = vadd.f32 %v12368_v50, %v7170_v17  ;;  %v7221_v60 = vmul.f32 0.11111111, %v7213_v26  ;;  %v7273_v57 = vsel %vm7265_vm8, %v7217_v53, -1e+30  ;;  %v7350_v33 = vsel %vm7342_vm9, %v7217_v53, -1e+30  ;;  %v7338_v53 = vpop.permute.xlu0 %7337 }
0x1489   :  { %v7281_v6 = vsel %vm2604_vm5, %v7273_v57, -inf  ;;  %v7358_v50 = vsel %vm2604_vm5, %v7350_v33, -inf  ;;  %v7188_v57 = vadd.f32 %v12408_v5, %v7156_v25  ;;  %vm7348_vm1 = vcmp.eq.s32.totalorder %v7338_v53, 1 }
0x148a   :  { %v7202_v27 = vadd.f32 %v7194_v19, %v7186_v40  ;;  %v7277_v56 = vsel %vm7269_vm12, %v7221_v60, -1e+30  ;;  %v7354_v0 = vsel %vm7346_vm0, %v7221_v60, -1e+30  ;;  %vm7379_vm9 = vcmask 1040384  }
0x148b   :  { %v7285_v62 = vsel %vm2604_vm5, %v7277_v56, -inf  ;;  %v7362_v48 = vsel %vm2604_vm5, %v7354_v0, -inf  ;;  %v7058_v1 = vpop.f32.mrf.mxu0  ;;  %v7145_v11 = vpop.f32.mrf.mxu1  ;;  %vm7391_vm12 = vcmask 1024  }
0x148c   :  { %v7210_v52 = vadd.f32 %v7202_v27, %v7136_v35  ;;  %v7286_v14 = vmax.f32 %v7281_v6, %v7285_v62  ;;  %v7363_v24 = vmax.f32 %v7358_v50, %v7362_v48  ;;  %v7059_v46 = vadd.f32 %v12211_v22, %v7058_v1 }
0x148d   :  { %v7146_v12 = vadd.f32 %v12211_v22, %v7145_v11  ;;  %v7341_v11 = vpop.permute.xlu1 %7340 }
0x148e   :  { %v7218_v28 = vmul.f32 0.11111111, %v7210_v52  ;;  %v7171_v32 = vadd.f32 %v7079_v58, %v7059_v46  ;;  %vm7349_vm8 = vcmp.eq.s32.totalorder %v7341_v11, 1 }
0x148f   :  { %v7214_v30 = vadd.f32 %v12433_v4, %v7146_v12 }
0x1490   :  { %v7195_v18 = vadd.f32 %v12375_v41, %v7171_v32  ;;  %v7274_v63 = vsel %vm7266_vm11, %v7218_v28, -1e+30  ;;  %v7351_v59 = vsel %vm7343_vm14, %v7218_v28, -1e+30 }
0x1491   :  { %v7222_v20 = vmul.f32 0.11111111, %v7214_v30  ;;  %v7282_v7 = vsel %vm2604_vm5, %v7274_v63, -inf  ;;  %v7359_v36 = vsel %vm2604_vm5, %v7351_v59, -inf }
0x1492   :  { %v7203_v4 = vadd.f32 %v7195_v18, %v12402_v37 }
0x1493   :  { %v7278_v41 = vsel %vm7270_vm10, %v7222_v20, -1e+30  ;;  %v7355_v55 = vsel %vm7347_vm13, %v7222_v20, -1e+30  ;;  %v7060_v34 = vpop.f32.mrf.mxu0  ;;  %v7148_v61 = vpop.f32.mrf.mxu1 }
0x1494   :  { %v7287_v39 = vsel %vm2604_vm5, %v7278_v41, -inf  ;;  %v7364_v38 = vsel %vm2604_vm5, %v7355_v55, -inf  ;;  %v7061_v47 = vadd.f32 %v12211_v22, %v7060_v34  ;;  %v7149_v49 = vadd.f32 %v12211_v22, %v7148_v61 }
0x1495   :  { %v7288_v43 = vmax.f32 %v7282_v7, %v7287_v39  ;;  %v7365_v8 = vmax.f32 %v7359_v36, %v7364_v38  ;;  %v7211_v37 = vadd.f32 %v7203_v4, %v7139_v9  ;;  %v7894_v36 = vld [vmem:[#allocation2 + $0x338] ss:$0 sm:$0xff] }
0x1496   :  { %v7172_v17 = vadd.f32 %v7081_v44, %v7061_v47  ;;  %v7215_v26 = vadd.f32 %v12446_v10, %v7149_v49  ;;  %v7141_v10 = vadd.f32 %v12211_v22, %v12465_v2  ;;  %v7895_v47 = vld [vmem:[#allocation2 + $0x340] ss:$0 sm:$0xff] }
0x1497   :  { %v7293_v40 = vmax.f32 %v7286_v14, %v7288_v43  ;;  %v7370_v19 = vmax.f32 %v7363_v24, %v7365_v8  ;;  %v7219_v60 = vmul.f32 0.11111111, %v7211_v37 }
0x1498   :  { %v7196_v33 = vadd.f32 %v12383_v13, %v7172_v17  ;;  %v7223_v21 = vmul.f32 0.11111111, %v7215_v26 }
0x1499   :  { %v7275_v58 = vsel %vm7267_vm4, %v7219_v60, -1e+30  ;;  %v7352_v35 = vsel %vm7344_vm15, %v7219_v60, -1e+30 }
0x149a   :  { %v7204_v27 = vadd.f32 %v7196_v33, %v7188_v57  ;;  %v7279_v3 = vsel %vm7271_vm6, %v7223_v21, -1e+30  ;;  %v7356_v56 = vsel %vm7348_vm1, %v7223_v21, -1e+30  ;;  %v7283_v0 = vsel %vm2604_vm5, %v7275_v58, -inf }
0x149b   :  { %v7289_v5 = vsel %vm2604_vm5, %v7279_v3, -inf  ;;  %v7360_v31 = vsel %vm2604_vm5, %v7352_v35, -inf  ;;  %v7366_v13 = vsel %vm2604_vm5, %v7356_v56, -inf  ;;  %v7150_v62 = vpop.f32.mrf.mxu1 }
0x149c   :  { %v7212_v6 = vadd.f32 %v7204_v27, %v7141_v10  ;;  %v7290_v15 = vmax.f32 %v7283_v0, %v7289_v5  ;;  %v7367_v50 = vmax.f32 %v7360_v31, %v7366_v13  ;;  %v7151_v48 = vadd.f32 %v12211_v22, %v7150_v62 }
0x149e   :  { %v7220_v1 = vmul.f32 0.11111111, %v7212_v6  ;;  %v7216_v2 = vadd.f32 %v12463_v45, %v7151_v48 }
0x14a0   :  { %v7224_v52 = vmul.f32 0.11111111, %v7216_v2  ;;  %v7276_v14 = vsel %vm7268_vm2, %v7220_v1, -1e+30  ;;  %v7353_v24 = vsel %vm7345_vm7, %v7220_v1, -1e+30 }
0x14a1   :  { %v7284_v28 = vsel %vm2604_vm5, %v7276_v14, -inf  ;;  %v7361_v32 = vsel %vm2604_vm5, %v7353_v24, -inf }
0x14a2   :  { %v7280_v46 = vsel %vm7272_vm3, %v7224_v52, -1e+30  ;;  %v7357_v12 = vsel %vm7349_vm8, %v7224_v52, -1e+30 }
0x14a3   :  { %v7291_v22 = vsel %vm2604_vm5, %v7280_v46, -inf  ;;  %v7368_v45 = vsel %vm2604_vm5, %v7357_v12, -inf  ;;  %vm7384_vm5 = vcmask 254976  }
0x14a4   :  { %v7292_v30 = vmax.f32 %v7284_v28, %v7291_v22  ;;  %v7369_v29 = vmax.f32 %v7361_v32, %v7368_v45 }
0x14a6   :  { %v7294_v16 = vmax.f32 %v7290_v15, %v7292_v30  ;;  %v7371_v23 = vmax.f32 %v7367_v50, %v7369_v29 }
0x14a8   :  { %v7295_v18 = vmax.f32 %v7293_v40, %v7294_v16  ;;  %v7372_v63 = vmax.f32 %v7370_v19, %v7371_v23 }
0x14aa   :  { %v7296_v59 = vrot.slane %v7295_v18, 4  ;;  %v7373_v51 = vrot.slane %v7372_v63, 4 }
0x14ac   :  { %v7297_v54 = vmax.f32 %v7295_v18, %v7296_v59  ;;  %v7374_v44 = vmax.f32 %v7372_v63, %v7373_v51 }
0x14ae   :  { %v7298_v42 = vrot.slane %v7297_v54, 2  ;;  %v7375_v20 = vrot.slane %v7374_v44, 2 }
0x14b0   :  { %v7299_v9 = vmax.f32 %v7297_v54, %v7298_v42  ;;  %v7376_v4 = vmax.f32 %v7374_v44, %v7375_v20 }
0x14b2   :  { %v7300_v41 = vrot.slane %v7299_v9, 1  ;;  %v7377_v7 = vrot.slane %v7376_v4, 1 }
0x14b4   :  { %v7301_v55 = vmax.f32 %v7299_v9, %v7300_v41  ;;  %v7378_v34 = vmax.f32 %v7376_v4, %v7377_v7 }
0x14b6   :  { %v7380_v61 = vsel %vm7379_vm9, %v7301_v55, %v7378_v34 }
0x14b7   :  { %v7383_v39 = vmul.f32 %v7894_v36, %v7380_v61 }
0x14b9   :  { %v7385_v38 = vsel %vm7384_vm5, %v7383_v39, 0.0 }
0x14ba   :  { %7386 = vadd.xlane.f32.xlu2 %v7385_v38 }
0x152d   :  { %v7387_v49 = vpop.xlane.xlu2 %7386 }
0x152e   :  { %v7390_v43 = vadd.f32 %v7895_v47, %v7387_v49 }
0x1530   :  { %7392 = vst.msk [vmem:[%s12542_s2] sm:$0x3] %vm7391_vm12, %v7390_v43 }
0x1531   :  { %7397 = vsyncpa [#allocation3], 1 }

</bundles_post_ra>
